<compile_context>
chip_gen: v7x
topology: tpu7x:2x2x1
jax: 0.10.0
libtpu: 0.0.40
codegen_flags: <defaults>
</compile_context>

<pallas_src>
import jax
import jax.numpy as jnp
from jax import lax
from jax.experimental import pallas as pl
from jax.experimental.pallas import tpu as pltpu

# ---- SimpleSDF hyper-parameters ----
D = 128                    # d_model
NHEAD = 8
HEAD_DIM = D // NHEAD      # 16
NUM_LAYERS = 5
FF = D                     # dim_feedforward
NDIC = D // 3 + 1          # 43 Tri dictionary centers: linspace(0,1,44)[:-1]
EMB_REAL = 3 * NDIC        # 129 real encoding features
EMB_PAD = 256              # padded to 2 full vreg lane-tiles
INV_D = float(D)           # Tri: param[0] is None -> d = 1/D -> 1/d = 128
LN_EPS = 1e-5
LEAKY_SLOPE = 0.01
Q_SCALE = 1.0 / (HEAD_DIM ** 0.5)

# Matmul input dtype. jnp.bfloat16 ~doubles MXU throughput on v6e/v7x (f32
# accumulation kept via preferred_element_type); default f32 matches the
# PyTorch reference numerics exactly.
MM_DTYPE = jnp.float32


def _mm(a, b):
    return jnp.dot(a.astype(MM_DTYPE), b.astype(MM_DTYPE),
                   preferred_element_type=jnp.float32)


def _bmm(eq, a, b):
    return jnp.einsum(eq, a.astype(MM_DTYPE), b.astype(MM_DTYPE),
                      preferred_element_type=jnp.float32)


def _layernorm(x, g, b):
    mu = jnp.mean(x, axis=-1, keepdims=True)
    xc = x - mu
    var = jnp.mean(xc * xc, axis=-1, keepdims=True)
    return xc * lax.rsqrt(var + LN_EPS) * g + b


def _leaky(x):
    return jnp.where(x > 0, x, LEAKY_SLOPE * x)


def _tri_encode(x, sel, dic):
    # x: (N, 3) -> padded encoding (N, 256); pad columns are exactly 0.
    xs = _mm(x, sel)                                       # (N, 256) one-hot gather
    return jnp.maximum(1.0 - jnp.abs(xs - dic) * INV_D, 0.0)


# ------------------------- pass 1: global max row-norm -------------------------
def norm_max_kernel(x_ref, sel_ref, dic_ref, gmax_ref):
    @pl.when(pl.program_id(0) == 0)
    def _init():
        gmax_ref[...] = jnp.zeros_like(gmax_ref)

    emb = _tri_encode(x_ref[0], sel_ref[...], dic_ref[...])          # (N, 256)
    nrm2 = jnp.sum(emb * emb, axis=-1, keepdims=True)                # (N, 1) (pad adds 0)
    tile_max = jnp.sqrt(jnp.max(nrm2, axis=0, keepdims=True))        # (1, 1)
    gmax_ref[...] = jnp.maximum(gmax_ref[...], tile_max)             # broadcast to (8,128)


# --------------------- pass 2: encoding + transformer + MLP --------------------
def sdf_kernel(x_ref, gmax_ref, sel_ref, dic_ref,
               wqkv_ref, bqkv_ref, wo_ref, bo_ref,
               ln1g_ref, ln1b_ref, ln2g_ref, ln2b_ref,
               w1_ref, b1_ref, w2_ref, b2_ref,
               wd1t_ref, bd1t_ref, wd2t_ref, bd2t_ref, wd3t_ref,
               out_ref, attn_sc):
    # ---- Tri encoding, normalized by the global max norm (norm over all 129 cols,
    #      slice to 128 afterwards — matches the reference ordering) ----
    emb = _tri_encode(x_ref[0], sel_ref[...], dic_ref[...])          # (N, 256)
    inv_gmax = pl.reciprocal(gmax_ref[0:1, :], approx=True)          # (1, 128)
    h = emb[:, :D] * inv_gmax                                        # (N, 128)

    # ---- TransformerEncoder (post-norm, relu FFN, dropout = identity) ----
    def layer(l, h):
        # self-attention; Q already pre-scaled by 1/sqrt(head_dim) in the weights
        qkv = _mm(h, wqkv_ref[l]) + bqkv_ref[l]                      # (N, 3D)
        q = jnp.stack([qkv[:, i * HEAD_DIM:(i + 1) * HEAD_DIM]
                       for i in range(NHEAD)], axis=0)               # (H, N, dh)
        k = jnp.stack([qkv[:, D + i * HEAD_DIM:D + (i + 1) * HEAD_DIM]
                       for i in range(NHEAD)], axis=0)
        v = jnp.stack([qkv[:, 2 * D + i * HEAD_DIM:2 * D + (i + 1) * HEAD_DIM]
                       for i in range(NHEAD)], axis=0)
        s = _bmm('hqd,hkd->hqk', q, k)                               # (H, N, N)
        s = s - jnp.max(s, axis=-1, keepdims=True)
        p = jnp.exp(s)
        p = p * pl.reciprocal(jnp.sum(p, axis=-1, keepdims=True), approx=True)
        o = _bmm('hqk,hkd->hqd', p, v)                               # (H, N, dh)
        for i in range(NHEAD):                                       # heads -> one (N, D) slab
            attn_sc[:, i * HEAD_DIM:(i + 1) * HEAD_DIM] = o[i]
        attn = _mm(attn_sc[...], wo_ref[l]) + bo_ref[l]              # single K=128 out-proj
        h = _layernorm(h + attn, ln1g_ref[l], ln1b_ref[l])

        ff = jnp.maximum(_mm(h, w1_ref[l]) + b1_ref[l], 0.0)         # relu FFN
        ff = _mm(ff, w2_ref[l]) + b2_ref[l]
        return _layernorm(h + ff, ln2g_ref[l], ln2b_ref[l])

    h = lax.fori_loop(0, NUM_LAYERS, layer, h)

    # ---- Decoder MLP 128 -> 64 -> 32 -> 1, transposed => lane-dense (1, N) store ----
    ht = h.T                                                         # (D, N)
    y = _leaky(_mm(wd1t_ref[...], ht) + bd1t_ref[...])               # (64, N)
    y = _leaky(_mm(wd2t_ref[...], y) + bd2t_ref[...])                # (32, N)
    y = _mm(wd3t_ref[...], y)                                        # (1, N)
    out_ref[0] = y


# ----------------------------------- params -----------------------------------
def init_params(key):
    L = NUM_LAYERS
    keys = jax.random.split(key, 16)

    def w(k, shape, s=0.05):
        return s * jax.random.normal(k, shape, jnp.float32)

    # Tri-encoding constants, padded 129 -> 256 lanes.
    cols = jnp.arange(EMB_PAD)
    coord = jnp.where(cols < EMB_REAL, cols // NDIC, 0)
    valid = (cols < EMB_REAL).astype(jnp.float32)
    sel = jnp.zeros((3, EMB_PAD), jnp.float32).at[coord, cols].set(valid)
    dic = jnp.linspace(0.0, 1.0, NDIC + 1)[:-1].astype(jnp.float32)  # 43 centers
    dic3 = jnp.concatenate(
        [dic, dic, dic, jnp.full((EMB_PAD - EMB_REAL,), 1e9, jnp.float32)]
    ).reshape(1, EMB_PAD)                                            # sentinel pad -> relu 0

    wqkv = w(keys[0], (L, D, 3 * D))      # = in_proj_weight.T, stacked over layers
    bqkv = w(keys[1], (L, 1, 3 * D))
    # one-time weight transform: fold 1/sqrt(head_dim) into the Q columns.
    wqkv = wqkv.at[:, :, :D].multiply(Q_SCALE)
    bqkv = bqkv.at[:, :, :D].multiply(Q_SCALE)

    return dict(
        sel=sel, dic3=dic3,
        wqkv=wqkv, bqkv=bqkv,
        wo=w(keys[2], (L, D, D)), bo=w(keys[3], (L, 1, D)),
        ln1g=jnp.ones((L, 1, D), jnp.float32), ln1b=jnp.zeros((L, 1, D), jnp.float32),
        ln2g=jnp.ones((L, 1, D), jnp.float32), ln2b=jnp.zeros((L, 1, D), jnp.float32),
        w1=w(keys[4], (L, D, FF)), b1=w(keys[5], (L, 1, FF)),
        w2=w(keys[6], (L, FF, D)), b2=w(keys[7], (L, 1, D)),
        # decoder weights stored pre-transposed (out_features-major) for the
        # lane-dense transposed tail.
        wd1t=w(keys[8], (64, D)),  bd1t=w(keys[9], (64, 1)),
        wd2t=w(keys[10], (32, 64)), bd2t=w(keys[11], (32, 1)),
        wd3t=w(keys[12], (1, 32)),
    )


def _const_spec(shape):
    zeros = (0,) * len(shape)

    def idx(b):
        return zeros

    return pl.BlockSpec(shape, idx)


# ---------------------------------- forward -----------------------------------
@jax.jit
def simple_sdf_forward(sdf_q, params):
    B, N, _ = sdf_q.shape
    L = NUM_LAYERS
    x = sdf_q.astype(jnp.float32)

    def mosaic(sem):
        return pltpu.CompilerParams(dimension_semantics=sem,
                                    vmem_limit_bytes=32 * 1024 * 1024)

    # ---- pass 1: global max row-norm of the Tri encoding ----
    gmax = pl.pallas_call(
        norm_max_kernel,
        out_shape=jax.ShapeDtypeStruct((8, 128), jnp.float32),
        grid_spec=pltpu.PrefetchScalarGridSpec(
            num_scalar_prefetch=0, grid=(B,),
            in_specs=[pl.BlockSpec((1, N, 3), lambda b: (b, 0, 0)),
                      _const_spec((3, EMB_PAD)),
                      _const_spec((1, EMB_PAD))],
            out_specs=pl.BlockSpec((8, 128), lambda b: (0, 0))),
        compiler_params=mosaic(("arbitrary",)),     # resident accumulator output
    )(x, params['sel'], params['dic3'])

    # ---- pass 2: full forward, gridded over batch ----
    in_specs = [
        pl.BlockSpec((1, N, 3), lambda b: (b, 0, 0)),   # x (per-batch-item block)
        _const_spec((8, 128)),                          # global max norm
        _const_spec((3, EMB_PAD)), _const_spec((1, EMB_PAD)),
        _const_spec((L, D, 3 * D)), _const_spec((L, 1, 3 * D)),
        _const_spec((L, D, D)), _const_spec((L, 1, D)),
        _const_spec((L, 1, D)), _const_spec((L, 1, D)),
        _const_spec((L, 1, D)), _const_spec((L, 1, D)),
        _const_spec((L, D, FF)), _const_spec((L, 1, FF)),
        _const_spec((L, FF, D)), _const_spec((L, 1, D)),
        _const_spec((64, D)), _const_spec((64, 1)),
        _const_spec((32, 64)), _const_spec((32, 1)),
        _const_spec((1, 32)),
    ]
    out3 = pl.pallas_call(
        sdf_kernel,
        out_shape=jax.ShapeDtypeStruct((B, 1, N), jnp.float32),
        grid_spec=pltpu.PrefetchScalarGridSpec(
            num_scalar_prefetch=0, grid=(B,),
            in_specs=in_specs,
            out_specs=pl.BlockSpec((1, 1, N), lambda b: (b, 0, 0)),
            scratch_shapes=[pltpu.VMEM((N, D), jnp.float32)]),       # head-assembly slab
        compiler_params=mosaic(("parallel",)),        # shards batch over v7x's 2 TCs
    )(x, gmax, params['sel'], params['dic3'],
      params['wqkv'], params['bqkv'], params['wo'], params['bo'],
      params['ln1g'], params['ln1b'], params['ln2g'], params['ln2b'],
      params['w1'], params['b1'], params['w2'], params['b2'],
      params['wd1t'], params['bd1t'], params['wd2t'], params['bd2t'],
      params['wd3t'])
    return out3.reshape(B, N)


if __name__ == "__main__":
    key = jax.random.PRNGKey(0)
    pkey, xkey = jax.random.split(key)
    params = init_params(pkey)

    B, N = 2, 128
    sdf_q = jax.random.uniform(xkey, (B, N, 3), jnp.float32)   # 3-D query points in [0, 1)

    out = simple_sdf_forward(sdf_q, params)
    jax.block_until_ready(out)
    assert out.shape == (B, N) and out.dtype == jnp.float32
    print("KERNEL_OK")
</pallas_src>

<mosaic_0001>
module attributes {stable_mosaic.version = 11 : i64} {
  func.func @norm_max_kernel(%arg0: i32, %arg1: memref<1x128x3xf32, #tpu.memory_space<vmem>>, %arg2: memref<3x256xf32, #tpu.memory_space<vmem>>, %arg3: memref<1x256xf32, #tpu.memory_space<vmem>>, %arg4: memref<8x128xf32, #tpu.memory_space<vmem>>) attributes {dimension_semantics = [#tpu.dimension_semantics<arbitrary>], iteration_bounds = array<i64: 2>, scalar_prefetch = 0 : i64, scratch_operands = 0 : i64, tpu.core_type = #tpu.core_type<tc>, window_params = [{transform_indices = @transform_0, window_bounds = array<i64: 1, 128, 3>}, {pipeline_mode = #tpu.pipeline_mode<synchronous>, transform_indices = @transform_1, window_bounds = array<i64: 3, 256>}, {pipeline_mode = #tpu.pipeline_mode<synchronous>, transform_indices = @transform_2, window_bounds = array<i64: 1, 256>}, {pipeline_mode = #tpu.pipeline_mode<synchronous>, transform_indices = @transform_3, window_bounds = array<i64: 8, 128>}]} {
    %c0_i32 = arith.constant 0 : i32
    %0 = arith.cmpi eq, %arg0, %c0_i32 : i32
    %1 = arith.extui %0 : i1 to i32
    %c0_i32_0 = arith.constant 0 : i32
    %2 = arith.cmpi ne, %1, %c0_i32_0 : i32
    scf.if %2 {
      %cst_16 = arith.constant 0.000000e+00 : f32
      %27 = vector.broadcast %cst_16 : f32 to vector<8x128xf32>
      %c0_17 = arith.constant 0 : index
      %c0_18 = arith.constant 0 : index
      %28 = vector.load %arg4[%c0_17, %c0_18] : memref<8x128xf32, #tpu.memory_space<vmem>>, vector<8x128xf32>
      tpu.vector_store %arg4[%c0_17, %c0_18], %27 {strides = array<i32>} : memref<8x128xf32, #tpu.memory_space<vmem>>, vector<8x128xf32>,
    } else {
    }
    %c0 = arith.constant 0 : index
    %c0_1 = arith.constant 0 : index
    %c0_2 = arith.constant 0 : index
    %3 = vector.load %arg1[%c0, %c0_1, %c0_2] : memref<1x128x3xf32, #tpu.memory_space<vmem>>, vector<1x128x3xf32>
    %4 = vector.shape_cast %3 : vector<1x128x3xf32> to vector<128x3xf32>
    %c0_3 = arith.constant 0 : index
    %c0_4 = arith.constant 0 : index
    %5 = vector.load %arg2[%c0_3, %c0_4] : memref<3x256xf32, #tpu.memory_space<vmem>>, vector<3x256xf32>
    %c0_5 = arith.constant 0 : index
    %c0_6 = arith.constant 0 : index
    %6 = vector.load %arg3[%c0_5, %c0_6] : memref<1x256xf32, #tpu.memory_space<vmem>>, vector<1x256xf32>
    %cst = arith.constant dense<0.000000e+00> : vector<128x256xf32>
    %7 = tpu.matmul %4, %5, %cst {dimension_numbers = #tpu.dot_dimension_numbers<[1], [0], [0], [1], [0, 0, 1, 1], [], []>} : vector<128x3xf32>, vector<3x256xf32>, vector<128x256xf32> -> vector<128x256xf32>
    %8 = vector.broadcast %6 : vector<1x256xf32> to vector<128x256xf32>
    %9 = arith.subf %7, %8 : vector<128x256xf32>
    %10 = math.absf %9 : vector<128x256xf32>
    %cst_7 = arith.constant 1.280000e+02 : f32
    %11 = vector.broadcast %cst_7 : f32 to vector<128x256xf32>
    %12 = arith.mulf %10, %11 : vector<128x256xf32>
    %cst_8 = arith.constant 1.000000e+00 : f32
    %13 = vector.broadcast %cst_8 : f32 to vector<128x256xf32>
    %14 = arith.subf %13, %12 : vector<128x256xf32>
    %cst_9 = arith.constant 0.000000e+00 : f32
    %15 = vector.broadcast %cst_9 : f32 to vector<128x256xf32>
    %16 = arith.maximumf %14, %15 : vector<128x256xf32>
    %17 = arith.mulf %16, %16 : vector<128x256xf32>
    %cst_10 = arith.constant dense<0.000000e+00> : vector<128xf32>
    %18 = vector.multi_reduction <add>, %17, %cst_10 [1] : vector<128x256xf32> to vector<128xf32>
    %19 = vector.shape_cast %18 : vector<128xf32> to vector<128x1xf32>
    %cst_11 = arith.constant dense<0xFF800000> : vector<1xf32>
    %20 = vector.multi_reduction <maximumf>, %19, %cst_11 [0] : vector<128x1xf32> to vector<1xf32>
    %21 = vector.shape_cast %20 : vector<1xf32> to vector<1x1xf32>
    %22 = math.sqrt %21 : vector<1x1xf32>
    %c0_12 = arith.constant 0 : index
    %c0_13 = arith.constant 0 : index
    %23 = vector.load %arg4[%c0_12, %c0_13] : memref<8x128xf32, #tpu.memory_space<vmem>>, vector<8x128xf32>
    %24 = vector.broadcast %22 : vector<1x1xf32> to vector<8x128xf32>
    %25 = arith.maximumf %23, %24 : vector<8x128xf32>
    %c0_14 = arith.constant 0 : index
    %c0_15 = arith.constant 0 : index
    %26 = vector.load %arg4[%c0_14, %c0_15] : memref<8x128xf32, #tpu.memory_space<vmem>>, vector<8x128xf32>
    tpu.vector_store %arg4[%c0_14, %c0_15], %25 {strides = array<i32>} : memref<8x128xf32, #tpu.memory_space<vmem>>, vector<8x128xf32>,
    return
  }
  func.func @transform_0(%arg0: i32) -> (i32, i32, i32) {
    %c0_i32 = arith.constant 0 : i32
    %c0_i32_0 = arith.constant 0 : i32
    %c0_i32_1 = arith.constant 0 : i32
    return %arg0, %c0_i32, %c0_i32_0 : i32, i32, i32
  }
  func.func @transform_1(%arg0: i32) -> (i32, i32) {
    %c0_i32 = arith.constant 0 : i32
    %c0_i32_0 = arith.constant 0 : i32
    %c0_i32_1 = arith.constant 0 : i32
    return %c0_i32, %c0_i32_0 : i32, i32
  }
  func.func @transform_2(%arg0: i32) -> (i32, i32) {
    %c0_i32 = arith.constant 0 : i32
    %c0_i32_0 = arith.constant 0 : i32
    %c0_i32_1 = arith.constant 0 : i32
    return %c0_i32, %c0_i32_0 : i32, i32
  }
  func.func @transform_3(%arg0: i32) -> (i32, i32) {
    %c0_i32 = arith.constant 0 : i32
    %c0_i32_0 = arith.constant 0 : i32
    %c0_i32_1 = arith.constant 0 : i32
    return %c0_i32, %c0_i32_0 : i32, i32
  }
}

module attributes {stable_mosaic.version = 11 : i64} {
  func.func @sdf_kernel(%arg0: i32, %arg1: memref<1x128x3xf32, #tpu.memory_space<vmem>>, %arg2: memref<8x128xf32, #tpu.memory_space<vmem>>, %arg3: memref<3x256xf32, #tpu.memory_space<vmem>>, %arg4: memref<1x256xf32, #tpu.memory_space<vmem>>, %arg5: memref<5x128x384xf32, #tpu.memory_space<vmem>>, %arg6: memref<5x1x384xf32, #tpu.memory_space<vmem>>, %arg7: memref<5x128x128xf32, #tpu.memory_space<vmem>>, %arg8: memref<5x1x128xf32, #tpu.memory_space<vmem>>, %arg9: memref<5x1x128xf32, #tpu.memory_space<vmem>>, %arg10: memref<5x1x128xf32, #tpu.memory_space<vmem>>, %arg11: memref<5x1x128xf32, #tpu.memory_space<vmem>>, %arg12: memref<5x1x128xf32, #tpu.memory_space<vmem>>, %arg13: memref<5x128x128xf32, #tpu.memory_space<vmem>>, %arg14: memref<5x1x128xf32, #tpu.memory_space<vmem>>, %arg15: memref<5x128x128xf32, #tpu.memory_space<vmem>>, %arg16: memref<5x1x128xf32, #tpu.memory_space<vmem>>, %arg17: memref<64x128xf32, #tpu.memory_space<vmem>>, %arg18: memref<64x1xf32, #tpu.memory_space<vmem>>, %arg19: memref<32x64xf32, #tpu.memory_space<vmem>>, %arg20: memref<32x1xf32, #tpu.memory_space<vmem>>, %arg21: memref<1x32xf32, #tpu.memory_space<vmem>>, %arg22: memref<1x1x128xf32, #tpu.memory_space<vmem>>, %arg23: memref<128x128xf32, #tpu.memory_space<vmem>>) attributes {dimension_semantics = [#tpu.dimension_semantics<parallel>], iteration_bounds = array<i64: 2>, scalar_prefetch = 0 : i64, scratch_operands = 1 : i64, tpu.core_type = #tpu.core_type<tc>, window_params = [{transform_indices = @transform_0, window_bounds = array<i64: 1, 128, 3>}, {pipeline_mode = #tpu.pipeline_mode<synchronous>, transform_indices = @transform_1, window_bounds = array<i64: 8, 128>}, {pipeline_mode = #tpu.pipeline_mode<synchronous>, transform_indices = @transform_2, window_bounds = array<i64: 3, 256>}, {pipeline_mode = #tpu.pipeline_mode<synchronous>, transform_indices = @transform_3, window_bounds = array<i64: 1, 256>}, {pipeline_mode = #tpu.pipeline_mode<synchronous>, transform_indices = @transform_4, window_bounds = array<i64: 5, 128, 384>}, {pipeline_mode = #tpu.pipeline_mode<synchronous>, transform_indices = @transform_5, window_bounds = array<i64: 5, 1, 384>}, {pipeline_mode = #tpu.pipeline_mode<synchronous>, transform_indices = @transform_6, window_bounds = array<i64: 5, 128, 128>}, {pipeline_mode = #tpu.pipeline_mode<synchronous>, transform_indices = @transform_7, window_bounds = array<i64: 5, 1, 128>}, {pipeline_mode = #tpu.pipeline_mode<synchronous>, transform_indices = @transform_8, window_bounds = array<i64: 5, 1, 128>}, {pipeline_mode = #tpu.pipeline_mode<synchronous>, transform_indices = @transform_9, window_bounds = array<i64: 5, 1, 128>}, {pipeline_mode = #tpu.pipeline_mode<synchronous>, transform_indices = @transform_10, window_bounds = array<i64: 5, 1, 128>}, {pipeline_mode = #tpu.pipeline_mode<synchronous>, transform_indices = @transform_11, window_bounds = array<i64: 5, 1, 128>}, {pipeline_mode = #tpu.pipeline_mode<synchronous>, transform_indices = @transform_12, window_bounds = array<i64: 5, 128, 128>}, {pipeline_mode = #tpu.pipeline_mode<synchronous>, transform_indices = @transform_13, window_bounds = array<i64: 5, 1, 128>}, {pipeline_mode = #tpu.pipeline_mode<synchronous>, transform_indices = @transform_14, window_bounds = array<i64: 5, 128, 128>}, {pipeline_mode = #tpu.pipeline_mode<synchronous>, transform_indices = @transform_15, window_bounds = array<i64: 5, 1, 128>}, {pipeline_mode = #tpu.pipeline_mode<synchronous>, transform_indices = @transform_16, window_bounds = array<i64: 64, 128>}, {pipeline_mode = #tpu.pipeline_mode<synchronous>, transform_indices = @transform_17, window_bounds = array<i64: 64, 1>}, {pipeline_mode = #tpu.pipeline_mode<synchronous>, transform_indices = @transform_18, window_bounds = array<i64: 32, 64>}, {pipeline_mode = #tpu.pipeline_mode<synchronous>, transform_indices = @transform_19, window_bounds = array<i64: 32, 1>}, {pipeline_mode = #tpu.pipeline_mode<synchronous>, transform_indices = @transform_20, window_bounds = array<i64: 1, 32>}, {transform_indices = @transform_21, window_bounds = array<i64: 1, 1, 128>}]} {
    %c0 = arith.constant 0 : index
    %c0_0 = arith.constant 0 : index
    %c0_1 = arith.constant 0 : index
    %0 = vector.load %arg1[%c0, %c0_0, %c0_1] : memref<1x128x3xf32, #tpu.memory_space<vmem>>, vector<1x128x3xf32>
    %1 = vector.shape_cast %0 : vector<1x128x3xf32> to vector<128x3xf32>
    %c0_2 = arith.constant 0 : index
    %c0_3 = arith.constant 0 : index
    %2 = vector.load %arg3[%c0_2, %c0_3] : memref<3x256xf32, #tpu.memory_space<vmem>>, vector<3x256xf32>
    %c0_4 = arith.constant 0 : index
    %c0_5 = arith.constant 0 : index
    %3 = vector.load %arg4[%c0_4, %c0_5] : memref<1x256xf32, #tpu.memory_space<vmem>>, vector<1x256xf32>
    %cst = arith.constant dense<0.000000e+00> : vector<128x256xf32>
    %4 = tpu.matmul %1, %2, %cst {dimension_numbers = #tpu.dot_dimension_numbers<[1], [0], [0], [1], [0, 0, 1, 1], [], []>} : vector<128x3xf32>, vector<3x256xf32>, vector<128x256xf32> -> vector<128x256xf32>
    %5 = vector.broadcast %3 : vector<1x256xf32> to vector<128x256xf32>
    %6 = arith.subf %4, %5 : vector<128x256xf32>
    %7 = math.absf %6 : vector<128x256xf32>
    %cst_6 = arith.constant 1.280000e+02 : f32
    %8 = vector.broadcast %cst_6 : f32 to vector<128x256xf32>
    %9 = arith.mulf %7, %8 : vector<128x256xf32>
    %cst_7 = arith.constant 1.000000e+00 : f32
    %10 = vector.broadcast %cst_7 : f32 to vector<128x256xf32>
    %11 = arith.subf %10, %9 : vector<128x256xf32>
    %cst_8 = arith.constant 0.000000e+00 : f32
    %12 = vector.broadcast %cst_8 : f32 to vector<128x256xf32>
    %13 = arith.maximumf %11, %12 : vector<128x256xf32>
    %c0_9 = arith.constant 0 : index
    %c0_10 = arith.constant 0 : index
    %14 = vector.load %arg2[%c0_9, %c0_10] : memref<8x128xf32, #tpu.memory_space<vmem>>, vector<1x128xf32>
    %15 = tpu.reciprocal %14 {approx = true} : vector<1x128xf32> -> vector<1x128xf32>
    %16 = vector.extract_strided_slice %13 {offsets = [0, 0], sizes = [128, 128], strides = [1, 1]} : vector<128x256xf32> to vector<128x128xf32>
    %17 = vector.broadcast %15 : vector<1x128xf32> to vector<128x128xf32>
    %18 = arith.mulf %16, %17 : vector<128x128xf32>
    %c0_i32 = arith.constant 0 : i32
    %c5_i32 = arith.constant 5 : i32
    %19 = arith.addi %c0_i32, %c5_i32 : i32
    %c1_i32 = arith.constant 1 : i32
    %20 = scf.for %arg24 = %c0_i32 to %19 step %c1_i32 iter_args(%arg25 = %18) -> (vector<128x128xf32>)  : i32 {
      %47 = arith.index_cast %arg24 : i32 to index
      %c0_32 = arith.constant 0 : index
      %c0_33 = arith.constant 0 : index
      %48 = vector.load %arg5[%47, %c0_32, %c0_33] : memref<5x128x384xf32, #tpu.memory_space<vmem>>, vector<1x128x384xf32>
      %49 = vector.shape_cast %48 : vector<1x128x384xf32> to vector<128x384xf32>
      %cst_34 = arith.constant dense<0.000000e+00> : vector<128x384xf32>
      %50 = tpu.matmul %arg25, %49, %cst_34 {dimension_numbers = #tpu.dot_dimension_numbers<[1], [0], [0], [1], [0, 0, 1, 1], [], []>} : vector<128x128xf32>, vector<128x384xf32>, vector<128x384xf32> -> vector<128x384xf32>
      %51 = arith.index_cast %arg24 : i32 to index
      %c0_35 = arith.constant 0 : index
      %c0_36 = arith.constant 0 : index
      %52 = vector.load %arg6[%51, %c0_35, %c0_36] : memref<5x1x384xf32, #tpu.memory_space<vmem>>, vector<1x1x384xf32>
      %53 = vector.shape_cast %52 : vector<1x1x384xf32> to vector<1x384xf32>
      %54 = vector.broadcast %53 : vector<1x384xf32> to vector<128x384xf32>
      %55 = arith.addf %50, %54 : vector<128x384xf32>
      %56 = vector.extract_strided_slice %55 {offsets = [0, 0], sizes = [128, 16], strides = [1, 1]} : vector<128x384xf32> to vector<128x16xf32>
      %57 = vector.extract_strided_slice %55 {offsets = [0, 16], sizes = [128, 16], strides = [1, 1]} : vector<128x384xf32> to vector<128x16xf32>
      %58 = vector.extract_strided_slice %55 {offsets = [0, 32], sizes = [128, 16], strides = [1, 1]} : vector<128x384xf32> to vector<128x16xf32>
      %59 = vector.extract_strided_slice %55 {offsets = [0, 48], sizes = [128, 16], strides = [1, 1]} : vector<128x384xf32> to vector<128x16xf32>
      %60 = vector.extract_strided_slice %55 {offsets = [0, 64], sizes = [128, 16], strides = [1, 1]} : vector<128x384xf32> to vector<128x16xf32>
      %61 = vector.extract_strided_slice %55 {offsets = [0, 80], sizes = [128, 16], strides = [1, 1]} : vector<128x384xf32> to vector<128x16xf32>
      %62 = vector.extract_strided_slice %55 {offsets = [0, 96], sizes = [128, 16], strides = [1, 1]} : vector<128x384xf32> to vector<128x16xf32>
      %63 = vector.extract_strided_slice %55 {offsets = [0, 112], sizes = [128, 16], strides = [1, 1]} : vector<128x384xf32> to vector<128x16xf32>
      %64 = vector.shape_cast %56 : vector<128x16xf32> to vector<1x128x16xf32>
      %65 = vector.shape_cast %57 : vector<128x16xf32> to vector<1x128x16xf32>
      %66 = vector.shape_cast %58 : vector<128x16xf32> to vector<1x128x16xf32>
      %67 = vector.shape_cast %59 : vector<128x16xf32> to vector<1x128x16xf32>
      %68 = vector.shape_cast %60 : vector<128x16xf32> to vector<1x128x16xf32>
      %69 = vector.shape_cast %61 : vector<128x16xf32> to vector<1x128x16xf32>
      %70 = vector.shape_cast %62 : vector<128x16xf32> to vector<1x128x16xf32>
      %71 = vector.shape_cast %63 : vector<128x16xf32> to vector<1x128x16xf32>
      %72 = tpu.concatenate %64, %65, %66, %67, %68, %69, %70, %71 in 0 : vector<1x128x16xf32>, vector<1x128x16xf32>, vector<1x128x16xf32>, vector<1x128x16xf32>, vector<1x128x16xf32>, vector<1x128x16xf32>, vector<1x128x16xf32>, vector<1x128x16xf32> -> vector<8x128x16xf32>
      %73 = vector.extract_strided_slice %55 {offsets = [0, 128], sizes = [128, 16], strides = [1, 1]} : vector<128x384xf32> to vector<128x16xf32>
      %74 = vector.extract_strided_slice %55 {offsets = [0, 144], sizes = [128, 16], strides = [1, 1]} : vector<128x384xf32> to vector<128x16xf32>
      %75 = vector.extract_strided_slice %55 {offsets = [0, 160], sizes = [128, 16], strides = [1, 1]} : vector<128x384xf32> to vector<128x16xf32>
      %76 = vector.extract_strided_slice %55 {offsets = [0, 176], sizes = [128, 16], strides = [1, 1]} : vector<128x384xf32> to vector<128x16xf32>
      %77 = vector.extract_strided_slice %55 {offsets = [0, 192], sizes = [128, 16], strides = [1, 1]} : vector<128x384xf32> to vector<128x16xf32>
      %78 = vector.extract_strided_slice %55 {offsets = [0, 208], sizes = [128, 16], strides = [1, 1]} : vector<128x384xf32> to vector<128x16xf32>
      %79 = vector.extract_strided_slice %55 {offsets = [0, 224], sizes = [128, 16], strides = [1, 1]} : vector<128x384xf32> to vector<128x16xf32>
      %80 = vector.extract_strided_slice %55 {offsets = [0, 240], sizes = [128, 16], strides = [1, 1]} : vector<128x384xf32> to vector<128x16xf32>
      %81 = vector.shape_cast %73 : vector<128x16xf32> to vector<1x128x16xf32>
      %82 = vector.shape_cast %74 : vector<128x16xf32> to vector<1x128x16xf32>
      %83 = vector.shape_cast %75 : vector<128x16xf32> to vector<1x128x16xf32>
      %84 = vector.shape_cast %76 : vector<128x16xf32> to vector<1x128x16xf32>
      %85 = vector.shape_cast %77 : vector<128x16xf32> to vector<1x128x16xf32>
      %86 = vector.shape_cast %78 : vector<128x16xf32> to vector<1x128x16xf32>
      %87 = vector.shape_cast %79 : vector<128x16xf32> to vector<1x128x16xf32>
      %88 = vector.shape_cast %80 : vector<128x16xf32> to vector<1x128x16xf32>
      %89 = tpu.concatenate %81, %82, %83, %84, %85, %86, %87, %88 in 0 : vector<1x128x16xf32>, vector<1x128x16xf32>, vector<1x128x16xf32>, vector<1x128x16xf32>, vector<1x128x16xf32>, vector<1x128x16xf32>, vector<1x128x16xf32>, vector<1x128x16xf32> -> vector<8x128x16xf32>
      %90 = vector.extract_strided_slice %55 {offsets = [0, 256], sizes = [128, 16], strides = [1, 1]} : vector<128x384xf32> to vector<128x16xf32>
      %91 = vector.extract_strided_slice %55 {offsets = [0, 272], sizes = [128, 16], strides = [1, 1]} : vector<128x384xf32> to vector<128x16xf32>
      %92 = vector.extract_strided_slice %55 {offsets = [0, 288], sizes = [128, 16], strides = [1, 1]} : vector<128x384xf32> to vector<128x16xf32>
      %93 = vector.extract_strided_slice %55 {offsets = [0, 304], sizes = [128, 16], strides = [1, 1]} : vector<128x384xf32> to vector<128x16xf32>
      %94 = vector.extract_strided_slice %55 {offsets = [0, 320], sizes = [128, 16], strides = [1, 1]} : vector<128x384xf32> to vector<128x16xf32>
      %95 = vector.extract_strided_slice %55 {offsets = [0, 336], sizes = [128, 16], strides = [1, 1]} : vector<128x384xf32> to vector<128x16xf32>
      %96 = vector.extract_strided_slice %55 {offsets = [0, 352], sizes = [128, 16], strides = [1, 1]} : vector<128x384xf32> to vector<128x16xf32>
      %97 = vector.extract_strided_slice %55 {offsets = [0, 368], sizes = [128, 16], strides = [1, 1]} : vector<128x384xf32> to vector<128x16xf32>
      %98 = vector.shape_cast %90 : vector<128x16xf32> to vector<1x128x16xf32>
      %99 = vector.shape_cast %91 : vector<128x16xf32> to vector<1x128x16xf32>
      %100 = vector.shape_cast %92 : vector<128x16xf32> to vector<1x128x16xf32>
      %101 = vector.shape_cast %93 : vector<128x16xf32> to vector<1x128x16xf32>
      %102 = vector.shape_cast %94 : vector<128x16xf32> to vector<1x128x16xf32>
      %103 = vector.shape_cast %95 : vector<128x16xf32> to vector<1x128x16xf32>
      %104 = vector.shape_cast %96 : vector<128x16xf32> to vector<1x128x16xf32>
      %105 = vector.shape_cast %97 : vector<128x16xf32> to vector<1x128x16xf32>
      %106 = tpu.concatenate %98, %99, %100, %101, %102, %103, %104, %105 in 0 : vector<1x128x16xf32>, vector<1x128x16xf32>, vector<1x128x16xf32>, vector<1x128x16xf32>, vector<1x128x16xf32>, vector<1x128x16xf32>, vector<1x128x16xf32>, vector<1x128x16xf32> -> vector<8x128x16xf32>
      "tpu.trace_start"() <{level = 10 : i32, message = "hqd,hkd->hqk"}> : () -> ()
      %cst_37 = arith.constant dense<0.000000e+00> : vector<8x128x128xf32>
      %107 = tpu.matmul %72, %89, %cst_37 {dimension_numbers = #tpu.dot_dimension_numbers<[2], [2], [1], [1], [0, 0, 0, 1, 1, 1], [0], [0]>} : vector<8x128x16xf32>, vector<8x128x16xf32>, vector<8x128x128xf32> -> vector<8x128x128xf32>
      "tpu.trace_stop"() : () -> ()
      %cst_38 = arith.constant dense<0xFF800000> : vector<8x128xf32>
      %108 = vector.multi_reduction <maximumf>, %107, %cst_38 [2] : vector<8x128x128xf32> to vector<8x128xf32>
      %109 = vector.shape_cast %108 : vector<8x128xf32> to vector<8x128x1xf32>
      %110 = vector.broadcast %109 : vector<8x128x1xf32> to vector<8x128x128xf32>
      %111 = arith.subf %107, %110 : vector<8x128x128xf32>
      %112 = math.exp %111 : vector<8x128x128xf32>
      %cst_39 = arith.constant dense<0.000000e+00> : vector<8x128xf32>
      %113 = vector.multi_reduction <add>, %112, %cst_39 [2] : vector<8x128x128xf32> to vector<8x128xf32>
      %114 = vector.shape_cast %113 : vector<8x128xf32> to vector<8x128x1xf32>
      %115 = tpu.reciprocal %114 {approx = true} : vector<8x128x1xf32> -> vector<8x128x1xf32>
      %116 = vector.broadcast %115 : vector<8x128x1xf32> to vector<8x128x128xf32>
      %117 = arith.mulf %112, %116 : vector<8x128x128xf32>
      "tpu.trace_start"() <{level = 10 : i32, message = "hqk,hkd->hqd"}> : () -> ()
      %cst_40 = arith.constant dense<0.000000e+00> : vector<8x128x16xf32>
      %118 = tpu.matmul %117, %106, %cst_40 {dimension_numbers = #tpu.dot_dimension_numbers<[2], [1], [1], [2], [0, 0, 0, 1, 1, 2], [0], [0]>} : vector<8x128x128xf32>, vector<8x128x16xf32>, vector<8x128x16xf32> -> vector<8x128x16xf32>
      "tpu.trace_stop"() : () -> ()
      %119 = vector.extract_strided_slice %118 {offsets = [0, 0, 0], sizes = [1, 128, 16], strides = [1, 1, 1]} : vector<8x128x16xf32> to vector<1x128x16xf32>
      %120 = vector.shape_cast %119 : vector<1x128x16xf32> to vector<128x16xf32>
      %c0_41 = arith.constant 0 : index
      %c0_42 = arith.constant 0 : index
      %121 = vector.load %arg23[%c0_41, %c0_42] : memref<128x128xf32, #tpu.memory_space<vmem>>, vector<128x16xf32>
      tpu.vector_store %arg23[%c0_41, %c0_42], %120 {strides = array<i32>} : memref<128x128xf32, #tpu.memory_space<vmem>>, vector<128x16xf32>,
      %122 = vector.extract_strided_slice %118 {offsets = [1, 0, 0], sizes = [1, 128, 16], strides = [1, 1, 1]} : vector<8x128x16xf32> to vector<1x128x16xf32>
      %123 = vector.shape_cast %122 : vector<1x128x16xf32> to vector<128x16xf32>
      %c0_43 = arith.constant 0 : index
      %c16 = arith.constant 16 : index
      %124 = vector.load %arg23[%c0_43, %c16] : memref<128x128xf32, #tpu.memory_space<vmem>>, vector<128x16xf32>
      tpu.vector_store %arg23[%c0_43, %c16], %123 {strides = array<i32>} : memref<128x128xf32, #tpu.memory_space<vmem>>, vector<128x16xf32>,
      %125 = vector.extract_strided_slice %118 {offsets = [2, 0, 0], sizes = [1, 128, 16], strides = [1, 1, 1]} : vector<8x128x16xf32> to vector<1x128x16xf32>
      %126 = vector.shape_cast %125 : vector<1x128x16xf32> to vector<128x16xf32>
      %c0_44 = arith.constant 0 : index
      %c32 = arith.constant 32 : index
      %127 = vector.load %arg23[%c0_44, %c32] : memref<128x128xf32, #tpu.memory_space<vmem>>, vector<128x16xf32>
      tpu.vector_store %arg23[%c0_44, %c32], %126 {strides = array<i32>} : memref<128x128xf32, #tpu.memory_space<vmem>>, vector<128x16xf32>,
      %128 = vector.extract_strided_slice %118 {offsets = [3, 0, 0], sizes = [1, 128, 16], strides = [1, 1, 1]} : vector<8x128x16xf32> to vector<1x128x16xf32>
      %129 = vector.shape_cast %128 : vector<1x128x16xf32> to vector<128x16xf32>
      %c0_45 = arith.constant 0 : index
      %c48 = arith.constant 48 : index
      %130 = vector.load %arg23[%c0_45, %c48] : memref<128x128xf32, #tpu.memory_space<vmem>>, vector<128x16xf32>
      tpu.vector_store %arg23[%c0_45, %c48], %129 {strides = array<i32>} : memref<128x128xf32, #tpu.memory_space<vmem>>, vector<128x16xf32>,
      %131 = vector.extract_strided_slice %118 {offsets = [4, 0, 0], sizes = [1, 128, 16], strides = [1, 1, 1]} : vector<8x128x16xf32> to vector<1x128x16xf32>
      %132 = vector.shape_cast %131 : vector<1x128x16xf32> to vector<128x16xf32>
      %c0_46 = arith.constant 0 : index
      %c64 = arith.constant 64 : index
      %133 = vector.load %arg23[%c0_46, %c64] : memref<128x128xf32, #tpu.memory_space<vmem>>, vector<128x16xf32>
      tpu.vector_store %arg23[%c0_46, %c64], %132 {strides = array<i32>} : memref<128x128xf32, #tpu.memory_space<vmem>>, vector<128x16xf32>,
      %134 = vector.extract_strided_slice %118 {offsets = [5, 0, 0], sizes = [1, 128, 16], strides = [1, 1, 1]} : vector<8x128x16xf32> to vector<1x128x16xf32>
      %135 = vector.shape_cast %134 : vector<1x128x16xf32> to vector<128x16xf32>
      %c0_47 = arith.constant 0 : index
      %c80 = arith.constant 80 : index
      %136 = vector.load %arg23[%c0_47, %c80] : memref<128x128xf32, #tpu.memory_space<vmem>>, vector<128x16xf32>
      tpu.vector_store %arg23[%c0_47, %c80], %135 {strides = array<i32>} : memref<128x128xf32, #tpu.memory_space<vmem>>, vector<128x16xf32>,
      %137 = vector.extract_strided_slice %118 {offsets = [6, 0, 0], sizes = [1, 128, 16], strides = [1, 1, 1]} : vector<8x128x16xf32> to vector<1x128x16xf32>
      %138 = vector.shape_cast %137 : vector<1x128x16xf32> to vector<128x16xf32>
      %c0_48 = arith.constant 0 : index
      %c96 = arith.constant 96 : index
      %139 = vector.load %arg23[%c0_48, %c96] : memref<128x128xf32, #tpu.memory_space<vmem>>, vector<128x16xf32>
      tpu.vector_store %arg23[%c0_48, %c96], %138 {strides = array<i32>} : memref<128x128xf32, #tpu.memory_space<vmem>>, vector<128x16xf32>,
      %140 = vector.extract_strided_slice %118 {offsets = [7, 0, 0], sizes = [1, 128, 16], strides = [1, 1, 1]} : vector<8x128x16xf32> to vector<1x128x16xf32>
      %141 = vector.shape_cast %140 : vector<1x128x16xf32> to vector<128x16xf32>
      %c0_49 = arith.constant 0 : index
      %c112 = arith.constant 112 : index
      %142 = vector.load %arg23[%c0_49, %c112] : memref<128x128xf32, #tpu.memory_space<vmem>>, vector<128x16xf32>
      tpu.vector_store %arg23[%c0_49, %c112], %141 {strides = array<i32>} : memref<128x128xf32, #tpu.memory_space<vmem>>, vector<128x16xf32>,
      %c0_50 = arith.constant 0 : index
      %c0_51 = arith.constant 0 : index
      %143 = vector.load %arg23[%c0_50, %c0_51] : memref<128x128xf32, #tpu.memory_space<vmem>>, vector<128x128xf32>
      %144 = arith.index_cast %arg24 : i32 to index
      %c0_52 = arith.constant 0 : index
      %c0_53 = arith.constant 0 : index
      %145 = vector.load %arg7[%144, %c0_52, %c0_53] : memref<5x128x128xf32, #tpu.memory_space<vmem>>, vector<1x128x128xf32>
      %146 = vector.shape_cast %145 : vector<1x128x128xf32> to vector<128x128xf32>
      %cst_54 = arith.constant dense<0.000000e+00> : vector<128x128xf32>
      %147 = tpu.matmul %143, %146, %cst_54 {dimension_numbers = #tpu.dot_dimension_numbers<[1], [0], [0], [1], [0, 0, 1, 1], [], []>} : vector<128x128xf32>, vector<128x128xf32>, vector<128x128xf32> -> vector<128x128xf32>
      %148 = arith.index_cast %arg24 : i32 to index
      %c0_55 = arith.constant 0 : index
      %c0_56 = arith.constant 0 : index
      %149 = vector.load %arg8[%148, %c0_55, %c0_56] : memref<5x1x128xf32, #tpu.memory_space<vmem>>, vector<1x1x128xf32>
      %150 = vector.shape_cast %149 : vector<1x1x128xf32> to vector<1x128xf32>
      %151 = vector.broadcast %150 : vector<1x128xf32> to vector<128x128xf32>
      %152 = arith.addf %147, %151 : vector<128x128xf32>
      %153 = arith.addf %arg25, %152 : vector<128x128xf32>
      %154 = arith.index_cast %arg24 : i32 to index
      %c0_57 = arith.constant 0 : index
      %c0_58 = arith.constant 0 : index
      %155 = vector.load %arg9[%154, %c0_57, %c0_58] : memref<5x1x128xf32, #tpu.memory_space<vmem>>, vector<1x1x128xf32>
      %156 = vector.shape_cast %155 : vector<1x1x128xf32> to vector<1x128xf32>
      %157 = arith.index_cast %arg24 : i32 to index
      %c0_59 = arith.constant 0 : index
      %c0_60 = arith.constant 0 : index
      %158 = vector.load %arg10[%157, %c0_59, %c0_60] : memref<5x1x128xf32, #tpu.memory_space<vmem>>, vector<1x1x128xf32>
      %159 = vector.shape_cast %158 : vector<1x1x128xf32> to vector<1x128xf32>
      %cst_61 = arith.constant dense<0.000000e+00> : vector<128xf32>
      %160 = vector.multi_reduction <add>, %153, %cst_61 [1] : vector<128x128xf32> to vector<128xf32>
      %161 = vector.shape_cast %160 : vector<128xf32> to vector<128x1xf32>
      %cst_62 = arith.constant 1.280000e+02 : f32
      %162 = vector.broadcast %cst_62 : f32 to vector<128x1xf32>
      %163 = arith.divf %161, %162 : vector<128x1xf32>
      %164 = vector.broadcast %163 : vector<128x1xf32> to vector<128x128xf32>
      %165 = arith.subf %153, %164 : vector<128x128xf32>
      %166 = arith.mulf %165, %165 : vector<128x128xf32>
      %cst_63 = arith.constant dense<0.000000e+00> : vector<128xf32>
      %167 = vector.multi_reduction <add>, %166, %cst_63 [1] : vector<128x128xf32> to vector<128xf32>
      %168 = vector.shape_cast %167 : vector<128xf32> to vector<128x1xf32>
      %cst_64 = arith.constant 1.280000e+02 : f32
      %169 = vector.broadcast %cst_64 : f32 to vector<128x1xf32>
      %170 = arith.divf %168, %169 : vector<128x1xf32>
      %cst_65 = arith.constant 9.99999974E-6 : f32
      %171 = vector.broadcast %cst_65 : f32 to vector<128x1xf32>
      %172 = arith.addf %170, %171 : vector<128x1xf32>
      %173 = math.rsqrt %172 : vector<128x1xf32>
      %174 = vector.broadcast %173 : vector<128x1xf32> to vector<128x128xf32>
      %175 = arith.mulf %165, %174 : vector<128x128xf32>
      %176 = vector.broadcast %156 : vector<1x128xf32> to vector<128x128xf32>
      %177 = arith.mulf %175, %176 : vector<128x128xf32>
      %178 = vector.broadcast %159 : vector<1x128xf32> to vector<128x128xf32>
      %179 = arith.addf %177, %178 : vector<128x128xf32>
      %180 = arith.index_cast %arg24 : i32 to index
      %c0_66 = arith.constant 0 : index
      %c0_67 = arith.constant 0 : index
      %181 = vector.load %arg13[%180, %c0_66, %c0_67] : memref<5x128x128xf32, #tpu.memory_space<vmem>>, vector<1x128x128xf32>
      %182 = vector.shape_cast %181 : vector<1x128x128xf32> to vector<128x128xf32>
      %cst_68 = arith.constant dense<0.000000e+00> : vector<128x128xf32>
      %183 = tpu.matmul %179, %182, %cst_68 {dimension_numbers = #tpu.dot_dimension_numbers<[1], [0], [0], [1], [0, 0, 1, 1], [], []>} : vector<128x128xf32>, vector<128x128xf32>, vector<128x128xf32> -> vector<128x128xf32>
      %184 = arith.index_cast %arg24 : i32 to index
      %c0_69 = arith.constant 0 : index
      %c0_70 = arith.constant 0 : index
      %185 = vector.load %arg14[%184, %c0_69, %c0_70] : memref<5x1x128xf32, #tpu.memory_space<vmem>>, vector<1x1x128xf32>
      %186 = vector.shape_cast %185 : vector<1x1x128xf32> to vector<1x128xf32>
      %187 = vector.broadcast %186 : vector<1x128xf32> to vector<128x128xf32>
      %188 = arith.addf %183, %187 : vector<128x128xf32>
      %cst_71 = arith.constant 0.000000e+00 : f32
      %189 = vector.broadcast %cst_71 : f32 to vector<128x128xf32>
      %190 = arith.maximumf %188, %189 : vector<128x128xf32>
      %191 = arith.index_cast %arg24 : i32 to index
      %c0_72 = arith.constant 0 : index
      %c0_73 = arith.constant 0 : index
      %192 = vector.load %arg15[%191, %c0_72, %c0_73] : memref<5x128x128xf32, #tpu.memory_space<vmem>>, vector<1x128x128xf32>
      %193 = vector.shape_cast %192 : vector<1x128x128xf32> to vector<128x128xf32>
      %cst_74 = arith.constant dense<0.000000e+00> : vector<128x128xf32>
      %194 = tpu.matmul %190, %193, %cst_74 {dimension_numbers = #tpu.dot_dimension_numbers<[1], [0], [0], [1], [0, 0, 1, 1], [], []>} : vector<128x128xf32>, vector<128x128xf32>, vector<128x128xf32> -> vector<128x128xf32>
      %195 = arith.index_cast %arg24 : i32 to index
      %c0_75 = arith.constant 0 : index
      %c0_76 = arith.constant 0 : index
      %196 = vector.load %arg16[%195, %c0_75, %c0_76] : memref<5x1x128xf32, #tpu.memory_space<vmem>>, vector<1x1x128xf32>
      %197 = vector.shape_cast %196 : vector<1x1x128xf32> to vector<1x128xf32>
      %198 = vector.broadcast %197 : vector<1x128xf32> to vector<128x128xf32>
      %199 = arith.addf %194, %198 : vector<128x128xf32>
      %200 = arith.addf %179, %199 : vector<128x128xf32>
      %201 = arith.index_cast %arg24 : i32 to index
      %c0_77 = arith.constant 0 : index
      %c0_78 = arith.constant 0 : index
      %202 = vector.load %arg11[%201, %c0_77, %c0_78] : memref<5x1x128xf32, #tpu.memory_space<vmem>>, vector<1x1x128xf32>
      %203 = vector.shape_cast %202 : vector<1x1x128xf32> to vector<1x128xf32>
      %204 = arith.index_cast %arg24 : i32 to index
      %c0_79 = arith.constant 0 : index
      %c0_80 = arith.constant 0 : index
      %205 = vector.load %arg12[%204, %c0_79, %c0_80] : memref<5x1x128xf32, #tpu.memory_space<vmem>>, vector<1x1x128xf32>
      %206 = vector.shape_cast %205 : vector<1x1x128xf32> to vector<1x128xf32>
      %cst_81 = arith.constant dense<0.000000e+00> : vector<128xf32>
      %207 = vector.multi_reduction <add>, %200, %cst_81 [1] : vector<128x128xf32> to vector<128xf32>
      %208 = vector.shape_cast %207 : vector<128xf32> to vector<128x1xf32>
      %cst_82 = arith.constant 1.280000e+02 : f32
      %209 = vector.broadcast %cst_82 : f32 to vector<128x1xf32>
      %210 = arith.divf %208, %209 : vector<128x1xf32>
      %211 = vector.broadcast %210 : vector<128x1xf32> to vector<128x128xf32>
      %212 = arith.subf %200, %211 : vector<128x128xf32>
      %213 = arith.mulf %212, %212 : vector<128x128xf32>
      %cst_83 = arith.constant dense<0.000000e+00> : vector<128xf32>
      %214 = vector.multi_reduction <add>, %213, %cst_83 [1] : vector<128x128xf32> to vector<128xf32>
      %215 = vector.shape_cast %214 : vector<128xf32> to vector<128x1xf32>
      %cst_84 = arith.constant 1.280000e+02 : f32
      %216 = vector.broadcast %cst_84 : f32 to vector<128x1xf32>
      %217 = arith.divf %215, %216 : vector<128x1xf32>
      %cst_85 = arith.constant 9.99999974E-6 : f32
      %218 = vector.broadcast %cst_85 : f32 to vector<128x1xf32>
      %219 = arith.addf %217, %218 : vector<128x1xf32>
      %220 = math.rsqrt %219 : vector<128x1xf32>
      %221 = vector.broadcast %220 : vector<128x1xf32> to vector<128x128xf32>
      %222 = arith.mulf %212, %221 : vector<128x128xf32>
      %223 = vector.broadcast %203 : vector<1x128xf32> to vector<128x128xf32>
      %224 = arith.mulf %222, %223 : vector<128x128xf32>
      %225 = vector.broadcast %206 : vector<1x128xf32> to vector<128x128xf32>
      %226 = arith.addf %224, %225 : vector<128x128xf32>
      scf.yield %226 : vector<128x128xf32>
    }
    %c5_i32_11 = arith.constant 5 : i32
    %21 = tpu.transpose %20, [1, 0] : vector<128x128xf32> -> vector<128x128xf32>
    %c0_12 = arith.constant 0 : index
    %c0_13 = arith.constant 0 : index
    %22 = vector.load %arg17[%c0_12, %c0_13] : memref<64x128xf32, #tpu.memory_space<vmem>>, vector<64x128xf32>
    %cst_14 = arith.constant dense<0.000000e+00> : vector<64x128xf32>
    %23 = tpu.matmul %22, %21, %cst_14 {dimension_numbers = #tpu.dot_dimension_numbers<[1], [0], [0], [1], [0, 0, 1, 1], [], []>} : vector<64x128xf32>, vector<128x128xf32>, vector<64x128xf32> -> vector<64x128xf32>
    %c0_15 = arith.constant 0 : index
    %c0_16 = arith.constant 0 : index
    %24 = vector.load %arg18[%c0_15, %c0_16] : memref<64x1xf32, #tpu.memory_space<vmem>>, vector<64x1xf32>
    %25 = vector.broadcast %24 : vector<64x1xf32> to vector<64x128xf32>
    %26 = arith.addf %23, %25 : vector<64x128xf32>
    %cst_17 = arith.constant 0.000000e+00 : f32
    %27 = vector.broadcast %cst_17 : f32 to vector<64x128xf32>
    %28 = arith.cmpf ogt, %26, %27 : vector<64x128xf32>
    %cst_18 = arith.constant 0.00999999977 : f32
    %29 = vector.broadcast %cst_18 : f32 to vector<64x128xf32>
    %30 = arith.mulf %29, %26 : vector<64x128xf32>
    %31 = arith.select %28, %26, %30 : vector<64x128xi1>, vector<64x128xf32>
    %c0_19 = arith.constant 0 : index
    %c0_20 = arith.constant 0 : index
    %32 = vector.load %arg19[%c0_19, %c0_20] : memref<32x64xf32, #tpu.memory_space<vmem>>, vector<32x64xf32>
    %cst_21 = arith.constant dense<0.000000e+00> : vector<32x128xf32>
    %33 = tpu.matmul %32, %31, %cst_21 {dimension_numbers = #tpu.dot_dimension_numbers<[1], [0], [0], [1], [0, 0, 1, 1], [], []>} : vector<32x64xf32>, vector<64x128xf32>, vector<32x128xf32> -> vector<32x128xf32>
    %c0_22 = arith.constant 0 : index
    %c0_23 = arith.constant 0 : index
    %34 = vector.load %arg20[%c0_22, %c0_23] : memref<32x1xf32, #tpu.memory_space<vmem>>, vector<32x1xf32>
    %35 = vector.broadcast %34 : vector<32x1xf32> to vector<32x128xf32>
    %36 = arith.addf %33, %35 : vector<32x128xf32>
    %cst_24 = arith.constant 0.000000e+00 : f32
    %37 = vector.broadcast %cst_24 : f32 to vector<32x128xf32>
    %38 = arith.cmpf ogt, %36, %37 : vector<32x128xf32>
    %cst_25 = arith.constant 0.00999999977 : f32
    %39 = vector.broadcast %cst_25 : f32 to vector<32x128xf32>
    %40 = arith.mulf %39, %36 : vector<32x128xf32>
    %41 = arith.select %38, %36, %40 : vector<32x128xi1>, vector<32x128xf32>
    %c0_26 = arith.constant 0 : index
    %c0_27 = arith.constant 0 : index
    %42 = vector.load %arg21[%c0_26, %c0_27] : memref<1x32xf32, #tpu.memory_space<vmem>>, vector<1x32xf32>
    %cst_28 = arith.constant dense<0.000000e+00> : vector<1x128xf32>
    %43 = tpu.matmul %42, %41, %cst_28 {dimension_numbers = #tpu.dot_dimension_numbers<[1], [0], [0], [1], [0, 0, 1, 1], [], []>} : vector<1x32xf32>, vector<32x128xf32>, vector<1x128xf32> -> vector<1x128xf32>
    %c0_29 = arith.constant 0 : index
    %c0_30 = arith.constant 0 : index
    %c0_31 = arith.constant 0 : index
    %44 = vector.load %arg22[%c0_29, %c0_30, %c0_31] : memref<1x1x128xf32, #tpu.memory_space<vmem>>, vector<1x1x128xf32>
    %45 = vector.shape_cast %44 : vector<1x1x128xf32> to vector<1x128xf32>
    %46 = vector.shape_cast %43 : vector<1x128xf32> to vector<1x1x128xf32>
    tpu.vector_store %arg22[%c0_29, %c0_30, %c0_31], %46 {strides = array<i32>} : memref<1x1x128xf32, #tpu.memory_space<vmem>>, vector<1x1x128xf32>,
    return
  }
  func.func @transform_0(%arg0: i32) -> (i32, i32, i32) {
    %c0_i32 = arith.constant 0 : i32
    %c0_i32_0 = arith.constant 0 : i32
    %c0_i32_1 = arith.constant 0 : i32
    return %arg0, %c0_i32, %c0_i32_0 : i32, i32, i32
  }
  func.func @transform_1(%arg0: i32) -> (i32, i32) {
    %c0_i32 = arith.constant 0 : i32
    %c0_i32_0 = arith.constant 0 : i32
    %c0_i32_1 = arith.constant 0 : i32
    return %c0_i32, %c0_i32_0 : i32, i32
  }
  func.func @transform_2(%arg0: i32) -> (i32, i32) {
    %c0_i32 = arith.constant 0 : i32
    %c0_i32_0 = arith.constant 0 : i32
    %c0_i32_1 = arith.constant 0 : i32
    return %c0_i32, %c0_i32_0 : i32, i32
  }
  func.func @transform_3(%arg0: i32) -> (i32, i32) {
    %c0_i32 = arith.constant 0 : i32
    %c0_i32_0 = arith.constant 0 : i32
    %c0_i32_1 = arith.constant 0 : i32
    return %c0_i32, %c0_i32_0 : i32, i32
  }
  func.func @transform_4(%arg0: i32) -> (i32, i32, i32) {
    %c0_i32 = arith.constant 0 : i32
    %c0_i32_0 = arith.constant 0 : i32
    %c0_i32_1 = arith.constant 0 : i32
    %c0_i32_2 = arith.constant 0 : i32
    return %c0_i32, %c0_i32_0, %c0_i32_1 : i32, i32, i32
  }
  func.func @transform_5(%arg0: i32) -> (i32, i32, i32) {
    %c0_i32 = arith.constant 0 : i32
    %c0_i32_0 = arith.constant 0 : i32
    %c0_i32_1 = arith.constant 0 : i32
    %c0_i32_2 = arith.constant 0 : i32
    return %c0_i32, %c0_i32_0, %c0_i32_1 : i32, i32, i32
  }
  func.func @transform_6(%arg0: i32) -> (i32, i32, i32) {
    %c0_i32 = arith.constant 0 : i32
    %c0_i32_0 = arith.constant 0 : i32
    %c0_i32_1 = arith.constant 0 : i32
    %c0_i32_2 = arith.constant 0 : i32
    return %c0_i32, %c0_i32_0, %c0_i32_1 : i32, i32, i32
  }
  func.func @transform_7(%arg0: i32) -> (i32, i32, i32) {
    %c0_i32 = arith.constant 0 : i32
    %c0_i32_0 = arith.constant 0 : i32
    %c0_i32_1 = arith.constant 0 : i32
    %c0_i32_2 = arith.constant 0 : i32
    return %c0_i32, %c0_i32_0, %c0_i32_1 : i32, i32, i32
  }
  func.func @transform_8(%arg0: i32) -> (i32, i32, i32) {
    %c0_i32 = arith.constant 0 : i32
    %c0_i32_0 = arith.constant 0 : i32
    %c0_i32_1 = arith.constant 0 : i32
    %c0_i32_2 = arith.constant 0 : i32
    return %c0_i32, %c0_i32_0, %c0_i32_1 : i32, i32, i32
  }
  func.func @transform_9(%arg0: i32) -> (i32, i32, i32) {
    %c0_i32 = arith.constant 0 : i32
    %c0_i32_0 = arith.constant 0 : i32
    %c0_i32_1 = arith.constant 0 : i32
    %c0_i32_2 = arith.constant 0 : i32
    return %c0_i32, %c0_i32_0, %c0_i32_1 : i32, i32, i32
  }
  func.func @transform_10(%arg0: i32) -> (i32, i32, i32) {
    %c0_i32 = arith.constant 0 : i32
    %c0_i32_0 = arith.constant 0 : i32
    %c0_i32_1 = arith.constant 0 : i32
    %c0_i32_2 = arith.constant 0 : i32
    return %c0_i32, %c0_i32_0, %c0_i32_1 : i32, i32, i32
  }
  func.func @transform_11(%arg0: i32) -> (i32, i32, i32) {
    %c0_i32 = arith.constant 0 : i32
    %c0_i32_0 = arith.constant 0 : i32
    %c0_i32_1 = arith.constant 0 : i32
    %c0_i32_2 = arith.constant 0 : i32
    return %c0_i32, %c0_i32_0, %c0_i32_1 : i32, i32, i32
  }
  func.func @transform_12(%arg0: i32) -> (i32, i32, i32) {
    %c0_i32 = arith.constant 0 : i32
    %c0_i32_0 = arith.constant 0 : i32
    %c0_i32_1 = arith.constant 0 : i32
    %c0_i32_2 = arith.constant 0 : i32
    return %c0_i32, %c0_i32_0, %c0_i32_1 : i32, i32, i32
  }
  func.func @transform_13(%arg0: i32) -> (i32, i32, i32) {
    %c0_i32 = arith.constant 0 : i32
    %c0_i32_0 = arith.constant 0 : i32
    %c0_i32_1 = arith.constant 0 : i32
    %c0_i32_2 = arith.constant 0 : i32
    return %c0_i32, %c0_i32_0, %c0_i32_1 : i32, i32, i32
  }
  func.func @transform_14(%arg0: i32) -> (i32, i32, i32) {
    %c0_i32 = arith.constant 0 : i32
    %c0_i32_0 = arith.constant 0 : i32
    %c0_i32_1 = arith.constant 0 : i32
    %c0_i32_2 = arith.constant 0 : i32
    return %c0_i32, %c0_i32_0, %c0_i32_1 : i32, i32, i32
  }
  func.func @transform_15(%arg0: i32) -> (i32, i32, i32) {
    %c0_i32 = arith.constant 0 : i32
    %c0_i32_0 = arith.constant 0 : i32
    %c0_i32_1 = arith.constant 0 : i32
    %c0_i32_2 = arith.constant 0 : i32
    return %c0_i32, %c0_i32_0, %c0_i32_1 : i32, i32, i32
  }
  func.func @transform_16(%arg0: i32) -> (i32, i32) {
    %c0_i32 = arith.constant 0 : i32
    %c0_i32_0 = arith.constant 0 : i32
    %c0_i32_1 = arith.constant 0 : i32
    return %c0_i32, %c0_i32_0 : i32, i32
  }
  func.func @transform_17(%arg0: i32) -> (i32, i32) {
    %c0_i32 = arith.constant 0 : i32
    %c0_i32_0 = arith.constant 0 : i32
    %c0_i32_1 = arith.constant 0 : i32
    return %c0_i32, %c0_i32_0 : i32, i32
  }
  func.func @transform_18(%arg0: i32) -> (i32, i32) {
    %c0_i32 = arith.constant 0 : i32
    %c0_i32_0 = arith.constant 0 : i32
    %c0_i32_1 = arith.constant 0 : i32
    return %c0_i32, %c0_i32_0 : i32, i32
  }
  func.func @transform_19(%arg0: i32) -> (i32, i32) {
    %c0_i32 = arith.constant 0 : i32
    %c0_i32_0 = arith.constant 0 : i32
    %c0_i32_1 = arith.constant 0 : i32
    return %c0_i32, %c0_i32_0 : i32, i32
  }
  func.func @transform_20(%arg0: i32) -> (i32, i32) {
    %c0_i32 = arith.constant 0 : i32
    %c0_i32_0 = arith.constant 0 : i32
    %c0_i32_1 = arith.constant 0 : i32
    return %c0_i32, %c0_i32_0 : i32, i32
  }
  func.func @transform_21(%arg0: i32) -> (i32, i32, i32) {
    %c0_i32 = arith.constant 0 : i32
    %c0_i32_0 = arith.constant 0 : i32
    %c0_i32_1 = arith.constant 0 : i32
    return %arg0, %c0_i32, %c0_i32_0 : i32, i32, i32
  }
}

</mosaic_0001>

<bundles_post_ra>
// kernel: simple_sdf_forward.2
= control target key start
LH: loop header
LB: loop body
LE: loop exit
PB: predicated region body
PF: predicated region fallthrough
CT: control target
= control target key end

     0   :  { %s779_s12 = smov 0   ;;  %s972_s0 = inlined_call_operand.vmem [shape: f32[2,128,3], index: 0, kind: input, shape index: {}]   ;;  %s973_s1 = inlined_call_operand.vmem [shape: f32[3,256], index: 1, kind: input, shape index: {}]   ;;  %s974_s2 = inlined_call_operand.vmem [shape: f32[1,256], index: 2, kind: input, shape index: {}]   ;;  %s975_s3 = inlined_call_operand.vmem [shape: f32[8,128], index: 3, kind: output, shape index: {}]  }
   0x1 LB: > { %s706_s13 = sadd.s32 4294967295, %s755_s12   ;;  %p709_p0 = scmp.ge.s32.totalorder %s755_s12, 1  ;;  %s755_s12 = sphi %s779_s12, %s13_s12  }
   0x2   : > { %p132_p1 = scmp.lt.s32.totalorder %s755_s12, 3 }
   0x4   : > { %p133_p2 = pnand %p709_p0, %p132_p1 }
   0x5   : > { %p151_p3 = scmp.lt.s32.totalorder (!%p133_p2), %s706_s13, 1  ;;  %p712_p4 = scmp.ne.s32.totalorder (!%p133_p2), %s706_s13, 0 }
   0x6   : > { %136 = sbr.rel (%p133_p2) target bundleno = 480 (0x1e0), region = 32 }
   0xd   : > { %s152_s14 = scalar_select %p151_p3, %s706_s13, 1 }
   0xe   : > { %159 = sbr.rel (%p712_p4) target bundleno = 21 (0x15), region = 36  ;;  %v757_v0 = vmov (!%p712_p4), 0.0  }
   0xf   : > { %s733_s15 = sshll.u32 %s152_s14, 7  ;;  %160 = vst [vmem:[%s975_s3] sm:$0xff] (!%p712_p4), %v757_v0 }
  0x10   : > { %s790_s18 = scalar_lea.vmem %s972_s0, %s733_s15 }
  0x15 PF: > { %v177_v1 = vld [vmem:[%s973_s1] sm:$0x77]  ;;  %vm230_vm0 = vcmask 1042432   ;;  %v758_v3 = vmov 0.0   ;;  %vm181_vm1 = vcmask 23552   ;;  %v162_v6 = vld [vmem:[%s790_s18 + $0x8] sm:$0xff]  ;;  %v397_v20 = vlaneseq }
  0x16   : > { %v180_v2 = vcombine.high %v177_v1, %v177_v1  ;;  %299 = vmatprep.mubr.f32.mxu0 %v758_v3  ;;  %347 = vmatprep.mubr.f32.mxu1 %v758_v3  ;;  %v161_v4 = vld [vmem:[%s790_s18] sm:$0xff]  ;;  %v170_v7 = vld [vmem:[%s790_s18 + $0x48] sm:$0xff]  ;;  %v163_v8 = vld [vmem:[%s790_s18 + $0x10] sm:$0xff] }
  0x17   : > { %v169_v5 = vld [vmem:[%s790_s18 + $0x40] sm:$0xff]  ;;  %v171_v9 = vld [vmem:[%s790_s18 + $0x50] sm:$0xff]  ;;  %v164_v10 = vld [vmem:[%s790_s18 + $0x18] sm:$0xff]  ;;  %v398_v21 = vshrl.u32 %v397_v20, 7 }
  0x18   : > { %713 = vmatprep.subr.msk.mxu0 %vm230_vm0, %v180_v2  ;;  %734 = vmatprep.subr.msk.mxu1 %vm230_vm0, %v180_v2  ;;  %v172_v11 = vld [vmem:[%s790_s18 + $0x58] sm:$0xff]  ;;  %v165_v12 = vld [vmem:[%s790_s18 + $0x20] sm:$0xff]  ;;  %v166_v14 = vld [vmem:[%s790_s18 + $0x28] sm:$0xff] }
  0x19   : > { %714 = vmatpush1.msk.msra.mxu0 %vm230_vm0, %v177_v1  ;;  %735 = vmatpush1.msk.msra.mxu1 %vm230_vm0, %v177_v1  ;;  %v173_v13 = vld [vmem:[%s790_s18 + $0x60] sm:$0xff]  ;;  %v174_v15 = vld [vmem:[%s790_s18 + $0x68] sm:$0xff]  ;;  %v167_v16 = vld [vmem:[%s790_s18 + $0x30] sm:$0xff]  ;;  %v399_v22 = vsub.s32 0, %v398_v21  ;;  %v403_v24 = vsub.s32 1, %v398_v21 }
  0x1a   : > { %715 = vmatmul.mubr.msk.f32.vlgmr.msra.gmra.mrb[0].mxu0 %vm181_vm1, %v161_v4  ;;  %723 = vmatmul.mubr.msk.f32.vlgmr.msra.gmra.mrb[0].mxu1 %vm181_vm1, %v169_v5  ;;  %v175_v17 = vld [vmem:[%s790_s18 + $0x70] sm:$0xff]  ;;  %v168_v18 = vld [vmem:[%s790_s18 + $0x38] sm:$0xff]  ;;  %v178_v23 = vld [vmem:[%s974_s2] sm:$0x3] }
  0x1b   : > { %305 = vmatprep.mubr.f32.mxu0 %v758_v3  ;;  %353 = vmatprep.mubr.f32.mxu1 %v758_v3  ;;  %v176_v19 = vld [vmem:[%s790_s18 + $0x78] sm:$0xff]  ;;  %v833_v25 = vrot.slane %v178_v23, %v399_v22  ;;  %v835_v26 = vrot.slane %v178_v23, %v403_v24 }
  0x1e   : > { %716 = vmatmul.mubr.msk.f32.gmra.mrb[2].mxu0 %vm181_vm1, %v162_v6  ;;  %724 = vmatmul.mubr.msk.f32.gmra.mrb[2].mxu1 %vm181_vm1, %v170_v7 }
  0x1f   : > { %311 = vmatprep.mubr.f32.mxu0 %v758_v3  ;;  %359 = vmatprep.mubr.f32.mxu1 %v758_v3 }
  0x22   : > { %717 = vmatmul.mubr.msk.f32.gmra.mrb[4].mxu0 %vm181_vm1, %v163_v8  ;;  %725 = vmatmul.mubr.msk.f32.gmra.mrb[4].mxu1 %vm181_vm1, %v171_v9 }
  0x23   : > { %317 = vmatprep.mubr.f32.mxu0 %v758_v3  ;;  %365 = vmatprep.mubr.f32.mxu1 %v758_v3 }
  0x26   : > { %718 = vmatmul.mubr.msk.f32.gmra.mrb[6].mxu0 %vm181_vm1, %v164_v10  ;;  %726 = vmatmul.mubr.msk.f32.gmra.mrb[6].mxu1 %vm181_vm1, %v172_v11 }
  0x27   : > { %323 = vmatprep.mubr.f32.mxu0 %v758_v3  ;;  %371 = vmatprep.mubr.f32.mxu1 %v758_v3 }
  0x2a   : > { %719 = vmatmul.mubr.msk.f32.gmra.mrb[8].mxu0 %vm181_vm1, %v165_v12  ;;  %727 = vmatmul.mubr.msk.f32.gmra.mrb[8].mxu1 %vm181_vm1, %v173_v13 }
  0x2b   : > { %329 = vmatprep.mubr.f32.mxu0 %v758_v3  ;;  %377 = vmatprep.mubr.f32.mxu1 %v758_v3 }
  0x2e   : > { %720 = vmatmul.mubr.msk.f32.gmra.mrb[10].mxu0 %vm181_vm1, %v166_v14  ;;  %728 = vmatmul.mubr.msk.f32.gmra.mrb[10].mxu1 %vm181_vm1, %v174_v15 }
  0x2f   : > { %335 = vmatprep.mubr.f32.mxu0 %v758_v3  ;;  %383 = vmatprep.mubr.f32.mxu1 %v758_v3 }
  0x32   : > { %721 = vmatmul.mubr.msk.f32.gmra.mrb[12].mxu0 %vm181_vm1, %v167_v16  ;;  %729 = vmatmul.mubr.msk.f32.gmra.mrb[12].mxu1 %vm181_vm1, %v175_v17 }
  0x33   : > { %341 = vmatprep.mubr.f32.mxu0 %v758_v3  ;;  %389 = vmatprep.mubr.f32.mxu1 %v758_v3 }
  0x36   : > { %722 = vmatmul.mubr.msk.f32.gmra.mrb[14].mxu0 %vm181_vm1, %v168_v18  ;;  %730 = vmatmul.mubr.msk.f32.gmra.mrb[14].mxu1 %vm181_vm1, %v176_v19 }
  0xed   : > { %v301_v27 = vpop.f32.mrb[0].mxu0  ;;  %v349_v28 = vpop.f32.mrb[0].mxu1 }
  0xee   : > { %v407_v29 = vsub.f32 %v301_v27, %v833_v25  ;;  %v423_v30 = vsub.f32 %v349_v28, %v833_v25  ;;  %v303_v31 = vpop.f32.mrb[1].mxu0  ;;  %v351_v32 = vpop.f32.mrb[1].mxu1 }
  0xef   : > { %v408_v33 = vsub.f32 %v303_v31, %v835_v26  ;;  %v424_v34 = vsub.f32 %v351_v32, %v835_v26 }
  0xf0   : > { %v439_v35 = vand.u32 2147483647, %v407_v29  ;;  %v455_v36 = vand.u32 2147483647, %v423_v30 }
  0xf1   : > { %v440_v37 = vand.u32 2147483647, %v408_v33  ;;  %v456_v38 = vand.u32 2147483647, %v424_v34  ;;  %v307_v39 = vpop.f32.mrb[2].mxu0  ;;  %v355_v40 = vpop.f32.mrb[2].mxu1 }
  0xf2   : > { %v471_v41 = vmul.f32 128.0, %v439_v35  ;;  %v487_v42 = vmul.f32 128.0, %v455_v36  ;;  %v409_v43 = vsub.f32 %v307_v39, %v833_v25  ;;  %v425_v44 = vsub.f32 %v355_v40, %v833_v25  ;;  %v309_v45 = vpop.f32.mrb[3].mxu0  ;;  %v357_v46 = vpop.f32.mrb[3].mxu1 }
  0xf3   : > { %v843_v47 = vmul.f32 128.0, %v440_v37  ;;  %v488_v48 = vmul.f32 128.0, %v456_v38  ;;  %v410_v49 = vsub.f32 %v309_v45, %v835_v26  ;;  %v426_v50 = vsub.f32 %v357_v46, %v835_v26 }
  0xf4   : > { %v503_v51 = vsub.f32 1.0, %v471_v41  ;;  %v519_v52 = vsub.f32 1.0, %v487_v42  ;;  %v441_v53 = vand.u32 2147483647, %v409_v43  ;;  %v457_v54 = vand.u32 2147483647, %v425_v44 }
  0xf5   : > { %v504_v55 = vsub.f32 1.0, %v843_v47  ;;  %v520_v56 = vsub.f32 1.0, %v488_v48  ;;  %v442_v57 = vand.u32 2147483647, %v410_v49  ;;  %v458_v58 = vand.u32 2147483647, %v426_v50 }
  0xf6   : > { %v551_v59 = vmax.f32 %v519_v52, 0.0  ;;  %v473_v60 = vmul.f32 128.0, %v441_v53  ;;  %v848_v61 = vmul.f32 128.0, %v457_v54  ;;  %v313_v62 = vpop.f32.mrb[4].mxu0  ;;  %v361_v63 = vpop.f32.mrb[4].mxu1  ;;  %v850_v0 = vmax.f32 %v503_v51, 0.0 }
  0xf7   : > { %v552_v1 = vmax.f32 %v520_v56, 0.0  ;;  %v474_v2 = vmul.f32 128.0, %v442_v57  ;;  %v852_v3 = vmul.f32 128.0, %v458_v58  ;;  %v411_v4 = vsub.f32 %v313_v62, %v833_v25  ;;  %v315_v5 = vpop.f32.mrb[5].mxu0  ;;  %v363_v6 = vpop.f32.mrb[5].mxu1 }
  0xf8   : > { %v855_v7 = vmul.f32 %v551_v59, %v551_v59  ;;  %v505_v8 = vsub.f32 1.0, %v473_v60  ;;  %v521_v9 = vsub.f32 1.0, %v848_v61  ;;  %v412_v10 = vsub.f32 %v315_v5, %v835_v26 }
  0xf9   : > { %v859_v11 = vmul.f32 %v552_v1, %v552_v1  ;;  %v506_v12 = vsub.f32 1.0, %v474_v2  ;;  %v522_v13 = vsub.f32 1.0, %v852_v3  ;;  %v443_v14 = vand.u32 2147483647, %v411_v4  ;;  %v319_v15 = vpop.f32.mrb[6].mxu0  ;;  %v367_v16 = vpop.f32.mrb[6].mxu1 }
  0xfa   : > { %v537_v17 = vmax.f32 %v505_v8, 0.0  ;;  %v444_v18 = vand.u32 2147483647, %v412_v10  ;;  %v427_v19 = vsub.f32 %v361_v63, %v833_v25  ;;  %v413_v20 = vsub.f32 %v319_v15, %v833_v25  ;;  %v321_v21 = vpop.f32.mrb[7].mxu0  ;;  %v369_v22 = vpop.f32.mrb[7].mxu1 }
  0xfb   : > { %v538_v23 = vmax.f32 %v506_v12, 0.0  ;;  %v475_v24 = vmul.f32 128.0, %v443_v14  ;;  %v428_v27 = vsub.f32 %v363_v6, %v835_v26  ;;  %v414_v28 = vsub.f32 %v321_v21, %v835_v26 }
  0xfc   : > { %v866_v29 = vmul.f32 %v537_v17, %v537_v17  ;;  %v476_v30 = vmul.f32 128.0, %v444_v18  ;;  %v459_v31 = vand.u32 2147483647, %v427_v19  ;;  %v445_v32 = vand.u32 2147483647, %v413_v20 }
  0xfd   : > { %v868_v33 = vmul.f32 %v538_v23, %v538_v23  ;;  %v507_v34 = vsub.f32 1.0, %v475_v24  ;;  %v460_v35 = vand.u32 2147483647, %v428_v27  ;;  %v446_v36 = vand.u32 2147483647, %v414_v28  ;;  %v325_v37 = vpop.f32.mrb[8].mxu0 }
  0xfe   : > { %v508_v38 = vsub.f32 1.0, %v476_v30  ;;  %v491_v39 = vmul.f32 128.0, %v459_v31  ;;  %v477_v40 = vmul.f32 128.0, %v445_v32  ;;  %v429_v41 = vsub.f32 %v367_v16, %v833_v25  ;;  %v327_v42 = vpop.f32.mrb[9].mxu0  ;;  %v373_v43 = vpop.f32.mrb[8].mxu1 }
  0xff   : > { %v539_v44 = vmax.f32 %v507_v34, 0.0  ;;  %v492_v45 = vmul.f32 128.0, %v460_v35  ;;  %v478_v46 = vmul.f32 128.0, %v446_v36  ;;  %v430_v48 = vsub.f32 %v369_v22, %v835_v26  ;;  %v375_v49 = vpop.f32.mrb[9].mxu1 }
 0x100   : > { %v540_v50 = vmax.f32 %v508_v38, 0.0  ;;  %v523_v51 = vsub.f32 1.0, %v491_v39  ;;  %v509_v52 = vsub.f32 1.0, %v477_v40  ;;  %v461_v53 = vand.u32 2147483647, %v429_v41 }
 0x101   : > { %v872_v54 = vmul.f32 %v539_v44, %v539_v44  ;;  %v524_v56 = vsub.f32 1.0, %v492_v45  ;;  %v510_v57 = vsub.f32 1.0, %v478_v46  ;;  %v462_v58 = vand.u32 2147483647, %v430_v48  ;;  %v331_v59 = vpop.f32.mrb[10].mxu0  ;;  %v874_v60 = vpop.f32.mrb[10].mxu1 }
 0x102   : > { %v876_v62 = vmul.f32 %v540_v50, %v540_v50  ;;  %v555_v63 = vmax.f32 %v523_v51, 0.0  ;;  %v541_v1 = vmax.f32 %v509_v52, 0.0  ;;  %v493_v2 = vmul.f32 128.0, %v461_v53  ;;  %v333_v4 = vpop.f32.mrb[11].mxu0  ;;  %v878_v5 = vpop.f32.mrb[11].mxu1 }
 0x103   : > { %v556_v6 = vmax.f32 %v524_v56, 0.0  ;;  %v542_v8 = vmax.f32 %v510_v57, 0.0  ;;  %v494_v10 = vmul.f32 128.0, %v462_v58  ;;  %v536_v12 = vmax.f32 %v504_v55, 0.0 }
 0x104   : > { %v882_v14 = vmul.f32 %v555_v63, %v555_v63  ;;  %v884_v15 = vmul.f32 %v541_v1, %v541_v1  ;;  %v525_v16 = vsub.f32 1.0, %v493_v2  ;;  %v567_v17 = vmul.f32 %v850_v0, %v850_v0 }
 0x105   : > { %v888_v18 = vmul.f32 %v556_v6, %v556_v6  ;;  %v890_v19 = vmul.f32 %v542_v8, %v542_v8  ;;  %v526_v20 = vsub.f32 1.0, %v494_v10  ;;  %v568_v21 = vmul.f32 %v536_v12, %v536_v12  ;;  %v892_v22 = vpop.f32.mrb[12].mxu0  ;;  %v894_v23 = vpop.f32.mrb[12].mxu1 }
 0x106   : > { %v557_v47 = vmax.f32 %v525_v16, 0.0  ;;  %v415_v55 = vsub.f32 %v325_v37, %v833_v25  ;;  %v416_v24 = vsub.f32 %v327_v42, %v835_v26  ;;  %v431_v27 = vsub.f32 %v373_v43, %v833_v25  ;;  %v899_v28 = vpop.f32.mrb[13].mxu0  ;;  %v901_v0 = vpop.f32.mrb[13].mxu1 }
 0x107   : > { %v558_v30 = vmax.f32 %v526_v20, 0.0  ;;  %v599_v31 = vadd.f32 %v568_v21, %v567_v17  ;;  %v553_v32 = vmax.f32 %v521_v9, 0.0  ;;  %v554_v34 = vmax.f32 %v522_v13, 0.0 }
 0x108   : > { %v907_v35 = vmul.f32 %v557_v47, %v557_v47  ;;  %v447_v36 = vand.u32 2147483647, %v415_v55  ;;  %v448_v37 = vand.u32 2147483647, %v416_v24  ;;  %v463_v38 = vand.u32 2147483647, %v431_v27 }
 0x109   : > { %v909_v39 = vmul.f32 %v558_v30, %v558_v30  ;;  %600 = vadd.xlane.f32.xlu0 %v599_v31  ;;  %v585_v40 = vmul.f32 %v553_v32, %v553_v32  ;;  %v586_v41 = vmul.f32 %v554_v34, %v554_v34  ;;  %v432_v42 = vsub.f32 %v375_v49, %v835_v26  ;;  %v912_v43 = vpop.f32.mrb[14].mxu0  ;;  %v914_v44 = vpop.f32.mrb[14].mxu1 }
 0x10a   : > { %v479_v61 = vmul.f32 128.0, %v447_v36  ;;  %v480_v9 = vmul.f32 128.0, %v448_v37  ;;  %v495_v3 = vmul.f32 128.0, %v463_v38  ;;  %v623_v13 = vadd.f32 %v859_v11, %v855_v7  ;;  %v918_v45 = vpop.f32.mrb[15].mxu0  ;;  %v920_v46 = vpop.f32.mrb[15].mxu1 }
 0x10b   : > { %v626_v48 = vadd.f32 %v586_v41, %v585_v40  ;;  %v464_v50 = vand.u32 2147483647, %v432_v42  ;;  %v417_v51 = vsub.f32 %v331_v59, %v833_v25  ;;  %v418_v49 = vsub.f32 %v333_v4, %v835_v26 }
 0x10c   : > { %v511_v52 = vsub.f32 1.0, %v479_v61  ;;  %v512_v53 = vsub.f32 1.0, %v480_v9  ;;  %v527_v56 = vsub.f32 1.0, %v495_v3  ;;  %v433_v57 = vsub.f32 %v874_v60, %v833_v25 }
 0x10d   : > { %627 = vadd.xlane.f32.xlu1 %v626_v48  ;;  %v496_v58 = vmul.f32 128.0, %v464_v50  ;;  %624 = vadd.xlane.f32.xlu0 %v623_v13  ;;  %v449_v7 = vand.u32 2147483647, %v417_v51  ;;  %v450_v11 = vand.u32 2147483647, %v418_v49  ;;  %v434_v63 = vsub.f32 %v878_v5, %v835_v26 }
 0x10e   : > { %v543_v1 = vmax.f32 %v511_v52, 0.0  ;;  %v544_v2 = vmax.f32 %v512_v53, 0.0  ;;  %v559_v6 = vmax.f32 %v527_v56, 0.0  ;;  %v465_v59 = vand.u32 2147483647, %v433_v57 }
 0x10f   : > { %v528_v8 = vsub.f32 1.0, %v496_v58  ;;  %v481_v4 = vmul.f32 128.0, %v449_v7  ;;  %v482_v10 = vmul.f32 128.0, %v450_v11  ;;  %v466_v12 = vand.u32 2147483647, %v434_v63 }
 0x110   : > { %v928_v16 = vmul.f32 %v543_v1, %v543_v1  ;;  %v930_v17 = vmul.f32 %v544_v2, %v544_v2  ;;  %v932_v60 = vmul.f32 %v559_v6, %v559_v6  ;;  %v497_v20 = vmul.f32 128.0, %v465_v59 }
 0x111   : > { %v560_v21 = vmax.f32 %v528_v8, 0.0  ;;  %v513_v47 = vsub.f32 1.0, %v481_v4  ;;  %v514_v55 = vsub.f32 1.0, %v482_v10  ;;  %v498_v24 = vmul.f32 128.0, %v466_v12 }
 0x112   : > { %v529_v5 = vsub.f32 1.0, %v497_v20  ;;  %v602_v27 = vadd.f32 %v868_v33, %v866_v29  ;;  %v605_v30 = vadd.f32 %v876_v62, %v872_v54  ;;  %v419_v31 = vsub.f32 %v892_v22, %v833_v25 }
 0x113   : > { %v592_v32 = vmul.f32 %v560_v21, %v560_v21  ;;  %v545_v34 = vmax.f32 %v513_v47, 0.0  ;;  %v546_v36 = vmax.f32 %v514_v55, 0.0  ;;  %v530_v37 = vsub.f32 1.0, %v498_v24 }
 0x114   : > { %v561_v38 = vmax.f32 %v529_v5, 0.0  ;;  %603 = vadd.xlane.f32.xlu0 %v602_v27  ;;  %606 = vadd.xlane.f32.xlu1 %v605_v30  ;;  %v451_v40 = vand.u32 2147483647, %v419_v31  ;;  %v420_v41 = vsub.f32 %v899_v28, %v835_v26  ;;  %v435_v29 = vsub.f32 %v894_v23, %v833_v25 }
 0x115   : > { %v577_v33 = vmul.f32 %v545_v34, %v545_v34  ;;  %v578_v42 = vmul.f32 %v546_v36, %v546_v36  ;;  %v562_v54 = vmax.f32 %v530_v37, 0.0  ;;  %v436_v62 = vsub.f32 %v901_v0, %v835_v26 }
 0x116   : > { %v593_v22 = vmul.f32 %v561_v38, %v561_v38  ;;  %v483_v61 = vmul.f32 128.0, %v451_v40  ;;  %v452_v9 = vand.u32 2147483647, %v420_v41  ;;  %v467_v3 = vand.u32 2147483647, %v435_v29 }
 0x117   : > { %v594_v13 = vmul.f32 %v562_v54, %v562_v54  ;;  %v468_v48 = vand.u32 2147483647, %v436_v62  ;;  %v629_v50 = vadd.f32 %v888_v18, %v882_v14  ;;  %v608_v28 = vadd.f32 %v890_v19, %v884_v15 }
 0x118   : > { %v515_v51 = vsub.f32 1.0, %v483_v61  ;;  %v484_v23 = vmul.f32 128.0, %v452_v9  ;;  %v499_v49 = vmul.f32 128.0, %v467_v3  ;;  %v421_v52 = vsub.f32 %v912_v43, %v833_v25 }
 0x119   : > { %v500_v53 = vmul.f32 128.0, %v468_v48  ;;  %630 = vadd.xlane.f32.xlu0 %v629_v50  ;;  %609 = vadd.xlane.f32.xlu1 %v608_v28  ;;  %v422_v0 = vsub.f32 %v918_v45, %v835_v26  ;;  %v437_v56 = vsub.f32 %v914_v44, %v833_v25  ;;  %v438_v14 = vsub.f32 %v920_v46, %v835_v26 }
 0x11a   : > { %v547_v18 = vmax.f32 %v515_v51, 0.0  ;;  %v516_v15 = vsub.f32 1.0, %v484_v23  ;;  %v531_v19 = vsub.f32 1.0, %v499_v49  ;;  %v453_v57 = vand.u32 2147483647, %v421_v52 }
 0x11b   : > { %v532_v58 = vsub.f32 1.0, %v500_v53  ;;  %v454_v7 = vand.u32 2147483647, %v422_v0  ;;  %v469_v11 = vand.u32 2147483647, %v437_v56  ;;  %v632_v43 = vadd.f32 %v909_v39, %v907_v35 }
 0x11c   : > { %v579_v63 = vmul.f32 %v547_v18, %v547_v18  ;;  %v548_v1 = vmax.f32 %v516_v15, 0.0  ;;  %v563_v2 = vmax.f32 %v531_v19, 0.0  ;;  %v485_v45 = vmul.f32 128.0, %v453_v57 }
 0x11d   : > { %v564_v6 = vmax.f32 %v532_v58, 0.0  ;;  %v486_v59 = vmul.f32 128.0, %v454_v7  ;;  %v501_v25 = vmul.f32 128.0, %v469_v11  ;;  %v470_v44 = vand.u32 2147483647, %v438_v14  ;;  %633 = vadd.xlane.f32.xlu1 %v632_v43 }
 0x11e   : > { %v580_v26 = vmul.f32 %v548_v1, %v548_v1  ;;  %v595_v46 = vmul.f32 %v563_v2, %v563_v2  ;;  %v517_v8 = vsub.f32 1.0, %v485_v45  ;;  %v611_v4 = vadd.f32 %v930_v17, %v928_v16 }
 0x11f   : > { %v596_v10 = vmul.f32 %v564_v6, %v564_v6  ;;  %v518_v12 = vsub.f32 1.0, %v486_v59  ;;  %v533_v20 = vsub.f32 1.0, %v501_v25  ;;  %v502_v21 = vmul.f32 128.0, %v470_v44  ;;  %v675_v44 = vld [vmem:[%s975_s3] sm:$0xff] }
 0x120   : > { %v549_v35 = vmax.f32 %v517_v8, 0.0  ;;  %612 = vadd.xlane.f32.xlu0 %v611_v4  ;;  %v635_v39 = vadd.f32 %v592_v32, %v932_v60  ;;  %v614_v47 = vadd.f32 %v578_v42, %v577_v33  ;;  %v638_v55 = vadd.f32 %v594_v13, %v593_v22 }
 0x121   : > { %v550_v24 = vmax.f32 %v518_v12, 0.0  ;;  %v565_v5 = vmax.f32 %v533_v20, 0.0  ;;  %v534_v27 = vsub.f32 1.0, %v502_v21  ;;  %v617_v30 = vadd.f32 %v580_v26, %v579_v63 }
 0x122   : > { %v581_v31 = vmul.f32 %v549_v35, %v549_v35  ;;  %615 = vadd.xlane.f32.xlu1 %v614_v47  ;;  %v641_v34 = vadd.f32 %v596_v10, %v595_v46 }
 0x123   : > { %v582_v36 = vmul.f32 %v550_v24, %v550_v24  ;;  %v597_v37 = vmul.f32 %v565_v5, %v565_v5  ;;  %v566_v16 = vmax.f32 %v534_v27, 0.0 }
 0x124   : > { %636 = vadd.xlane.f32.xlu0 %v635_v39 }
 0x125   : > { %v598_v17 = vmul.f32 %v566_v16, %v566_v16  ;;  %v620_v38 = vadd.f32 %v582_v36, %v581_v31 }
 0x126   : > { %639 = vadd.xlane.f32.xlu1 %v638_v55 }
 0x127   : > { %v644_v40 = vadd.f32 %v598_v17, %v597_v37 }
 0x128   : > { %618 = vadd.xlane.f32.xlu0 %v617_v30 }
 0x12a   : > { %621 = vadd.xlane.f32.xlu1 %v620_v38 }
 0x12c   : > { %642 = vadd.xlane.f32.xlu0 %v641_v34 }
 0x12e   : > { %645 = vadd.xlane.f32.xlu1 %v644_v40 }
 0x196   : > { %v601_v60 = vpop.xlane.xlu0 %600 }
 0x19a   : > { %v628_v32 = vpop.xlane.xlu1 %627  ;;  %v625_v41 = vpop.xlane.xlu0 %624 }
 0x1a1   : > { %v604_v29 = vpop.xlane.xlu0 %603  ;;  %v607_v33 = vpop.xlane.xlu1 %606 }
 0x1a6   : > { %v610_v42 = vpop.xlane.xlu1 %609  ;;  %v631_v54 = vpop.xlane.xlu0 %630 }
 0x1aa   : > { %v634_v62 = vpop.xlane.xlu1 %633 }
 0x1ad   : > { %v613_v22 = vpop.xlane.xlu0 %612 }
 0x1ae   : > { %v647_v48 = vmax.f32 %v601_v60, %v613_v22 }
 0x1af   : > { %v616_v61 = vpop.xlane.xlu1 %615 }
 0x1b0   : > { %v648_v3 = vmax.f32 %v604_v29, %v616_v61  ;;  %v651_v49 = vmax.f32 %v647_v48, %v625_v41 }
 0x1b1   : > { %v637_v9 = vpop.xlane.xlu0 %636 }
 0x1b2   : > { %v652_v28 = vmax.f32 %v648_v3, %v628_v32  ;;  %v655_v15 = vmax.f32 %v651_v49, %v637_v9 }
 0x1b3   : > { %v640_v13 = vpop.xlane.xlu1 %639 }
 0x1b4   : > { %v656_v56 = vmax.f32 %v652_v28, %v640_v13 }
 0x1b5   : > { %v619_v50 = vpop.xlane.xlu0 %618 }
 0x1b6   : > { %v649_v51 = vmax.f32 %v607_v33, %v619_v50  ;;  %v659_v58 = vmax.f32 %v655_v15, %v656_v56 }
 0x1b7   : > { %v622_v23 = vpop.xlane.xlu1 %621 }
 0x1b8   : > { %v653_v52 = vmax.f32 %v649_v51, %v631_v54  ;;  %v650_v53 = vmax.f32 %v610_v42, %v622_v23 }
 0x1b9   : > { %v643_v0 = vpop.xlane.xlu0 %642 }
 0x1ba   : > { %v654_v14 = vmax.f32 %v650_v53, %v634_v62  ;;  %v657_v19 = vmax.f32 %v653_v52, %v643_v0 }
 0x1bb   : > { %v646_v18 = vpop.xlane.xlu1 %645 }
 0x1bc   : > { %v658_v57 = vmax.f32 %v654_v14, %v646_v18 }
 0x1be   : > { %v660_v7 = vmax.f32 %v657_v19, %v658_v57 }
 0x1c0   : > { %v661_v11 = vmax.f32 %v659_v58, %v660_v7 }
 0x1c2   : > { %v662_v43 = vrot.slane %v661_v11, 4 }
 0x1c4   : > { %v663_v63 = vmax.f32 %v661_v11, %v662_v43 }
 0x1c6   : > { %v664_v1 = vrot.slane %v663_v63, 2 }
 0x1c8   : > { %v665_v2 = vmax.f32 %v663_v63, %v664_v1 }
 0x1ca   : > { %v666_v45 = vrot.slane %v665_v2, 1 }
 0x1cc   : > { %v667_v6 = vmax.f32 %v665_v2, %v666_v45 }
 0x1ce   : > { %747 = vrsqrt.f32 %v667_v6  ;;  %vm670_vm2 = vcmp.eq.f32.partialorder %v667_v6, inf  ;;  %v673_v26 = vand.u32 2147483648, %v667_v6  ;;  %vm672_vm3 = vcmp.eq.f32.partialorder %v667_v6, 0.0 }
 0x1d8   : > { %v748_v59 = vpop.eup %747 }
 0x1d9   : > { %v669_v25 = vmul.f32 %v748_v59, %v667_v6 }
 0x1db   : > { %v671_v46 = vsel %vm670_vm2, %v667_v6, %v669_v25 }
 0x1dc   : > { %v674_v8 = vsel %vm672_vm3, %v673_v26, %v671_v46 }
 0x1dd   : > { %v676_v4 = vmax.f32 %v675_v44, %v674_v8 }
 0x1df   : > { %677 = vst [vmem:[%s975_s3] sm:$0xff] %v676_v4 }
 0x1e0 PF: > { %s13_s12 = sadd.s32 1, %s755_s12  }
 0x1e1   : > { %p10_p5 = scmp.ge.s32.totalorder %s13_s12, 4  }
 0x1e3   :  { %12 = sbr.rel (!%p10_p5) target bundleno = 1 (0x1), region = 62 }

// kernel: simple_sdf_forward.3
= control target key start
LH: loop header
LB: loop body
LE: loop exit
PB: predicated region body
PF: predicated region fallthrough
CT: control target
= control target key end

     0   :  { %s18838_s0 = inlined_call_operand.vmem [shape: f32[2,128,3], index: 0, kind: input, shape index: {}]   ;;  %s18839_s1 = inlined_call_operand.vmem [shape: f32[8,128], index: 1, kind: input, shape index: {}]   ;;  %s18840_s2 = inlined_call_operand.vmem [shape: f32[3,256], index: 2, kind: input, shape index: {}]   ;;  %s18841_s3 = inlined_call_operand.vmem [shape: f32[1,256], index: 3, kind: input, shape index: {}]   ;;  %s18842_s4 = inlined_call_operand.hbm [shape: f32[5,128,384], index: 4, kind: input, shape index: {}]   ;;  %s18843_s5 = inlined_call_operand.vmem [shape: f32[5,1,384], index: 5, kind: input, shape index: {}]   ;;  %s18844_s6 = inlined_call_operand.vmem [shape: f32[5,128,128], index: 6, kind: input, shape index: {}]   ;;  %s18845_s7 = inlined_call_operand.vmem [shape: f32[5,1,128], index: 7, kind: input, shape index: {}]   ;;  %s18846_s8 = inlined_call_operand.hbm [shape: f32[5,1,128], index: 8, kind: input, shape index: {}]   ;;  %s18847_s9 = inlined_call_operand.hbm [shape: f32[5,1,128], index: 9, kind: input, shape index: {}]   ;;  %s18848_s10 = inlined_call_operand.hbm [shape: f32[5,1,128], index: 10, kind: input, shape index: {}]   ;;  %s18849_s11 = inlined_call_operand.hbm [shape: f32[5,1,128], index: 11, kind: input, shape index: {}]   ;;  %s18850_s12 = inlined_call_operand.hbm [shape: f32[5,128,128], index: 12, kind: input, shape index: {}]   ;;  %s18851_s13 = inlined_call_operand.hbm [shape: f32[5,1,128], index: 13, kind: input, shape index: {}]   ;;  %s18852_s14 = inlined_call_operand.hbm [shape: f32[5,128,128], index: 14, kind: input, shape index: {}]   ;;  %s18853_s15 = inlined_call_operand.hbm [shape: f32[5,1,128], index: 15, kind: input, shape index: {}]   ;;  %s18854_s16 = inlined_call_operand.hbm [shape: f32[64,128], index: 16, kind: input, shape index: {}]   ;;  %s18855_s17 = inlined_call_operand.vmem [shape: f32[64,1], index: 17, kind: input, shape index: {}]   ;;  %s18856_s18 = inlined_call_operand.vmem [shape: f32[32,64], index: 18, kind: input, shape index: {}]   ;;  %s18857_s19 = inlined_call_operand.vmem [shape: f32[32,1], index: 19, kind: input, shape index: {}]   ;;  %s18858_s20 = inlined_call_operand.hbm [shape: f32[1,32], index: 20, kind: input, shape index: {}]   ;;  %s18859_s21 = inlined_call_operand.hbm [shape: f32[2,1,128], index: 21, kind: output, shape index: {}]  }
   0x1   :  { %19088 = sst [smem:[#allocation215_spill]] %s18838_s0 }
   0x2   :  { %19089 = sst [smem:[#allocation216_spill]] %s18839_s1 }
   0x3   :  { %19090 = sst [smem:[#allocation217_spill]] %s18840_s2 }
   0x4   :  { %19091 = sst [smem:[#allocation218_spill]] %s18841_s3 }
   0x5   :  { %19092 = sst [smem:[#allocation219_spill]] %s18842_s4 }
   0x6   :  { %19093 = sst [smem:[#allocation220_spill]] %s18843_s5 }
   0x7   :  { %19094 = sst [smem:[#allocation221_spill]] %s18846_s8 }
   0x8   :  { %19095 = sst [smem:[#allocation222_spill]] %s18848_s10 }
   0x9   :  { %19096 = sst [smem:[#allocation223_spill]] %s18855_s17 }
   0xa   :  { %19097 = sst [smem:[#allocation224_spill]] %s18856_s18 }
   0xb   :  { %19098 = sst [smem:[#allocation225_spill]] %s18857_s19 }
   0xc   :  { %19099 = sst [smem:[#allocation226_spill]] %s18859_s21 }
   0xd   :  { %26 = vsyncpa [#allocation4], 0 }
   0xe   :  { %27 = vsyncpa [#allocation7], 0 }
   0xf   :  { %28 = vsyncpa [#allocation10], 0 }
  0x10   :  { %29 = vsyncpa [#allocation13], 0 }
  0x11   :  { %30 = vsyncpa [#allocation16], 0 }
  0x12   :  { %31 = vsyncpa [#allocation19], 0 }
  0x13   :  { %32 = vsyncpa [#allocation5], 0 }
  0x14   :  { %34 = vsyncpa [#allocation5 + $0x1], 0  ;;  %s13794_s2 = smov 0   ;;  %s13796_s25 = smov 0  }
  0x15   :  { %s13798_s26 = smov 0   ;;  %s13800_s27 = smov 0  }
  0x16 LB: > { %19100 = sst [smem:[#allocation29_spill]] %s13572_s2  ;;  %s13815_s3 = sadd.s32 4294967295, %s13584_s27   ;;  %s13584_s27 = sphi %s13800_s27, %s19993_s27   ;;  %s13580_s26 = sphi %s13798_s26, %s19995_s26   ;;  %s13576_s25 = sphi %s13796_s25, %s19997_s25   ;;  %s13572_s2 = sphi %s13794_s2, %s19996_s2  }
  0x17   : > { %19101 = sst [smem:[#allocation30_spill]] %s13580_s26  ;;  %s8605_s28 = sadd.s32 4294967294, %s13584_s27  }
  0x18   : > { %19102 = sst [smem:[#allocation31_spill]] %s13584_s27  ;;  %s13819_s29 = sadd.s32 1, %s13584_s27  }
  0x19   : > { %19103 = sst [smem:[#allocation32_spill]] %s13819_s29  ;;  %s493_s0 = sadd.s32 1, %s13580_s26 }
  0x1a   : > { %s490_s4 = ssub.s32 %s13584_s27, %s13819_s29  ;;  %p503_p0 = scmp.ne.s32.totalorder %s13580_s26, %s13576_s25 }
  0x1b   : > { %p491_p1 = scmp.eq.s32.totalorder %s490_s4, 0  ;;  %p504_p2 = scmp.eq.s32.totalorder %s13815_s3, 1 }
  0x1c   : > { %p509_p3 = scmp.ne.s32.totalorder %s13576_s25, %s13572_s2  ;;  %p510_p4 = scmp.eq.s32.totalorder %s8605_s28, 1 }
  0x1d   : > { %s13830_s30 = scalar_select %p491_p1, %s13580_s26, %s493_s0  }
  0x1e   : > { %p13832_p5 = por %p504_p2, %p503_p0  ;;  %p13836_p6 = por %p510_p4, %p509_p3 }
  0x1f   : > { %19104 = sst [smem:[#allocation33_spill]] %s13830_s30  ;;  %p8606_p7 = scmp.ge.s32.totalorder %s13584_s27, 1 }
  0x20   : > { %s19105_s5 = scalar_select %p13832_p5, 1, 0 }
  0x21   : > { %s19107_s22 = scalar_select %p13836_p6, 1, 0 }
  0x22   : > { %19106 = sst [smem:[#allocation34_spill]] %s19105_s5  ;;  %p517_p8 = scmp.lt.s32.totalorder %s13584_s27, 3 }
  0x23   : > { %19108 = sst [smem:[#allocation35_spill]] %s19107_s22  ;;  %p18868_p9 = scmp.eq.s32.totalorder %s13815_s3, 0 }
  0x24   : > { %p13843_p10 = pnand %p8606_p7, %p517_p8  ;;  %s13654_s1 = smov [#allocation6]  }
  0x25   : > { %s560_s24 = sshll.u32 %s13654_s1, 4  ;;  %s13655_s0 = smov [#allocation9]   ;;  %s13849_s24 = int_to_ptr.vmem [resolvable:$true] %s560_s24 }
  0x26   : > { %s19109_s23 = scalar_select %p13843_p10, 1, 0 }
  0x27   : > { %p11722_p11 = pneg %p13843_p10  ;;  %s586_s4 = sshll.u32 %s13655_s0, 4  ;;  %s13857_s4 = int_to_ptr.vmem [resolvable:$true] %s586_s4 }
  0x28   : > { %s13656_s30 = smov [#allocation12]   ;;  %s19111_s8 = sld [smem:[#allocation221_spill]] }
  0x29   : > { %p13853_p12 = pnand %p18868_p9, %p11722_p11  ;;  %s13859_s26 = sshll.u32 %s13656_s30, 4  ;;  %s613_s26 = int_to_ptr.vmem [resolvable:$true] %s13859_s26 }
  0x2b   : > { %p13869_p0 = pneg %p13853_p12 }
  0x2e   : > { %s13122_s1 = scalar_lea.hbm %s19111_s8, 80 }
  0x2f   : > { %p13123_p13 = scmp.ne.s32.totalorder %s19111_s8, %s13122_s1  ;;  %p13129_p3 = scmp.lt.u32.totalorder %s13122_s1, %s19111_s8 }
  0x31   : > { %p13125_p1 = pnand %p13869_p0, %p13123_p13 }
  0x33   : > { %p13126_p2 = pneg %p13125_p1 }
  0x35   : > { %p13131_p4 = pnand %p13129_p3, %p13126_p2 }
  0x37   : > { %13134 = shalt.err (!%p13131_p4)
}
  0x38   : > { %s13135_s2 = scalar_lea.vmem %s13849_s24, 80  ;;  %s13142_s27 = scalar_lea.vmem %s13849_s24, 96 }
  0x39   : > { %p13136_p7 = scmp.ne.s32.totalorder %s13849_s24, %s13135_s2  ;;  %p13143_p13 = scmp.lt.s32.totalorder %s13849_s24, %s13849_s24 }
  0x3a   : > { %p13144_p1 = scmp.lt.s32.totalorder %s13142_s27, %s13135_s2 }
  0x3b   : > { %p13138_p8 = pnand %p13136_p7, %p13869_p0 }
  0x3c   : > { %p13145_p9 = por %p13144_p1, %p13143_p13 }
  0x3d   : > { %p13139_p11 = pneg %p13138_p8 }
  0x3f   : > { %p13146_p6 = pnand %p13145_p9, %p13139_p11 }
  0x41   : > { %13149 = shalt.err (!%p13146_p6)
}
  0x42   : > { %s18876_s29 = smov 16   ;;  %s18878_s22 = smov 1  }
  0x43   : > { %11728 = dma.hbm_to_vmem [thread:$0]  (!%p13853_p12), %s19111_s8, 80, %s13849_s24, [#allocation7], %s18876_s29, %s18876_s29, %s18878_s22  }
  0x44   : > { %s19113_s10 = sld [smem:[#allocation222_spill]] }
  0x4a   : > { %s13150_s2 = scalar_lea.hbm %s19113_s10, 80 }
  0x4b   : > { %p13151_p6 = scmp.ne.s32.totalorder %s19113_s10, %s13150_s2  ;;  %p13157_p3 = scmp.lt.u32.totalorder %s13150_s2, %s19113_s10 }
  0x4d   : > { %p13153_p9 = pnand %p13151_p6, %p13869_p0 }
  0x4f   : > { %p13154_p2 = pneg %p13153_p9 }
  0x51   : > { %p13159_p4 = pnand %p13157_p3, %p13154_p2 }
  0x53   : > { %13162 = shalt.err (!%p13159_p4)
}
  0x54   : > { %s13163_s5 = scalar_lea.vmem %s13857_s4, 80  ;;  %s13170_s18 = scalar_lea.vmem %s13857_s4, 96 }
  0x55   : > { %p13164_p7 = scmp.ne.s32.totalorder %s13857_s4, %s13163_s5  ;;  %p13171_p13 = scmp.lt.s32.totalorder %s13857_s4, %s13857_s4 }
  0x56   : > { %p13172_p1 = scmp.lt.s32.totalorder %s13170_s18, %s13163_s5 }
  0x57   : > { %p13166_p8 = pnand %p13164_p7, %p13869_p0 }
  0x58   : > { %p13173_p6 = por %p13172_p1, %p13171_p13 }
  0x59   : > { %p13167_p11 = pneg %p13166_p8 }
  0x5b   : > { %p13174_p9 = pnand %p13173_p6, %p13167_p11 }
  0x5d   : > { %13177 = shalt.err (!%p13174_p9)
}
  0x5e   : > { %11734 = dma.hbm_to_vmem [thread:$0]  (!%p13853_p12), %s19113_s10, 80, %s13857_s4, [#allocation10], %s18876_s29, %s18876_s29, %s18878_s22  }
  0x5f   : > { %s13178_s0 = scalar_lea.hbm %s18850_s12, 10240 }
  0x60   : > { %p13179_p2 = scmp.ne.s32.totalorder %s18850_s12, %s13178_s0  ;;  %p13185_p7 = scmp.lt.u32.totalorder %s13178_s0, %s18850_s12 }
  0x62   : > { %p13181_p3 = pnand %p13179_p2, %p13869_p0 }
  0x64   : > { %p13182_p4 = pneg %p13181_p3 }
  0x66   : > { %p13187_p8 = pnand %p13185_p7, %p13182_p4 }
  0x68   : > { %13190 = shalt.err (!%p13187_p8)
}
  0x69   : > { %s13191_s18 = scalar_lea.vmem %s613_s26, 10240  ;;  %p13199_p6 = scmp.lt.s32.totalorder %s613_s26, %s613_s26 }
  0x6a   : > { %p13192_p11 = scmp.ne.s32.totalorder %s613_s26, %s13191_s18  ;;  %p13200_p9 = scmp.lt.s32.totalorder %s13191_s18, %s13191_s18 }
  0x6c   : > { %p13194_p13 = pnand %p13192_p11, %p13869_p0  ;;  %p13201_p5 = por %p13200_p9, %p13199_p6 }
  0x6e   : > { %p13195_p1 = pneg %p13194_p13 }
  0x70   : > { %p13202_p10 = pnand %p13201_p5, %p13195_p1 }
  0x72   : > { %13205 = shalt.err (!%p13202_p10)
}
  0x73   : > { %s13659_s4 = smov 128   ;;  %s13660_s17 = smov 8  }
  0x74   : > { %11740 = dma.hbm_to_vmem [thread:$0]  (!%p13853_p12), %s18850_s12, 10240, %s613_s26, [#allocation13], %s13659_s4, %s13659_s4, %s13660_s17  }
  0x75   : > { %s13661_s1 = smov [#allocation15]   ;;  %s13662_s30 = smov [#allocation18]  }
  0x76   : > { %s638_s0 = sshll.u32 %s13661_s1, 4  ;;  %s664_s2 = sshll.u32 %s13662_s30, 4  ;;  %s639_s0 = int_to_ptr.vmem [resolvable:$true] %s638_s0  ;;  %s665_s2 = int_to_ptr.vmem [resolvable:$true] %s664_s2 }
  0x77   : > { %s13206_s18 = scalar_lea.hbm %s18852_s14, 10240 }
  0x78   : > { %p13207_p5 = scmp.ne.s32.totalorder %s18852_s14, %s13206_s18  ;;  %p13213_p3 = scmp.lt.u32.totalorder %s13206_s18, %s18852_s14 }
  0x7a   : > { %p13209_p10 = pnand %p13207_p5, %p13869_p0 }
  0x7c   : > { %p13210_p2 = pneg %p13209_p10 }
  0x7e   : > { %p13215_p4 = pnand %p13213_p3, %p13210_p2 }
  0x80   : > { %13218 = shalt.err (!%p13215_p4)
}
  0x81   : > { %s13219_s26 = scalar_lea.vmem %s639_s0, 10240  ;;  %p13227_p13 = scmp.lt.s32.totalorder %s639_s0, %s639_s0 }
  0x82   : > { %p13220_p7 = scmp.ne.s32.totalorder %s639_s0, %s13219_s26  ;;  %p13228_p1 = scmp.lt.s32.totalorder %s13219_s26, %s13219_s26 }
  0x84   : > { %p13222_p8 = pnand %p13220_p7, %p13869_p0  ;;  %p13229_p6 = por %p13228_p1, %p13227_p13 }
  0x86   : > { %p13223_p11 = pneg %p13222_p8 }
  0x88   : > { %p13230_p9 = pnand %p13229_p6, %p13223_p11 }
  0x8a   : > { %13233 = shalt.err (!%p13230_p9)
}
  0x8b   : > { %11746 = dma.hbm_to_vmem [thread:$0]  (!%p13853_p12), %s18852_s14, 10240, %s639_s0, [#allocation16], %s13659_s4, %s13659_s4, %s13660_s17  }
  0x8c   : > { %s13234_s19 = scalar_lea.hbm %s18854_s16, 1024 }
  0x8d   : > { %p13235_p5 = scmp.ne.s32.totalorder %s18854_s16, %s13234_s19  ;;  %p13241_p3 = scmp.lt.u32.totalorder %s13234_s19, %s18854_s16 }
  0x8f   : > { %p13237_p10 = pnand %p13235_p5, %p13869_p0 }
  0x91   : > { %p13238_p2 = pneg %p13237_p10 }
  0x93   : > { %p13243_p4 = pnand %p13241_p3, %p13238_p2 }
  0x95   : > { %13246 = shalt.err (!%p13243_p4)
}
  0x96   : > { %s13247_s5 = scalar_lea.vmem %s665_s2, 1024  ;;  %p13255_p13 = scmp.lt.s32.totalorder %s665_s2, %s665_s2 }
  0x97   : > { %p13248_p7 = scmp.ne.s32.totalorder %s665_s2, %s13247_s5  ;;  %p13256_p1 = scmp.lt.s32.totalorder %s13247_s5, %s13247_s5 }
  0x99   : > { %p13250_p8 = pnand %p13248_p7, %p13869_p0  ;;  %p13257_p6 = por %p13256_p1, %p13255_p13 }
  0x9b   : > { %p13251_p11 = pneg %p13250_p8 }
  0x9d   : > { %p13258_p9 = pnand %p13257_p6, %p13251_p11 }
  0x9f   : > { %13261 = shalt.err (!%p13258_p9)
}
  0xa0   : > { %11752 = dma.hbm_to_vmem [thread:$0]  (!%p13853_p12), %s18854_s16, 1024, %s665_s2, [#allocation19], %s13659_s4, %s13659_s4, %s13660_s17  }
  0xa1   : > { %s13663_s26 = smov [#allocation3]   ;;  %s19114_s22 = sld [smem:[#allocation219_spill]] }
  0xa2   : > { %s538_s8 = sshll.u32 %s13663_s26, 4  ;;  %s539_s8 = int_to_ptr.vmem [resolvable:$true] %s538_s8 }
  0xa7   : > { %s13262_s19 = scalar_lea.hbm %s19114_s22, 30720 }
  0xa8   : > { %p13263_p5 = scmp.ne.s32.totalorder %s19114_s22, %s13262_s19  ;;  %p13269_p3 = scmp.lt.u32.totalorder %s13262_s19, %s19114_s22 }
  0xaa   : > { %p13265_p10 = pnand %p13263_p5, %p13869_p0 }
  0xac   : > { %p13266_p2 = pneg %p13265_p10 }
  0xae   : > { %p13271_p4 = pnand %p13269_p3, %p13266_p2 }
  0xb0   : > { %13274 = shalt.err (!%p13271_p4)
}
  0xb1   : > { %s13275_s4 = scalar_lea.vmem %s539_s8, 30720  ;;  %p13283_p13 = scmp.lt.s32.totalorder %s539_s8, %s539_s8 }
  0xb2   : > { %p13276_p7 = scmp.ne.s32.totalorder %s539_s8, %s13275_s4  ;;  %p13284_p1 = scmp.lt.s32.totalorder %s13275_s4, %s13275_s4 }
  0xb4   : > { %p13278_p8 = pnand %p13276_p7, %p13869_p0  ;;  %p13285_p6 = por %p13284_p1, %p13283_p13 }
  0xb6   : > { %p13279_p11 = pneg %p13278_p8 }
  0xb8   : > { %p13286_p9 = pnand %p13285_p6, %p13279_p11 }
  0xba   : > { %13289 = shalt.err (!%p13286_p9)
}
  0xbb   : > { %s13664_s17 = smov 384   ;;  %s13665_s2 = smov 24  }
  0xbc   : > { %11725 = dma.hbm_to_vmem [thread:$0]  (!%p13853_p12), %s19114_s22, 30720, %s539_s8, [#allocation4], %s13664_s17, %s13664_s17, %s13665_s2  }
  0xbd   : > { %s13666_s18 = smov [#allocation8]   ;;  %s13667_s10 = smov [#allocation11]  }
  0xbe   : > { %s573_s26 = sshll.u32 %s13666_s18, 4  ;;  %s599_s29 = sshll.u32 %s13667_s10, 4  ;;  %s574_s26 = int_to_ptr.vmem [resolvable:$true] %s573_s26  ;;  %s14003_s29 = int_to_ptr.vmem [resolvable:$true] %s599_s29 }
  0xbf   : > { %s13290_s1 = scalar_lea.hbm %s18847_s9, 80 }
  0xc0   : > { %p13291_p5 = scmp.ne.s32.totalorder %s18847_s9, %s13290_s1  ;;  %p13297_p3 = scmp.lt.u32.totalorder %s13290_s1, %s18847_s9 }
  0xc2   : > { %p13293_p10 = pnand %p13291_p5, %p13869_p0 }
  0xc4   : > { %p13294_p2 = pneg %p13293_p10 }
  0xc6   : > { %p13299_p4 = pnand %p13297_p3, %p13294_p2 }
  0xc8   : > { %13302 = shalt.err (!%p13299_p4)
}
  0xc9   : > { %s13303_s17 = scalar_lea.vmem %s574_s26, 80  ;;  %s13310_s2 = scalar_lea.vmem %s574_s26, 96 }
  0xca   : > { %p13304_p7 = scmp.ne.s32.totalorder %s574_s26, %s13303_s17  ;;  %p13311_p13 = scmp.lt.s32.totalorder %s574_s26, %s574_s26 }
  0xcb   : > { %p13312_p1 = scmp.lt.s32.totalorder %s13310_s2, %s13303_s17 }
  0xcc   : > { %p13306_p8 = pnand %p13304_p7, %p13869_p0 }
  0xcd   : > { %p13313_p6 = por %p13312_p1, %p13311_p13 }
  0xce   : > { %p13307_p11 = pneg %p13306_p8 }
  0xd0   : > { %p13314_p9 = pnand %p13313_p6, %p13307_p11 }
  0xd2   : > { %13317 = shalt.err (!%p13314_p9)
}
  0xd3   : > { %s19115_s5 = smov 1   ;;  %s19116_s0 = smov 16  }
  0xd4   : > { %11731 = dma.hbm_to_vmem [thread:$0]  (!%p13853_p12), %s18847_s9, 80, %s574_s26, [#allocation7], %s19116_s0, %s19116_s0, %s19115_s5  }
  0xd5   : > { %s13318_s1 = scalar_lea.hbm %s18849_s11, 80 }
  0xd6   : > { %p13319_p5 = scmp.ne.s32.totalorder %s18849_s11, %s13318_s1  ;;  %p13325_p3 = scmp.lt.u32.totalorder %s13318_s1, %s18849_s11 }
  0xd8   : > { %p13321_p10 = pnand %p13319_p5, %p13869_p0 }
  0xda   : > { %p13322_p2 = pneg %p13321_p10 }
  0xdc   : > { %p13327_p4 = pnand %p13325_p3, %p13322_p2 }
  0xde   : > { %13330 = shalt.err (!%p13327_p4)
}
  0xdf   : > { %s13331_s26 = scalar_lea.vmem %s14003_s29, 80  ;;  %s13338_s17 = scalar_lea.vmem %s14003_s29, 96 }
  0xe0   : > { %p13332_p7 = scmp.ne.s32.totalorder %s14003_s29, %s13331_s26  ;;  %p13339_p13 = scmp.lt.s32.totalorder %s14003_s29, %s14003_s29 }
  0xe1   : > { %p13340_p1 = scmp.lt.s32.totalorder %s13338_s17, %s13331_s26 }
  0xe2   : > { %p13334_p8 = pnand %p13332_p7, %p13869_p0 }
  0xe3   : > { %p13341_p6 = por %p13340_p1, %p13339_p13 }
  0xe4   : > { %p13335_p11 = pneg %p13334_p8 }
  0xe6   : > { %p13342_p9 = pnand %p13341_p6, %p13335_p11 }
  0xe8   : > { %13345 = shalt.err (!%p13342_p9)
}
  0xe9   : > { %11737 = dma.hbm_to_vmem [thread:$0]  (!%p13853_p12), %s18849_s11, 80, %s14003_s29, [#allocation10], %s19116_s0, %s19116_s0, %s19115_s5  }
  0xea   : > { %s13668_s10 = smov [#allocation14]   ;;  %s13669_s24 = smov [#allocation17]  }
  0xeb   : > { %s625_s19 = sshll.u32 %s13668_s10, 4  ;;  %s651_s1 = sshll.u32 %s13669_s24, 4  ;;  %s626_s19 = int_to_ptr.vmem [resolvable:$true] %s625_s19  ;;  %s14053_s1 = int_to_ptr.vmem [resolvable:$true] %s651_s1 }
  0xec   : > { %s13346_s4 = scalar_lea.hbm %s18851_s13, 80 }
  0xed   : > { %p13347_p5 = scmp.ne.s32.totalorder %s18851_s13, %s13346_s4  ;;  %p13353_p3 = scmp.lt.u32.totalorder %s13346_s4, %s18851_s13 }
  0xef   : > { %p13349_p10 = pnand %p13347_p5, %p13869_p0 }
  0xf1   : > { %p13350_p2 = pneg %p13349_p10 }
  0xf3   : > { %p13355_p4 = pnand %p13353_p3, %p13350_p2 }
  0xf5   : > { %13358 = shalt.err (!%p13355_p4)
}
  0xf6   : > { %s13359_s2 = scalar_lea.vmem %s626_s19, 80  ;;  %s13366_s18 = scalar_lea.vmem %s626_s19, 96 }
  0xf7   : > { %p13360_p7 = scmp.ne.s32.totalorder %s626_s19, %s13359_s2  ;;  %p13367_p13 = scmp.lt.s32.totalorder %s626_s19, %s626_s19 }
  0xf8   : > { %p13368_p1 = scmp.lt.s32.totalorder %s13366_s18, %s13359_s2 }
  0xf9   : > { %p13362_p8 = pnand %p13360_p7, %p13869_p0 }
  0xfa   : > { %p13369_p6 = por %p13368_p1, %p13367_p13 }
  0xfb   : > { %p13363_p11 = pneg %p13362_p8 }
  0xfd   : > { %p13370_p9 = pnand %p13369_p6, %p13363_p11 }
  0xff   : > { %13373 = shalt.err (!%p13370_p9)
}
 0x100   : > { %11743 = dma.hbm_to_vmem [thread:$0]  (!%p13853_p12), %s18851_s13, 80, %s626_s19, [#allocation13], %s19116_s0, %s19116_s0, %s19115_s5  }
 0x101   : > { %s13374_s4 = scalar_lea.hbm %s18853_s15, 80 }
 0x102   : > { %p13375_p5 = scmp.ne.s32.totalorder %s18853_s15, %s13374_s4  ;;  %p13381_p3 = scmp.lt.u32.totalorder %s13374_s4, %s18853_s15 }
 0x104   : > { %p13377_p10 = pnand %p13375_p5, %p13869_p0 }
 0x106   : > { %p13378_p2 = pneg %p13377_p10 }
 0x108   : > { %p13383_p4 = pnand %p13381_p3, %p13378_p2 }
 0x10a   : > { %13386 = shalt.err (!%p13383_p4)
}
 0x10b   : > { %s13387_s19 = scalar_lea.vmem %s14053_s1, 80  ;;  %s13394_s2 = scalar_lea.vmem %s14053_s1, 96 }
 0x10c   : > { %p13388_p7 = scmp.ne.s32.totalorder %s14053_s1, %s13387_s19  ;;  %p13395_p13 = scmp.lt.s32.totalorder %s14053_s1, %s14053_s1 }
 0x10d   : > { %p13396_p1 = scmp.lt.s32.totalorder %s13394_s2, %s13387_s19 }
 0x10e   : > { %p13390_p8 = pnand %p13388_p7, %p13869_p0 }
 0x10f   : > { %p13397_p6 = por %p13396_p1, %p13395_p13 }
 0x110   : > { %p13391_p11 = pneg %p13390_p8 }
 0x112   : > { %p13398_p9 = pnand %p13397_p6, %p13391_p11 }
 0x114   : > { %13401 = shalt.err (!%p13398_p9)
}
 0x115   : > { %11749 = dma.hbm_to_vmem [thread:$0]  (!%p13853_p12), %s18853_s15, 80, %s14053_s1, [#allocation16], %s19116_s0, %s19116_s0, %s19115_s5  }
 0x116   : > { %s13670_s24 = smov [#allocation20]   ;;  %s13402_s8 = scalar_lea.hbm %s18858_s20, 16 }
 0x117   : > { %s687_s30 = sshll.u32 %s13670_s24, 4  ;;  %p13403_p5 = scmp.ne.s32.totalorder %s18858_s20, %s13402_s8  ;;  %s688_s30 = int_to_ptr.vmem [resolvable:$true] %s687_s30 }
 0x118   : > { %p13409_p3 = scmp.lt.u32.totalorder %s13402_s8, %s18858_s20 }
 0x119   : > { %p13405_p10 = pnand %p13403_p5, %p13869_p0 }
 0x11b   : > { %p13406_p2 = pneg %p13405_p10 }
 0x11d   : > { %p13411_p4 = pnand %p13409_p3, %p13406_p2 }
 0x11f   : > { %13414 = shalt.err (!%p13411_p4)
}
 0x120   : > { %s13415_s5 = scalar_lea.vmem %s688_s30, 16  ;;  %s13422_s0 = scalar_lea.vmem %s688_s30, 32 }
 0x121   : > { %p13416_p7 = scmp.ne.s32.totalorder %s688_s30, %s13415_s5  ;;  %p13423_p13 = scmp.lt.s32.totalorder %s688_s30, %s688_s30 }
 0x122   : > { %p13424_p1 = scmp.lt.s32.totalorder %s13422_s0, %s13415_s5 }
 0x123   : > { %p13418_p8 = pnand %p13416_p7, %p13869_p0 }
 0x124   : > { %p13425_p6 = por %p13424_p1, %p13423_p13 }
 0x125   : > { %p13419_p11 = pneg %p13418_p8 }
 0x127   : > { %p13426_p9 = pnand %p13425_p6, %p13419_p11 }
 0x129   : > { %13429 = shalt.err (!%p13426_p9)
}
 0x12a   : > { %11755 = dma.hbm_to_vmem [thread:$0]  (!%p13853_p12), %s18858_s20, 16, %s688_s30, [#allocation19]  }
 0x12b   : > { %p19117_p5 = scmp.ne.s32.totalorder %s19109_s23, 0 }
 0x12d   : > { %708 = sbr.rel (%p19117_p5) target bundleno = 5742 (0x166e), region = 104 }
 0x134   : > { %p19118_p10 = scmp.eq.s32.totalorder %s13815_s3, 0 }
 0x136   : > { %13543 = dma.done.wait (%p19118_p10), [#allocation4], 30720   ;;  %p19119_p0 = pmov %p19118_p10 }
 0x138   : > { %13545 = vsyncadd (%p19119_p0), [#allocation4], 4294936576  ;;  %p19120_p2 = pmov %p19119_p0 }
 0x139   : > { %p19121_p3 = pmov %p19119_p0 }
 0x13a   : > { %13547 = dma.done.wait (%p19120_p2), [#allocation7], 160  }
 0x13b   : > { %13549 = vsyncadd (%p19121_p3), [#allocation7], 4294967136  ;;  %p19122_p4 = pmov %p19119_p0 }
 0x13c   : > { %p19123_p12 = pmov %p19119_p0 }
 0x13d   : > { %13551 = dma.done.wait (%p19122_p4), [#allocation10], 160  }
 0x13e   : > { %13553 = vsyncadd (%p19123_p12), [#allocation10], 4294967136  ;;  %p19124_p7 = pmov %p19119_p0 }
 0x13f   : > { %p19125_p8 = pmov %p19119_p0 }
 0x140   : > { %13555 = dma.done.wait (%p19124_p7), [#allocation13], 10320  }
 0x141   : > { %13557 = vsyncadd (%p19125_p8), [#allocation13], 4294956976  ;;  %p19126_p11 = pmov %p19119_p0 }
 0x142   : > { %p19127_p13 = pmov %p19119_p0 }
 0x143   : > { %13559 = dma.done.wait (%p19126_p11), [#allocation16], 10320  }
 0x144   : > { %13561 = vsyncadd (%p19127_p13), [#allocation16], 4294956976  ;;  %p19128_p1 = pmov %p19119_p0 }
 0x145   : > { %p19129_p6 = pmov %p19119_p0 }
 0x146   : > { %13563 = dma.done.wait (%p19128_p1), [#allocation19], 1040  }
 0x147   : > { %13565 = vsyncadd (%p19129_p6), [#allocation19], 4294966256  ;;  %s805_s21 = sand.u32 1, %s13576_s25   ;;  %p807_p9 = scmp.lt.s32.totalorder %s13815_s3, 1  ;;  %v18880_v0 = vmov 0.0   ;;  %vm881_vm0 = vcmask 1042432   ;;  %v1032_v19 = vlaneseq }
 0x148   : > { %950 = vmatprep.mubr.f32.mxu0 %v18880_v0  ;;  %990 = vmatprep.mubr.f32.mxu1 %v18880_v0  ;;  %s19130_s24 = sld [smem:[#allocation215_spill]]  ;;  %s19131_s8 = sld [smem:[#allocation217_spill]]  ;;  %vm832_vm1 = vcmask 23552  }
 0x149   : > { %s808_s23 = scalar_select %p807_p9, %s13815_s3, 1  ;;  %v14206_v20 = vshrl.u32 %v1032_v19, 7 }
 0x14a   : > { %s19133_s29 = sld [smem:[#allocation216_spill]]  ;;  %s19135_s0 = sld [smem:[#allocation218_spill]] }
 0x14b   : > { %s8924_s28 = sshll.u32 %s808_s23, 7  ;;  %19132 = vst [vmem:[#allocation36_spill] sm:$0xff] %v14206_v20  ;;  %v14212_v22 = vsub.s32 0, %v14206_v20  ;;  %s14269_s1 = scalar_lea.vmem [#allocation21], %s805_s21 }
 0x14c   : > { %s14309_s2 = smov 0  }
 0x14d   : > { %19134 = vst [vmem:[#allocation37_spill] sm:$0xff] %v14212_v22 }
 0x14e   : > { %s14155_s30 = scalar_lea.vmem %s19130_s24, %s8924_s28  ;;  %v828_v1 = vld [vmem:[%s19131_s8] sm:$0x77] }
 0x14f   : > { %v831_v2 = vcombine.high %v828_v1, %v828_v1  ;;  %v812_v3 = vld [vmem:[%s14155_s30] sm:$0xff]  ;;  %v813_v5 = vld [vmem:[%s14155_s30 + $0x8] sm:$0xff]  ;;  %v814_v7 = vld [vmem:[%s14155_s30 + $0x10] sm:$0xff] }
 0x150   : > { %v820_v4 = vld [vmem:[%s14155_s30 + $0x40] sm:$0xff]  ;;  %v821_v6 = vld [vmem:[%s14155_s30 + $0x48] sm:$0xff]  ;;  %v822_v8 = vld [vmem:[%s14155_s30 + $0x50] sm:$0xff] }
 0x151   : > { %8633 = vmatprep.subr.msk.mxu0 %vm881_vm0, %v831_v2  ;;  %11658 = vmatprep.subr.msk.mxu1 %vm881_vm0, %v831_v2  ;;  %v815_v9 = vld [vmem:[%s14155_s30 + $0x18] sm:$0xff]  ;;  %v816_v11 = vld [vmem:[%s14155_s30 + $0x20] sm:$0xff]  ;;  %v817_v13 = vld [vmem:[%s14155_s30 + $0x28] sm:$0xff] }
 0x152   : > { %8634 = vmatpush1.msk.msra.mxu0 %vm881_vm0, %v828_v1  ;;  %11659 = vmatpush1.msk.msra.mxu1 %vm881_vm0, %v828_v1  ;;  %v823_v10 = vld [vmem:[%s14155_s30 + $0x58] sm:$0xff]  ;;  %v824_v12 = vld [vmem:[%s14155_s30 + $0x60] sm:$0xff]  ;;  %v825_v14 = vld [vmem:[%s14155_s30 + $0x68] sm:$0xff] }
 0x153   : > { %8635 = vmatmul.mubr.msk.f32.vlgmr.msra.gmra.mrb[0].mxu0 %vm832_vm1, %v812_v3  ;;  %8643 = vmatmul.mubr.msk.f32.vlgmr.msra.gmra.mrb[0].mxu1 %vm832_vm1, %v820_v4  ;;  %v818_v15 = vld [vmem:[%s14155_s30 + $0x30] sm:$0xff]  ;;  %v819_v17 = vld [vmem:[%s14155_s30 + $0x38] sm:$0xff]  ;;  %v1117_v21 = vld [vmem:[%s19133_s29] sm:$0x1] }
 0x154   : > { %955 = vmatprep.mubr.f32.mxu0 %v18880_v0  ;;  %995 = vmatprep.mubr.f32.mxu1 %v18880_v0  ;;  %v826_v16 = vld [vmem:[%s14155_s30 + $0x70] sm:$0xff]  ;;  %v827_v18 = vld [vmem:[%s14155_s30 + $0x78] sm:$0xff]  ;;  %11981 = vrcp.f32 %v1117_v21  ;;  %v829_v23 = vld [vmem:[%s19135_s0] sm:$0x3] }
 0x155   : > { %v14218_v24 = vrot.slane %v829_v23, %v14212_v22 }
 0x157   : > { %8636 = vmatmul.mubr.msk.f32.gmra.mrb[2].mxu0 %vm832_vm1, %v813_v5  ;;  %8644 = vmatmul.mubr.msk.f32.gmra.mrb[2].mxu1 %vm832_vm1, %v821_v6 }
 0x158   : > { %960 = vmatprep.mubr.f32.mxu0 %v18880_v0  ;;  %1000 = vmatprep.mubr.f32.mxu1 %v18880_v0 }
 0x15b   : > { %8637 = vmatmul.mubr.msk.f32.gmra.mrb[4].mxu0 %vm832_vm1, %v814_v7  ;;  %8645 = vmatmul.mubr.msk.f32.gmra.mrb[4].mxu1 %vm832_vm1, %v822_v8 }
 0x15c   : > { %965 = vmatprep.mubr.f32.mxu0 %v18880_v0  ;;  %1005 = vmatprep.mubr.f32.mxu1 %v18880_v0 }
 0x15e   : > { %v11982_v31 = vpop.eup %11981 }
 0x15f   : > { %8638 = vmatmul.mubr.msk.f32.gmra.mrb[6].mxu0 %vm832_vm1, %v815_v9  ;;  %8646 = vmatmul.mubr.msk.f32.gmra.mrb[6].mxu1 %vm832_vm1, %v823_v10  ;;  %v14225_v42 = vrot.slane %v11982_v31, %v14212_v22 }
 0x160   : > { %970 = vmatprep.mubr.f32.mxu0 %v18880_v0  ;;  %1010 = vmatprep.mubr.f32.mxu1 %v18880_v0 }
 0x163   : > { %8639 = vmatmul.mubr.msk.f32.gmra.mrb[8].mxu0 %vm832_vm1, %v816_v11  ;;  %8647 = vmatmul.mubr.msk.f32.gmra.mrb[8].mxu1 %vm832_vm1, %v824_v12 }
 0x164   : > { %975 = vmatprep.mubr.f32.mxu0 %v18880_v0  ;;  %1015 = vmatprep.mubr.f32.mxu1 %v18880_v0 }
 0x167   : > { %8640 = vmatmul.mubr.msk.f32.gmra.mrb[10].mxu0 %vm832_vm1, %v817_v13  ;;  %8648 = vmatmul.mubr.msk.f32.gmra.mrb[10].mxu1 %vm832_vm1, %v825_v14 }
 0x168   : > { %980 = vmatprep.mubr.f32.mxu0 %v18880_v0  ;;  %1020 = vmatprep.mubr.f32.mxu1 %v18880_v0 }
 0x16b   : > { %8641 = vmatmul.mubr.msk.f32.gmra.mrb[12].mxu0 %vm832_vm1, %v818_v15  ;;  %8649 = vmatmul.mubr.msk.f32.gmra.mrb[12].mxu1 %vm832_vm1, %v826_v16 }
 0x16c   : > { %985 = vmatprep.mubr.f32.mxu0 %v18880_v0  ;;  %1025 = vmatprep.mubr.f32.mxu1 %v18880_v0 }
 0x16f   : > { %8642 = vmatmul.mubr.msk.f32.gmra.mrb[14].mxu0 %vm832_vm1, %v819_v17  ;;  %8650 = vmatmul.mubr.msk.f32.gmra.mrb[14].mxu1 %vm832_vm1, %v827_v18 }
 0x226   : > { %v952_v25 = vpop.f32.mrb[0].mxu0  ;;  %v992_v26 = vpop.f32.mrb[0].mxu1 }
 0x227   : > { %v1037_v27 = vsub.f32 %v952_v25, %v14218_v24  ;;  %v1045_v28 = vsub.f32 %v992_v26, %v14218_v24  ;;  %v954_v29 = vpop.f32.mrb[1].mxu0  ;;  %v994_v30 = vpop.f32.mrb[1].mxu1 }
 0x229   : > { %v1053_v32 = vand.u32 2147483647, %v1037_v27  ;;  %v1061_v33 = vand.u32 2147483647, %v1045_v28 }
 0x22a   : > { %v957_v34 = vpop.f32.mrb[2].mxu0  ;;  %v997_v35 = vpop.f32.mrb[2].mxu1 }
 0x22b   : > { %v1069_v36 = vmul.f32 128.0, %v1053_v32  ;;  %v1077_v37 = vmul.f32 128.0, %v1061_v33  ;;  %v1038_v38 = vsub.f32 %v957_v34, %v14218_v24  ;;  %v1046_v39 = vsub.f32 %v997_v35, %v14218_v24  ;;  %v959_v40 = vpop.f32.mrb[3].mxu0  ;;  %v999_v41 = vpop.f32.mrb[3].mxu1 }
 0x22d   : > { %v1085_v43 = vsub.f32 1.0, %v1069_v36  ;;  %v1093_v44 = vsub.f32 1.0, %v1077_v37  ;;  %v1054_v45 = vand.u32 2147483647, %v1038_v38  ;;  %v1062_v46 = vand.u32 2147483647, %v1046_v39 }
 0x22e   : > { %v962_v47 = vpop.f32.mrb[4].mxu0  ;;  %v1002_v48 = vpop.f32.mrb[4].mxu1 }
 0x22f   : > { %v1101_v49 = vmax.f32 %v1085_v43, 0.0  ;;  %v1109_v50 = vmax.f32 %v1093_v44, 0.0  ;;  %v1070_v51 = vmul.f32 128.0, %v1054_v45  ;;  %v1078_v52 = vmul.f32 128.0, %v1062_v46  ;;  %v964_v53 = vpop.f32.mrb[5].mxu0  ;;  %v1004_v54 = vpop.f32.mrb[5].mxu1 }
 0x230   : > { %v1039_v55 = vsub.f32 %v962_v47, %v14218_v24  ;;  %v1047_v56 = vsub.f32 %v1002_v48, %v14218_v24 }
 0x231   : > { %v14230_v57 = vmul.f32 %v14225_v42, %v1101_v49   ;;  %v14233_v58 = vmul.f32 %v14225_v42, %v1109_v50   ;;  %v1086_v59 = vsub.f32 1.0, %v1070_v51  ;;  %v1094_v60 = vsub.f32 1.0, %v1078_v52 }
 0x232   : > { %v1055_v61 = vand.u32 2147483647, %v1039_v55  ;;  %v1063_v62 = vand.u32 2147483647, %v1047_v56  ;;  %v967_v63 = vpop.f32.mrb[6].mxu0  ;;  %v1007_v1 = vpop.f32.mrb[6].mxu1 }
 0x233   : > { %v1102_v2 = vmax.f32 %v1086_v59, 0.0  ;;  %v1110_v3 = vmax.f32 %v1094_v60, 0.0  ;;  %v1040_v4 = vsub.f32 %v967_v63, %v14218_v24  ;;  %v1048_v5 = vsub.f32 %v1007_v1, %v14218_v24  ;;  %v969_v6 = vpop.f32.mrb[7].mxu0  ;;  %v1009_v7 = vpop.f32.mrb[7].mxu1 }
 0x234   : > { %v1071_v8 = vmul.f32 128.0, %v1055_v61  ;;  %v1079_v9 = vmul.f32 128.0, %v1063_v62 }
 0x235   : > { %v14238_v10 = vmul.f32 %v14225_v42, %v1102_v2   ;;  %v14241_v11 = vmul.f32 %v14225_v42, %v1110_v3   ;;  %v1056_v12 = vand.u32 2147483647, %v1040_v4  ;;  %v1064_v13 = vand.u32 2147483647, %v1048_v5 }
 0x236   : > { %v1087_v14 = vsub.f32 1.0, %v1071_v8  ;;  %v1095_v15 = vsub.f32 1.0, %v1079_v9  ;;  %v972_v16 = vpop.f32.mrb[8].mxu0  ;;  %v1012_v17 = vpop.f32.mrb[8].mxu1 }
 0x237   : > { %v1072_v18 = vmul.f32 128.0, %v1056_v12  ;;  %v1080_v19 = vmul.f32 128.0, %v1064_v13  ;;  %v1041_v21 = vsub.f32 %v972_v16, %v14218_v24  ;;  %v1049_v23 = vsub.f32 %v1012_v17, %v14218_v24  ;;  %v974_v25 = vpop.f32.mrb[9].mxu0  ;;  %v1014_v26 = vpop.f32.mrb[9].mxu1 }
 0x238   : > { %v1103_v27 = vmax.f32 %v1087_v14, 0.0  ;;  %v1111_v28 = vmax.f32 %v1095_v15, 0.0 }
 0x239   : > { %v1088_v29 = vsub.f32 1.0, %v1072_v18  ;;  %v1096_v30 = vsub.f32 1.0, %v1080_v19  ;;  %v1057_v31 = vand.u32 2147483647, %v1041_v21  ;;  %v1065_v32 = vand.u32 2147483647, %v1049_v23 }
 0x23a   : > { %v14246_v33 = vmul.f32 %v14225_v42, %v1103_v27   ;;  %v14249_v34 = vmul.f32 %v14225_v42, %v1111_v28   ;;  %v977_v35 = vpop.f32.mrb[10].mxu0  ;;  %v1017_v36 = vpop.f32.mrb[10].mxu1 }
 0x23b   : > { %v1104_v37 = vmax.f32 %v1088_v29, 0.0  ;;  %v1112_v38 = vmax.f32 %v1096_v30, 0.0  ;;  %v1073_v39 = vmul.f32 128.0, %v1057_v31  ;;  %v1081_v40 = vmul.f32 128.0, %v1065_v32  ;;  %v979_v41 = vpop.f32.mrb[11].mxu0  ;;  %v1019_v43 = vpop.f32.mrb[11].mxu1 }
 0x23c   : > { %v1042_v44 = vsub.f32 %v977_v35, %v14218_v24  ;;  %v1050_v45 = vsub.f32 %v1017_v36, %v14218_v24 }
 0x23d   : > { %v1126_v46 = vmul.f32 %v14225_v42, %v1104_v37   ;;  %v1134_v47 = vmul.f32 %v14225_v42, %v1112_v38   ;;  %v1089_v48 = vsub.f32 1.0, %v1073_v39  ;;  %v1097_v49 = vsub.f32 1.0, %v1081_v40 }
 0x23e   : > { %v1058_v50 = vand.u32 2147483647, %v1042_v44  ;;  %v1066_v51 = vand.u32 2147483647, %v1050_v45  ;;  %v982_v52 = vpop.f32.mrb[12].mxu0  ;;  %v1022_v53 = vpop.f32.mrb[12].mxu1 }
 0x23f   : > { %v1105_v54 = vmax.f32 %v1089_v48, 0.0  ;;  %v1113_v55 = vmax.f32 %v1097_v49, 0.0  ;;  %v1043_v56 = vsub.f32 %v982_v52, %v14218_v24  ;;  %v1051_v59 = vsub.f32 %v1022_v53, %v14218_v24  ;;  %v984_v60 = vpop.f32.mrb[13].mxu0  ;;  %v1024_v61 = vpop.f32.mrb[13].mxu1 }
 0x240   : > { %v1074_v62 = vmul.f32 128.0, %v1058_v50  ;;  %v1082_v63 = vmul.f32 128.0, %v1066_v51 }
 0x241   : > { %v1127_v1 = vmul.f32 %v14225_v42, %v1105_v54   ;;  %v1135_v2 = vmul.f32 %v14225_v42, %v1113_v55   ;;  %v1059_v3 = vand.u32 2147483647, %v1043_v56  ;;  %v1067_v4 = vand.u32 2147483647, %v1051_v59 }
 0x242   : > { %v1090_v5 = vsub.f32 1.0, %v1074_v62  ;;  %v1098_v6 = vsub.f32 1.0, %v1082_v63  ;;  %v987_v7 = vpop.f32.mrb[14].mxu0  ;;  %v1027_v8 = vpop.f32.mrb[14].mxu1 }
 0x243   : > { %v1075_v9 = vmul.f32 128.0, %v1059_v3  ;;  %v1083_v12 = vmul.f32 128.0, %v1067_v4  ;;  %v1044_v13 = vsub.f32 %v987_v7, %v14218_v24  ;;  %v1052_v14 = vsub.f32 %v1027_v8, %v14218_v24  ;;  %v989_v15 = vpop.f32.mrb[15].mxu0  ;;  %v1029_v16 = vpop.f32.mrb[15].mxu1 }
 0x244   : > { %v1106_v17 = vmax.f32 %v1090_v5, 0.0  ;;  %v1114_v18 = vmax.f32 %v1098_v6, 0.0 }
 0x245   : > { %v1091_v19 = vsub.f32 1.0, %v1075_v9  ;;  %v1099_v21 = vsub.f32 1.0, %v1083_v12  ;;  %v1060_v23 = vand.u32 2147483647, %v1044_v13  ;;  %v1068_v25 = vand.u32 2147483647, %v1052_v14 }
 0x246   : > { %v1128_v26 = vmul.f32 %v14225_v42, %v1106_v17   ;;  %v1136_v27 = vmul.f32 %v14225_v42, %v1114_v18  }
 0x247   : > { %v1107_v28 = vmax.f32 %v1091_v19, 0.0  ;;  %v1115_v29 = vmax.f32 %v1099_v21, 0.0  ;;  %v1076_v30 = vmul.f32 128.0, %v1060_v23  ;;  %v1084_v31 = vmul.f32 128.0, %v1068_v25 }
 0x249   : > { %v1129_v32 = vmul.f32 %v14225_v42, %v1107_v28   ;;  %v1137_v24 = vmul.f32 %v14225_v42, %v1115_v29   ;;  %v1092_v35 = vsub.f32 1.0, %v1076_v30  ;;  %v1100_v36 = vsub.f32 1.0, %v1084_v31 }
 0x24b   : > { %v1108_v37 = vmax.f32 %v1092_v35, 0.0  ;;  %v1116_v38 = vmax.f32 %v1100_v36, 0.0 }
 0x24d   : > { %v1130_v39 = vmul.f32 %v14225_v42, %v1108_v37   ;;  %v1138_v40 = vmul.f32 %v14225_v42, %v1116_v38  }
 0x24e LB: >> { %v19136_v20 = vld [vmem:[#allocation36_spill] sm:$0xff]  ;;  %19137 = vst [vmem:[#allocation38_spill] sm:$0xff] %v13588_v40  ;;  %19138 = vst [vmem:[#allocation39_spill] sm:$0xff] %v13592_v24  ;;  %v13672_v42 = vmov 0.0   ;;  %s8925_s23 = smul.u32 384, %s13652_s2  ;;  %9639 = vmatprep.mubr.f32.mxu1 %v13648_v57  ;;  %s19153_s30 = sld [smem:[#allocation220_spill]]  ;;  %v13588_v40 = vphi %v1138_v40, %v19965_v40   ;;  %s13652_s2 = sphi %s14309_s2, %s1144_s2   ;;  %v13648_v57 = vphi %v14230_v57, %v19980_v57   ;;  %v13644_v10 = vphi %v14238_v10, %v19979_v10   ;;  %v13640_v33 = vphi %v14246_v33, %v19978_v33   ;;  %v13636_v46 = vphi %v1126_v46, %v19977_v46   ;;  %v13632_v1 = vphi %v1127_v1, %v19976_v1   ;;  %v13628_v26 = vphi %v1128_v26, %v19975_v26   ;;  %v13624_v32 = vphi %v1129_v32, %v19974_v32   ;;  %v13620_v39 = vphi %v1130_v39, %v19973_v39   ;;  %v13616_v58 = vphi %v14233_v58, %v19972_v58   ;;  %v13612_v11 = vphi %v14241_v11, %v19971_v11   ;;  %v13608_v34 = vphi %v14249_v34, %v19970_v34   ;;  %v13604_v47 = vphi %v1134_v47, %v19969_v47   ;;  %v13600_v2 = vphi %v1135_v2, %v19968_v2   ;;  %v13596_v27 = vphi %v1136_v27, %v19967_v27   ;;  %v13592_v24 = vphi %v1137_v24, %v19966_v24  }
 0x24f   : >> { %19139 = vst [vmem:[#allocation40_spill] sm:$0xff] %v13596_v27  ;;  %19140 = vst [vmem:[#allocation41_spill] sm:$0xff] %v13600_v2  ;;  %1295 = vmatprep.mubr.f32.mxu0 %v13672_v42  ;;  %s1212_s18 = smul.u32 3, %s13652_s2  ;;  %v19154_v22 = vld [vmem:[#allocation37_spill] sm:$0xff]  ;;  %vm2369_vm2 = vcmask 130048   ;;  %s13673_s4 = smov 112  }
 0x250   : >> { %19141 = vst [vmem:[#allocation42_spill] sm:$0xff] %v13604_v47  ;;  %19142 = vst [vmem:[#allocation43_spill] sm:$0xff] %v13608_v34  ;;  %s14365_s28 = scalar_lea.vmem [#allocation3], %s8925_s23  ;;  %s13674_s8 = smov 96   ;;  %vm6434_vm4 = vcmask 261248   ;;  %vm6515_vm5 = vcmask 392448  }
 0x251   : >> { %19143 = vst [vmem:[#allocation44_spill] sm:$0xff] %v13612_v11  ;;  %19144 = vst [vmem:[#allocation45_spill] sm:$0xff] %v13616_v58  ;;  %v1165_v41 = vld [vmem:[%s14365_s28 + $0x8] sm:$0xff]  ;;  %v1168_v43 = vld [vmem:[%s14365_s28 + $0x20] sm:$0xff]  ;;  %s13675_s26 = smov 80   ;;  %s13676_s17 = smov 64  }
 0x252   : >> { %19145 = vst [vmem:[#allocation46_spill] sm:$0xff] %v13620_v39  ;;  %19146 = vst [vmem:[#allocation47_spill] sm:$0xff] %v13624_v32  ;;  %v1164_v44 = vld [vmem:[%s14365_s28] sm:$0xff]  ;;  %v10804_v45 = vpack.c.bf16 %v1168_v43, %v1165_v41  ;;  %v1167_v48 = vld [vmem:[%s14365_s28 + $0x18] sm:$0xff]  ;;  %s13677_s29 = smov 48   ;;  %s13678_s19 = smov 32  }
 0x253   : >> { %19147 = vst [vmem:[#allocation48_spill] sm:$0xff] %v13628_v26  ;;  %19148 = vst [vmem:[#allocation49_spill] sm:$0xff] %v13632_v1  ;;  %v1171_v49 = vld [vmem:[%s14365_s28 + $0x38] sm:$0xff]  ;;  %v1174_v50 = vld [vmem:[%s14365_s28 + $0x50] sm:$0xff]  ;;  %v10806_v51 = vpack.c.bf16 %v1167_v48, %v1164_v44  ;;  %s13679_s5 = smov 16   ;;  %vm6596_vm6 = vcmask 523648  }
 0x254   : >> { %19149 = vst [vmem:[#allocation50_spill] sm:$0xff] %v13636_v46  ;;  %19150 = vst [vmem:[#allocation51_spill] sm:$0xff] %v13640_v33  ;;  %v10808_v52 = vpack.c.bf16 %v1174_v50, %v1171_v49  ;;  %v1170_v53 = vld [vmem:[%s14365_s28 + $0x30] sm:$0xff]  ;;  %v1173_v54 = vld [vmem:[%s14365_s28 + $0x48] sm:$0xff]  ;;  %10805 = vmatprep.subr.bf16.mxu0 %v10804_v45  ;;  %s14464_s27 = scalar_lea.vmem %s19153_s30, %s1212_s18  ;;  %vm6677_vm7 = vcmask 654848   ;;  %vm6758_vm8 = vcmask 786048   ;;  %s6971_s30 = scalar_lea.vmem %s18845_s7, %s13652_s2 }
 0x255   : >> { %19151 = vst [vmem:[#allocation52_spill] sm:$0xff] %v13644_v10  ;;  %19152 = vst [vmem:[#allocation53_spill] sm:$0xff] %v13648_v57  ;;  %v1177_v55 = vld [vmem:[%s14365_s28 + $0x68] sm:$0xff]  ;;  %v1180_v56 = vld [vmem:[%s14365_s28 + $0x80] sm:$0xff]  ;;  %10807 = vmatpush1.bf16.msra.mxu0 %v10806_v51  ;;  %v10810_v59 = vpack.c.bf16 %v1173_v54, %v1170_v53  ;;  %s17806_s0 = sshll.u32 %s13652_s2, 7  ;;  %vm6839_vm9 = vcmask 917248  }
 0x256   : >> { %10809 = vmatprep.subr.bf16.mxu0 %v10808_v52  ;;  %v10812_v60 = vpack.c.bf16 %v1180_v56, %v1177_v55  ;;  %v1176_v61 = vld [vmem:[%s14365_s28 + $0x60] sm:$0xff]  ;;  %v1179_v62 = vld [vmem:[%s14365_s28 + $0x78] sm:$0xff]  ;;  %v1186_v3 = vld [vmem:[%s14365_s28 + $0xb0] sm:$0xff]  ;;  %s17812_s18 = scalar_lea.vmem %s18844_s6, %s17806_s0  ;;  %vm6920_vm10 = vcmask 1048448  }
 0x257   : >> { %v1183_v63 = vld [vmem:[%s14365_s28 + $0x98] sm:$0xff]  ;;  %v10814_v4 = vpack.c.bf16 %v1179_v62, %v1176_v61  ;;  %v1182_v6 = vld [vmem:[%s14365_s28 + $0x90] sm:$0xff]  ;;  %v1185_v7 = vld [vmem:[%s14365_s28 + $0xa8] sm:$0xff] }
 0x258   : >> { %v10816_v5 = vpack.c.bf16 %v1186_v3, %v1183_v63  ;;  %v1189_v8 = vld [vmem:[%s14365_s28 + $0xc8] sm:$0xff]  ;;  %v1192_v9 = vld [vmem:[%s14365_s28 + $0xe0] sm:$0xff]  ;;  %v10818_v12 = vpack.c.bf16 %v1185_v7, %v1182_v6  ;;  %v1191_v15 = vld [vmem:[%s14365_s28 + $0xd8] sm:$0xff] }
 0x259   : >> { %10811 = vmatpush1.bf16.msra.mxu0 %v10810_v59  ;;  %v10820_v13 = vpack.c.bf16 %v1192_v9, %v1189_v8  ;;  %v1188_v14 = vld [vmem:[%s14365_s28 + $0xc0] sm:$0xff]  ;;  %v1195_v16 = vld [vmem:[%s14365_s28 + $0xf8] sm:$0xff]  ;;  %v1198_v17 = vld [vmem:[%s14365_s28 + $0x110] sm:$0xff] }
 0x25a   : >> { %10813 = vmatprep.subr.bf16.mxu0 %v10812_v60  ;;  %v10822_v18 = vpack.c.bf16 %v1191_v15, %v1188_v14  ;;  %v10824_v19 = vpack.c.bf16 %v1198_v17, %v1195_v16  ;;  %v1194_v21 = vld [vmem:[%s14365_s28 + $0xf0] sm:$0xff]  ;;  %v1197_v23 = vld [vmem:[%s14365_s28 + $0x108] sm:$0xff]  ;;  %v1204_v28 = vld [vmem:[%s14365_s28 + $0x140] sm:$0xff]  ;;  %v1222_v16 = vsub.s32 1, %v19136_v20 }
 0x25b   : >> { %v1201_v25 = vld [vmem:[%s14365_s28 + $0x128] sm:$0xff]  ;;  %v10826_v29 = vpack.c.bf16 %v1197_v23, %v1194_v21  ;;  %v1200_v31 = vld [vmem:[%s14365_s28 + $0x120] sm:$0xff]  ;;  %v1203_v35 = vld [vmem:[%s14365_s28 + $0x138] sm:$0xff] }
 0x25c   : >> { %v10828_v30 = vpack.c.bf16 %v1204_v28, %v1201_v25  ;;  %v1207_v36 = vld [vmem:[%s14365_s28 + $0x158] sm:$0xff]  ;;  %v1210_v37 = vld [vmem:[%s14365_s28 + $0x170] sm:$0xff]  ;;  %v10830_v38 = vpack.c.bf16 %v1203_v35, %v1200_v31  ;;  %v1209_v44 = vld [vmem:[%s14365_s28 + $0x168] sm:$0xff] }
 0x25d   : >> { %10815 = vmatpush1.bf16.msra.mxu0 %v10814_v4  ;;  %v10832_v41 = vpack.c.bf16 %v1210_v37, %v1207_v36  ;;  %v1206_v43 = vld [vmem:[%s14365_s28 + $0x150] sm:$0xff]  ;;  %v1169_v49 = vld [vmem:[%s14365_s28 + $0x28] sm:$0xff]  ;;  %v1172_v51 = vld [vmem:[%s14365_s28 + $0x40] sm:$0xff] }
 0x25e   : >> { %10817 = vmatprep.subr.bf16.mxu0 %v10816_v5  ;;  %v10834_v45 = vpack.c.bf16 %v1209_v44, %v1206_v43  ;;  %v1166_v48 = vld [vmem:[%s14365_s28 + $0x10] sm:$0xff]  ;;  %v1175_v52 = vld [vmem:[%s14365_s28 + $0x58] sm:$0xff]  ;;  %v1184_v56 = vld [vmem:[%s14365_s28 + $0xa0] sm:$0xff] }
 0x25f   : >> { %v10836_v50 = vpack.c.bf16 %v1169_v49, %v1166_v48  ;;  %v10840_v53 = vpack.c.bf16 %v1175_v52, %v1172_v51  ;;  %v1178_v54 = vld [vmem:[%s14365_s28 + $0x70] sm:$0xff]  ;;  %v1187_v59 = vld [vmem:[%s14365_s28 + $0xb8] sm:$0xff]  ;;  %v1193_v62 = vld [vmem:[%s14365_s28 + $0xe8] sm:$0xff] }
 0x260   : >> { %v10848_v60 = vpack.c.bf16 %v1187_v59, %v1184_v56  ;;  %v1190_v61 = vld [vmem:[%s14365_s28 + $0xd0] sm:$0xff]  ;;  %v1196_v3 = vld [vmem:[%s14365_s28 + $0x100] sm:$0xff]  ;;  %v1199_v4 = vld [vmem:[%s14365_s28 + $0x118] sm:$0xff] }
 0x261   : >> { %10819 = vmatpush1.bf16.msra.mxu0 %v10818_v12  ;;  %10837 = vmatprep.subr.bf16.mxu1 %v10836_v50  ;;  %v10852_v63 = vpack.c.bf16 %v1193_v62, %v1190_v61  ;;  %v10856_v5 = vpack.c.bf16 %v1199_v4, %v1196_v3  ;;  %v1202_v6 = vld [vmem:[%s14365_s28 + $0x130] sm:$0xff]  ;;  %v1205_v7 = vld [vmem:[%s14365_s28 + $0x148] sm:$0xff]  ;;  %v1208_v9 = vld [vmem:[%s14365_s28 + $0x160] sm:$0xff] }
 0x262   : >> { %10821 = vmatprep.subr.bf16.mxu0 %v10820_v13  ;;  %10839 = vmatpush3.bf16.msra.mxu1 %v10836_v50  ;;  %v10860_v8 = vpack.c.bf16 %v1205_v7, %v1202_v6  ;;  %v1211_v12 = vld [vmem:[%s14365_s28 + $0x178] sm:$0xff]  ;;  %v1214_v14 = vld [vmem:[%s14464_s27] sm:$0x7]  ;;  %vm14487_vm3 = vmpackc.low %vm2369_vm2, %vm2369_vm2 }
 0x263   : >> { %10841 = vmatprep.subr.bf16.mxu1 %v10840_v53  ;;  %v10864_v13 = vpack.c.bf16 %v1211_v12, %v1208_v9  ;;  %v14469_v15 = vrot.slane %v1214_v14, %v19154_v22  ;;  %v14473_v21 = vrot.slane %v1214_v14, %v1222_v16 }
 0x265   : >> { %10823 = vmatpush1.bf16.msra.mxu0 %v10822_v18 }
 0x266   : >> { %10825 = vmatprep.subr.bf16.mxu0 %v10824_v19  ;;  %10843 = vmatpush3.bf16.msra.mxu1 %v10840_v53 }
 0x269   : >> { %10827 = vmatpush1.bf16.msra.mxu0 %v10826_v29 }
 0x26a   : >> { %10829 = vmatprep.subr.bf16.mxu0 %v10828_v30 }
 0x26d   : >> { %10831 = vmatpush1.bf16.msra.mxu0 %v10830_v38 }
 0x26e   : >> { %10833 = vmatprep.subr.bf16.mxu0 %v10832_v41 }
 0x271   : >> { %10835 = vmatpush1.bf16.msra.mxu0 %v10834_v45 }
 0x274   : >> { %1296 = vmatmul.mubr.f32.vlgmr.msra.gmra.mrb[0].mxu0 %v13648_v57 }
 0x275   : >> { %1301 = vmatprep.mubr.f32.mxu0 %v13672_v42 }
 0x278   : >> { %1302 = vmatmul.mubr.f32.gmra.mrb[2].mxu0 %v13644_v10 }
 0x279   : >> { %1307 = vmatprep.mubr.f32.mxu0 %v13672_v42 }
 0x27c   : >> { %1308 = vmatmul.mubr.f32.gmra.mrb[4].mxu0 %v13640_v33 }
 0x27d   : >> { %1313 = vmatprep.mubr.f32.mxu0 %v13672_v42 }
 0x280   : >> { %1314 = vmatmul.mubr.f32.gmra.mrb[6].mxu0 %v13636_v46 }
 0x281   : >> { %1319 = vmatprep.mubr.f32.mxu0 %v13672_v42 }
 0x284   : >> { %1320 = vmatmul.mubr.f32.gmra.mrb[8].mxu0 %v13632_v1 }
 0x285   : >> { %1325 = vmatprep.mubr.f32.mxu0 %v13672_v42 }
 0x288   : >> { %1326 = vmatmul.mubr.f32.gmra.mrb[10].mxu0 %v13628_v26 }
 0x289   : >> { %1331 = vmatprep.mubr.f32.mxu0 %v13672_v42 }
 0x28c   : >> { %1332 = vmatmul.mubr.f32.gmra.mrb[12].mxu0 %v13624_v32 }
 0x28d   : >> { %1337 = vmatprep.mubr.f32.mxu0 %v13672_v42 }
 0x290   : >> { %1338 = vmatmul.mubr.f32.gmra.mrb[14].mxu0 %v13620_v39 }
 0x291   : >> { %1343 = vmatprep.mubr.f32.mxu0 %v13672_v42 }
 0x294   : >> { %1344 = vmatmul.mubr.f32.gmra.mrb[16].mxu0 %v13616_v58 }
 0x295   : >> { %1349 = vmatprep.mubr.f32.mxu0 %v13672_v42 }
 0x298   : >> { %1350 = vmatmul.mubr.f32.gmra.mrb[18].mxu0 %v13612_v11 }
 0x299   : >> { %1355 = vmatprep.mubr.f32.mxu0 %v13672_v42 }
 0x29c   : >> { %1356 = vmatmul.mubr.f32.gmra.mrb[20].mxu0 %v13608_v34 }
 0x29d   : >> { %1361 = vmatprep.mubr.f32.mxu0 %v13672_v42 }
 0x2a0   : >> { %1362 = vmatmul.mubr.f32.gmra.mrb[22].mxu0 %v13604_v47 }
 0x2a1   : >> { %1367 = vmatprep.mubr.f32.mxu0 %v13672_v42 }
 0x2a4   : >> { %1368 = vmatmul.mubr.f32.gmra.mrb[24].mxu0 %v13600_v2 }
 0x2a5   : >> { %1373 = vmatprep.mubr.f32.mxu0 %v13672_v42 }
 0x2a8   : >> { %1374 = vmatmul.mubr.f32.gmra.mrb[26].mxu0 %v13596_v27 }
 0x2a9   : >> { %1379 = vmatprep.mubr.f32.mxu0 %v13672_v42 }
 0x2ac   : >> { %1380 = vmatmul.mubr.f32.gmra.mrb[28].mxu0 %v13592_v24 }
 0x2ad   : >> { %1385 = vmatprep.mubr.f32.mxu0 %v13672_v42  ;;  %v1181_v42 = vld [vmem:[%s14365_s28 + $0x88] sm:$0xff] }
 0x2ae   : >> { %v10844_v55 = vpack.c.bf16 %v1181_v42, %v1178_v54 }
 0x2b0   : >> { %1386 = vmatmul.mubr.f32.gmra.mrb[30].mxu0 %v13588_v40  ;;  %10845 = vmatprep.subr.bf16.mxu1 %v10844_v55 }
 0x2b1   : >> { %10847 = vmatpush3.bf16.msra.mxu1 %v10844_v55 }
 0x2b2   : >> { %10849 = vmatprep.subr.bf16.mxu1 %v10848_v60 }
 0x2b5   : >> { %10851 = vmatpush3.bf16.msra.mxu1 %v10848_v60 }
 0x2b6   : >> { %10853 = vmatprep.subr.bf16.mxu1 %v10852_v63 }
 0x2b9   : >> { %10855 = vmatpush3.bf16.msra.mxu1 %v10852_v63 }
 0x2ba   : >> { %10857 = vmatprep.subr.bf16.mxu1 %v10856_v5 }
 0x2bd   : >> { %10859 = vmatpush3.bf16.msra.mxu1 %v10856_v5 }
 0x2be   : >> { %10861 = vmatprep.subr.bf16.mxu1 %v10860_v8 }
 0x2c1   : >> { %10863 = vmatpush3.bf16.msra.mxu1 %v10860_v8 }
 0x2c2   : >> { %10865 = vmatprep.subr.bf16.mxu1 %v10864_v13 }
 0x2c5   : >> { %10867 = vmatpush3.bf16.msra.mxu1 %v10864_v13 }
 0x2c8   : >> { %9640 = vmatmul.mubr.f32.vlgmr.msra.gmra.mrb[0].mxu1 %v13644_v10 }
 0x2c9   : >> { %9642 = vmatprep.mubr.f32.mxu1 %v13640_v33 }
 0x2cc   : >> { %9643 = vmatmul.mubr.f32.gmra.mrb[2].mxu1 %v13636_v46 }
 0x2cd   : >> { %9645 = vmatprep.mubr.f32.mxu1 %v13632_v1 }
 0x2d0   : >> { %9646 = vmatmul.mubr.f32.gmra.mrb[4].mxu1 %v13628_v26 }
 0x2d1   : >> { %9648 = vmatprep.mubr.f32.mxu1 %v13624_v32 }
 0x2d4   : >> { %9649 = vmatmul.mubr.f32.gmra.mrb[6].mxu1 %v13620_v39 }
 0x2d5   : >> { %9651 = vmatprep.mubr.f32.mxu1 %v13616_v58 }
 0x2d8   : >> { %9652 = vmatmul.mubr.f32.gmra.mrb[8].mxu1 %v13612_v11 }
 0x2d9   : >> { %9654 = vmatprep.mubr.f32.mxu1 %v13608_v34 }
 0x2dc   : >> { %9655 = vmatmul.mubr.f32.gmra.mrb[10].mxu1 %v13604_v47 }
 0x2dd   : >> { %9657 = vmatprep.mubr.f32.mxu1 %v13600_v2 }
 0x2e0   : >> { %9658 = vmatmul.mubr.f32.gmra.mrb[12].mxu1 %v13596_v27 }
 0x2e1   : >> { %9660 = vmatprep.mubr.f32.mxu1 %v13592_v24 }
 0x2e4   : >> { %9661 = vmatmul.mubr.f32.gmra.mrb[14].mxu1 %v13588_v40 }
 0x347   : >> { %v1297_v17 = vpop.f32.mrb[0].mxu0 }
 0x348   : >> { %v1298_v18 = vadd.f32 %v1297_v17, %v14469_v15  ;;  %v1299_v19 = vpop.f32.mrb[1].mxu0 }
 0x349   : >> { %v1300_v29 = vadd.f32 %v1299_v19, %v14473_v21 }
 0x34a   : >> { %1553 = vrot.lane.b32.xlu0 %v1298_v18, %s13673_s4  ;;  %9695 = vmatprep.mubr.msk.f32.mxu0 %vm2369_vm2, %v1298_v18 }
 0x34b   : >> { %v1303_v23 = vpop.f32.mrb[2].mxu0 }
 0x34c   : >> { %v14478_v25 = vadd.f32 %v1303_v23, %v14469_v15  ;;  %v1305_v28 = vpop.f32.mrb[3].mxu0 }
 0x34d   : >> { %v1306_v30 = vadd.f32 %v1305_v28, %v14473_v21 }
 0x34e   : >> { %1585 = vrot.lane.b32.xlu0 %v1298_v18, %s13674_s8  ;;  %1555 = vrot.lane.b32.xlu1 %v14478_v25, %s13673_s4 }
 0x34f   : >> { %v14491_v35 = vpop.f32.mrb[4].mxu0  ;;  %v10868_v36 = vpack.c.bf16 %v1306_v30, %v1300_v29  ;;  %v14493_v37 = vpack.i.bf16 %v1306_v30, %v1300_v29 }
 0x350   : >> { %v1311_v38 = vpop.f32.mrb[5].mxu0 }
 0x351   : >> { %10870 = vmatprep.subr.msk.bf16.mxu0 %vm14487_vm3, %v10868_v36  ;;  %v1312_v41 = vadd.f32 %v1311_v38, %v14473_v21 }
 0x352   : >> { %1617 = vrot.lane.b32.xlu0 %v1298_v18, %s13675_s26  ;;  %10873 = vmatpush3.bf16.xpose.msk.msra.mxu0 %vm14487_vm3, %v10868_v36 }
 0x353   : >> { %1587 = vrot.lane.b32.xlu1 %v14478_v25, %s13674_s8  ;;  %v14503_v43 = vpop.f32.mrb[6].mxu0 }
 0x354   : >> { %v1317_v44 = vpop.f32.mrb[7].mxu0  ;;  %v1316_v38 = vadd.f32 %v14503_v43, %v14469_v15 }
 0x355   : >> { %v1318_v45 = vadd.f32 %v1317_v44, %v14473_v21 }
 0x356   : >> { %1649 = vrot.lane.b32.xlu0 %v1298_v18, %s13676_s17 }
 0x357   : >> { %1619 = vrot.lane.b32.xlu1 %v14478_v25, %s13675_s26  ;;  %v1321_v48 = vpop.f32.mrb[8].mxu0  ;;  %v10874_v49 = vpack.c.bf16 %v1318_v45, %v1312_v41  ;;  %v14509_v50 = vpack.i.bf16 %v1318_v45, %v1312_v41  ;;  %v1310_v45 = vadd.f32 %v14491_v35, %v14469_v15 }
 0x358   : >> { %v14512_v51 = vadd.f32 %v1321_v48, %v14469_v15  ;;  %v1323_v52 = vpop.f32.mrb[9].mxu0 }
 0x359   : >> { %10876 = vmatprep.subr.msk.bf16.mxu0 %vm14487_vm3, %v10874_v49  ;;  %v1324_v53 = vadd.f32 %v1323_v52, %v14473_v21 }
 0x35a   : >> { %1681 = vrot.lane.b32.xlu0 %v1298_v18, %s13677_s29  ;;  %10879 = vmatpush3.bf16.xpose.msk.msra.mxu0 %vm14487_vm3, %v10874_v49 }
 0x35b   : >> { %1651 = vrot.lane.b32.xlu1 %v14478_v25, %s13676_s17  ;;  %v1327_v54 = vpop.f32.mrb[10].mxu0 }
 0x35c   : >> { %v14523_v42 = vadd.f32 %v1327_v54, %v14469_v15  ;;  %v1329_v55 = vpop.f32.mrb[11].mxu0 }
 0x35d   : >> { %v1330_v56 = vadd.f32 %v1329_v55, %v14473_v21 }
 0x35e   : >> { %1713 = vrot.lane.b32.xlu0 %v1298_v18, %s13678_s19 }
 0x35f   : >> { %1683 = vrot.lane.b32.xlu1 %v14478_v25, %s13677_s29  ;;  %v1333_v59 = vpop.f32.mrb[12].mxu0  ;;  %v10880_v60 = vpack.c.bf16 %v1330_v56, %v1324_v53  ;;  %v14529_v61 = vpack.i.bf16 %v1330_v56, %v1324_v53 }
 0x360   : >> { %v14532_v62 = vadd.f32 %v1333_v59, %v14469_v15  ;;  %v1335_v63 = vpop.f32.mrb[13].mxu0 }
 0x361   : >> { %10882 = vmatprep.subr.msk.bf16.mxu0 %vm14487_vm3, %v10880_v60  ;;  %v1336_v3 = vadd.f32 %v1335_v63, %v14473_v21 }
 0x362   : >> { %1745 = vrot.lane.b32.xlu0 %v1298_v18, %s13679_s5  ;;  %10885 = vmatpush3.bf16.xpose.msk.msra.mxu0 %vm14487_vm3, %v10880_v60 }
 0x363   : >> { %1715 = vrot.lane.b32.xlu1 %v14478_v25, %s13678_s19  ;;  %v1339_v4 = vpop.f32.mrb[14].mxu0 }
 0x364   : >> { %v14543_v5 = vadd.f32 %v1339_v4, %v14469_v15  ;;  %v1341_v6 = vpop.f32.mrb[15].mxu0 }
 0x365   : >> { %v1342_v7 = vadd.f32 %v1341_v6, %v14473_v21 }
 0x366   : >> { %11984 = vrot.lane.b32.xlu0 %v14493_v37, %s13673_s4 }
 0x367   : >> { %1747 = vrot.lane.b32.xlu1 %v14478_v25, %s13679_s5  ;;  %v1345_v8 = vpop.f32.mrb[16].mxu0  ;;  %v10886_v9 = vpack.c.bf16 %v1342_v7, %v1336_v3  ;;  %v14550_v12 = vpack.i.bf16 %v1342_v7, %v1336_v3 }
 0x368   : >> { %v14553_v13 = vadd.f32 %v1345_v8, %v14469_v15  ;;  %v1347_v14 = vpop.f32.mrb[17].mxu0 }
 0x369   : >> { %10888 = vmatprep.subr.msk.bf16.mxu0 %vm14487_vm3, %v10886_v9  ;;  %v1348_v16 = vadd.f32 %v1347_v14, %v14473_v21 }
 0x36a   : >> { %11989 = vrot.lane.b32.xlu0 %v14493_v37, %s13674_s8  ;;  %10891 = vmatpush3.bf16.xpose.msk.msra.mxu0 %vm14487_vm3, %v10886_v9 }
 0x36b   : >> { %11994 = vrot.lane.b32.xlu1 %v14493_v37, %s13675_s26  ;;  %v1351_v17 = vpop.f32.mrb[18].mxu0 }
 0x36c   : >> { %v14565_v18 = vadd.f32 %v1351_v17, %v14469_v15  ;;  %v1353_v19 = vpop.f32.mrb[19].mxu0 }
 0x36d   : >> { %v1354_v23 = vadd.f32 %v1353_v19, %v14473_v21 }
 0x36e   : >> { %11999 = vrot.lane.b32.xlu0 %v14493_v37, %s13676_s17 }
 0x36f   : >> { %12004 = vrot.lane.b32.xlu1 %v14493_v37, %s13677_s29  ;;  %v1357_v28 = vpop.f32.mrb[20].mxu0  ;;  %v10892_v29 = vpack.c.bf16 %v1354_v23, %v1348_v16  ;;  %v14597_v55 = vpack.i.bf16 %v1354_v23, %v1348_v16 }
 0x370   : >> { %v14573_v30 = vadd.f32 %v1357_v28, %v14469_v15  ;;  %v1359_v36 = vpop.f32.mrb[21].mxu0 }
 0x371   : >> { %10894 = vmatprep.subr.msk.bf16.mxu0 %vm14487_vm3, %v10892_v29  ;;  %v1360_v41 = vadd.f32 %v1359_v36, %v14473_v21 }
 0x372   : >> { %12009 = vrot.lane.b32.xlu0 %v14493_v37, %s13678_s19  ;;  %10897 = vmatpush3.bf16.xpose.msk.msra.mxu0 %vm14487_vm3, %v10892_v29 }
 0x373   : >> { %12014 = vrot.lane.b32.xlu1 %v14493_v37, %s13679_s5  ;;  %v1363_v44 = vpop.f32.mrb[22].mxu0 }
 0x374   : >> { %v14589_v48 = vadd.f32 %v1363_v44, %v14469_v15  ;;  %v1365_v49 = vpop.f32.mrb[23].mxu0 }
 0x375   : >> { %v1366_v52 = vadd.f32 %v1365_v49, %v14473_v21 }
 0x376   : >> { %1557 = vrot.lane.b32.xlu0 %v1310_v45, %s13673_s4 }
 0x377   : >> { %1559 = vrot.lane.b32.xlu1 %v1316_v38, %s13673_s4  ;;  %v1369_v43 = vpop.f32.mrb[24].mxu0  ;;  %v10898_v53 = vpack.c.bf16 %v1366_v52, %v1360_v41 }
 0x378   : >> { %v14595_v37 = vadd.f32 %v1369_v43, %v14469_v15  ;;  %v1371_v54 = vpop.f32.mrb[25].mxu0 }
 0x379   : >> { %10900 = vmatprep.subr.msk.bf16.mxu0 %vm14487_vm3, %v10898_v53  ;;  %v14606_v35 = vadd.f32 %v1371_v54, %v14473_v21 }
 0x37a   : >> { %1589 = vrot.lane.b32.xlu0 %v1310_v45, %s13674_s8  ;;  %10903 = vmatpush3.bf16.xpose.msk.msra.mxu0 %vm14487_vm3, %v10898_v53 }
 0x37b   : >> { %1591 = vrot.lane.b32.xlu1 %v1316_v38, %s13674_s8  ;;  %v1375_v56 = vpop.f32.mrb[26].mxu0 }
 0x37c   : >> { %v14609_v59 = vadd.f32 %v1375_v56, %v14469_v15  ;;  %v1377_v60 = vpop.f32.mrb[27].mxu0 }
 0x37d   : >> { %v14612_v63 = vadd.f32 %v1377_v60, %v14473_v21 }
 0x37e   : >> { %1621 = vrot.lane.b32.xlu0 %v1310_v45, %s13675_s26 }
 0x37f   : >> { %1623 = vrot.lane.b32.xlu1 %v1316_v38, %s13675_s26  ;;  %v1381_v3 = vpop.f32.mrb[28].mxu0  ;;  %v10904_v4 = vpack.c.bf16 %v14612_v63, %v14606_v35 }
 0x380   : >> { %v14619_v6 = vadd.f32 %v1381_v3, %v14469_v15  ;;  %v1383_v7 = vpop.f32.mrb[29].mxu0 }
 0x381   : >> { %10906 = vmatprep.subr.msk.bf16.mxu0 %vm14487_vm3, %v10904_v4  ;;  %v14628_v8 = vadd.f32 %v1383_v7, %v14473_v21 }
 0x382   : >> { %1653 = vrot.lane.b32.xlu0 %v1310_v45, %s13676_s17  ;;  %10909 = vmatpush3.bf16.xpose.msk.msra.mxu0 %vm14487_vm3, %v10904_v4 }
 0x383   : >> { %1655 = vrot.lane.b32.xlu1 %v1316_v38, %s13676_s17  ;;  %v1387_v9 = vpop.f32.mrb[30].mxu0 }
 0x384   : >> { %v14631_v14 = vadd.f32 %v1387_v9, %v14469_v15  ;;  %v1389_v16 = vpop.f32.mrb[31].mxu0  ;;  %v14678_v15 = vpack.i.bf16 %v1366_v52, %v1360_v41 }
 0x385   : >> { %v14634_v17 = vadd.f32 %v1389_v16, %v14473_v21 }
 0x386   : >> { %1685 = vrot.lane.b32.xlu0 %v1310_v45, %s13677_s29 }
 0x387   : >> { %1687 = vrot.lane.b32.xlu1 %v1316_v38, %s13677_s29  ;;  %v10910_v19 = vpack.c.bf16 %v14634_v17, %v14628_v8 }
 0x389   : >> { %10912 = vmatprep.subr.msk.bf16.mxu0 %vm14487_vm3, %v10910_v19 }
 0x38a   : >> { %1717 = vrot.lane.b32.xlu0 %v1310_v45, %s13678_s19  ;;  %10915 = vmatpush3.bf16.xpose.msk.msra.mxu0 %vm14487_vm3, %v10910_v19 }
 0x38b   : >> { %1719 = vrot.lane.b32.xlu1 %v1316_v38, %s13678_s19 }
 0x38e   : >> { %1749 = vrot.lane.b32.xlu0 %v1310_v45, %s13679_s5 }
 0x38f   : >> { %1751 = vrot.lane.b32.xlu1 %v1316_v38, %s13679_s5 }
 0x391   : >> { %9696 = vmatmul.mubr.msk.f32.vlgmr.msra.gmra.mrb[32].mxu0 %vm2369_vm2, %v14478_v25 }
 0x392   : >> { %12019 = vrot.lane.b32.xlu0 %v14509_v50, %s13673_s4  ;;  %9698 = vmatprep.mubr.msk.f32.mxu0 %vm2369_vm2, %v1310_v45 }
 0x393   : >> { %12029 = vrot.lane.b32.xlu1 %v14509_v50, %s13675_s26 }
 0x395   : >> { %9699 = vmatmul.mubr.msk.f32.gmra.mrb[34].mxu0 %vm2369_vm2, %v1316_v38 }
 0x396   : >> { %12024 = vrot.lane.b32.xlu0 %v14509_v50, %s13674_s8  ;;  %9701 = vmatprep.mubr.msk.f32.mxu0 %vm2369_vm2, %v14512_v51 }
 0x397   : >> { %12039 = vrot.lane.b32.xlu1 %v14509_v50, %s13677_s29 }
 0x399   : >> { %9702 = vmatmul.mubr.msk.f32.gmra.mrb[36].mxu0 %vm2369_vm2, %v14523_v42 }
 0x39a   : >> { %12034 = vrot.lane.b32.xlu0 %v14509_v50, %s13676_s17  ;;  %9704 = vmatprep.mubr.msk.f32.mxu0 %vm2369_vm2, %v14532_v62 }
 0x39b   : >> { %12049 = vrot.lane.b32.xlu1 %v14509_v50, %s13679_s5 }
 0x39d   : >> { %9705 = vmatmul.mubr.msk.f32.gmra.mrb[38].mxu0 %vm2369_vm2, %v14543_v5 }
 0x39e   : >> { %12044 = vrot.lane.b32.xlu0 %v14509_v50, %s13678_s19  ;;  %9707 = vmatprep.mubr.msk.f32.mxu0 %vm2369_vm2, %v14553_v13 }
 0x39f   : >> { %1657 = vrot.lane.b32.xlu1 %v14512_v51, %s13676_s17 }
 0x3a1   : >> { %9708 = vmatmul.mubr.msk.f32.gmra.mrb[40].mxu0 %vm2369_vm2, %v14565_v18 }
 0x3a2   : >> { %1561 = vrot.lane.b32.xlu0 %v14512_v51, %s13673_s4  ;;  %9710 = vmatprep.mubr.msk.f32.mxu0 %vm2369_vm2, %v14573_v30 }
 0x3a3   : >> { %1563 = vrot.lane.b32.xlu1 %v14523_v42, %s13673_s4 }
 0x3a5   : >> { %9711 = vmatmul.mubr.msk.f32.gmra.mrb[42].mxu0 %vm2369_vm2, %v14589_v48 }
 0x3a6   : >> { %1593 = vrot.lane.b32.xlu0 %v14512_v51, %s13674_s8  ;;  %9713 = vmatprep.mubr.msk.f32.mxu0 %vm2369_vm2, %v14595_v37 }
 0x3a7   : >> { %1595 = vrot.lane.b32.xlu1 %v14523_v42, %s13674_s8 }
 0x3a9   : >> { %9714 = vmatmul.mubr.msk.f32.gmra.mrb[44].mxu0 %vm2369_vm2, %v14609_v59 }
 0x3aa   : >> { %1625 = vrot.lane.b32.xlu0 %v14512_v51, %s13675_s26  ;;  %9716 = vmatprep.mubr.msk.f32.mxu0 %vm2369_vm2, %v14619_v6 }
 0x3ab   : >> { %1627 = vrot.lane.b32.xlu1 %v14523_v42, %s13675_s26 }
 0x3ad   : >> { %9717 = vmatmul.mubr.msk.f32.gmra.mrb[46].mxu0 %vm2369_vm2, %v14631_v14 }
 0x3ae   : >> { %1689 = vrot.lane.b32.xlu0 %v14512_v51, %s13677_s29 }
 0x3af   : >> { %1659 = vrot.lane.b32.xlu1 %v14523_v42, %s13676_s17 }
 0x3b2   : >> { %1721 = vrot.lane.b32.xlu0 %v14512_v51, %s13678_s19 }
 0x3b3   : >> { %1691 = vrot.lane.b32.xlu1 %v14523_v42, %s13677_s29 }
 0x3b6   : >> { %1753 = vrot.lane.b32.xlu0 %v14512_v51, %s13679_s5 }
 0x3b7   : >> { %1723 = vrot.lane.b32.xlu1 %v14523_v42, %s13678_s19 }
 0x3ba   : >> { %12059 = vrot.lane.b32.xlu0 %v14529_v61, %s13674_s8 }
 0x3bb   : >> { %1755 = vrot.lane.b32.xlu1 %v14523_v42, %s13679_s5 }
 0x3bc   : >> { %v1554_v21 = vpop.permute.xlu0 %1553 }
 0x3bd   : >> { %9751 = vmatprep.mubr.msk.f32.mxu1 %vm2369_vm2, %v1554_v21 }
 0x3be   : >> { %12069 = vrot.lane.b32.xlu0 %v14529_v61, %s13676_s17 }
 0x3bf   : >> { %12054 = vrot.lane.b32.xlu1 %v14529_v61, %s13673_s4 }
 0x3c0   : >> { %v1586_v25 = vpop.permute.xlu0 %1585  ;;  %v14727_v50 = vpop.permute.xlu1 %1555 }
 0x3c1   : >> { %9807 = vmatprep.mubr.msk.f32.mxu0 %vm2369_vm2, %v1586_v25 }
 0x3c2   : >> { %12079 = vrot.lane.b32.xlu0 %v14529_v61, %s13678_s19 }
 0x3c3   : >> { %12064 = vrot.lane.b32.xlu1 %v14529_v61, %s13675_s26 }
 0x3c4   : >> { %v14734_v51 = vpop.permute.xlu0 %1617 }
 0x3c5   : >> { %19157 = vst [vmem:[#allocation54_spill] sm:$0xff] %v14734_v51  ;;  %v14736_v42 = vpop.permute.xlu1 %1587 }
 0x3c6   : >> { %1565 = vrot.lane.b32.xlu0 %v14532_v62, %s13673_s4 }
 0x3c7   : >> { %12074 = vrot.lane.b32.xlu1 %v14529_v61, %s13677_s29 }
 0x3c8   : >> { %v14742_v23 = vpop.permute.xlu0 %1649 }
 0x3c9   : >> { %19158 = vst [vmem:[#allocation55_spill] sm:$0xff] %v14742_v23  ;;  %v14744_v28 = vpop.permute.xlu1 %1619 }
 0x3ca   : >> { %19159 = vst [vmem:[#allocation56_spill] sm:$0xff] %v14744_v28  ;;  %1597 = vrot.lane.b32.xlu0 %v14532_v62, %s13674_s8 }
 0x3cb   : >> { %12084 = vrot.lane.b32.xlu1 %v14529_v61, %s13679_s5 }
 0x3cc   : >> { %v14750_v29 = vpop.permute.xlu0 %1681 }
 0x3cd   : >> { %19160 = vst [vmem:[#allocation57_spill] sm:$0xff] %v14750_v29  ;;  %v14752_v36 = vpop.permute.xlu1 %1651 }
 0x3ce   : >> { %19161 = vst [vmem:[#allocation58_spill] sm:$0xff] %v14752_v36  ;;  %1629 = vrot.lane.b32.xlu0 %v14532_v62, %s13675_s26 }
 0x3cf   : >> { %1567 = vrot.lane.b32.xlu1 %v14543_v5, %s13673_s4 }
 0x3d0   : >> { %v14758_v38 = vpop.permute.xlu0 %1713 }
 0x3d1   : >> { %19162 = vst [vmem:[#allocation59_spill] sm:$0xff] %v14758_v38  ;;  %v14760_v41 = vpop.permute.xlu1 %1683 }
 0x3d2   : >> { %19163 = vst [vmem:[#allocation60_spill] sm:$0xff] %v14760_v41  ;;  %1661 = vrot.lane.b32.xlu0 %v14532_v62, %s13676_s17 }
 0x3d3   : >> { %1599 = vrot.lane.b32.xlu1 %v14543_v5, %s13674_s8 }
 0x3d4   : >> { %v14766_v61 = vpop.permute.xlu0 %1745 }
 0x3d5   : >> { %19164 = vst [vmem:[#allocation61_spill] sm:$0xff] %v14766_v61  ;;  %v14768_v44 = vpop.permute.xlu1 %1715 }
 0x3d6   : >> { %19165 = vst [vmem:[#allocation62_spill] sm:$0xff] %v14768_v44  ;;  %1693 = vrot.lane.b32.xlu0 %v14532_v62, %s13677_s29 }
 0x3d7   : >> { %1631 = vrot.lane.b32.xlu1 %v14543_v5, %s13675_s26 }
 0x3d8   : >> { %v11985_v45 = vpop.permute.xlu0 %11984 }
 0x3d9   : >> { %v11987_v49 = vunpack.i.h.bf16 %v11985_v45  ;;  %v11986_v52 = vunpack.i.l.bf16 %v11985_v45  ;;  %v14774_v43 = vpop.permute.xlu1 %1747 }
 0x3da   : >> { %19166 = vst [vmem:[#allocation63_spill] sm:$0xff] %v14774_v43  ;;  %1725 = vrot.lane.b32.xlu0 %v14532_v62, %s13678_s19 }
 0x3db   : >> { %v10916_v53 = vpack.c.bf16 %v11987_v49, %v11986_v52  ;;  %1663 = vrot.lane.b32.xlu1 %v14543_v5, %s13676_s17 }
 0x3dc   : >> { %v11990_v54 = vpop.permute.xlu0 %11989 }
 0x3dd   : >> { %v11992_v56 = vunpack.i.h.bf16 %v11990_v54  ;;  %v11991_v60 = vunpack.i.l.bf16 %v11990_v54  ;;  %v14780_v3 = vpop.permute.xlu1 %11994  ;;  %10918 = vmatprep.subr.msk.bf16.mxu1 %vm14487_vm3, %v10916_v53 }
 0x3de   : >> { %10921 = vmatpush3.bf16.xpose.msk.msra.mxu1 %vm14487_vm3, %v10916_v53  ;;  %1757 = vrot.lane.b32.xlu0 %v14532_v62, %s13679_s5 }
 0x3df   : >> { %v10964_v4 = vpack.c.bf16 %v11992_v56, %v11991_v60  ;;  %1695 = vrot.lane.b32.xlu1 %v14543_v5, %s13677_s29 }
 0x3e0   : >> { %v14790_v7 = vpop.permute.xlu0 %11999 }
 0x3e1   : >> { %v14792_v9 = vpop.permute.xlu1 %12004  ;;  %10966 = vmatprep.subr.msk.bf16.mxu0 %vm14487_vm3, %v10964_v4 }
 0x3e2   : >> { %19167 = vst [vmem:[#allocation64_spill] sm:$0xff] %v14792_v9  ;;  %12094 = vrot.lane.b32.xlu0 %v14550_v12, %s13674_s8  ;;  %10969 = vmatpush3.bf16.xpose.msk.msra.mxu0 %vm14487_vm3, %v10964_v4 }
 0x3e3   : >> { %1727 = vrot.lane.b32.xlu1 %v14543_v5, %s13678_s19 }
 0x3e4   : >> { %v14802_v62 = vpop.permute.xlu0 %12009 }
 0x3e5   : >> { %19168 = vst [vmem:[#allocation65_spill] sm:$0xff] %v14802_v62  ;;  %v14804_v16 = vpop.permute.xlu1 %12014 }
 0x3e6   : >> { %19169 = vst [vmem:[#allocation66_spill] sm:$0xff] %v14804_v16  ;;  %12104 = vrot.lane.b32.xlu0 %v14550_v12, %s13676_s17 }
 0x3e7   : >> { %1759 = vrot.lane.b32.xlu1 %v14543_v5, %s13679_s5 }
 0x3e8   : >> { %v14810_v19 = vpop.permute.xlu0 %1557 }
 0x3e9   : >> { %v14812_v21 = vpop.permute.xlu1 %1559 }
 0x3ea   : >> { %12114 = vrot.lane.b32.xlu0 %v14550_v12, %s13678_s19 }
 0x3eb   : >> { %12089 = vrot.lane.b32.xlu1 %v14550_v12, %s13673_s4 }
 0x3ec   : >> { %v14818_v25 = vpop.permute.xlu0 %1589 }
 0x3ed   : >> { %v14820_v45 = vpop.permute.xlu1 %1591 }
 0x3ee   : >> { %1569 = vrot.lane.b32.xlu0 %v14553_v13, %s13673_s4 }
 0x3ef   : >> { %12099 = vrot.lane.b32.xlu1 %v14550_v12, %s13675_s26 }
 0x3f0   : >> { %v14826_v5 = vpop.permute.xlu0 %1621 }
 0x3f1   : >> { %19170 = vst [vmem:[#allocation67_spill] sm:$0xff] %v14826_v5  ;;  %v14828_v49 = vpop.permute.xlu1 %1623 }
 0x3f2   : >> { %19171 = vst [vmem:[#allocation68_spill] sm:$0xff] %v14828_v49  ;;  %1601 = vrot.lane.b32.xlu0 %v14553_v13, %s13674_s8 }
 0x3f3   : >> { %12109 = vrot.lane.b32.xlu1 %v14550_v12, %s13677_s29 }
 0x3f4   : >> { %v14834_v52 = vpop.permute.xlu0 %1653 }
 0x3f5   : >> { %19172 = vst [vmem:[#allocation69_spill] sm:$0xff] %v14834_v52  ;;  %v14836_v53 = vpop.permute.xlu1 %1655 }
 0x3f6   : >> { %19173 = vst [vmem:[#allocation70_spill] sm:$0xff] %v14836_v53  ;;  %1633 = vrot.lane.b32.xlu0 %v14553_v13, %s13675_s26 }
 0x3f7   : >> { %12119 = vrot.lane.b32.xlu1 %v14550_v12, %s13679_s5 }
 0x3f8   : >> { %v14842_v54 = vpop.permute.xlu0 %1685 }
 0x3f9   : >> { %19174 = vst [vmem:[#allocation71_spill] sm:$0xff] %v14842_v54  ;;  %v14844_v56 = vpop.permute.xlu1 %1687 }
 0x3fa   : >> { %19175 = vst [vmem:[#allocation72_spill] sm:$0xff] %v14844_v56  ;;  %1697 = vrot.lane.b32.xlu0 %v14553_v13, %s13677_s29 }
 0x3fb   : >> { %1665 = vrot.lane.b32.xlu1 %v14553_v13, %s13676_s17 }
 0x3fc   : >> { %v14850_v60 = vpop.permute.xlu0 %1717 }
 0x3fd   : >> { %19176 = vst [vmem:[#allocation73_spill] sm:$0xff] %v14850_v60  ;;  %v14852_v4 = vpop.permute.xlu1 %1719 }
 0x3fe   : >> { %19177 = vst [vmem:[#allocation74_spill] sm:$0xff] %v14852_v4  ;;  %1729 = vrot.lane.b32.xlu0 %v14553_v13, %s13678_s19 }
 0x3ff   : >> { %1571 = vrot.lane.b32.xlu1 %v14565_v18, %s13673_s4 }
 0x400   : >> { %v14858_v12 = vpop.permute.xlu0 %1749 }
 0x401   : >> { %19178 = vst [vmem:[#allocation75_spill] sm:$0xff] %v14858_v12  ;;  %v14860_v0 = vpop.permute.xlu1 %1751 }
 0x402   : >> { %19179 = vst [vmem:[#allocation76_spill] sm:$0xff] %v14860_v0  ;;  %1761 = vrot.lane.b32.xlu0 %v14553_v13, %s13679_s5 }
 0x403   : >> { %1603 = vrot.lane.b32.xlu1 %v14565_v18, %s13674_s8 }
 0x404   : >> { %v12020_v22 = vpop.permute.xlu0 %12019 }
 0x405   : >> { %v12022_v24 = vunpack.i.h.bf16 %v12020_v22  ;;  %v12021_v40 = vunpack.i.l.bf16 %v12020_v22  ;;  %v14866_v2 = vpop.permute.xlu1 %12029 }
 0x406   : >> { %12124 = vrot.lane.b32.xlu0 %v14597_v55, %s13673_s4 }
 0x407   : >> { %v10922_v27 = vpack.c.bf16 %v12022_v24, %v12021_v40  ;;  %1635 = vrot.lane.b32.xlu1 %v14565_v18, %s13675_s26 }
 0x408   : >> { %v12025_v34 = vpop.permute.xlu0 %12024 }
 0x409   : >> { %v12027_v47 = vunpack.i.h.bf16 %v12025_v34  ;;  %v12026_v58 = vunpack.i.l.bf16 %v12025_v34  ;;  %v14872_v11 = vpop.permute.xlu1 %12039  ;;  %10924 = vmatprep.subr.msk.bf16.mxu1 %vm14487_vm3, %v10922_v27 }
 0x40a   : >> { %19180 = vst [vmem:[#allocation77_spill] sm:$0xff] %v14872_v11  ;;  %10927 = vmatpush3.bf16.xpose.msk.msra.mxu1 %vm14487_vm3, %v10922_v27  ;;  %12129 = vrot.lane.b32.xlu0 %v14597_v55, %s13674_s8  ;;  %v14904_v27 = vpop.f32.mrb[0].mxu1 }
 0x40b   : >> { %v10970_v22 = vpack.c.bf16 %v12027_v47, %v12026_v58  ;;  %1667 = vrot.lane.b32.xlu1 %v14565_v18, %s13676_s17 }
 0x40c   : >> { %v14882_v24 = vpop.permute.xlu0 %12034 }
 0x40d   : >> { %v14884_v40 = vpop.permute.xlu1 %12049  ;;  %10972 = vmatprep.subr.msk.bf16.mxu0 %vm14487_vm3, %v10970_v22 }
 0x40e   : >> { %19181 = vst [vmem:[#allocation78_spill] sm:$0xff] %v14884_v40  ;;  %12139 = vrot.lane.b32.xlu0 %v14597_v55, %s13676_s17  ;;  %10975 = vmatpush3.bf16.xpose.msk.msra.mxu0 %vm14487_vm3, %v10970_v22  ;;  %v14912_v22 = vpop.f32.mrb[1].mxu1 }
 0x40f   : >> { %1699 = vrot.lane.b32.xlu1 %v14565_v18, %s13677_s29  ;;  %v14916_v39 = vpop.f32.mrb[2].mxu1 }
 0x410   : >> { %v14894_v58 = vpop.permute.xlu0 %12044  ;;  %v14920_v26 = vpop.f32.mrb[3].mxu1 }
 0x411   : >> { %19182 = vst [vmem:[#allocation79_spill] sm:$0xff] %v14894_v58  ;;  %v14896_v34 = vpop.permute.xlu1 %1657  ;;  %v14924_v46 = vpop.f32.mrb[4].mxu1 }
 0x412   : >> { %19183 = vst [vmem:[#allocation80_spill] sm:$0xff] %v14896_v34  ;;  %12149 = vrot.lane.b32.xlu0 %v14597_v55, %s13678_s19  ;;  %v14928_v33 = vpop.f32.mrb[5].mxu1 }
 0x413   : >> { %1731 = vrot.lane.b32.xlu1 %v14565_v18, %s13678_s19  ;;  %v14932_v57 = vpop.f32.mrb[6].mxu1 }
 0x414   : >> { %v14902_v47 = vpop.permute.xlu0 %1561  ;;  %v14936_v0 = vpop.f32.mrb[7].mxu1 }
 0x415   : >> { %19184 = vst [vmem:[#allocation81_spill] sm:$0xff] %v14902_v47  ;;  %v14906_v13 = vpop.permute.xlu1 %1563  ;;  %v14940_v12 = vpop.f32.mrb[8].mxu1 }
 0x416   : >> { %19185 = vst [vmem:[#allocation82_spill] sm:$0xff] %v14906_v13  ;;  %1573 = vrot.lane.b32.xlu0 %v14573_v30, %s13673_s4  ;;  %v14944_v43 = vpop.f32.mrb[9].mxu1 }
 0x417   : >> { %1763 = vrot.lane.b32.xlu1 %v14565_v18, %s13679_s5  ;;  %v14948_v56 = vpop.f32.mrb[10].mxu1 }
 0x418   : >> { %v14914_v32 = vpop.permute.xlu0 %1593  ;;  %v14952_v41 = vpop.f32.mrb[11].mxu1 }
 0x419   : >> { %v14918_v1 = vpop.permute.xlu1 %1595  ;;  %v14956_v4 = vpop.f32.mrb[12].mxu1 }
 0x41a   : >> { %1605 = vrot.lane.b32.xlu0 %v14573_v30, %s13674_s8  ;;  %v14960_v40 = vpop.f32.mrb[13].mxu1 }
 0x41b   : >> { %12134 = vrot.lane.b32.xlu1 %v14597_v55, %s13675_s26 }
 0x41c   : >> { %v14930_v18 = vpop.permute.xlu0 %1625 }
 0x41d   : >> { %19186 = vst [vmem:[#allocation83_spill] sm:$0xff] %v14930_v18  ;;  %v14934_v10 = vpop.permute.xlu1 %1627 }
 0x41e   : >> { %19187 = vst [vmem:[#allocation84_spill] sm:$0xff] %v14934_v10  ;;  %1637 = vrot.lane.b32.xlu0 %v14573_v30, %s13675_s26 }
 0x41f   : >> { %12144 = vrot.lane.b32.xlu1 %v14597_v55, %s13677_s29 }
 0x420   : >> { %v14946_v61 = vpop.permute.xlu0 %1689 }
 0x421   : >> { %19188 = vst [vmem:[#allocation85_spill] sm:$0xff] %v14946_v61  ;;  %v14950_v54 = vpop.permute.xlu1 %1659  ;;  %v14968_v61 = vpop.f32.mrb[14].mxu1 }
 0x422   : >> { %19189 = vst [vmem:[#allocation86_spill] sm:$0xff] %v14950_v54  ;;  %1669 = vrot.lane.b32.xlu0 %v14573_v30, %s13676_s17  ;;  %v14972_v16 = vpop.f32.mrb[15].mxu1 }
 0x423   : >> { %12154 = vrot.lane.b32.xlu1 %v14597_v55, %s13679_s5 }
 0x424   : >> { %v14962_v60 = vpop.permute.xlu0 %1721 }
 0x425   : >> { %19190 = vst [vmem:[#allocation87_spill] sm:$0xff] %v14962_v60  ;;  %v14964_v44 = vpop.permute.xlu1 %1691 }
 0x426   : >> { %19191 = vst [vmem:[#allocation88_spill] sm:$0xff] %v14964_v44  ;;  %1701 = vrot.lane.b32.xlu0 %v14573_v30, %s13677_s29 }
 0x427   : >> { %1575 = vrot.lane.b32.xlu1 %v14589_v48, %s13673_s4 }
 0x428   : >> { %v14974_v29 = vpop.permute.xlu0 %1753 }
 0x429   : >> { %19192 = vst [vmem:[#allocation89_spill] sm:$0xff] %v14974_v29  ;;  %v14976_v38 = vpop.permute.xlu1 %1723 }
 0x42a   : >> { %19193 = vst [vmem:[#allocation90_spill] sm:$0xff] %v14976_v38  ;;  %1733 = vrot.lane.b32.xlu0 %v14573_v30, %s13678_s19 }
 0x42b   : >> { %1607 = vrot.lane.b32.xlu1 %v14589_v48, %s13674_s8 }
 0x42c   : >> { %v12060_v55 = vpop.permute.xlu0 %12059 }
 0x42d   : >> { %v12062_v44 = vunpack.i.h.bf16 %v12060_v55  ;;  %v12061_v60 = vunpack.i.l.bf16 %v12060_v55  ;;  %v14982_v10 = vpop.permute.xlu1 %1755 }
 0x42e   : >> { %19194 = vst [vmem:[#allocation91_spill] sm:$0xff] %v14982_v10  ;;  %12164 = vrot.lane.b32.xlu0 %v14678_v15, %s13674_s8 }
 0x42f   : >> { %v10976_v18 = vpack.c.bf16 %v12062_v44, %v12061_v60  ;;  %1639 = vrot.lane.b32.xlu1 %v14589_v48, %s13675_s26 }
 0x430   : >> { %v14988_v29 = vpop.permute.xlu0 %12069 }
 0x431   : >> { %v12055_v38 = vpop.permute.xlu1 %12054  ;;  %10978 = vmatprep.subr.msk.bf16.mxu0 %vm14487_vm3, %v10976_v18 }
 0x432   : >> { %v12057_v49 = vunpack.i.h.bf16 %v12055_v38  ;;  %v12056_v5 = vunpack.i.l.bf16 %v12055_v38  ;;  %12174 = vrot.lane.b32.xlu0 %v14678_v15, %s13676_s17  ;;  %10981 = vmatpush3.bf16.xpose.msk.msra.mxu0 %vm14487_vm3, %v10976_v18 }
 0x433   : >> { %1671 = vrot.lane.b32.xlu1 %v14589_v48, %s13676_s17 }
 0x434   : >> { %v10928_v44 = vpack.c.bf16 %v12057_v49, %v12056_v5  ;;  %v14998_v60 = vpop.permute.xlu0 %12079 }
 0x435   : >> { %19195 = vst [vmem:[#allocation92_spill] sm:$0xff] %v14998_v60  ;;  %v15000_v55 = vpop.permute.xlu1 %12064 }
 0x436   : >> { %10930 = vmatprep.subr.msk.bf16.mxu1 %vm14487_vm3, %v10928_v44  ;;  %12184 = vrot.lane.b32.xlu0 %v14678_v15, %s13678_s19 }
 0x437   : >> { %10933 = vmatpush3.bf16.xpose.msk.msra.mxu1 %vm14487_vm3, %v10928_v44  ;;  %1703 = vrot.lane.b32.xlu1 %v14589_v48, %s13677_s29 }
 0x438   : >> { %v15010_v38 = vpop.permute.xlu0 %1565 }
 0x439   : >> { %19196 = vst [vmem:[#allocation93_spill] sm:$0xff] %v15010_v38  ;;  %v15012_v18 = vpop.permute.xlu1 %12074 }
 0x43a   : >> { %19197 = vst [vmem:[#allocation94_spill] sm:$0xff] %v15012_v18  ;;  %12189 = vrot.lane.b32.xlu0 %v14678_v15, %s13679_s5 }
 0x43b   : >> { %1735 = vrot.lane.b32.xlu1 %v14589_v48, %s13678_s19 }
 0x43c   : >> { %v15018_v5 = vpop.permute.xlu0 %1597 }
 0x43d   : >> { %v15020_v49 = vpop.permute.xlu1 %12084 }
 0x43e   : >> { %19198 = vst [vmem:[#allocation95_spill] sm:$0xff] %v15020_v49  ;;  %1577 = vrot.lane.b32.xlu0 %v14595_v37, %s13673_s4 }
 0x43f   : >> { %12159 = vrot.lane.b32.xlu1 %v14678_v15, %s13673_s4 }
 0x440   : >> { %v15026_v44 = vpop.permute.xlu0 %1629 }
 0x441   : >> { %19199 = vst [vmem:[#allocation96_spill] sm:$0xff] %v15026_v44  ;;  %v15028_v10 = vpop.permute.xlu1 %1567 }
 0x442   : >> { %19200 = vst [vmem:[#allocation97_spill] sm:$0xff] %v15028_v10  ;;  %1609 = vrot.lane.b32.xlu0 %v14595_v37, %s13674_s8 }
 0x443   : >> { %12169 = vrot.lane.b32.xlu1 %v14678_v15, %s13675_s26 }
 0x444   : >> { %v15034_v18 = vpop.permute.xlu0 %1661 }
 0x445   : >> { %19201 = vst [vmem:[#allocation98_spill] sm:$0xff] %v15034_v18  ;;  %v15036_v54 = vpop.permute.xlu1 %1599  ;;  %v12193_v18 = vpack.i.bf16 %v14612_v63, %v14606_v35 }
 0x446   : >> { %1641 = vrot.lane.b32.xlu0 %v14595_v37, %s13675_s26 }
 0x447   : >> { %12179 = vrot.lane.b32.xlu1 %v14678_v15, %s13677_s29 }
 0x448   : >> { %v15042_v49 = vpop.permute.xlu0 %1693 }
 0x449   : >> { %19202 = vst [vmem:[#allocation99_spill] sm:$0xff] %v15042_v49  ;;  %v15044_v44 = vpop.permute.xlu1 %1631 }
 0x44a   : >> { %19203 = vst [vmem:[#allocation100_spill] sm:$0xff] %v15044_v44  ;;  %1705 = vrot.lane.b32.xlu0 %v14595_v37, %s13677_s29 }
 0x44b   : >> { %1673 = vrot.lane.b32.xlu1 %v14595_v37, %s13676_s17 }
 0x44c   : >> { %v15050_v28 = vpop.permute.xlu0 %1725 }
 0x44d   : >> { %19204 = vst [vmem:[#allocation101_spill] sm:$0xff] %v15050_v28  ;;  %v15054_v34 = vpop.permute.xlu1 %1663 }
 0x44e   : >> { %19205 = vst [vmem:[#allocation102_spill] sm:$0xff] %v15054_v34  ;;  %12194 = vrot.lane.b32.xlu0 %v12193_v18, %s13673_s4 }
 0x44f   : >> { %1579 = vrot.lane.b32.xlu1 %v14609_v59, %s13673_s4 }
 0x450   : >> { %v15059_v15 = vpop.permute.xlu0 %1757 }
 0x451   : >> { %19206 = vst [vmem:[#allocation103_spill] sm:$0xff] %v15059_v15  ;;  %v15061_v49 = vpop.permute.xlu1 %1695 }
 0x452   : >> { %19207 = vst [vmem:[#allocation104_spill] sm:$0xff] %v15061_v49  ;;  %12199 = vrot.lane.b32.xlu0 %v12193_v18, %s13674_s8 }
 0x453   : >> { %1611 = vrot.lane.b32.xlu1 %v14609_v59, %s13674_s8 }
 0x454   : >> { %v12095_v28 = vpop.permute.xlu0 %12094 }
 0x455   : >> { %v12097_v44 = vunpack.i.h.bf16 %v12095_v28  ;;  %v12096_v60 = vunpack.i.l.bf16 %v12095_v28  ;;  %v15066_v35 = vpop.permute.xlu1 %1727 }
 0x456   : >> { %19208 = vst [vmem:[#allocation105_spill] sm:$0xff] %v15066_v35  ;;  %12209 = vrot.lane.b32.xlu0 %v12193_v18, %s13676_s17 }
 0x457   : >> { %v10982_v63 = vpack.c.bf16 %v12097_v44, %v12096_v60  ;;  %1643 = vrot.lane.b32.xlu1 %v14609_v59, %s13675_s26 }
 0x458   : >> { %v15071_v34 = vpop.permute.xlu0 %12104 }
 0x459   : >> { %19209 = vst [vmem:[#allocation106_spill] sm:$0xff] %v15071_v34  ;;  %v15073_v15 = vpop.permute.xlu1 %1759  ;;  %10984 = vmatprep.subr.msk.bf16.mxu0 %vm14487_vm3, %v10982_v63 }
 0x45a   : >> { %19210 = vst [vmem:[#allocation107_spill] sm:$0xff] %v15073_v15  ;;  %12219 = vrot.lane.b32.xlu0 %v12193_v18, %s13678_s19  ;;  %10987 = vmatpush3.bf16.xpose.msk.msra.mxu0 %vm14487_vm3, %v10982_v63 }
 0x45b   : >> { %1675 = vrot.lane.b32.xlu1 %v14609_v59, %s13676_s17 }
 0x45c   : >> { %v15082_v28 = vpop.permute.xlu0 %12114 }
 0x45d   : >> { %19211 = vst [vmem:[#allocation108_spill] sm:$0xff] %v15082_v28  ;;  %v12090_v60 = vpop.permute.xlu1 %12089 }
 0x45e   : >> { %v12092_v44 = vunpack.i.h.bf16 %v12090_v60  ;;  %v12091_v49 = vunpack.i.l.bf16 %v12090_v60  ;;  %12224 = vrot.lane.b32.xlu0 %v12193_v18, %s13679_s5 }
 0x45f   : >> { %1707 = vrot.lane.b32.xlu1 %v14609_v59, %s13677_s29 }
 0x460   : >> { %v10934_v15 = vpack.c.bf16 %v12092_v44, %v12091_v49  ;;  %v15087_v35 = vpop.permute.xlu0 %1569 }
 0x461   : >> { %19212 = vst [vmem:[#allocation109_spill] sm:$0xff] %v15087_v35  ;;  %v15089_v53 = vpop.permute.xlu1 %12099 }
 0x462   : >> { %19213 = vst [vmem:[#allocation110_spill] sm:$0xff] %v15089_v53  ;;  %10936 = vmatprep.subr.msk.bf16.mxu1 %vm14487_vm3, %v10934_v15  ;;  %1581 = vrot.lane.b32.xlu0 %v14619_v6, %s13673_s4 }
 0x463   : >> { %10939 = vmatpush3.bf16.xpose.msk.msra.mxu1 %vm14487_vm3, %v10934_v15  ;;  %12204 = vrot.lane.b32.xlu1 %v12193_v18, %s13675_s26 }
 0x464   : >> { %v15098_v63 = vpop.permute.xlu0 %1601  ;;  %v15100_v60 = vpop.f32.mrb[32].mxu0 }
 0x465   : >> { %19214 = vst [vmem:[#allocation111_spill] sm:$0xff] %v15100_v60  ;;  %v15102_v49 = vpop.permute.xlu1 %12109  ;;  %v15104_v44 = vpop.f32.mrb[33].mxu0 }
 0x466   : >> { %19215 = vst [vmem:[#allocation112_spill] sm:$0xff] %v15102_v49  ;;  %19216 = vst [vmem:[#allocation113_spill] sm:$0xff] %v15104_v44  ;;  %1613 = vrot.lane.b32.xlu0 %v14619_v6, %s13674_s8 }
 0x467   : >> { %12214 = vrot.lane.b32.xlu1 %v12193_v18, %s13677_s29 }
 0x468   : >> { %v15109_v28 = vpop.permute.xlu0 %1633  ;;  %v15111_v11 = vpop.f32.mrb[34].mxu0 }
 0x469   : >> { %19217 = vst [vmem:[#allocation114_spill] sm:$0xff] %v15109_v28  ;;  %19218 = vst [vmem:[#allocation115_spill] sm:$0xff] %v15111_v11  ;;  %v15113_v15 = vpop.permute.xlu1 %12119  ;;  %v15115_v52 = vpop.f32.mrb[35].mxu0 }
 0x46a   : >> { %19219 = vst [vmem:[#allocation116_spill] sm:$0xff] %v15113_v15  ;;  %19220 = vst [vmem:[#allocation117_spill] sm:$0xff] %v15115_v52  ;;  %1645 = vrot.lane.b32.xlu0 %v14619_v6, %s13675_s26 }
 0x46b   : >> { %1583 = vrot.lane.b32.xlu1 %v14631_v14, %s13673_s4 }
 0x46c   : >> { %v15121_v49 = vpop.permute.xlu0 %1697  ;;  %v15123_v36 = vpop.f32.mrb[36].mxu0 }
 0x46d   : >> { %19221 = vst [vmem:[#allocation118_spill] sm:$0xff] %v15121_v49  ;;  %19222 = vst [vmem:[#allocation119_spill] sm:$0xff] %v15123_v36  ;;  %v15125_v58 = vpop.permute.xlu1 %1665  ;;  %v15127_v18 = vpop.f32.mrb[37].mxu0 }
 0x46e   : >> { %19223 = vst [vmem:[#allocation120_spill] sm:$0xff] %v15125_v58  ;;  %19224 = vst [vmem:[#allocation121_spill] sm:$0xff] %v15127_v18  ;;  %1677 = vrot.lane.b32.xlu0 %v14619_v6, %s13676_s17  ;;  %v12233_v58 = vpack.i.bf16 %v14634_v17, %v14628_v8 }
 0x46f   : >> { %1615 = vrot.lane.b32.xlu1 %v14631_v14, %s13674_s8 }
 0x470   : >> { %v15133_v15 = vpop.permute.xlu0 %1729  ;;  %v15135_v28 = vpop.f32.mrb[38].mxu0 }
 0x471   : >> { %19225 = vst [vmem:[#allocation122_spill] sm:$0xff] %v15133_v15  ;;  %19226 = vst [vmem:[#allocation123_spill] sm:$0xff] %v15135_v28  ;;  %v15137_v9 = vpop.permute.xlu1 %1571  ;;  %v15139_v62 = vpop.f32.mrb[39].mxu0 }
 0x472   : >> { %19227 = vst [vmem:[#allocation124_spill] sm:$0xff] %v15137_v9  ;;  %19228 = vst [vmem:[#allocation125_spill] sm:$0xff] %v15139_v62  ;;  %1709 = vrot.lane.b32.xlu0 %v14619_v6, %s13677_s29 }
 0x473   : >> { %1647 = vrot.lane.b32.xlu1 %v14631_v14, %s13675_s26 }
 0x474   : >> { %v15145_v49 = vpop.permute.xlu0 %1761  ;;  %v15149_v51 = vpop.f32.mrb[40].mxu0 }
 0x475   : >> { %19229 = vst [vmem:[#allocation126_spill] sm:$0xff] %v15145_v49  ;;  %19230 = vst [vmem:[#allocation127_spill] sm:$0xff] %v15149_v51  ;;  %v15151_v15 = vpop.permute.xlu1 %1603  ;;  %v15153_v23 = vpop.f32.mrb[41].mxu0 }
 0x476   : >> { %19231 = vst [vmem:[#allocation128_spill] sm:$0xff] %v15151_v15  ;;  %19232 = vst [vmem:[#allocation129_spill] sm:$0xff] %v15153_v23  ;;  %12234 = vrot.lane.b32.xlu0 %v12233_v58, %s13674_s8 }
 0x477   : >> { %1679 = vrot.lane.b32.xlu1 %v14631_v14, %s13676_s17 }
 0x478   : >> { %v12125_v9 = vpop.permute.xlu0 %12124  ;;  %v15158_v35 = vpop.f32.mrb[42].mxu0 }
 0x479   : >> { %19233 = vst [vmem:[#allocation130_spill] sm:$0xff] %v15158_v35  ;;  %v12127_v10 = vunpack.i.h.bf16 %v12125_v9  ;;  %v12126_v53 = vunpack.i.l.bf16 %v12125_v9  ;;  %v15160_v49 = vpop.permute.xlu1 %1635  ;;  %v15162_v38 = vpop.f32.mrb[43].mxu0 }
 0x47a   : >> { %19234 = vst [vmem:[#allocation131_spill] sm:$0xff] %v15160_v49  ;;  %19235 = vst [vmem:[#allocation132_spill] sm:$0xff] %v15162_v38  ;;  %12244 = vrot.lane.b32.xlu0 %v12233_v58, %s13676_s17 }
 0x47b   : >> { %v10940_v8 = vpack.c.bf16 %v12127_v10, %v12126_v53  ;;  %1711 = vrot.lane.b32.xlu1 %v14631_v14, %s13677_s29 }
 0x47c   : >> { %v12130_v17 = vpop.permute.xlu0 %12129  ;;  %v15167_v13 = vpop.f32.mrb[44].mxu0 }
 0x47d   : >> { %v12132_v15 = vunpack.i.h.bf16 %v12130_v17  ;;  %v12131_v47 = vunpack.i.l.bf16 %v12130_v17  ;;  %v15169_v34 = vpop.permute.xlu1 %1667  ;;  %10942 = vmatprep.subr.msk.bf16.mxu1 %vm14487_vm3, %v10940_v8  ;;  %v15173_v9 = vpop.f32.mrb[45].mxu0 }
 0x47e   : >> { %19236 = vst [vmem:[#allocation133_spill] sm:$0xff] %v15169_v34  ;;  %19237 = vst [vmem:[#allocation134_spill] sm:$0xff] %v15173_v9  ;;  %10945 = vmatpush3.bf16.xpose.msk.msra.mxu1 %vm14487_vm3, %v10940_v8  ;;  %12254 = vrot.lane.b32.xlu0 %v12233_v58, %s13678_s19 }
 0x47f   : >> { %v10988_v10 = vpack.c.bf16 %v12132_v15, %v12131_v47  ;;  %12229 = vrot.lane.b32.xlu1 %v12233_v58, %s13673_s4 }
 0x480   : >> { %v15179_v53 = vpop.permute.xlu0 %12139  ;;  %v15181_v49 = vpop.f32.mrb[46].mxu0 }
 0x481   : >> { %19238 = vst [vmem:[#allocation135_spill] sm:$0xff] %v15181_v49  ;;  %v15183_v17 = vpop.permute.xlu1 %1699  ;;  %10990 = vmatprep.subr.msk.bf16.mxu0 %vm14487_vm3, %v10988_v10  ;;  %v15187_v34 = vpop.f32.mrb[47].mxu0 }
 0x482   : >> { %19239 = vst [vmem:[#allocation136_spill] sm:$0xff] %v15183_v17  ;;  %19240 = vst [vmem:[#allocation137_spill] sm:$0xff] %v15187_v34  ;;  %12259 = vrot.lane.b32.xlu0 %v12233_v58, %s13679_s5  ;;  %10993 = vmatpush3.bf16.xpose.msk.msra.mxu0 %vm14487_vm3, %v10988_v10  ;;  %v1226_v10 = vsub.s32 2, %v19136_v20 }
 0x483   : >> { %12239 = vrot.lane.b32.xlu1 %v12233_v58, %s13675_s26 }
 0x484   : >> { %v15193_v47 = vpop.permute.xlu0 %12149 }
 0x485   : >> { %19241 = vst [vmem:[#allocation138_spill] sm:$0xff] %v15193_v47  ;;  %v15195_v15 = vpop.permute.xlu1 %1731 }
 0x486   : >> { %19242 = vst [vmem:[#allocation139_spill] sm:$0xff] %v15195_v15  ;;  %1765 = vrot.lane.b32.xlu0 %v14573_v30, %s13679_s5  ;;  %v13119_v30 = vld [vmem:[%s14464_s27] sm:$0x7]  ;;  %s18231_s27 = scalar_lea.vmem [#allocation12], %s17806_s0 }
 0x487   : >> { %12249 = vrot.lane.b32.xlu1 %v12233_v58, %s13677_s29  ;;  %v1227_v58 = vrot.slane %v13119_v30, %v1226_v10 }
 0x488   : >> { %v15200_v8 = vpop.permute.xlu0 %1573 }
 0x489   : >> { %19243 = vst [vmem:[#allocation140_spill] sm:$0xff] %v15200_v8  ;;  %v15202_v17 = vpop.permute.xlu1 %1763  ;;  %v15228_v20 = vadd.f32 %v14912_v22, %v1227_v58  ;;  %v15239_v30 = vadd.f32 %v14924_v46, %v1227_v58  ;;  %v15249_v22 = vadd.f32 %v14916_v39, %v1227_v58 }
 0x48a   : >> { %19244 = vst [vmem:[#allocation141_spill] sm:$0xff] %v15202_v17  ;;  %1737 = vrot.lane.b32.xlu0 %v14595_v37, %s13678_s19 }
 0x48b   : >> { %1767 = vrot.lane.b32.xlu1 %v14589_v48, %s13679_s5  ;;  %v15225_v48 = vadd.f32 %v14904_v27, %v1227_v58  ;;  %19248 = vst [vmem:[#allocation145_spill] sm:$0xff] %v15239_v30  ;;  %19251 = vst [vmem:[#allocation148_spill] sm:$0xff] %v15249_v22 }
 0x48c   : >> { %v15209_v47 = vpop.permute.xlu0 %1605 }
 0x48d   : >> { %v15211_v15 = vpop.permute.xlu1 %12134  ;;  %19246 = vst [vmem:[#allocation143_spill] sm:$0xff] %v15225_v48  ;;  %v15246_v27 = vpack.i.bf16 %v15225_v48, %v15228_v20 }
 0x48e   : >> { %1769 = vrot.lane.b32.xlu0 %v14595_v37, %s13679_s5 }
 0x48f   : >> { %1739 = vrot.lane.b32.xlu1 %v14609_v59, %s13678_s19  ;;  %19250 = vst [vmem:[#allocation147_spill] sm:$0xff] %v15246_v27 }
 0x490   : >> { %v15218_v17 = vpop.permute.xlu0 %1637 }
 0x491   : >> { %v15220_v8 = vpop.permute.xlu1 %12144 }
 0x492   : >> { %19245 = vst [vmem:[#allocation142_spill] sm:$0xff] %v15220_v8  ;;  %1741 = vrot.lane.b32.xlu0 %v14619_v6, %s13678_s19  ;;  %v15242_v8 = vadd.f32 %v14928_v33, %v1227_v58  ;;  %v15263_v33 = vadd.f32 %v14940_v12, %v1227_v58 }
 0x493   : >> { %1771 = vrot.lane.b32.xlu1 %v14609_v59, %s13679_s5  ;;  %v15254_v59 = vadd.f32 %v14920_v26, %v1227_v58  ;;  %v15273_v26 = vadd.f32 %v14932_v57, %v1227_v58  ;;  %v15291_v57 = vadd.f32 %v14956_v4, %v1227_v58 }
 0x494   : >> { %v15232_v37 = vpop.permute.xlu0 %1669  ;;  %19249 = vst [vmem:[#allocation146_spill] sm:$0xff] %v15242_v8  ;;  %19254 = vst [vmem:[#allocation151_spill] sm:$0xff] %v15263_v33  ;;  %v15270_v39 = vpack.i.bf16 %v15239_v30, %v15242_v8  ;;  %v15294_v30 = vadd.f32 %v14960_v40, %v1227_v58 }
 0x495   : >> { %v15234_v10 = vpop.permute.xlu1 %12154  ;;  %19252 = vst [vmem:[#allocation149_spill] sm:$0xff] %v15254_v59  ;;  %19257 = vst [vmem:[#allocation154_spill] sm:$0xff] %v15273_v26  ;;  %v15282_v12 = vpack.i.bf16 %v15249_v22, %v15254_v59 }
 0x496   : >> { %19247 = vst [vmem:[#allocation144_spill] sm:$0xff] %v15234_v10  ;;  %1773 = vrot.lane.b32.xlu0 %v14619_v6, %s13679_s5  ;;  %v15266_v10 = vadd.f32 %v14944_v43, %v1227_v58  ;;  %19256 = vst [vmem:[#allocation153_spill] sm:$0xff] %v15270_v39 }
 0x497   : >> { %1743 = vrot.lane.b32.xlu1 %v14631_v14, %s13678_s19  ;;  %19259 = vst [vmem:[#allocation156_spill] sm:$0xff] %v15282_v12  ;;  %19261 = vst [vmem:[#allocation158_spill] sm:$0xff] %v15291_v57 }
 0x498   : >> { %v15256_v6 = vpop.permute.xlu0 %1701  ;;  %19255 = vst [vmem:[#allocation152_spill] sm:$0xff] %v15266_v10  ;;  %19262 = vst [vmem:[#allocation159_spill] sm:$0xff] %v15294_v30 }
 0x499   : >> { %19253 = vst [vmem:[#allocation150_spill] sm:$0xff] %v15256_v6  ;;  %v15258_v46 = vpop.permute.xlu1 %1575  ;;  %v15278_v6 = vadd.f32 %v14936_v0, %v1227_v58  ;;  %v15298_v0 = vpack.i.bf16 %v15263_v33, %v15266_v10  ;;  %v15326_v33 = vadd.f32 %v14972_v16, %v1227_v58 }
 0x49a   : >> { %12264 = vrot.lane.b32.xlu0 %v15246_v27, %s13673_s4 }
 0x49b   : >> { %1775 = vrot.lane.b32.xlu1 %v14631_v14, %s13679_s5  ;;  %19258 = vst [vmem:[#allocation155_spill] sm:$0xff] %v15278_v6  ;;  %19263 = vst [vmem:[#allocation160_spill] sm:$0xff] %v15298_v0  ;;  %v15301_v14 = vadd.f32 %v14948_v56, %v1227_v58  ;;  %v15310_v4 = vpack.i.bf16 %v15273_v26, %v15278_v6  ;;  %v15318_v56 = vpack.i.bf16 %v15291_v57, %v15294_v30 }
 0x49c   : >> { %v15284_v48 = vpop.permute.xlu0 %1733  ;;  %19269 = vst [vmem:[#allocation166_spill] sm:$0xff] %v15326_v33 }
 0x49d   : >> { %19260 = vst [vmem:[#allocation157_spill] sm:$0xff] %v15284_v48  ;;  %v15286_v43 = vpop.permute.xlu1 %1607  ;;  %19264 = vst [vmem:[#allocation161_spill] sm:$0xff] %v15301_v14  ;;  %v15306_v48 = vadd.f32 %v14952_v41, %v1227_v58  ;;  %v15323_v41 = vadd.f32 %v14968_v61, %v1227_v58 }
 0x49e   : >> { %12274 = vrot.lane.b32.xlu0 %v15270_v39, %s13673_s4  ;;  %19266 = vst [vmem:[#allocation163_spill] sm:$0xff] %v15310_v4  ;;  %19267 = vst [vmem:[#allocation164_spill] sm:$0xff] %v15318_v56 }
 0x49f   : >> { %12269 = vrot.lane.b32.xlu1 %v15282_v12, %s13673_s4  ;;  %19265 = vst [vmem:[#allocation162_spill] sm:$0xff] %v15306_v48  ;;  %19268 = vst [vmem:[#allocation165_spill] sm:$0xff] %v15323_v41  ;;  %v15346_v61 = vpack.i.bf16 %v15323_v41, %v15326_v33 }
 0x4a0   : >> { %v12165_v39 = vpop.permute.xlu0 %12164 }
 0x4a1   : >> { %v12167_v40 = vunpack.i.h.bf16 %v12165_v39  ;;  %v12166_v8 = vunpack.i.l.bf16 %v12165_v39  ;;  %v15312_v22 = vpop.permute.xlu1 %1639  ;;  %v15330_v39 = vpack.i.bf16 %v15301_v14, %v15306_v48  ;;  %19271 = vst [vmem:[#allocation168_spill] sm:$0xff] %v15346_v61 }
 0x4a2   : >> { %12284 = vrot.lane.b32.xlu0 %v15298_v0, %s13673_s4 }
 0x4a3   : >> { %v10994_v12 = vpack.c.bf16 %v12167_v40, %v12166_v8  ;;  %12279 = vrot.lane.b32.xlu1 %v15310_v4, %s13673_s4  ;;  %19270 = vst [vmem:[#allocation167_spill] sm:$0xff] %v15330_v39 }
 0x4a4   : >> { %v15332_v10 = vpop.permute.xlu0 %12174 }
 0x4a5   : >> { %v15334_v0 = vpop.permute.xlu1 %1671  ;;  %10996 = vmatprep.subr.msk.bf16.mxu0 %vm14487_vm3, %v10994_v12 }
 0x4a6   : >> { %12294 = vrot.lane.b32.xlu0 %v15318_v56, %s13673_s4  ;;  %10999 = vmatpush3.bf16.xpose.msk.msra.mxu0 %vm14487_vm3, %v10994_v12 }
 0x4a7   : >> { %12289 = vrot.lane.b32.xlu1 %v15330_v39, %s13673_s4 }
 0x4a8   : >> { %v15348_v16 = vpop.permute.xlu0 %12184 }
 0x4a9   : >> { %v15350_v8 = vpop.permute.xlu1 %1703 }
 0x4aa   : >> { %19272 = vst [vmem:[#allocation169_spill] sm:$0xff] %v15350_v8  ;;  %12304 = vrot.lane.b32.xlu0 %v15246_v27, %s13674_s8 }
 0x4ab   : >> { %12299 = vrot.lane.b32.xlu1 %v15346_v61, %s13673_s4 }
 0x4ac   : >> { %v15356_v58 = vpop.permute.xlu0 %12189 }
 0x4ad   : >> { %19273 = vst [vmem:[#allocation170_spill] sm:$0xff] %v15356_v58  ;;  %v15358_v12 = vpop.permute.xlu1 %1735 }
 0x4ae   : >> { %19274 = vst [vmem:[#allocation171_spill] sm:$0xff] %v15358_v12  ;;  %12309 = vrot.lane.b32.xlu0 %v15246_v27, %s13675_s26 }
 0x4b0   : >> { %v15362_v40 = vpop.permute.xlu0 %1577 }
 0x4b1   : >> { %v12160_v56 = vpop.permute.xlu1 %12159 }
 0x4b2   : >> { %v12162_v39 = vunpack.i.h.bf16 %v12160_v56  ;;  %v12161_v4 = vunpack.i.l.bf16 %v12160_v56 }
 0x4b4   : >> { %v10946_v41 = vpack.c.bf16 %v12162_v39, %v12161_v4  ;;  %v15364_v8 = vpop.permute.xlu0 %1609 }
 0x4b5   : >> { %v15366_v33 = vpop.permute.xlu1 %12169 }
 0x4b6   : >> { %10948 = vmatprep.subr.msk.bf16.mxu1 %vm14487_vm3, %v10946_v41 }
 0x4b7   : >> { %10951 = vmatpush3.bf16.xpose.msk.msra.mxu1 %vm14487_vm3, %v10946_v41 }
 0x4b8   : >> { %v15372_v61 = vpop.permute.xlu0 %1641 }
 0x4b9   : >> { %v15374_v58 = vpop.permute.xlu1 %12179 }
 0x4bc   : >> { %v15376_v27 = vpop.permute.xlu0 %1705 }
 0x4bd   : >> { %19275 = vst [vmem:[#allocation172_spill] sm:$0xff] %v15376_v27  ;;  %v15378_v57 = vpop.permute.xlu1 %1673 }
 0x4c0   : >> { %v12195_v56 = vpop.permute.xlu0 %12194 }
 0x4c1   : >> { %v12197_v4 = vunpack.i.h.bf16 %v12195_v56  ;;  %v12196_v39 = vunpack.i.l.bf16 %v12195_v56  ;;  %v15380_v30 = vpop.permute.xlu1 %1579 }
 0x4c3   : >> { %v10952_v12 = vpack.c.bf16 %v12197_v4, %v12196_v39 }
 0x4c4   : >> { %v12200_v14 = vpop.permute.xlu0 %12199 }
 0x4c5   : >> { %v12202_v48 = vunpack.i.h.bf16 %v12200_v14  ;;  %v12201_v26 = vunpack.i.l.bf16 %v12200_v14  ;;  %v15382_v6 = vpop.permute.xlu1 %1611  ;;  %10954 = vmatprep.subr.msk.bf16.mxu1 %vm14487_vm3, %v10952_v12 }
 0x4c6   : >> { %10957 = vmatpush3.bf16.xpose.msk.msra.mxu1 %vm14487_vm3, %v10952_v12 }
 0x4c7   : >> { %v11000_v41 = vpack.c.bf16 %v12202_v48, %v12201_v26 }
 0x4c8   : >> { %v15388_v27 = vpop.permute.xlu0 %12209 }
 0x4c9   : >> { %v15390_v59 = vpop.permute.xlu1 %1643  ;;  %11002 = vmatprep.subr.msk.bf16.mxu0 %vm14487_vm3, %v11000_v41 }
 0x4ca   : >> { %11005 = vmatpush3.bf16.xpose.msk.msra.mxu0 %vm14487_vm3, %v11000_v41 }
 0x4cc   : >> { %v15396_v14 = vpop.permute.xlu0 %12219 }
 0x4cd   : >> { %v15398_v56 = vpop.permute.xlu1 %1675  ;;  %4042 = vmax.xlane.f32.xlu0 %v15104_v44 }
 0x4cf   : >> { %4044 = vmax.xlane.f32.xlu1 %v15100_v60 }
 0x4d0   : >> { %v15402_v12 = vpop.permute.xlu0 %12224 }
 0x4d1   : >> { %19276 = vst [vmem:[#allocation173_spill] sm:$0xff] %v15402_v12  ;;  %v15404_v48 = vpop.permute.xlu1 %1707  ;;  %4048 = vmax.xlane.f32.xlu0 %v15111_v11 }
 0x4d2   : >> { %19277 = vst [vmem:[#allocation174_spill] sm:$0xff] %v15404_v48 }
 0x4d3   : >> { %4046 = vmax.xlane.f32.xlu1 %v15115_v52 }
 0x4d4   : >> { %v15408_v26 = vpop.permute.xlu0 %1581 }
 0x4d5   : >> { %v15410_v4 = vpop.permute.xlu1 %12204  ;;  %4052 = vmax.xlane.f32.xlu0 %v15123_v36 }
 0x4d7   : >> { %4050 = vmax.xlane.f32.xlu1 %v15127_v18 }
 0x4d8   : >> { %v15414_v39 = vpop.permute.xlu0 %1613 }
 0x4d9   : >> { %v15416_v41 = vpop.permute.xlu1 %12214  ;;  %4056 = vmax.xlane.f32.xlu0 %v15135_v28 }
 0x4db   : >> { %4054 = vmax.xlane.f32.xlu1 %v15139_v62 }
 0x4dc   : >> { %v15420_v60 = vpop.permute.xlu0 %1645 }
 0x4dd   : >> { %v15422_v11 = vpop.permute.xlu1 %1583  ;;  %4060 = vmax.xlane.f32.xlu0 %v15149_v51  ;;  %v12002_v51 = vunpack.i.h.bf16 %v14790_v7 }
 0x4df   : >> { %4058 = vmax.xlane.f32.xlu1 %v15153_v23  ;;  %v12001_v23 = vunpack.i.l.bf16 %v14790_v7  ;;  %v11997_v7 = vunpack.i.h.bf16 %v14780_v3 }
 0x4e0   : >> { %v15426_v52 = vpop.permute.xlu0 %1677 }
 0x4e1   : >> { %v15428_v36 = vpop.permute.xlu1 %1615  ;;  %4064 = vmax.xlane.f32.xlu0 %v15158_v35  ;;  %v11060_v35 = vpack.c.bf16 %v12002_v51, %v12001_v23  ;;  %v12036_v51 = vunpack.i.l.bf16 %v14882_v24 }
 0x4e3   : >> { %4062 = vmax.xlane.f32.xlu1 %v15162_v38 }
 0x4e4   : >> { %v15432_v18 = vpop.permute.xlu0 %1709 }
 0x4e5   : >> { %19278 = vst [vmem:[#allocation175_spill] sm:$0xff] %v15432_v18  ;;  %v15434_v28 = vpop.permute.xlu1 %1647  ;;  %4068 = vmax.xlane.f32.xlu0 %v15167_v13 }
 0x4e7   : >> { %4066 = vmax.xlane.f32.xlu1 %v15173_v9 }
 0x4e8   : >> { %v12235_v62 = vpop.permute.xlu0 %12234 }
 0x4e9   : >> { %v12237_v44 = vunpack.i.h.bf16 %v12235_v62  ;;  %v12236_v12 = vunpack.i.l.bf16 %v12235_v62  ;;  %v15440_v48 = vpop.permute.xlu1 %1679  ;;  %4072 = vmax.xlane.f32.xlu0 %v15181_v49  ;;  %v11996_v62 = vunpack.i.l.bf16 %v14780_v3  ;;  %v12031_v3 = vunpack.i.l.bf16 %v14866_v2 }
 0x4eb   : >> { %v11006_v38 = vpack.c.bf16 %v12237_v44, %v12236_v12  ;;  %4070 = vmax.xlane.f32.xlu1 %v15187_v34  ;;  %v12037_v44 = vunpack.i.h.bf16 %v14882_v24  ;;  %v11012_v9 = vpack.c.bf16 %v11997_v7, %v11996_v62  ;;  %v12071_v24 = vunpack.i.l.bf16 %v14988_v29 }
 0x4ec   : >> { %v12142_v7 = vunpack.i.h.bf16 %v15179_v53  ;;  %v12141_v62 = vunpack.i.l.bf16 %v15179_v53  ;;  %v12137_v53 = vunpack.i.h.bf16 %v15211_v15 }
 0x4ed   : >> { %v15444_v18 = vpop.permute.xlu1 %1711  ;;  %11008 = vmatprep.subr.msk.bf16.mxu0 %vm14487_vm3, %v11006_v38 }
 0x4ee   : >> { %11011 = vmatpush3.bf16.xpose.msk.msra.mxu0 %vm14487_vm3, %v11006_v38  ;;  %v11066_v38 = vpack.c.bf16 %v12037_v44, %v12036_v51  ;;  %v19286_v44 = vld [vmem:[#allocation109_spill] sm:$0xff]  ;;  %v19287_v51 = vld [vmem:[#allocation124_spill] sm:$0xff] }
 0x4ef   : >> { %11062 = vmatprep.subr.msk.bf16.mxu0 %vm14487_vm3, %v11060_v35 }
 0x4f1   : >> { %v12230_v49 = vpop.permute.xlu1 %12229 }
 0x4f2   : >> { %v12232_v23 = vunpack.i.h.bf16 %v12230_v49  ;;  %v12231_v12 = vunpack.i.l.bf16 %v12230_v49 }
 0x4f4   : >> { %v10958_v34 = vpack.c.bf16 %v12232_v23, %v12231_v12  ;;  %v11084_v23 = vpack.c.bf16 %v12142_v7, %v12141_v62  ;;  %v19288_v12 = vld [vmem:[#allocation140_spill] sm:$0xff]  ;;  %v19294_v7 = vld [vmem:[#allocation58_spill] sm:$0xff]  ;;  %v19295_v62 = vld [vmem:[#allocation69_spill] sm:$0xff] }
 0x4f5   : >> { %9808 = vmatmul.mubr.msk.f32.vlgmr.msra.gmra.mrb[48].mxu0 %vm2369_vm2, %v14736_v42  ;;  %v12032_v42 = vunpack.i.h.bf16 %v14866_v2  ;;  %v12066_v2 = vunpack.i.l.bf16 %v15000_v55 }
 0x4f6   : >> { %10960 = vmatprep.subr.msk.bf16.mxu1 %vm14487_vm3, %v10958_v34  ;;  %9810 = vmatprep.mubr.msk.f32.mxu0 %vm2369_vm2, %v14818_v25  ;;  %v12072_v25 = vunpack.i.h.bf16 %v14988_v29 }
 0x4f7   : >> { %10963 = vmatpush3.bf16.xpose.msk.msra.mxu1 %vm14487_vm3, %v10958_v34  ;;  %11065 = vmatpush3.bf16.xpose.msk.msra.mxu0 %vm14487_vm3, %v11060_v35  ;;  %v11018_v34 = vpack.c.bf16 %v12032_v42, %v12031_v3  ;;  %v19282_v35 = vld [vmem:[#allocation82_spill] sm:$0xff] }
 0x4f8   : >> { %11014 = vmatprep.subr.msk.bf16.mxu1 %vm14487_vm3, %v11012_v9  ;;  %11068 = vmatprep.subr.msk.bf16.mxu0 %vm14487_vm3, %v11066_v38 }
 0x4f9   : >> { %9811 = vmatmul.mubr.msk.f32.gmra.mrb[50].mxu0 %vm2369_vm2, %v14820_v45  ;;  %v11072_v45 = vpack.c.bf16 %v12072_v25, %v12071_v24  ;;  %v12245_v25 = vpop.permute.xlu0 %12244 }
 0x4fa   : >> { %9813 = vmatprep.mubr.msk.f32.mxu0 %vm2369_vm2, %v14914_v32  ;;  %v19279_v32 = vld [vmem:[#allocation106_spill] sm:$0xff]  ;;  %v12246_v24 = vunpack.i.l.bf16 %v12245_v25 }
 0x4fb   : >> { %v12106_v29 = vunpack.i.l.bf16 %v19279_v32 }
 0x4fd   : >> { %9814 = vmatmul.mubr.msk.f32.gmra.mrb[52].mxu0 %vm2369_vm2, %v14918_v1  ;;  %v12067_v1 = vunpack.i.h.bf16 %v15000_v55  ;;  %v19283_v55 = vld [vmem:[#allocation93_spill] sm:$0xff] }
 0x4fe   : >> { %9752 = vmatmul.mubr.msk.f32.vlgmr.msra.gmra.mrb[16].mxu1 %vm2369_vm2, %v14727_v50  ;;  %9816 = vmatprep.mubr.msk.f32.mxu0 %vm2369_vm2, %v15018_v5  ;;  %v12107_v50 = vunpack.i.h.bf16 %v19279_v32  ;;  %v19281_v5 = vld [vmem:[#allocation128_spill] sm:$0xff] }
 0x4ff   : >> { %9754 = vmatprep.mubr.msk.f32.mxu1 %vm2369_vm2, %v14810_v19  ;;  %11017 = vmatpush3.bf16.xpose.msk.msra.mxu1 %vm14487_vm3, %v11012_v9  ;;  %v19280_v19 = vld [vmem:[#allocation81_spill] sm:$0xff] }
 0x500   : >> { %11071 = vmatpush3.bf16.xpose.msk.msra.mxu0 %vm14487_vm3, %v11066_v38  ;;  %11020 = vmatprep.subr.msk.bf16.mxu1 %vm14487_vm3, %v11018_v34  ;;  %v12176_v38 = vunpack.i.l.bf16 %v15332_v10 }
 0x501   : >> { %11074 = vmatprep.subr.msk.bf16.mxu0 %vm14487_vm3, %v11072_v45  ;;  %9817 = vmatmul.mubr.msk.f32.gmra.mrb[54].mxu0 %vm2369_vm2, %v15036_v54  ;;  %v11024_v54 = vpack.c.bf16 %v12067_v1, %v12066_v2  ;;  %v12240_v1 = vpop.permute.xlu1 %12239 }
 0x502   : >> { %9755 = vmatmul.mubr.msk.f32.gmra.mrb[18].mxu1 %vm2369_vm2, %v14812_v21  ;;  %9819 = vmatprep.mubr.msk.f32.mxu0 %vm2369_vm2, %v15098_v63  ;;  %v11078_v21 = vpack.c.bf16 %v12107_v50, %v12106_v29  ;;  %v19284_v63 = vld [vmem:[#allocation110_spill] sm:$0xff]  ;;  %v12242_v2 = vunpack.i.h.bf16 %v12240_v1  ;;  %v12241_v32 = vunpack.i.l.bf16 %v12240_v1  ;;  %v19311_v1 = vld [vmem:[#allocation133_spill] sm:$0xff] }
 0x503   : >> { %9757 = vmatprep.mubr.msk.f32.mxu1 %vm2369_vm2, %v19280_v19  ;;  %v12102_v49 = vunpack.i.h.bf16 %v19284_v63  ;;  %v12101_v9 = vunpack.i.l.bf16 %v19284_v63 }
 0x504   : >> { %v11054_v19 = vpack.c.bf16 %v12242_v2, %v12241_v32  ;;  %v19312_v2 = vld [vmem:[#allocation96_spill] sm:$0xff] }
 0x505   : >> { %9820 = vmatmul.mubr.msk.f32.gmra.mrb[56].mxu0 %vm2369_vm2, %v19281_v5 }
 0x506   : >> { %9758 = vmatmul.mubr.msk.f32.gmra.mrb[20].mxu1 %vm2369_vm2, %v19282_v35  ;;  %9822 = vmatprep.mubr.msk.f32.mxu0 %vm2369_vm2, %v15209_v47  ;;  %v19285_v47 = vld [vmem:[#allocation97_spill] sm:$0xff] }
 0x507   : >> { %9760 = vmatprep.mubr.msk.f32.mxu1 %vm2369_vm2, %v19283_v55  ;;  %11023 = vmatpush3.bf16.xpose.msk.msra.mxu1 %vm14487_vm3, %v11018_v34  ;;  %v19293_v55 = vld [vmem:[#allocation79_spill] sm:$0xff] }
 0x508   : >> { %11077 = vmatpush3.bf16.xpose.msk.msra.mxu0 %vm14487_vm3, %v11072_v45  ;;  %11026 = vmatprep.subr.msk.bf16.mxu1 %vm14487_vm3, %v11024_v54  ;;  %v12047_v63 = vunpack.i.h.bf16 %v19293_v55 }
 0x509   : >> { %11080 = vmatprep.subr.msk.bf16.mxu0 %vm14487_vm3, %v11078_v21  ;;  %9823 = vmatmul.mubr.msk.f32.gmra.mrb[58].mxu0 %vm2369_vm2, %v15286_v43  ;;  %v11030_v43 = vpack.c.bf16 %v12102_v49, %v12101_v9  ;;  %v12046_v49 = vunpack.i.l.bf16 %v19293_v55  ;;  %v19317_v55 = vld [vmem:[#allocation131_spill] sm:$0xff] }
 0x50a   : >> { %9761 = vmatmul.mubr.msk.f32.gmra.mrb[22].mxu1 %vm2369_vm2, %v19285_v47  ;;  %9825 = vmatprep.mubr.msk.f32.mxu0 %vm2369_vm2, %v15364_v8  ;;  %v19289_v8 = vld [vmem:[#allocation55_spill] sm:$0xff] }
 0x50b   : >> { %9763 = vmatprep.mubr.msk.f32.mxu1 %vm2369_vm2, %v19286_v44  ;;  %v11162_v47 = vpack.c.bf16 %v12047_v63, %v12046_v49  ;;  %v19296_v44 = vld [vmem:[#allocation77_spill] sm:$0xff]  ;;  %v12186_v49 = vunpack.i.l.bf16 %v15348_v16 }
 0x50d   : >> { %9826 = vmatmul.mubr.msk.f32.gmra.mrb[60].mxu0 %vm2369_vm2, %v15382_v6  ;;  %v12136_v6 = vunpack.i.l.bf16 %v15211_v15  ;;  %v12172_v15 = vunpack.i.h.bf16 %v15366_v33 }
 0x50e   : >> { %9764 = vmatmul.mubr.msk.f32.gmra.mrb[24].mxu1 %vm2369_vm2, %v19287_v51  ;;  %9828 = vmatprep.mubr.msk.f32.mxu0 %vm2369_vm2, %v15414_v39  ;;  %v12177_v39 = vunpack.i.h.bf16 %v15332_v10  ;;  %v12171_v10 = vunpack.i.l.bf16 %v15366_v33  ;;  %v12247_v33 = vunpack.i.h.bf16 %v12245_v25  ;;  %v12041_v51 = vunpack.i.l.bf16 %v19296_v44  ;;  %v19307_v25 = vld [vmem:[#allocation83_spill] sm:$0xff] }
 0x50f   : >> { %9766 = vmatprep.mubr.msk.f32.mxu1 %vm2369_vm2, %v19288_v12  ;;  %11029 = vmatpush3.bf16.xpose.msk.msra.mxu1 %vm14487_vm3, %v11024_v54  ;;  %v11036_v42 = vpack.c.bf16 %v12137_v53, %v12136_v6  ;;  %v19292_v54 = vld [vmem:[#allocation64_spill] sm:$0xff] }
 0x510   : >> { %11083 = vmatpush3.bf16.xpose.msk.msra.mxu0 %vm14487_vm3, %v11078_v21  ;;  %11032 = vmatprep.subr.msk.bf16.mxu1 %vm14487_vm3, %v11030_v43  ;;  %v11102_v45 = vpack.c.bf16 %v12247_v33, %v12246_v24  ;;  %v12007_v35 = vunpack.i.h.bf16 %v19292_v54  ;;  %v12006_v21 = vunpack.i.l.bf16 %v19292_v54  ;;  %v19298_v12 = vld [vmem:[#allocation92_spill] sm:$0xff] }
 0x511   : >> { %11086 = vmatprep.subr.msk.bf16.mxu0 %vm14487_vm3, %v11084_v23  ;;  %9829 = vmatmul.mubr.msk.f32.gmra.mrb[62].mxu0 %vm2369_vm2, %v15428_v36  ;;  %v11090_v36 = vpack.c.bf16 %v12177_v39, %v12176_v38  ;;  %v12082_v53 = vunpack.i.h.bf16 %v19298_v12  ;;  %v12081_v6 = vunpack.i.l.bf16 %v19298_v12  ;;  %v19300_v39 = vld [vmem:[#allocation56_spill] sm:$0xff] }
 0x512   : >> { %9767 = vmatmul.mubr.msk.f32.gmra.mrb[26].mxu1 %vm2369_vm2, %v15258_v46  ;;  %9919 = vmatprep.mubr.msk.f32.mxu0 %vm2369_vm2, %v19289_v8  ;;  %v12211_v46 = vunpack.i.l.bf16 %v15388_v27  ;;  %v11108_v9 = vpack.c.bf16 %v12007_v35, %v12006_v21  ;;  %v19299_v8 = vld [vmem:[#allocation80_spill] sm:$0xff]  ;;  %v12255_v21 = vpop.permute.xlu0 %12254 }
 0x513   : >> { %9769 = vmatprep.mubr.msk.f32.mxu1 %vm2369_vm2, %v15362_v40  ;;  %v19290_v40 = vld [vmem:[#allocation54_spill] sm:$0xff]  ;;  %v19309_v24 = vld [vmem:[#allocation120_spill] sm:$0xff] }
 0x516   : >> { %9770 = vmatmul.mubr.msk.f32.gmra.mrb[28].mxu1 %vm2369_vm2, %v15380_v30  ;;  %v12212_v30 = vunpack.i.h.bf16 %v15388_v27  ;;  %v12206_v27 = vunpack.i.l.bf16 %v15410_v4 }
 0x517   : >> { %9772 = vmatprep.mubr.msk.f32.mxu1 %vm2369_vm2, %v15408_v26  ;;  %11035 = vmatpush3.bf16.xpose.msk.msra.mxu1 %vm14487_vm3, %v11030_v43  ;;  %v11042_v26 = vpack.c.bf16 %v12172_v15, %v12171_v10  ;;  %v12042_v43 = vunpack.i.h.bf16 %v19296_v44  ;;  %v11168_v15 = vpack.c.bf16 %v12082_v53, %v12081_v6  ;;  %v19303_v10 = vld [vmem:[#allocation98_spill] sm:$0xff] }
 0x518   : >> { %11089 = vmatpush3.bf16.xpose.msk.msra.mxu0 %vm14487_vm3, %v11084_v23  ;;  %11038 = vmatprep.subr.msk.bf16.mxu1 %vm14487_vm3, %v11036_v42  ;;  %v11096_v3 = vpack.c.bf16 %v12212_v30, %v12211_v46  ;;  %v19297_v23 = vld [vmem:[#allocation70_spill] sm:$0xff]  ;;  %v19304_v30 = vld [vmem:[#allocation68_spill] sm:$0xff] }
 0x519   : >> { %11092 = vmatprep.subr.msk.bf16.mxu0 %vm14487_vm3, %v11090_v36  ;;  %v11114_v38 = vpack.c.bf16 %v12042_v43, %v12041_v51  ;;  %v19305_v46 = vld [vmem:[#allocation94_spill] sm:$0xff] }
 0x51a   : >> { %9773 = vmatmul.mubr.msk.f32.gmra.mrb[30].mxu1 %vm2369_vm2, %v15422_v11  ;;  %v12207_v11 = vunpack.i.h.bf16 %v15410_v4  ;;  %v19291_v4 = vld [vmem:[#allocation65_spill] sm:$0xff] }
 0x51b   : >> { %9863 = vmatprep.mubr.msk.f32.mxu1 %vm2369_vm2, %v19290_v40  ;;  %v12012_v50 = vunpack.i.h.bf16 %v19291_v4  ;;  %v12011_v29 = vunpack.i.l.bf16 %v19291_v4  ;;  %v12077_v40 = vunpack.i.h.bf16 %v19305_v46  ;;  %v19313_v4 = vld [vmem:[#allocation100_spill] sm:$0xff] }
 0x51c   : >> { %v11048_v34 = vpack.c.bf16 %v12207_v11, %v12206_v27  ;;  %v19308_v11 = vld [vmem:[#allocation108_spill] sm:$0xff] }
 0x51d   : >> { %v11156_v5 = vpack.c.bf16 %v12012_v50, %v12011_v29  ;;  %v12117_v27 = vunpack.i.h.bf16 %v19308_v11  ;;  %v12116_v33 = vunpack.i.l.bf16 %v19308_v11  ;;  %v19314_v50 = vld [vmem:[#allocation112_spill] sm:$0xff] }
 0x51e   : >> { %v12112_v29 = vunpack.i.h.bf16 %v19314_v50  ;;  %v19325_v11 = vld [vmem:[#allocation148_spill] sm:$0xff] }
 0x51f   : >> { %11041 = vmatpush3.bf16.xpose.msk.msra.mxu1 %vm14487_vm3, %v11036_v42  ;;  %v19301_v42 = vld [vmem:[#allocation86_spill] sm:$0xff]  ;;  %v11174_v32 = vpack.c.bf16 %v12117_v27, %v12116_v33  ;;  %v19326_v33 = vld [vmem:[#allocation73_spill] sm:$0xff] }
 0x520   : >> { %11095 = vmatpush3.bf16.xpose.msk.msra.mxu0 %vm14487_vm3, %v11090_v36  ;;  %11044 = vmatprep.subr.msk.bf16.mxu1 %vm14487_vm3, %v11042_v26  ;;  %v19302_v36 = vld [vmem:[#allocation67_spill] sm:$0xff] }
 0x521   : >> { %11098 = vmatprep.subr.msk.bf16.mxu0 %vm14487_vm3, %v11096_v3 }
 0x527   : >> { %11047 = vmatpush3.bf16.xpose.msk.msra.mxu1 %vm14487_vm3, %v11042_v26  ;;  %v12076_v26 = vunpack.i.l.bf16 %v19305_v46 }
 0x528   : >> { %11101 = vmatpush3.bf16.xpose.msk.msra.mxu0 %vm14487_vm3, %v11096_v3  ;;  %11050 = vmatprep.subr.msk.bf16.mxu1 %vm14487_vm3, %v11048_v34  ;;  %v19306_v3 = vld [vmem:[#allocation102_spill] sm:$0xff] }
 0x529   : >> { %11104 = vmatprep.subr.msk.bf16.mxu0 %vm14487_vm3, %v11102_v45 }
 0x52f   : >> { %11053 = vmatpush3.bf16.xpose.msk.msra.mxu1 %vm14487_vm3, %v11048_v34  ;;  %v19310_v34 = vld [vmem:[#allocation84_spill] sm:$0xff] }
 0x530   : >> { %11107 = vmatpush3.bf16.xpose.msk.msra.mxu0 %vm14487_vm3, %v11102_v45  ;;  %11056 = vmatprep.subr.msk.bf16.mxu1 %vm14487_vm3, %v11054_v19  ;;  %v11120_v45 = vpack.c.bf16 %v12077_v40, %v12076_v26 }
 0x531   : >> { %11158 = vmatprep.subr.msk.bf16.mxu0 %vm14487_vm3, %v11156_v5 }
 0x537   : >> { %9920 = vmatmul.mubr.msk.f32.vlgmr.msra.gmra.mrb[64].mxu0 %vm2369_vm2, %v19294_v7  ;;  %11059 = vmatpush3.bf16.xpose.msk.msra.mxu1 %vm14487_vm3, %v11054_v19  ;;  %v12111_v19 = vunpack.i.l.bf16 %v19314_v50  ;;  %v12222_v7 = vunpack.i.h.bf16 %v15396_v14 }
 0x538   : >> { %9922 = vmatprep.mubr.msk.f32.mxu0 %vm2369_vm2, %v19295_v62  ;;  %11161 = vmatpush3.bf16.xpose.msk.msra.mxu0 %vm14487_vm3, %v11156_v5  ;;  %v19316_v5 = vld [vmem:[#allocation138_spill] sm:$0xff]  ;;  %v12221_v62 = vunpack.i.l.bf16 %v15396_v14  ;;  %v12257_v14 = vunpack.i.h.bf16 %v12255_v21 }
 0x539   : >> { %11110 = vmatprep.subr.msk.bf16.mxu1 %vm14487_vm3, %v11108_v9  ;;  %11164 = vmatprep.subr.msk.bf16.mxu0 %vm14487_vm3, %v11162_v47  ;;  %v12152_v54 = vunpack.i.h.bf16 %v19316_v5  ;;  %v12151_v35 = vunpack.i.l.bf16 %v19316_v5  ;;  %v11126_v63 = vpack.c.bf16 %v12112_v29, %v12111_v19  ;;  %v19331_v29 = vld [vmem:[#allocation87_spill] sm:$0xff]  ;;  %v19332_v19 = vld [vmem:[#allocation60_spill] sm:$0xff]  ;;  %v19333_v5 = vld [vmem:[#allocation90_spill] sm:$0xff] }
 0x53a   : >> { %v11192_v43 = vpack.c.bf16 %v12222_v7, %v12221_v62  ;;  %v19345_v62 = vld [vmem:[#allocation88_spill] sm:$0xff] }
 0x53b   : >> { %9923 = vmatmul.mubr.msk.f32.gmra.mrb[66].mxu0 %vm2369_vm2, %v19297_v23  ;;  %v12256_v23 = vunpack.i.l.bf16 %v12255_v21  ;;  %v19335_v21 = vld [vmem:[#allocation101_spill] sm:$0xff] }
 0x53c   : >> { %9925 = vmatprep.mubr.msk.f32.mxu0 %vm2369_vm2, %v19299_v8  ;;  %v12250_v8 = vpop.permute.xlu1 %12249 }
 0x53d   : >> { %v11198_v6 = vpack.c.bf16 %v12257_v14, %v12256_v23  ;;  %v19348_v14 = vld [vmem:[#allocation157_spill] sm:$0xff]  ;;  %v19349_v23 = vld [vmem:[#allocation162_spill] sm:$0xff] }
 0x53e   : >> { %9864 = vmatmul.mubr.msk.f32.vlgmr.msra.gmra.mrb[32].mxu1 %vm2369_vm2, %v19300_v39  ;;  %v12251_v39 = vunpack.i.l.bf16 %v12250_v8 }
 0x53f   : >> { %9926 = vmatmul.mubr.msk.f32.gmra.mrb[68].mxu0 %vm2369_vm2, %v19301_v42  ;;  %9866 = vmatprep.mubr.msk.f32.mxu1 %vm2369_vm2, %v19302_v36  ;;  %v19321_v36 = vld [vmem:[#allocation143_spill] sm:$0xff] }
 0x540   : >> { %9928 = vmatprep.mubr.msk.f32.mxu0 %vm2369_vm2, %v19303_v10  ;;  %11113 = vmatpush3.bf16.xpose.msk.msra.mxu1 %vm14487_vm3, %v11108_v9  ;;  %v15716_v9 = vpop.permute.xlu0 %12259 }
 0x541   : >> { %11167 = vmatpush3.bf16.xpose.msk.msra.mxu0 %vm14487_vm3, %v11162_v47  ;;  %11116 = vmatprep.subr.msk.bf16.mxu1 %vm14487_vm3, %v11114_v38  ;;  %v19319_v47 = vld [vmem:[#allocation59_spill] sm:$0xff] }
 0x542   : >> { %11170 = vmatprep.subr.msk.bf16.mxu0 %vm14487_vm3, %v11168_v15  ;;  %9867 = vmatmul.mubr.msk.f32.gmra.mrb[34].mxu1 %vm2369_vm2, %v19304_v30  ;;  %v19322_v30 = vld [vmem:[#allocation66_spill] sm:$0xff] }
 0x543   : >> { %9929 = vmatmul.mubr.msk.f32.gmra.mrb[70].mxu0 %vm2369_vm2, %v19306_v3  ;;  %9869 = vmatprep.mubr.msk.f32.mxu1 %vm2369_vm2, %v19307_v25  ;;  %v12017_v46 = vunpack.i.h.bf16 %v19322_v30  ;;  %v12016_v40 = vunpack.i.l.bf16 %v19322_v30  ;;  %v19323_v25 = vld [vmem:[#allocation62_spill] sm:$0xff] }
 0x544   : >> { %9931 = vmatprep.mubr.msk.f32.mxu0 %vm2369_vm2, %v19309_v24  ;;  %v19327_v24 = vld [vmem:[#allocation78_spill] sm:$0xff] }
 0x545   : >> { %v11204_v3 = vpack.c.bf16 %v12017_v46, %v12016_v40  ;;  %v19355_v46 = vld [vmem:[#allocation159_spill] sm:$0xff]  ;;  %v19356_v40 = vld [vmem:[#allocation158_spill] sm:$0xff] }
 0x546   : >> { %9870 = vmatmul.mubr.msk.f32.gmra.mrb[36].mxu1 %vm2369_vm2, %v19310_v34  ;;  %v12052_v34 = vunpack.i.h.bf16 %v19327_v24 }
 0x547   : >> { %9932 = vmatmul.mubr.msk.f32.gmra.mrb[72].mxu0 %vm2369_vm2, %v19311_v1  ;;  %9872 = vmatprep.mubr.msk.f32.mxu1 %vm2369_vm2, %v19312_v2  ;;  %v19328_v2 = vld [vmem:[#allocation74_spill] sm:$0xff] }
 0x548   : >> { %9934 = vmatprep.mubr.msk.f32.mxu0 %vm2369_vm2, %v15232_v37  ;;  %11119 = vmatpush3.bf16.xpose.msk.msra.mxu1 %vm14487_vm3, %v11114_v38  ;;  %v19315_v37 = vld [vmem:[#allocation114_spill] sm:$0xff] }
 0x549   : >> { %11173 = vmatpush3.bf16.xpose.msk.msra.mxu0 %vm14487_vm3, %v11168_v15  ;;  %11122 = vmatprep.subr.msk.bf16.mxu1 %vm14487_vm3, %v11120_v45  ;;  %v11252_v15 = vpack.c.bf16 %v19321_v36, %v15228_v20  ;;  %v19324_v20 = vld [vmem:[#allocation149_spill] sm:$0xff]  ;;  %v19353_v36 = vld [vmem:[#allocation171_spill] sm:$0xff] }
 0x54a   : >> { %11176 = vmatprep.subr.msk.bf16.mxu0 %vm14487_vm3, %v11174_v32  ;;  %9873 = vmatmul.mubr.msk.f32.gmra.mrb[38].mxu1 %vm2369_vm2, %v19313_v4  ;;  %v11256_v27 = vpack.c.bf16 %v19325_v11, %v19324_v20  ;;  %v19330_v4 = vld [vmem:[#allocation145_spill] sm:$0xff] }
 0x54b   : >> { %9935 = vmatmul.mubr.msk.f32.gmra.mrb[74].mxu0 %vm2369_vm2, %v15334_v0  ;;  %9875 = vmatprep.mubr.msk.f32.mxu1 %vm2369_vm2, %v19315_v37  ;;  %v11180_v0 = vpack.c.bf16 %v12152_v54, %v12151_v35  ;;  %v19334_v54 = vld [vmem:[#allocation71_spill] sm:$0xff]  ;;  %v15806_v35 = vpop.permute.xlu1 %1767 }
 0x54c   : >> { %9937 = vmatprep.mubr.msk.f32.mxu0 %vm2369_vm2, %v15378_v57 }
 0x54e   : >> { %9876 = vmatmul.mubr.msk.f32.gmra.mrb[40].mxu1 %vm2369_vm2, %v19317_v55  ;;  %v19336_v55 = vld [vmem:[#allocation155_spill] sm:$0xff] }
 0x54f   : >> { %9938 = vmatmul.mubr.msk.f32.gmra.mrb[76].mxu0 %vm2369_vm2, %v15398_v56  ;;  %9878 = vmatprep.mubr.msk.f32.mxu1 %vm2369_vm2, %v15218_v17  ;;  %v19318_v17 = vld [vmem:[#allocation142_spill] sm:$0xff]  ;;  %v1740_v7 = vpop.permute.xlu1 %1739 }
 0x550   : >> { %9940 = vmatprep.mubr.msk.f32.mxu0 %vm2369_vm2, %v15426_v52  ;;  %11125 = vmatpush3.bf16.xpose.msk.msra.mxu1 %vm14487_vm3, %v11120_v45  ;;  %v12147_v57 = vunpack.i.h.bf16 %v19318_v17  ;;  %v12146_v56 = vunpack.i.l.bf16 %v19318_v17  ;;  %v12187_v52 = vunpack.i.h.bf16 %v15348_v16  ;;  %v19320_v16 = vld [vmem:[#allocation57_spill] sm:$0xff]  ;;  %v12051_v45 = vunpack.i.l.bf16 %v19327_v24  ;;  %v19358_v24 = vld [vmem:[#allocation150_spill] sm:$0xff] }
 0x551   : >> { %11179 = vmatpush3.bf16.xpose.msk.msra.mxu0 %vm14487_vm3, %v11174_v32  ;;  %11128 = vmatprep.subr.msk.bf16.mxu1 %vm14487_vm3, %v11126_v63  ;;  %v19329_v32 = vld [vmem:[#allocation146_spill] sm:$0xff] }
 0x552   : >> { %11182 = vmatprep.subr.msk.bf16.mxu0 %vm14487_vm3, %v11180_v0  ;;  %9879 = vmatmul.mubr.msk.f32.gmra.mrb[42].mxu1 %vm2369_vm2, %v15312_v22  ;;  %v11132_v22 = vpack.c.bf16 %v12147_v57, %v12146_v56  ;;  %v11260_v50 = vpack.c.bf16 %v19330_v4, %v19329_v32  ;;  %v11210_v37 = vpack.c.bf16 %v12052_v34, %v12051_v45  ;;  %v19338_v57 = vld [vmem:[#allocation72_spill] sm:$0xff]  ;;  %v19339_v56 = vld [vmem:[#allocation95_spill] sm:$0xff]  ;;  %v19360_v34 = vld [vmem:[#allocation165_spill] sm:$0xff] }
 0x553   : >> { %9941 = vmatmul.mubr.msk.f32.gmra.mrb[78].mxu0 %vm2369_vm2, %v15440_v48  ;;  %9881 = vmatprep.mubr.msk.f32.mxu1 %vm2369_vm2, %v15372_v61  ;;  %v11186_v48 = vpack.c.bf16 %v12187_v52, %v12186_v49  ;;  %v15730_v61 = vpop.permute.xlu0 %1765  ;;  %v12087_v52 = vunpack.i.h.bf16 %v19339_v56  ;;  %v12086_v49 = vunpack.i.l.bf16 %v19339_v56  ;;  %v15854_v30 = vpop.permute.xlu1 %1771  ;;  %v19361_v32 = vld [vmem:[#allocation169_spill] sm:$0xff] }
 0x554   : >> { %10031 = vmatprep.mubr.msk.f32.mxu0 %vm2369_vm2, %v19319_v47  ;;  %v19340_v47 = vld [vmem:[#allocation105_spill] sm:$0xff] }
 0x555   : >> { %v19369_v56 = vld [vmem:[#allocation173_spill] sm:$0xff] }
 0x556   : >> { %9882 = vmatmul.mubr.msk.f32.gmra.mrb[44].mxu1 %vm2369_vm2, %v15390_v59  ;;  %v12181_v59 = vunpack.i.l.bf16 %v15374_v58 }
 0x557   : >> { %9884 = vmatprep.mubr.msk.f32.mxu1 %vm2369_vm2, %v15420_v60  ;;  %v12182_v60 = vunpack.i.h.bf16 %v15374_v58  ;;  %v15742_v51 = vpop.permute.xlu0 %1737  ;;  %v12216_v58 = vunpack.i.l.bf16 %v15416_v41 }
 0x558   : >> { %11131 = vmatpush3.bf16.xpose.msk.msra.mxu1 %vm14487_vm3, %v11126_v63  ;;  %v19337_v63 = vld [vmem:[#allocation154_spill] sm:$0xff] }
 0x559   : >> { %11185 = vmatpush3.bf16.xpose.msk.msra.mxu0 %vm14487_vm3, %v11180_v0  ;;  %11134 = vmatprep.subr.msk.bf16.mxu1 %vm14487_vm3, %v11132_v22  ;;  %v11138_v44 = vpack.c.bf16 %v12182_v60, %v12181_v59  ;;  %v11264_v0 = vpack.c.bf16 %v19337_v63, %v19336_v55  ;;  %v19343_v60 = vld [vmem:[#allocation152_spill] sm:$0xff]  ;;  %v19344_v59 = vld [vmem:[#allocation151_spill] sm:$0xff] }
 0x55a   : >> { %11188 = vmatprep.subr.msk.bf16.mxu0 %vm14487_vm3, %v11186_v48  ;;  %9885 = vmatmul.mubr.msk.f32.gmra.mrb[46].mxu1 %vm2369_vm2, %v15434_v28  ;;  %v12217_v28 = vunpack.i.h.bf16 %v15416_v41  ;;  %v12252_v41 = vunpack.i.h.bf16 %v12250_v8  ;;  %v19351_v8 = vld [vmem:[#allocation104_spill] sm:$0xff] }
 0x55b   : >> { %9975 = vmatprep.mubr.msk.f32.mxu1 %vm2369_vm2, %v19320_v16  ;;  %v15754_v12 = vpop.permute.xlu0 %1769  ;;  %v11268_v16 = vpack.c.bf16 %v19344_v59, %v19343_v60 }
 0x55c   : >> { %v11144_v53 = vpack.c.bf16 %v12217_v28, %v12216_v58  ;;  %v11150_v42 = vpack.c.bf16 %v12252_v41, %v12251_v39  ;;  %v19346_v28 = vld [vmem:[#allocation139_spill] sm:$0xff]  ;;  %v19352_v41 = vld [vmem:[#allocation116_spill] sm:$0xff] }
 0x55d   : >> { %v19347_v58 = vld [vmem:[#allocation99_spill] sm:$0xff]  ;;  %v12122_v39 = vunpack.i.h.bf16 %v19352_v41 }
 0x55f   : >> { %v15764_v38 = vpop.permute.xlu0 %1741 }
 0x560   : >> { %11137 = vmatpush3.bf16.xpose.msk.msra.mxu1 %vm14487_vm3, %v11132_v22  ;;  %v19341_v22 = vld [vmem:[#allocation85_spill] sm:$0xff] }
 0x561   : >> { %11191 = vmatpush3.bf16.xpose.msk.msra.mxu0 %vm14487_vm3, %v11186_v48  ;;  %11140 = vmatprep.subr.msk.bf16.mxu1 %vm14487_vm3, %v11138_v44  ;;  %v19342_v48 = vld [vmem:[#allocation122_spill] sm:$0xff] }
 0x562   : >> { %11194 = vmatprep.subr.msk.bf16.mxu0 %vm14487_vm3, %v11192_v43 }
 0x563   : >> { %v15774_v10 = vpop.permute.xlu0 %1773 }
 0x567   : >> { %v15778_v26 = vpop.permute.xlu0 %12264 }
 0x568   : >> { %11143 = vmatpush3.bf16.xpose.msk.msra.mxu1 %vm14487_vm3, %v11138_v44  ;;  %v11216_v44 = vpack.c.bf16 %v12087_v52, %v12086_v49  ;;  %v12227_v52 = vunpack.i.h.bf16 %v19369_v56  ;;  %v12226_v49 = vunpack.i.l.bf16 %v19369_v56  ;;  %v12267_v60 = vunpack.i.h.bf16 %v15778_v26 }
 0x569   : >> { %11197 = vmatpush3.bf16.xpose.msk.msra.mxu0 %vm14487_vm3, %v11192_v43  ;;  %11146 = vmatprep.subr.msk.bf16.mxu1 %vm14487_vm3, %v11144_v53  ;;  %v12266_v59 = vunpack.i.l.bf16 %v15778_v26 }
 0x56a   : >> { %11200 = vmatprep.subr.msk.bf16.mxu0 %vm14487_vm3, %v11198_v6 }
 0x56b   : >> { %v15792_v1 = vpop.permute.xlu0 %12274 }
 0x56f   : >> { %v15814_v17 = vpop.permute.xlu0 %12284 }
 0x570   : >> { %11149 = vmatpush3.bf16.xpose.msk.msra.mxu1 %vm14487_vm3, %v11144_v53  ;;  %v19350_v53 = vld [vmem:[#allocation161_spill] sm:$0xff] }
 0x571   : >> { %11203 = vmatpush3.bf16.xpose.msk.msra.mxu0 %vm14487_vm3, %v11198_v6  ;;  %11152 = vmatprep.subr.msk.bf16.mxu1 %vm14487_vm3, %v11150_v42  ;;  %v11272_v6 = vpack.c.bf16 %v19350_v53, %v19349_v23  ;;  %v19371_v53 = vld [vmem:[#allocation75_spill] sm:$0xff] }
 0x572   : >> { %11253 = vmatprep.subr.bf16.mxu0 %v11252_v15 }
 0x573   : >> { %v15832_v43 = vpop.permute.xlu0 %12294 }
 0x578   : >> { %10032 = vmatmul.mubr.msk.f32.vlgmr.msra.gmra.mrb[80].mxu0 %vm2369_vm2, %v19323_v25  ;;  %11155 = vmatpush3.bf16.xpose.msk.msra.mxu1 %vm14487_vm3, %v11150_v42  ;;  %v12121_v42 = vunpack.i.l.bf16 %v19352_v41  ;;  %v12305_v25 = vpop.permute.xlu0 %12304 }
 0x579   : >> { %10034 = vmatprep.mubr.msk.f32.mxu0 %vm2369_vm2, %v19326_v33  ;;  %11255 = vmatpush3.bf16.msra.mxu0 %v11252_v15  ;;  %v19354_v15 = vld [vmem:[#allocation118_spill] sm:$0xff]  ;;  %v12307_v20 = vunpack.i.h.bf16 %v12305_v25  ;;  %v12306_v11 = vunpack.i.l.bf16 %v12305_v25 }
 0x57a   : >> { %11206 = vmatprep.subr.msk.bf16.mxu1 %vm14487_vm3, %v11204_v3  ;;  %11257 = vmatprep.subr.bf16.mxu0 %v11256_v27  ;;  %v11222_v33 = vpack.c.bf16 %v12122_v39, %v12121_v42  ;;  %v19373_v39 = vld [vmem:[#allocation89_spill] sm:$0xff]  ;;  %v12286_v42 = vunpack.i.l.bf16 %v15814_v17 }
 0x57b   : >> { %v15875_v4 = vpack.c.bf16 %v12307_v20, %v12306_v11 }
 0x57c   : >> { %10035 = vmatmul.mubr.msk.f32.gmra.mrb[82].mxu0 %vm2369_vm2, %v19328_v2  ;;  %v1744_v2 = vpop.permute.xlu1 %1743 }
 0x57d   : >> { %10037 = vmatprep.mubr.msk.f32.mxu0 %vm2369_vm2, %v19331_v29  ;;  %11259 = vmatpush3.bf16.msra.mxu0 %v11256_v27  ;;  %v19357_v27 = vld [vmem:[#allocation136_spill] sm:$0xff]  ;;  %19362 = vst [vmem:[#allocation106_spill] sm:$0xff] %v15875_v4 }
 0x57e   : >> { %11261 = vmatprep.subr.bf16.mxu0 %v11260_v50 }
 0x57f   : >> { %9976 = vmatmul.mubr.msk.f32.vlgmr.msra.gmra.mrb[48].mxu1 %vm2369_vm2, %v19332_v19  ;;  %v19364_v19 = vld [vmem:[#allocation172_spill] sm:$0xff] }
 0x580   : >> { %10038 = vmatmul.mubr.msk.f32.gmra.mrb[84].mxu0 %vm2369_vm2, %v19333_v5  ;;  %9978 = vmatprep.mubr.msk.f32.mxu1 %vm2369_vm2, %v19334_v54  ;;  %v19366_v54 = vld [vmem:[#allocation175_spill] sm:$0xff] }
 0x581   : >> { %10040 = vmatprep.mubr.msk.f32.mxu0 %vm2369_vm2, %v19335_v21  ;;  %11209 = vmatpush3.bf16.xpose.msk.msra.mxu1 %vm14487_vm3, %v11204_v3  ;;  %v11276_v3 = vpack.c.bf16 %v19356_v40, %v19355_v46  ;;  %v19367_v21 = vld [vmem:[#allocation170_spill] sm:$0xff]  ;;  %v19376_v40 = vld [vmem:[#allocation103_spill] sm:$0xff] }
 0x582   : >> { %11263 = vmatpush3.bf16.msra.mxu0 %v11260_v50  ;;  %11212 = vmatprep.subr.msk.bf16.mxu1 %vm14487_vm3, %v11210_v37  ;;  %v19363_v50 = vld [vmem:[#allocation144_spill] sm:$0xff]  ;;  %v12192_v55 = vunpack.i.h.bf16 %v19367_v21  ;;  %v12191_v63 = vunpack.i.l.bf16 %v19367_v21 }
 0x583   : >> { %11265 = vmatprep.subr.bf16.mxu0 %v11264_v0  ;;  %9979 = vmatmul.mubr.msk.f32.gmra.mrb[50].mxu1 %vm2369_vm2, %v19338_v57  ;;  %v12157_v29 = vunpack.i.h.bf16 %v19363_v50 }
 0x584   : >> { %10041 = vmatmul.mubr.msk.f32.gmra.mrb[86].mxu0 %vm2369_vm2, %v19340_v47  ;;  %9981 = vmatprep.mubr.msk.f32.mxu1 %vm2369_vm2, %v19341_v22  ;;  %v11234_v57 = vpack.c.bf16 %v12192_v55, %v12191_v63  ;;  %v11240_v47 = vpack.c.bf16 %v12227_v52, %v12226_v49  ;;  %v12261_v22 = vunpack.i.l.bf16 %v15716_v9 }
 0x585   : >> { %10043 = vmatprep.mubr.msk.f32.mxu0 %vm2369_vm2, %v19342_v48 }
 0x586   : >> { %11267 = vmatpush3.bf16.msra.mxu0 %v11264_v0  ;;  %v19368_v0 = vld [vmem:[#allocation61_spill] sm:$0xff] }
 0x587   : >> { %11269 = vmatprep.subr.bf16.mxu0 %v11268_v16  ;;  %9982 = vmatmul.mubr.msk.f32.gmra.mrb[52].mxu1 %vm2369_vm2, %v19345_v62 }
 0x588   : >> { %10044 = vmatmul.mubr.msk.f32.gmra.mrb[88].mxu0 %vm2369_vm2, %v19346_v28  ;;  %9984 = vmatprep.mubr.msk.f32.mxu1 %vm2369_vm2, %v19347_v58  ;;  %v12277_v28 = vunpack.i.h.bf16 %v15792_v1  ;;  %v12276_v58 = vunpack.i.l.bf16 %v15792_v1  ;;  %v12287_v1 = vunpack.i.h.bf16 %v15814_v17 }
 0x589   : >> { %10046 = vmatprep.mubr.msk.f32.mxu0 %vm2369_vm2, %v19348_v14  ;;  %11215 = vmatpush3.bf16.xpose.msk.msra.mxu1 %vm14487_vm3, %v11210_v37  ;;  %v19365_v37 = vld [vmem:[#allocation174_spill] sm:$0xff]  ;;  %v19370_v14 = vld [vmem:[#allocation63_spill] sm:$0xff] }
 0x58a   : >> { %11271 = vmatpush3.bf16.msra.mxu0 %v11268_v16  ;;  %11218 = vmatprep.subr.msk.bf16.mxu1 %vm14487_vm3, %v11216_v44  ;;  %v15915_v16 = vpop.permute.xlu1 %1775  ;;  %v11292_v41 = vpack.c.bf16 %v12277_v28, %v12276_v58  ;;  %v11300_v17 = vpack.c.bf16 %v12287_v1, %v12286_v42 }
 0x58b   : >> { %11273 = vmatprep.subr.bf16.mxu0 %v11272_v6  ;;  %9985 = vmatmul.mubr.msk.f32.gmra.mrb[54].mxu1 %vm2369_vm2, %v19351_v8  ;;  %v19372_v8 = vld [vmem:[#allocation76_spill] sm:$0xff] }
 0x58c   : >> { %10047 = vmatmul.mubr.msk.f32.gmra.mrb[90].mxu0 %vm2369_vm2, %v19353_v36  ;;  %9987 = vmatprep.mubr.msk.f32.mxu1 %vm2369_vm2, %v19354_v15  ;;  %v19374_v36 = vld [vmem:[#allocation91_spill] sm:$0xff] }
 0x58d   : >> { %10049 = vmatprep.mubr.msk.f32.mxu0 %vm2369_vm2, %v15742_v51  ;;  %v19359_v51 = vld [vmem:[#allocation166_spill] sm:$0xff] }
 0x58e   : >> { %11275 = vmatpush3.bf16.msra.mxu0 %v11272_v6  ;;  %v11280_v45 = vpack.c.bf16 %v19360_v34, %v19359_v51  ;;  %v12270_v62 = vpop.permute.xlu1 %12269  ;;  %v12297_v34 = vunpack.i.h.bf16 %v15832_v43 }
 0x58f   : >> { %11277 = vmatprep.subr.bf16.mxu0 %v11276_v3  ;;  %9988 = vmatmul.mubr.msk.f32.gmra.mrb[56].mxu1 %vm2369_vm2, %v19357_v27  ;;  %v19378_v27 = vld [vmem:[#allocation107_spill] sm:$0xff] }
 0x590   : >> { %10050 = vmatmul.mubr.msk.f32.gmra.mrb[92].mxu0 %vm2369_vm2, %v1740_v7  ;;  %9990 = vmatprep.mubr.msk.f32.mxu1 %vm2369_vm2, %v19358_v24  ;;  %v11284_v7 = vpack.c.bf16 %v12267_v60, %v12266_v59  ;;  %v19379_v24 = vld [vmem:[#allocation126_spill] sm:$0xff] }
 0x591   : >> { %10052 = vmatprep.mubr.msk.f32.mxu0 %vm2369_vm2, %v15764_v38  ;;  %11221 = vmatpush3.bf16.xpose.msk.msra.mxu1 %vm14487_vm3, %v11216_v44  ;;  %v12156_v38 = vunpack.i.l.bf16 %v19363_v50  ;;  %v12271_v44 = vunpack.i.l.bf16 %v12270_v62 }
 0x592   : >> { %11279 = vmatpush3.bf16.msra.mxu0 %v11276_v3  ;;  %11224 = vmatprep.subr.msk.bf16.mxu1 %vm14487_vm3, %v11222_v33  ;;  %v12280_v26 = vpop.permute.xlu1 %12279 }
 0x593   : >> { %11281 = vmatprep.subr.bf16.mxu0 %v11280_v45  ;;  %9991 = vmatmul.mubr.msk.f32.gmra.mrb[58].mxu1 %vm2369_vm2, %v19361_v32  ;;  %v11228_v5 = vpack.c.bf16 %v12157_v29, %v12156_v38  ;;  %v12282_v31 = vunpack.i.h.bf16 %v12280_v26  ;;  %v12281_v6 = vunpack.i.l.bf16 %v12280_v26 }
 0x594   : >> { %10053 = vmatmul.mubr.msk.f32.gmra.mrb[94].mxu0 %vm2369_vm2, %v1744_v2  ;;  %9993 = vmatprep.mubr.msk.f32.mxu1 %vm2369_vm2, %v19364_v19  ;;  %v19381_v2 = vld [vmem:[#allocation141_spill] sm:$0xff] }
 0x595   : >> { %v11296_v15 = vpack.c.bf16 %v12282_v31, %v12281_v6 }
 0x596   : >> { %11283 = vmatpush3.bf16.msra.mxu0 %v11280_v45  ;;  %v12290_v25 = vpop.permute.xlu1 %12289  ;;  %v12296_v45 = vunpack.i.l.bf16 %v15832_v43 }
 0x597   : >> { %9994 = vmatmul.mubr.msk.f32.gmra.mrb[60].mxu1 %vm2369_vm2, %v19365_v37  ;;  %11317 = vmatprep.subr.bf16.mxu0 %v15875_v4  ;;  %v12292_v20 = vunpack.i.h.bf16 %v12290_v25  ;;  %v12291_v11 = vunpack.i.l.bf16 %v12290_v25 }
 0x598   : >> { %9996 = vmatprep.mubr.msk.f32.mxu1 %vm2369_vm2, %v19366_v54  ;;  %v11308_v54 = vpack.c.bf16 %v12297_v34, %v12296_v45 }
 0x599   : >> { %11227 = vmatpush3.bf16.xpose.msk.msra.mxu1 %vm14487_vm3, %v11222_v33  ;;  %v11304_v32 = vpack.c.bf16 %v12292_v20, %v12291_v11  ;;  %v19394_v20 = vld [vmem:[#allocation111_spill] sm:$0xff] }
 0x59a   : >> { %11230 = vmatprep.subr.msk.bf16.mxu1 %vm14487_vm3, %v11228_v5  ;;  %v12300_v43 = vpop.permute.xlu1 %12299 }
 0x59b   : >> { %9997 = vmatmul.mubr.msk.f32.gmra.mrb[62].mxu1 %vm2369_vm2, %v15444_v18  ;;  %v12262_v18 = vunpack.i.h.bf16 %v15716_v9  ;;  %v12272_v9 = vunpack.i.h.bf16 %v12270_v62  ;;  %v12302_v37 = vunpack.i.h.bf16 %v12300_v43 }
 0x59c   : >> { %10087 = vmatprep.mubr.msk.f32.mxu1 %vm2369_vm2, %v19368_v0  ;;  %v12310_v0 = vpop.permute.xlu0 %12309 }
 0x59d   : >> { %v11246_v48 = vpack.c.bf16 %v12262_v18, %v12261_v22  ;;  %v11288_v23 = vpack.c.bf16 %v12272_v9, %v12271_v44 }
 0x59e   : >> { %v4045_v31 = vpop.xlane.xlu1 %4044 }
 0x59f   : >> { %v4299_v11 = vsub.f32 %v19394_v20, %v4045_v31 }
 0x5a0   : >> { %v4043_v26 = vpop.xlane.xlu0 %4042 }
 0x5a1   : >> { %11233 = vmatpush3.bf16.xpose.msk.msra.mxu1 %vm14487_vm3, %v11228_v5  ;;  %v12301_v5 = vunpack.i.l.bf16 %v12300_v43  ;;  %v4428_v45 = vmul.f32 1.442695, %v4299_v11  ;;  %v19406_v11 = vld [vmem:[#allocation130_spill] sm:$0xff] }
 0x5a2   : >> { %11236 = vmatprep.subr.msk.bf16.mxu1 %vm14487_vm3, %v11234_v57 }
 0x5a3   : >> { %v11312_v56 = vpack.c.bf16 %v12302_v37, %v12301_v5  ;;  %v19397_v5 = vld [vmem:[#allocation123_spill] sm:$0xff] }
 0x5a4   : >> { %v4049_v6 = vpop.xlane.xlu0 %4048 }
 0x5a9   : >> { %11239 = vmatpush3.bf16.xpose.msk.msra.mxu1 %vm14487_vm3, %v11234_v57  ;;  %v12311_v57 = vunpack.i.l.bf16 %v12310_v0 }
 0x5aa   : >> { %11242 = vmatprep.subr.msk.bf16.mxu1 %vm14487_vm3, %v11240_v47 }
 0x5b1   : >> { %11245 = vmatpush3.bf16.xpose.msk.msra.mxu1 %vm14487_vm3, %v11240_v47 }
 0x5b2   : >> { %11248 = vmatprep.subr.msk.bf16.mxu1 %vm14487_vm3, %v11246_v48 }
 0x5b9   : >> { %11251 = vmatpush3.bf16.xpose.msk.msra.mxu1 %vm14487_vm3, %v11246_v48 }
 0x5ba   : >> { %11285 = vmatprep.subr.bf16.mxu1 %v11284_v7 }
 0x5c0   : >> { %10088 = vmatmul.mubr.msk.f32.vlgmr.msra.gmra.mrb[64].mxu1 %vm2369_vm2, %v19370_v14 }
 0x5c1   : >> { %10090 = vmatprep.mubr.msk.f32.mxu1 %vm2369_vm2, %v19371_v53  ;;  %11287 = vmatpush3.bf16.msra.mxu1 %v11284_v7 }
 0x5c2   : >> { %11289 = vmatprep.subr.bf16.mxu1 %v11288_v23 }
 0x5c4   : >> { %10091 = vmatmul.mubr.msk.f32.gmra.mrb[66].mxu1 %vm2369_vm2, %v19372_v8  ;;  %v4047_v8 = vpop.xlane.xlu1 %4046 }
 0x5c5   : >> { %10093 = vmatprep.mubr.msk.f32.mxu1 %vm2369_vm2, %v19373_v39  ;;  %11291 = vmatpush3.bf16.msra.mxu1 %v11288_v23  ;;  %v19392_v39 = vld [vmem:[#allocation113_spill] sm:$0xff] }
 0x5c6   : >> { %11293 = vmatprep.subr.bf16.mxu1 %v11292_v41  ;;  %v4298_v1 = vsub.f32 %v19392_v39, %v4043_v26 }
 0x5c8   : >> { %10094 = vmatmul.mubr.msk.f32.gmra.mrb[68].mxu1 %vm2369_vm2, %v19374_v36  ;;  %v15933_v46 = vpop.f32.mrb[48].mxu0  ;;  %v4051_v42 = vpop.xlane.xlu1 %4050  ;;  %v4426_v36 = vmul.f32 1.442695, %v4298_v1 }
 0x5c9   : >> { %19375 = vst [vmem:[#allocation81_spill] sm:$0xff] %v15933_v46  ;;  %10096 = vmatprep.mubr.msk.f32.mxu1 %vm2369_vm2, %v19376_v40  ;;  %11295 = vmatpush3.bf16.msra.mxu1 %v11292_v41  ;;  %v15937_v3 = vpop.f32.mrb[49].mxu0  ;;  %v4053_v41 = vpop.xlane.xlu0 %4052 }
 0x5ca   : >> { %19377 = vst [vmem:[#allocation128_spill] sm:$0xff] %v15937_v3  ;;  %11297 = vmatprep.subr.bf16.mxu1 %v11296_v15  ;;  %4106 = vmax.xlane.f32.xlu1 %v15937_v3  ;;  %12543 = vpow2.f32 %v4426_v36 }
 0x5cc   : >> { %10097 = vmatmul.mubr.msk.f32.gmra.mrb[70].mxu1 %vm2369_vm2, %v19378_v27  ;;  %v15942_v33 = vpop.f32.mrb[50].mxu0  ;;  %v4055_v34 = vpop.xlane.xlu1 %4054 }
 0x5cd   : >> { %10099 = vmatprep.mubr.msk.f32.mxu1 %vm2369_vm2, %v19379_v24  ;;  %11299 = vmatpush3.bf16.msra.mxu1 %v11296_v15  ;;  %v15946_v51 = vpop.f32.mrb[51].mxu0  ;;  %v19393_v15 = vld [vmem:[#allocation115_spill] sm:$0xff]  ;;  %v4057_v25 = vpop.xlane.xlu0 %4056 }
 0x5ce   : >> { %19380 = vst [vmem:[#allocation82_spill] sm:$0xff] %v15946_v51  ;;  %11301 = vmatprep.subr.bf16.mxu1 %v11300_v17  ;;  %v4301_v40 = vsub.f32 %v19393_v15, %v4049_v6 }
 0x5d0   : >> { %10100 = vmatmul.mubr.msk.f32.gmra.mrb[72].mxu1 %vm2369_vm2, %v19381_v2  ;;  %v15952_v50 = vpop.f32.mrb[52].mxu0  ;;  %v4432_v27 = vmul.f32 1.442695, %v4301_v40  ;;  %v19396_v2 = vld [vmem:[#allocation119_spill] sm:$0xff]  ;;  %v4059_v26 = vpop.xlane.xlu1 %4058 }
 0x5d1   : >> { %10102 = vmatprep.mubr.msk.f32.mxu1 %vm2369_vm2, %v15730_v61  ;;  %11303 = vmatpush3.bf16.msra.mxu1 %v11300_v17  ;;  %v15956_v29 = vpop.f32.mrb[16].mxu1  ;;  %v15958_v38 = vpop.f32.mrb[53].mxu0  ;;  %v19395_v17 = vld [vmem:[#allocation117_spill] sm:$0xff]  ;;  %v19404_v40 = vld [vmem:[#allocation127_spill] sm:$0xff] }
 0x5d2   : >> { %11305 = vmatprep.subr.bf16.mxu1 %v11304_v32  ;;  %v15960_v19 = vpop.f32.mrb[17].mxu1  ;;  %4076 = vmax.xlane.f32.xlu0 %v15956_v29  ;;  %v4300_v24 = vsub.f32 %v19395_v17, %v4047_v8  ;;  %v4061_v43 = vpop.xlane.xlu0 %4060  ;;  %12545 = vpow2.f32 %v4432_v27  ;;  %v19401_v8 = vld [vmem:[#allocation125_spill] sm:$0xff] }
 0x5d3   : >> { %12547 = vpow2.f32 %v4428_v45 }
 0x5d4   : >> { %10103 = vmatmul.mubr.msk.f32.gmra.mrb[74].mxu1 %vm2369_vm2, %v15806_v35  ;;  %v15965_v21 = vpop.f32.mrb[54].mxu0  ;;  %v12312_v35 = vunpack.i.h.bf16 %v12310_v0  ;;  %v4430_v37 = vmul.f32 1.442695, %v4300_v24  ;;  %v16064_v1 = vpop.eup %12543 }
 0x5d5   : >> { %10105 = vmatprep.mubr.msk.f32.mxu1 %vm2369_vm2, %v15754_v12  ;;  %11307 = vmatpush3.bf16.msra.mxu1 %v11304_v32  ;;  %v15969_v61 = vpop.f32.mrb[18].mxu1  ;;  %v15971_v55 = vpop.f32.mrb[55].mxu0  ;;  %v4303_v32 = vsub.f32 %v19396_v2, %v4053_v41  ;;  %v4304_v41 = vsub.f32 %v19401_v8, %v4055_v34  ;;  %19402 = vst [vmem:[#allocation69_spill] sm:$0xff] %v16064_v1 }
 0x5d6   : >> { %11309 = vmatprep.subr.bf16.mxu1 %v11308_v54  ;;  %v15973_v63 = vpop.f32.mrb[19].mxu1  ;;  %4108 = vmax.xlane.f32.xlu0 %v15933_v46  ;;  %12549 = vpow2.f32 %v4430_v37  ;;  %v4065_v39 = vpop.xlane.xlu0 %4064 }
 0x5d7   : >> { %4078 = vmax.xlane.f32.xlu1 %v15973_v63  ;;  %v4438_v20 = vmul.f32 1.442695, %v4304_v41  ;;  %v4309_v27 = vsub.f32 %v19406_v11, %v4065_v39  ;;  %v4063_v17 = vpop.xlane.xlu1 %4062 }
 0x5d8   : >> { %10106 = vmatmul.mubr.msk.f32.gmra.mrb[76].mxu1 %vm2369_vm2, %v15854_v30  ;;  %v15979_v12 = vpop.f32.mrb[56].mxu0  ;;  %v15993_v30 = vpack.c.bf16 %v12312_v35, %v12311_v57  ;;  %v4436_v35 = vmul.f32 1.442695, %v4303_v32  ;;  %v19399_v57 = vld [vmem:[#allocation121_spill] sm:$0xff] }
 0x5d9   : >> { %10108 = vmatprep.mubr.msk.f32.mxu1 %vm2369_vm2, %v15774_v10  ;;  %11311 = vmatpush3.bf16.msra.mxu1 %v11308_v54  ;;  %v15983_v52 = vpop.f32.mrb[20].mxu1  ;;  %v15985_v49 = vpop.f32.mrb[57].mxu0  ;;  %v4305_v54 = vsub.f32 %v19397_v5, %v4057_v25 }
 0x5da   : >> { %11313 = vmatprep.subr.bf16.mxu1 %v11312_v56  ;;  %v15987_v47 = vpop.f32.mrb[21].mxu1  ;;  %4074 = vmax.xlane.f32.xlu0 %v15960_v19  ;;  %19382 = vst [vmem:[#allocation93_spill] sm:$0xff] %v15993_v30  ;;  %12551 = vpow2.f32 %v4436_v35  ;;  %v19413_v35 = vld [vmem:[#allocation132_spill] sm:$0xff] }
 0x5db   : >> { %4110 = vmax.xlane.f32.xlu1 %v15946_v51  ;;  %v4440_v6 = vmul.f32 1.442695, %v4305_v54  ;;  %v4448_v54 = vmul.f32 1.442695, %v4309_v27 }
 0x5dc   : >> { %10109 = vmatmul.mubr.msk.f32.gmra.mrb[78].mxu1 %vm2369_vm2, %v15915_v16  ;;  %v15995_v18 = vpop.f32.mrb[58].mxu0  ;;  %v16076_v34 = vpop.eup %12545 }
 0x5dd   : >> { %19383 = vst [vmem:[#allocation110_spill] sm:$0xff] %v15995_v18  ;;  %11315 = vmatpush3.bf16.msra.mxu1 %v11312_v56  ;;  %v15997_v10 = vpop.f32.mrb[22].mxu1  ;;  %v15999_v22 = vpop.f32.mrb[59].mxu0  ;;  %v4302_v56 = vsub.f32 %v19399_v57, %v4051_v42  ;;  %v4307_v42 = vsub.f32 %v19404_v40, %v4061_v43  ;;  %12553 = vpow2.f32 %v4440_v6  ;;  %19408 = vst [vmem:[#allocation80_spill] sm:$0xff] %v16076_v34  ;;  %v19411_v43 = vld [vmem:[#allocation129_spill] sm:$0xff] }
 0x5de   : >> { %11349 = vmatprep.subr.bf16.mxu1 %v15993_v30  ;;  %v16002_v48 = vpop.f32.mrb[23].mxu1  ;;  %4080 = vmax.xlane.f32.xlu0 %v15969_v61  ;;  %v4306_v37 = vsub.f32 %v19411_v43, %v4059_v26  ;;  %v4308_v57 = vsub.f32 %v19413_v35, %v4063_v17  ;;  %v4069_v43 = vpop.xlane.xlu0 %4068 }
 0x5df   : >> { %4082 = vmax.xlane.f32.xlu1 %v15987_v47  ;;  %v4434_v15 = vmul.f32 1.442695, %v4302_v56  ;;  %v4444_v32 = vmul.f32 1.442695, %v4307_v42  ;;  %v16088_v56 = vpop.eup %12547 }
 0x5e0   : >> { %v16006_v60 = vpop.f32.mrb[60].mxu0  ;;  %19414 = vst [vmem:[#allocation98_spill] sm:$0xff] %v16088_v56  ;;  %v16092_v8 = vpop.eup %12549  ;;  %v4442_v26 = vmul.f32 1.442695, %v4306_v37  ;;  %v4446_v40 = vmul.f32 1.442695, %v4308_v57 }
 0x5e1   : >> { %19384 = vst [vmem:[#allocation97_spill] sm:$0xff] %v16006_v60  ;;  %v16008_v59 = vpop.f32.mrb[24].mxu1  ;;  %v16010_v16 = vpop.f32.mrb[61].mxu0  ;;  %12555 = vpow2.f32 %v4434_v15  ;;  %19416 = vst [vmem:[#allocation94_spill] sm:$0xff] %v16092_v8 }
 0x5e2   : >> { %19385 = vst [vmem:[#allocation109_spill] sm:$0xff] %v16010_v16  ;;  %v16012_v7 = vpop.f32.mrb[25].mxu1  ;;  %4112 = vmax.xlane.f32.xlu0 %v15942_v33  ;;  %12557 = vpow2.f32 %v4438_v20 }
 0x5e3   : >> { %4114 = vmax.xlane.f32.xlu1 %v15958_v38  ;;  %12559 = vpow2.f32 %v4444_v32 }
 0x5e4   : >> { %v16016_v62 = vpop.f32.mrb[62].mxu0  ;;  %12561 = vpow2.f32 %v4448_v54  ;;  %v16102_v42 = vpop.eup %12551 }
 0x5e5   : >> { %19386 = vst [vmem:[#allocation124_spill] sm:$0xff] %v16016_v62  ;;  %v16018_v9 = vpop.f32.mrb[26].mxu1  ;;  %v16020_v44 = vpop.f32.mrb[63].mxu0  ;;  %19420 = vst [vmem:[#allocation120_spill] sm:$0xff] %v16102_v42  ;;  %12563 = vpow2.f32 %v4442_v26  ;;  %v4311_v26 = vsub.f32 %v15167_v13, %v4069_v43 }
 0x5e6   : >> { %19387 = vst [vmem:[#allocation140_spill] sm:$0xff] %v16018_v9  ;;  %19388 = vst [vmem:[#allocation55_spill] sm:$0xff] %v16020_v44  ;;  %v16022_v28 = vpop.f32.mrb[27].mxu1  ;;  %4084 = vmax.xlane.f32.xlu0 %v15983_v52  ;;  %12565 = vpow2.f32 %v4446_v40  ;;  %v4067_v40 = vpop.xlane.xlu1 %4066 }
 0x5e7   : >> { %19389 = vst [vmem:[#allocation54_spill] sm:$0xff] %v16022_v28  ;;  %4086 = vmax.xlane.f32.xlu1 %v16002_v48  ;;  %v16106_v11 = vpop.eup %12553 }
 0x5e8   : >> { %19422 = vst [vmem:[#allocation133_spill] sm:$0xff] %v16106_v11 }
 0x5e9   : >> { %v16026_v58 = vpop.f32.mrb[28].mxu1 }
 0x5ea   : >> { %19390 = vst [vmem:[#allocation65_spill] sm:$0xff] %v16026_v58  ;;  %v16028_v14 = vpop.f32.mrb[29].mxu1  ;;  %4116 = vmax.xlane.f32.xlu0 %v15952_v50 }
 0x5eb   : >> { %4118 = vmax.xlane.f32.xlu1 %v15971_v55  ;;  %v16116_v37 = vpop.eup %12555 }
 0x5ec   : >> { %19426 = vst [vmem:[#allocation114_spill] sm:$0xff] %v16116_v37  ;;  %v16120_v35 = vpop.eup %12557 }
 0x5ed   : >> { %v16032_v23 = vpop.f32.mrb[30].mxu1  ;;  %19428 = vst [vmem:[#allocation131_spill] sm:$0xff] %v16120_v35 }
 0x5ee   : >> { %19391 = vst [vmem:[#allocation64_spill] sm:$0xff] %v16032_v23  ;;  %v16034_v53 = vpop.f32.mrb[31].mxu1  ;;  %4088 = vmax.xlane.f32.xlu0 %v15997_v10 }
 0x5ef   : >> { %4090 = vmax.xlane.f32.xlu1 %v16012_v7 }
 0x5f2   : >> { %4120 = vmax.xlane.f32.xlu0 %v15965_v21 }
 0x5f3   : >> { %4122 = vmax.xlane.f32.xlu1 %v15985_v49 }
 0x5f6   : >> { %4092 = vmax.xlane.f32.xlu0 %v16008_v59 }
 0x5f7   : >> { %4094 = vmax.xlane.f32.xlu1 %v16022_v28 }
 0x5fa   : >> { %4124 = vmax.xlane.f32.xlu0 %v15979_v12 }
 0x5fb   : >> { %4126 = vmax.xlane.f32.xlu1 %v15999_v22 }
 0x5fe   : >> { %4096 = vmax.xlane.f32.xlu0 %v16018_v9 }
 0x5ff   : >> { %4098 = vmax.xlane.f32.xlu1 %v16028_v14 }
 0x602   : >> { %4128 = vmax.xlane.f32.xlu0 %v15995_v18  ;;  %v19513_v18 = vld [vmem:[#allocation94_spill] sm:$0xff] }
 0x603   : >> { %4130 = vmax.xlane.f32.xlu1 %v16010_v16 }
 0x606   : >> { %4100 = vmax.xlane.f32.xlu0 %v16026_v58 }
 0x607   : >> { %4102 = vmax.xlane.f32.xlu1 %v16034_v53 }
 0x60a   : >> { %v16056_v0 = vpop.f32.mrb[64].mxu0  ;;  %4132 = vmax.xlane.f32.xlu0 %v16006_v60 }
 0x60b   : >> { %19398 = vst [vmem:[#allocation79_spill] sm:$0xff] %v16056_v0  ;;  %v16060_v31 = vpop.f32.mrb[65].mxu0  ;;  %4134 = vmax.xlane.f32.xlu1 %v16020_v44 }
 0x60c   : >> { %19400 = vst [vmem:[#allocation58_spill] sm:$0xff] %v16060_v31 }
 0x60e   : >> { %v16066_v36 = vpop.f32.mrb[66].mxu0  ;;  %4104 = vmax.xlane.f32.xlu0 %v16032_v23 }
 0x60f   : >> { %19403 = vst [vmem:[#allocation77_spill] sm:$0xff] %v16066_v36  ;;  %v16070_v25 = vpop.f32.mrb[67].mxu0  ;;  %4682 = vadd.xlane.f32.xlu1 %v16064_v1 }
 0x610   : >> { %19405 = vst [vmem:[#allocation70_spill] sm:$0xff] %v16070_v25 }
 0x611   : >> { %v16074_v24 = vpop.f32.mrb[32].mxu1 }
 0x612   : >> { %19407 = vst [vmem:[#allocation92_spill] sm:$0xff] %v16074_v24  ;;  %v16078_v45 = vpop.f32.mrb[68].mxu0  ;;  %v16080_v2 = vpop.f32.mrb[33].mxu1  ;;  %4136 = vmax.xlane.f32.xlu0 %v16016_v62 }
 0x613   : >> { %19409 = vst [vmem:[#allocation56_spill] sm:$0xff] %v16078_v45  ;;  %19410 = vst [vmem:[#allocation86_spill] sm:$0xff] %v16080_v2  ;;  %v16084_v5 = vpop.f32.mrb[69].mxu0  ;;  %4688 = vadd.xlane.f32.xlu1 %v16076_v34 }
 0x614   : >> { %19412 = vst [vmem:[#allocation67_spill] sm:$0xff] %v16084_v5 }
 0x615   : >> { %v16090_v6 = vpop.f32.mrb[34].mxu1 }
 0x616   : >> { %19415 = vst [vmem:[#allocation68_spill] sm:$0xff] %v16090_v6  ;;  %v16094_v41 = vpop.f32.mrb[70].mxu0  ;;  %v16096_v39 = vpop.f32.mrb[35].mxu1  ;;  %4684 = vadd.xlane.f32.xlu0 %v16088_v56 }
 0x617   : >> { %19417 = vst [vmem:[#allocation102_spill] sm:$0xff] %v16094_v41  ;;  %19418 = vst [vmem:[#allocation83_spill] sm:$0xff] %v16096_v39  ;;  %v16099_v15 = vpop.f32.mrb[71].mxu0  ;;  %4686 = vadd.xlane.f32.xlu1 %v16092_v8  ;;  %v19437_v8 = vld [vmem:[#allocation134_spill] sm:$0xff] }
 0x618   : >> { %19419 = vst [vmem:[#allocation108_spill] sm:$0xff] %v16099_v15  ;;  %v4310_v13 = vsub.f32 %v19437_v8, %v4067_v40 }
 0x619   : >> { %v16104_v20 = vpop.f32.mrb[36].mxu1 }
 0x61a   : >> { %19421 = vst [vmem:[#allocation84_spill] sm:$0xff] %v16104_v20  ;;  %v16108_v27 = vpop.f32.mrb[72].mxu0  ;;  %v16110_v17 = vpop.f32.mrb[37].mxu1  ;;  %4692 = vadd.xlane.f32.xlu0 %v16102_v42 }
 0x61b   : >> { %19423 = vst [vmem:[#allocation96_spill] sm:$0xff] %v16108_v27  ;;  %19424 = vst [vmem:[#allocation100_spill] sm:$0xff] %v16110_v17  ;;  %v16113_v32 = vpop.f32.mrb[73].mxu0  ;;  %4696 = vadd.xlane.f32.xlu1 %v16106_v11  ;;  %v16131_v11 = vpop.eup %12559 }
 0x61c   : >> { %19425 = vst [vmem:[#allocation112_spill] sm:$0xff] %v16113_v32  ;;  %19432 = vst [vmem:[#allocation143_spill] sm:$0xff] %v16131_v11  ;;  %v16135_v42 = vpop.eup %12561 }
 0x61d   : >> { %v16118_v54 = vpop.f32.mrb[38].mxu1  ;;  %19434 = vst [vmem:[#allocation62_spill] sm:$0xff] %v16135_v42 }
 0x61e   : >> { %19427 = vst [vmem:[#allocation138_spill] sm:$0xff] %v16118_v54  ;;  %v16122_v57 = vpop.f32.mrb[74].mxu0  ;;  %v16124_v62 = vpop.f32.mrb[39].mxu1  ;;  %4690 = vadd.xlane.f32.xlu0 %v16116_v37  ;;  %v4452_v37 = vmul.f32 1.442695, %v4311_v26 }
 0x61f   : >> { %19429 = vst [vmem:[#allocation142_spill] sm:$0xff] %v16122_v57  ;;  %19430 = vst [vmem:[#allocation59_spill] sm:$0xff] %v16124_v62  ;;  %v16128_v30 = vpop.f32.mrb[75].mxu0  ;;  %4694 = vadd.xlane.f32.xlu1 %v16120_v35  ;;  %v16146_v35 = vpop.eup %12563  ;;  %v4450_v26 = vmul.f32 1.442695, %v4310_v13 }
 0x620   : >> { %19431 = vst [vmem:[#allocation57_spill] sm:$0xff] %v16128_v30  ;;  %v16150_v58 = vpop.eup %12565  ;;  %12567 = vpow2.f32 %v4452_v37 }
 0x621   : >> { %v16133_v23 = vpop.f32.mrb[40].mxu1  ;;  %12569 = vpow2.f32 %v4450_v26 }
 0x622   : >> { %19433 = vst [vmem:[#allocation66_spill] sm:$0xff] %v16133_v23  ;;  %v16137_v34 = vpop.f32.mrb[76].mxu0  ;;  %v16139_v4 = vpop.f32.mrb[41].mxu1  ;;  %4700 = vadd.xlane.f32.xlu0 %v16131_v11 }
 0x623   : >> { %19435 = vst [vmem:[#allocation149_spill] sm:$0xff] %v16137_v34  ;;  %19436 = vst [vmem:[#allocation148_spill] sm:$0xff] %v16139_v4  ;;  %v16143_v43 = vpop.f32.mrb[77].mxu0  ;;  %4704 = vadd.xlane.f32.xlu1 %v16135_v42 }
 0x624   : >> { %19438 = vst [vmem:[#allocation73_spill] sm:$0xff] %v16143_v43 }
 0x625   : >> { %v16148_v56 = vpop.f32.mrb[42].mxu1 }
 0x626   : >> { %19439 = vst [vmem:[#allocation78_spill] sm:$0xff] %v16148_v56  ;;  %v16152_v28 = vpop.f32.mrb[78].mxu0  ;;  %v16154_v1 = vpop.f32.mrb[43].mxu1  ;;  %4698 = vadd.xlane.f32.xlu0 %v16146_v35 }
 0x627   : >> { %19440 = vst [vmem:[#allocation74_spill] sm:$0xff] %v16152_v28  ;;  %19441 = vst [vmem:[#allocation146_spill] sm:$0xff] %v16154_v1  ;;  %v16157_v11 = vpop.f32.mrb[79].mxu0  ;;  %4702 = vadd.xlane.f32.xlu1 %v16150_v58 }
 0x628   : >> { %19442 = vst [vmem:[#allocation145_spill] sm:$0xff] %v16157_v11 }
 0x629   : >> { %v16160_v8 = vpop.f32.mrb[44].mxu1 }
 0x62a   : >> { %19443 = vst [vmem:[#allocation87_spill] sm:$0xff] %v16160_v8  ;;  %v16162_v40 = vpop.f32.mrb[45].mxu1  ;;  %4140 = vmax.xlane.f32.xlu0 %v16074_v24  ;;  %v16172_v37 = vpop.eup %12567 }
 0x62b   : >> { %19444 = vst [vmem:[#allocation60_spill] sm:$0xff] %v16162_v40  ;;  %4138 = vmax.xlane.f32.xlu1 %v16080_v2  ;;  %19447 = vst [vmem:[#allocation101_spill] sm:$0xff] %v16172_v37  ;;  %v16176_v13 = vpop.eup %12569 }
 0x62c   : >> { %19448 = vst [vmem:[#allocation155_spill] sm:$0xff] %v16176_v13 }
 0x62d   : >> { %v16166_v42 = vpop.f32.mrb[46].mxu1 }
 0x62e   : >> { %19445 = vst [vmem:[#allocation90_spill] sm:$0xff] %v16166_v42  ;;  %v16168_v9 = vpop.f32.mrb[47].mxu1  ;;  %4172 = vmax.xlane.f32.xlu0 %v16056_v0 }
 0x62f   : >> { %19446 = vst [vmem:[#allocation71_spill] sm:$0xff] %v16168_v9  ;;  %4170 = vmax.xlane.f32.xlu1 %v16060_v31  ;;  %v16208_v31 = vpop.xlane.xlu1 %4070 }
 0x632   : >> { %4708 = vadd.xlane.f32.xlu0 %v16172_v37 }
 0x633   : >> { %4142 = vmax.xlane.f32.xlu1 %v16096_v39 }
 0x636   : >> { %4706 = vadd.xlane.f32.xlu0 %v16176_v13 }
 0x637   : >> { %4174 = vmax.xlane.f32.xlu1 %v16070_v25 }
 0x63a   : >> { %4144 = vmax.xlane.f32.xlu0 %v16090_v6 }
 0x63b   : >> { %4146 = vmax.xlane.f32.xlu1 %v16110_v17  ;;  %v16234_v17 = vpop.xlane.xlu0 %4072 }
 0x63c   : >> { %19465 = vst [vmem:[#allocation171_spill] sm:$0xff] %v16234_v17 }
 0x63e   : >> { %4176 = vmax.xlane.f32.xlu0 %v16066_v36 }
 0x63f   : >> { %4178 = vmax.xlane.f32.xlu1 %v16084_v5 }
 0x642   : >> { %4148 = vmax.xlane.f32.xlu0 %v16104_v20 }
 0x643   : >> { %4150 = vmax.xlane.f32.xlu1 %v16124_v62 }
 0x646   : >> { %4180 = vmax.xlane.f32.xlu0 %v16078_v45 }
 0x647   : >> { %4182 = vmax.xlane.f32.xlu1 %v16099_v15 }
 0x64a   : >> { %4152 = vmax.xlane.f32.xlu0 %v16118_v54 }
 0x64b   : >> { %v16189_v26 = vpop.f32.mrb[80].mxu0  ;;  %4154 = vmax.xlane.f32.xlu1 %v16139_v4 }
 0x64c   : >> { %19449 = vst [vmem:[#allocation154_spill] sm:$0xff] %v16189_v26  ;;  %v16192_v0 = vpop.f32.mrb[81].mxu0 }
 0x64d   : >> { %19450 = vst [vmem:[#allocation72_spill] sm:$0xff] %v16192_v0 }
 0x64e   : >> { %4184 = vmax.xlane.f32.xlu0 %v16094_v41 }
 0x64f   : >> { %v16195_v36 = vpop.f32.mrb[82].mxu0  ;;  %4186 = vmax.xlane.f32.xlu1 %v16113_v32 }
 0x650   : >> { %19451 = vst [vmem:[#allocation95_spill] sm:$0xff] %v16195_v36  ;;  %v16198_v5 = vpop.f32.mrb[83].mxu0 }
 0x651   : >> { %19452 = vst [vmem:[#allocation105_spill] sm:$0xff] %v16198_v5 }
 0x652   : >> { %v16200_v25 = vpop.f32.mrb[48].mxu1  ;;  %4156 = vmax.xlane.f32.xlu0 %v16133_v23 }
 0x653   : >> { %19453 = vst [vmem:[#allocation85_spill] sm:$0xff] %v16200_v25  ;;  %v16203_v45 = vpop.f32.mrb[84].mxu0  ;;  %v16205_v15 = vpop.f32.mrb[49].mxu1  ;;  %4192 = vmax.xlane.f32.xlu1 %v16122_v57 }
 0x654   : >> { %19454 = vst [vmem:[#allocation122_spill] sm:$0xff] %v16203_v45  ;;  %19455 = vst [vmem:[#allocation152_spill] sm:$0xff] %v16205_v15  ;;  %v16210_v54 = vpop.f32.mrb[85].mxu0 }
 0x655   : >> { %19456 = vst [vmem:[#allocation151_spill] sm:$0xff] %v16210_v54 }
 0x656   : >> { %v16212_v41 = vpop.f32.mrb[50].mxu1  ;;  %4188 = vmax.xlane.f32.xlu0 %v16108_v27 }
 0x657   : >> { %19457 = vst [vmem:[#allocation88_spill] sm:$0xff] %v16212_v41  ;;  %v16215_v32 = vpop.f32.mrb[86].mxu0  ;;  %v16217_v4 = vpop.f32.mrb[51].mxu1  ;;  %4158 = vmax.xlane.f32.xlu1 %v16154_v1 }
 0x658   : >> { %19458 = vst [vmem:[#allocation139_spill] sm:$0xff] %v16215_v32  ;;  %19459 = vst [vmem:[#allocation99_spill] sm:$0xff] %v16217_v4  ;;  %v16220_v23 = vpop.f32.mrb[87].mxu0  ;;  %v16222_v20 = vpop.xlane.xlu1 %4106 }
 0x659   : >> { %19460 = vst [vmem:[#allocation157_spill] sm:$0xff] %v16220_v23  ;;  %19461 = vst [vmem:[#allocation162_spill] sm:$0xff] %v16222_v20 }
 0x65a   : >> { %v16226_v62 = vpop.f32.mrb[52].mxu1  ;;  %4160 = vmax.xlane.f32.xlu0 %v16148_v56 }
 0x65b   : >> { %19462 = vst [vmem:[#allocation161_spill] sm:$0xff] %v16226_v62  ;;  %v16229_v6 = vpop.f32.mrb[88].mxu0  ;;  %v16231_v27 = vpop.f32.mrb[53].mxu1  ;;  %4190 = vmax.xlane.f32.xlu1 %v16128_v30 }
 0x65c   : >> { %19463 = vst [vmem:[#allocation104_spill] sm:$0xff] %v16229_v6  ;;  %19464 = vst [vmem:[#allocation116_spill] sm:$0xff] %v16231_v27  ;;  %v16236_v1 = vpop.f32.mrb[89].mxu0 }
 0x65d   : >> { %19466 = vst [vmem:[#allocation118_spill] sm:$0xff] %v16236_v1 }
 0x65e   : >> { %v16238_v2 = vpop.f32.mrb[54].mxu1  ;;  %4164 = vmax.xlane.f32.xlu0 %v16160_v8 }
 0x65f   : >> { %19467 = vst [vmem:[#allocation159_spill] sm:$0xff] %v16238_v2  ;;  %v16241_v39 = vpop.f32.mrb[90].mxu0  ;;  %v16243_v57 = vpop.f32.mrb[55].mxu1  ;;  %4162 = vmax.xlane.f32.xlu1 %v16162_v40 }
 0x660   : >> { %19468 = vst [vmem:[#allocation158_spill] sm:$0xff] %v16241_v39  ;;  %19469 = vst [vmem:[#allocation136_spill] sm:$0xff] %v16243_v57  ;;  %v16246_v56 = vpop.f32.mrb[91].mxu0  ;;  %v16248_v20 = vpop.xlane.xlu0 %4076 }
 0x661   : >> { %19470 = vst [vmem:[#allocation150_spill] sm:$0xff] %v16246_v56 }
 0x662   : >> { %v16250_v3 = vpop.f32.mrb[56].mxu1  ;;  %4196 = vmax.xlane.f32.xlu0 %v16137_v34 }
 0x663   : >> { %19471 = vst [vmem:[#allocation166_spill] sm:$0xff] %v16250_v3  ;;  %v16253_v30 = vpop.f32.mrb[92].mxu0  ;;  %v16255_v24 = vpop.f32.mrb[57].mxu1  ;;  %4200 = vmax.xlane.f32.xlu1 %v16152_v28 }
 0x664   : >> { %19472 = vst [vmem:[#allocation165_spill] sm:$0xff] %v16253_v30  ;;  %19473 = vst [vmem:[#allocation169_spill] sm:$0xff] %v16255_v24  ;;  %v16258_v8 = vpop.f32.mrb[93].mxu0  ;;  %v16260_v37 = vpop.xlane.xlu0 %4108 }
 0x665   : >> { %19474 = vst [vmem:[#allocation144_spill] sm:$0xff] %v16258_v8  ;;  %19475 = vst [vmem:[#allocation172_spill] sm:$0xff] %v16260_v37  ;;  %v16264_v56 = vpop.xlane.xlu1 %4078 }
 0x666   : >> { %v16266_v13 = vpop.f32.mrb[58].mxu1  ;;  %4194 = vmax.xlane.f32.xlu0 %v16143_v43 }
 0x667   : >> { %19476 = vst [vmem:[#allocation174_spill] sm:$0xff] %v16266_v13  ;;  %v16269_v34 = vpop.f32.mrb[94].mxu0  ;;  %v16271_v30 = vpop.f32.mrb[59].mxu1  ;;  %4166 = vmax.xlane.f32.xlu1 %v16168_v9 }
 0x668   : >> { %19477 = vst [vmem:[#allocation175_spill] sm:$0xff] %v16269_v34  ;;  %19478 = vst [vmem:[#allocation170_spill] sm:$0xff] %v16271_v30  ;;  %v16274_v28 = vpop.f32.mrb[95].mxu0  ;;  %v4075_v8 = vpop.xlane.xlu0 %4074 }
 0x669   : >> { %19479 = vst [vmem:[#allocation61_spill] sm:$0xff] %v16274_v28  ;;  %v16276_v17 = vpop.xlane.xlu1 %4110 }
 0x66a   : >> { %19480 = vst [vmem:[#allocation173_spill] sm:$0xff] %v16276_v17  ;;  %v16280_v37 = vpop.f32.mrb[60].mxu1  ;;  %4168 = vmax.xlane.f32.xlu0 %v16166_v42 }
 0x66b   : >> { %19481 = vst [vmem:[#allocation63_spill] sm:$0xff] %v16280_v37  ;;  %v16283_v46 = vpop.f32.mrb[61].mxu1  ;;  %4198 = vmax.xlane.f32.xlu1 %v16157_v11 }
 0x66c   : >> { %19482 = vst [vmem:[#allocation75_spill] sm:$0xff] %v16283_v46  ;;  %v16286_v43 = vpop.xlane.xlu0 %4080 }
 0x66d   : >> { %v16288_v34 = vpop.xlane.xlu1 %4082 }
 0x66e   : >> { %v16290_v9 = vpop.f32.mrb[62].mxu1  ;;  %4204 = vmax.xlane.f32.xlu0 %v16200_v25 }
 0x66f   : >> { %19483 = vst [vmem:[#allocation76_spill] sm:$0xff] %v16290_v9  ;;  %v16293_v28 = vpop.f32.mrb[63].mxu1  ;;  %4202 = vmax.xlane.f32.xlu1 %v16205_v15 }
 0x670   : >> { %19484 = vst [vmem:[#allocation89_spill] sm:$0xff] %v16293_v28  ;;  %v16296_v40 = vpop.xlane.xlu0 %4112 }
 0x671   : >> { %19485 = vst [vmem:[#allocation91_spill] sm:$0xff] %v16296_v40  ;;  %v16300_v17 = vpop.xlane.xlu1 %4114 }
 0x672   : >> { %4236 = vmax.xlane.f32.xlu0 %v16189_v26 }
 0x673   : >> { %4240 = vmax.xlane.f32.xlu1 %v16195_v36 }
 0x674   : >> { %v4085_v51 = vpop.xlane.xlu0 %4084 }
 0x675   : >> { %v16306_v25 = vpop.xlane.xlu1 %4086 }
 0x676   : >> { %4234 = vmax.xlane.f32.xlu0 %v16192_v0 }
 0x677   : >> { %4206 = vmax.xlane.f32.xlu1 %v16217_v4 }
 0x678   : >> { %v16310_v15 = vpop.xlane.xlu0 %4116 }
 0x679   : >> { %v16314_v40 = vpop.xlane.xlu1 %4118 }
 0x67a   : >> { %4208 = vmax.xlane.f32.xlu0 %v16212_v41 }
 0x67b   : >> { %4238 = vmax.xlane.f32.xlu1 %v16198_v5 }
 0x67c   : >> { %v16320_v36 = vpop.xlane.xlu0 %4088 }
 0x67d   : >> { %v16322_v26 = vpop.xlane.xlu1 %4090 }
 0x67e   : >> { %4212 = vmax.xlane.f32.xlu0 %v16226_v62 }
 0x67f   : >> { %4210 = vmax.xlane.f32.xlu1 %v16231_v27 }
 0x680   : >> { %v16326_v0 = vpop.xlane.xlu0 %4120 }
 0x681   : >> { %19486 = vst [vmem:[#allocation103_spill] sm:$0xff] %v16326_v0  ;;  %v16330_v4 = vpop.xlane.xlu1 %4122  ;;  %v4319_v0 = vsub.f32 %v15983_v52, %v4085_v51  ;;  %v4315_v52 = vsub.f32 %v15956_v29, %v16248_v20 }
 0x682   : >> { %4244 = vmax.xlane.f32.xlu0 %v16203_v45 }
 0x683   : >> { %4248 = vmax.xlane.f32.xlu1 %v16215_v32  ;;  %v4314_v32 = vsub.f32 %v15960_v19, %v4075_v8  ;;  %v4468_v8 = vmul.f32 1.442695, %v4319_v0  ;;  %v4460_v29 = vmul.f32 1.442695, %v4315_v52 }
 0x684   : >> { %v4093_v5 = vpop.xlane.xlu0 %4092 }
 0x685   : >> { %v16336_v41 = vpop.xlane.xlu1 %4094  ;;  %v4323_v19 = vsub.f32 %v16008_v59, %v4093_v5  ;;  %v4321_v59 = vsub.f32 %v15997_v10, %v16320_v36 }
 0x686   : >> { %4242 = vmax.xlane.f32.xlu0 %v16210_v54 }
 0x687   : >> { %4214 = vmax.xlane.f32.xlu1 %v16243_v57  ;;  %v4458_v57 = vmul.f32 1.442695, %v4314_v32  ;;  %v4318_v32 = vsub.f32 %v15987_v47, %v16288_v34  ;;  %v4317_v34 = vsub.f32 %v15969_v61, %v16286_v43  ;;  %v4322_v61 = vsub.f32 %v16012_v7, %v16322_v26 }
 0x688   : >> { %v16340_v62 = vpop.xlane.xlu0 %4124  ;;  %v4472_v10 = vmul.f32 1.442695, %v4321_v59 }
 0x689   : >> { %v16344_v27 = vpop.xlane.xlu1 %4126  ;;  %12571 = vpow2.f32 %v4458_v57  ;;  %v4466_v47 = vmul.f32 1.442695, %v4318_v32  ;;  %v4316_v32 = vsub.f32 %v15973_v63, %v16264_v56  ;;  %v4464_v52 = vmul.f32 1.442695, %v4317_v34 }
 0x68a   : >> { %4216 = vmax.xlane.f32.xlu0 %v16238_v2  ;;  %12573 = vpow2.f32 %v4468_v8  ;;  %v4476_v8 = vmul.f32 1.442695, %v4323_v19  ;;  %v4474_v7 = vmul.f32 1.442695, %v4322_v61 }
 0x68b   : >> { %4246 = vmax.xlane.f32.xlu1 %v16220_v23  ;;  %12575 = vpow2.f32 %v4466_v47 }
 0x68c   : >> { %v16351_v45 = vpop.xlane.xlu0 %4096  ;;  %12577 = vpow2.f32 %v4460_v29 }
 0x68d   : >> { %v4099_v54 = vpop.xlane.xlu1 %4098  ;;  %12579 = vpow2.f32 %v4476_v8 }
 0x68e   : >> { %4250 = vmax.xlane.f32.xlu0 %v16236_v1  ;;  %v4326_v47 = vsub.f32 %v16028_v14, %v4099_v54 }
 0x68f   : >> { %4220 = vmax.xlane.f32.xlu1 %v16250_v3 }
 0x690   : >> { %v16356_v42 = vpop.xlane.xlu0 %4128  ;;  %v4482_v14 = vmul.f32 1.442695, %v4326_v47 }
 0x691   : >> { %19487 = vst [vmem:[#allocation107_spill] sm:$0xff] %v16356_v42  ;;  %v16360_v2 = vpop.xlane.xlu1 %4130 }
 0x692   : >> { %19488 = vst [vmem:[#allocation126_spill] sm:$0xff] %v16360_v2  ;;  %4224 = vmax.xlane.f32.xlu0 %v16266_v13 }
 0x693   : >> { %v16367_v51 = vpop.f32.mrb[64].mxu1  ;;  %4252 = vmax.xlane.f32.xlu1 %v16229_v6  ;;  %v16411_v19 = vpop.eup %12571 }
 0x694   : >> { %19489 = vst [vmem:[#allocation141_spill] sm:$0xff] %v16367_v51  ;;  %v16372_v11 = vpop.f32.mrb[65].mxu1  ;;  %v16374_v1 = vpop.xlane.xlu0 %4100 }
 0x695   : >> { %19490 = vst [vmem:[#allocation113_spill] sm:$0xff] %v16372_v11  ;;  %v16376_v23 = vpop.xlane.xlu1 %4102  ;;  %v16422_v34 = vpop.eup %12573 }
 0x696   : >> { %4226 = vmax.xlane.f32.xlu0 %v16283_v46  ;;  %v16432_v61 = vpop.eup %12575  ;;  %v19505_v46 = vld [vmem:[#allocation69_spill] sm:$0xff] }
 0x697   : >> { %v16382_v0 = vpop.f32.mrb[66].mxu1  ;;  %4218 = vmax.xlane.f32.xlu1 %v16255_v24  ;;  %v16434_v47 = vpop.eup %12577 }
 0x698   : >> { %19491 = vst [vmem:[#allocation115_spill] sm:$0xff] %v16382_v0  ;;  %v16387_v20 = vpop.f32.mrb[67].mxu1  ;;  %v16389_v6 = vpop.xlane.xlu0 %4132 }
 0x699   : >> { %19492 = vst [vmem:[#allocation111_spill] sm:$0xff] %v16387_v20  ;;  %19493 = vst [vmem:[#allocation117_spill] sm:$0xff] %v16389_v6  ;;  %v16393_v5 = vpop.xlane.xlu1 %4134 }
 0x69a   : >> { %19494 = vst [vmem:[#allocation119_spill] sm:$0xff] %v16393_v5  ;;  %4230 = vmax.xlane.f32.xlu0 %v16293_v28  ;;  %v4462_v28 = vmul.f32 1.442695, %v4316_v32  ;;  %v19512_v5 = vld [vmem:[#allocation98_spill] sm:$0xff] }
 0x69b   : >> { %v16402_v43 = vpop.f32.mrb[68].mxu1  ;;  %4222 = vmax.xlane.f32.xlu1 %v16271_v30 }
 0x69c   : >> { %19495 = vst [vmem:[#allocation123_spill] sm:$0xff] %v16402_v43  ;;  %v16407_v63 = vpop.f32.mrb[69].mxu1  ;;  %v16409_v56 = vpop.xlane.xlu0 %4104 }
 0x69d   : >> { %19496 = vst [vmem:[#allocation121_spill] sm:$0xff] %v16407_v63  ;;  %v4683_v57 = vpop.xlane.xlu1 %4682 }
 0x69e   : >> { %4714 = vadd.xlane.f32.xlu0 %v16411_v19  ;;  %12581 = vrcp.f32 %v4683_v57  ;;  %v4320_v57 = vsub.f32 %v16002_v48, %v16306_v25  ;;  %v19502_v48 = vld [vmem:[#allocation140_spill] sm:$0xff] }
 0x69f   : >> { %v16415_v26 = vpop.f32.mrb[70].mxu1  ;;  %4228 = vmax.xlane.f32.xlu1 %v16280_v37  ;;  %12583 = vpow2.f32 %v4464_v52  ;;  %v4325_v25 = vsub.f32 %v19502_v48, %v16351_v45  ;;  %v19506_v45 = vld [vmem:[#allocation54_spill] sm:$0xff] }
 0x6a0   : >> { %19497 = vst [vmem:[#allocation125_spill] sm:$0xff] %v16415_v26  ;;  %v16418_v36 = vpop.f32.mrb[71].mxu1  ;;  %v16420_v29 = vpop.xlane.xlu0 %4136  ;;  %12585 = vpow2.f32 %v4462_v28  ;;  %v4470_v28 = vmul.f32 1.442695, %v4320_v57 }
 0x6a1   : >> { %19498 = vst [vmem:[#allocation127_spill] sm:$0xff] %v16418_v36  ;;  %19499 = vst [vmem:[#allocation130_spill] sm:$0xff] %v16420_v29  ;;  %v4689_v54 = vpop.xlane.xlu1 %4688  ;;  %12587 = vpow2.f32 %v4474_v7  ;;  %v4480_v48 = vmul.f32 1.442695, %v4325_v25  ;;  %v19509_v25 = vld [vmem:[#allocation65_spill] sm:$0xff] }
 0x6a2   : >> { %4724 = vadd.xlane.f32.xlu0 %v16422_v34  ;;  %12589 = vpow2.f32 %v4472_v10  ;;  %v16442_v10 = vpop.eup %12579 }
 0x6a3   : >> { %v16427_v32 = vpop.f32.mrb[72].mxu1  ;;  %4232 = vmax.xlane.f32.xlu1 %v16290_v9  ;;  %12591 = vpow2.f32 %v4482_v14 }
 0x6a4   : >> { %19500 = vst [vmem:[#allocation129_spill] sm:$0xff] %v16427_v32  ;;  %v16430_v59 = vpop.f32.mrb[73].mxu1  ;;  %v4685_v8 = vpop.xlane.xlu0 %4684 }
 0x6a5   : >> { %19501 = vst [vmem:[#allocation132_spill] sm:$0xff] %v16430_v59  ;;  %v4687_v52 = vpop.xlane.xlu1 %4686  ;;  %12593 = vrcp.f32 %v4685_v8 }
 0x6a6   : >> { %4722 = vadd.xlane.f32.xlu0 %v16432_v61  ;;  %12595 = vrcp.f32 %v4687_v52  ;;  %v4324_v52 = vsub.f32 %v19506_v45, %v16336_v41 }
 0x6a7   : >> { %v16439_v7 = vpop.f32.mrb[74].mxu1  ;;  %4716 = vadd.xlane.f32.xlu1 %v16434_v47  ;;  %12597 = vrcp.f32 %v4689_v54 }
 0x6a8   : >> { %19503 = vst [vmem:[#allocation134_spill] sm:$0xff] %v16439_v7  ;;  %v16444_v9 = vpop.f32.mrb[75].mxu1  ;;  %v4693_v14 = vpop.xlane.xlu0 %4692  ;;  %12599 = vpow2.f32 %v4470_v28  ;;  %v4478_v28 = vmul.f32 1.442695, %v4324_v52 }
 0x6a9   : >> { %19504 = vst [vmem:[#allocation140_spill] sm:$0xff] %v16444_v9  ;;  %v12582_v37 = vpop.eup %12581  ;;  %v4697_v13 = vpop.xlane.xlu1 %4696  ;;  %12601 = vrcp.f32 %v4693_v14  ;;  %v4327_v14 = vsub.f32 %v19509_v25, %v16374_v1  ;;  %v19514_v1 = vld [vmem:[#allocation137_spill] sm:$0xff] }
 0x6aa   : >> { %v16446_v8 = vpop.eup %12583  ;;  %v5066_v57 = vmul.f32 %v12582_v37, %v19505_v46  ;;  %4732 = vadd.xlane.f32.xlu0 %v16442_v10 }
 0x6ab   : >> { %v16452_v3 = vpop.f32.mrb[76].mxu1  ;;  %4720 = vadd.xlane.f32.xlu1 %v16446_v8  ;;  %v16455_v54 = vpop.eup %12585  ;;  %v4484_v25 = vmul.f32 1.442695, %v4327_v14  ;;  %v19517_v14 = vld [vmem:[#allocation114_spill] sm:$0xff] }
 0x6ac   : >> { %19507 = vst [vmem:[#allocation69_spill] sm:$0xff] %v16452_v3  ;;  %v16457_v30 = vpop.f32.mrb[77].mxu1  ;;  %10143 = vmatprep.mubr.f32.mxu0 %v5066_v57  ;;  %v4691_v24 = vpop.xlane.xlu0 %4690 }
 0x6ad   : >> { %19508 = vst [vmem:[#allocation54_spill] sm:$0xff] %v16457_v30  ;;  %v16459_v29 = vpop.eup %12587  ;;  %12603 = vrcp.f32 %v4691_v24  ;;  %v4695_v46 = vpop.xlane.xlu1 %4694 }
 0x6ae   : >> { %v16461_v37 = vpop.eup %12589  ;;  %12605 = vrcp.f32 %v4695_v46  ;;  %4730 = vadd.xlane.f32.xlu0 %v16459_v29 }
 0x6af   : >> { %v16464_v41 = vpop.eup %12591  ;;  %12607 = vpow2.f32 %v4480_v48  ;;  %v16468_v45 = vpop.f32.mrb[78].mxu1  ;;  %4718 = vadd.xlane.f32.xlu1 %v16455_v54  ;;  %v4312_v48 = vsub.f32 %v19514_v1, %v16208_v31 }
 0x6b0   : >> { %19510 = vst [vmem:[#allocation65_spill] sm:$0xff] %v16468_v45  ;;  %v12594_v57 = vpop.eup %12593  ;;  %12609 = vrcp.f32 %v4697_v13  ;;  %v16471_v24 = vpop.f32.mrb[79].mxu1  ;;  %v19515_v13 = vld [vmem:[#allocation106_spill] sm:$0xff] }
 0x6b1   : >> { %19511 = vst [vmem:[#allocation176_spill] sm:$0xff] %v16471_v24  ;;  %v4701_v6 = vpop.xlane.xlu0 %4700  ;;  %v12596_v60 = vpop.eup %12595  ;;  %v5067_v44 = vmul.f32 %v12594_v57, %v19512_v5  ;;  %12611 = vpow2.f32 %v4478_v28  ;;  %v4454_v28 = vmul.f32 1.442695, %v4312_v48  ;;  %v19520_v48 = vld [vmem:[#allocation64_spill] sm:$0xff] }
 0x6b2   : >> { %v4705_v46 = vpop.xlane.xlu1 %4704  ;;  %v12598_v42 = vpop.eup %12597  ;;  %v5068_v52 = vmul.f32 %v12596_v60, %v19513_v18  ;;  %4738 = vadd.xlane.f32.xlu0 %v16464_v41  ;;  %12613 = vrcp.f32 %v4701_v6  ;;  %v19516_v18 = vld [vmem:[#allocation80_spill] sm:$0xff] }
 0x6b3   : >> { %10144 = vmatmul.mubr.f32.vlgmr.msra.gmra.mrb[96].mxu0 %v5067_v44  ;;  %4728 = vadd.xlane.f32.xlu1 %v16461_v37  ;;  %v16480_v16 = vpop.eup %12599  ;;  %v5069_v60 = vmul.f32 %v12598_v42, %v19516_v18  ;;  %v19518_v42 = vld [vmem:[#allocation120_spill] sm:$0xff] }
 0x6b4   : >> { %11319 = vmatpush3.bf16.msra.mxu0 %v19515_v13  ;;  %10146 = vmatprep.mubr.f32.mxu0 %v5068_v52  ;;  %v12602_v57 = vpop.eup %12601 }
 0x6b5   : >> { %v4699_v2 = vpop.xlane.xlu0 %4698  ;;  %v5071_v13 = vmul.f32 %v12602_v57, %v19518_v42  ;;  %v19523_v57 = vld [vmem:[#allocation133_spill] sm:$0xff] }
 0x6b6   : >> { %12615 = vrcp.f32 %v4699_v2  ;;  %v4703_v5 = vpop.xlane.xlu1 %4702  ;;  %4266 = vmax.xlane.f32.xlu0 %v16372_v11 }
 0x6b7   : >> { %12617 = vrcp.f32 %v4703_v5  ;;  %v12604_v31 = vpop.eup %12603  ;;  %10147 = vmatmul.mubr.f32.gmra.mrb[98].mxu0 %v5069_v60  ;;  %4726 = vadd.xlane.f32.xlu1 %v16480_v16  ;;  %v19519_v5 = vld [vmem:[#allocation131_spill] sm:$0xff] }
 0x6b8   : >> { %12619 = vpow2.f32 %v4484_v25  ;;  %v12606_v44 = vpop.eup %12605  ;;  %v5070_v52 = vmul.f32 %v12604_v31, %v19517_v14 }
 0x6b9   : >> { %12621 = vrcp.f32 %v4705_v46  ;;  %v16485_v6 = vpop.xlane.xlu0 %4140  ;;  %v16488_v2 = vpop.eup %12607  ;;  %v5072_v18 = vmul.f32 %v12606_v44, %v19519_v5  ;;  %v4329_v46 = vsub.f32 %v19520_v48, %v16409_v56  ;;  %v19524_v48 = vld [vmem:[#allocation143_spill] sm:$0xff] }
 0x6ba   : >> { %v16490_v1 = vpop.xlane.xlu1 %4138  ;;  %v12610_v11 = vpop.eup %12609  ;;  %10149 = vmatprep.mubr.f32.mxu0 %v5070_v52  ;;  %4270 = vmax.xlane.f32.xlu0 %v16387_v20  ;;  %12623 = vpow2.f32 %v4454_v28 }
 0x6bb   : >> { %10150 = vmatmul.mubr.f32.gmra.mrb[100].mxu0 %v5071_v13  ;;  %4736 = vadd.xlane.f32.xlu1 %v16488_v2  ;;  %v16500_v60 = vpop.eup %12611  ;;  %v5073_v44 = vmul.f32 %v12610_v11, %v19523_v57  ;;  %v4488_v28 = vmul.f32 1.442695, %v4329_v46 }
 0x6bc   : >> { %10152 = vmatprep.mubr.f32.mxu0 %v5072_v18  ;;  %v12614_v14 = vpop.eup %12613 }
 0x6bd   : >> { %v16498_v25 = vpop.xlane.xlu0 %4172  ;;  %v5075_v20 = vmul.f32 %v12614_v14, %v19524_v48  ;;  %12625 = vpow2.f32 %v4488_v28 }
 0x6be   : >> { %19521 = vst [vmem:[#allocation98_spill] sm:$0xff] %v16498_v25  ;;  %v16502_v31 = vpop.xlane.xlu1 %4170  ;;  %4274 = vmax.xlane.f32.xlu0 %v16407_v63 }
 0x6bf   : >> { %19522 = vst [vmem:[#allocation94_spill] sm:$0xff] %v16502_v31  ;;  %10153 = vmatmul.mubr.f32.gmra.mrb[102].mxu0 %v5073_v44  ;;  %4734 = vadd.xlane.f32.xlu1 %v16500_v60 }
 0x6c0   : >> { %v12616_v52 = vpop.eup %12615 }
 0x6c1   : >> { %v12618_v56 = vpop.eup %12617  ;;  %v4709_v42 = vpop.xlane.xlu0 %4708  ;;  %v5074_v13 = vmul.f32 %v12616_v52, %v16146_v35  ;;  %v19526_v52 = vld [vmem:[#allocation62_spill] sm:$0xff] }
 0x6c2   : >> { %v16508_v5 = vpop.eup %12619  ;;  %v16510_v18 = vpop.xlane.xlu1 %4142  ;;  %v5076_v11 = vmul.f32 %v12618_v56, %v16150_v58  ;;  %4278 = vmax.xlane.f32.xlu0 %v16418_v36  ;;  %12627 = vrcp.f32 %v4709_v42 }
 0x6c3   : >> { %v12622_v57 = vpop.eup %12621  ;;  %10155 = vmatprep.mubr.f32.mxu0 %v5074_v13  ;;  %4740 = vadd.xlane.f32.xlu1 %v16508_v5 }
 0x6c4   : >> { %10156 = vmatmul.mubr.f32.gmra.mrb[104].mxu0 %v5075_v20  ;;  %v16516_v35 = vpop.eup %12623  ;;  %v5077_v14 = vmul.f32 %v12622_v57, %v19526_v52  ;;  %v19530_v57 = vld [vmem:[#allocation135_spill] sm:$0xff] }
 0x6c5   : >> { %10158 = vmatprep.mubr.f32.mxu0 %v5076_v11  ;;  %v4707_v46 = vpop.xlane.xlu0 %4706  ;;  %v19529_v11 = vld [vmem:[#allocation171_spill] sm:$0xff] }
 0x6c6   : >> { %12629 = vrcp.f32 %v4707_v46  ;;  %v16518_v44 = vpop.xlane.xlu1 %4174  ;;  %4710 = vadd.xlane.f32.xlu0 %v16516_v35  ;;  %v4313_v46 = vsub.f32 %v19530_v57, %v19529_v11  ;;  %v19535_v11 = vsub.f32 %v16034_v53, %v16376_v23  ;;  %v19541_v53 = vld [vmem:[#allocation156_spill] sm:$0xff] }
 0x6c7   : >> { %19525 = vst [vmem:[#allocation137_spill] sm:$0xff] %v16518_v44  ;;  %4268 = vmax.xlane.f32.xlu1 %v16367_v51  ;;  %v16531_v56 = vpop.eup %12625 }
 0x6c8   : >> { %10159 = vmatmul.mubr.f32.gmra.mrb[106].mxu0 %v5077_v14  ;;  %v19531_v14 = vld [vmem:[#allocation155_spill] sm:$0xff]  ;;  %v4456_v51 = vmul.f32 1.442695, %v4313_v46 }
 0x6c9   : >> { %v16523_v58 = vpop.xlane.xlu0 %4144 }
 0x6ca   : >> { %v16525_v20 = vpop.xlane.xlu1 %4146  ;;  %4256 = vmax.xlane.f32.xlu0 %v16241_v39  ;;  %12631 = vpow2.f32 %v4456_v51 }
 0x6cb   : >> { %4272 = vmax.xlane.f32.xlu1 %v16382_v0  ;;  %v19532_v0 = vld [vmem:[#allocation101_spill] sm:$0xff] }
 0x6cc   : >> { %v12628_v13 = vpop.eup %12627 }
 0x6cd   : >> { %v16529_v28 = vpop.xlane.xlu0 %4176  ;;  %v5079_v63 = vmul.f32 %v12628_v13, %v19532_v0 }
 0x6ce   : >> { %19527 = vst [vmem:[#allocation106_spill] sm:$0xff] %v16529_v28  ;;  %v16533_v42 = vpop.xlane.xlu1 %4178  ;;  %4744 = vadd.xlane.f32.xlu0 %v16531_v56 }
 0x6cf   : >> { %19528 = vst [vmem:[#allocation80_spill] sm:$0xff] %v16533_v42  ;;  %4276 = vmax.xlane.f32.xlu1 %v16402_v43 }
 0x6d0   : >> { %v12630_v48 = vpop.eup %12629 }
 0x6d1   : >> { %v16539_v52 = vpop.xlane.xlu0 %4148  ;;  %v5078_v39 = vmul.f32 %v12630_v48, %v19531_v14  ;;  %v4486_v48 = vmul.f32 1.442695, %v19535_v11 }
 0x6d2   : >> { %v16542_v36 = vpop.xlane.xlu1 %4150 }
 0x6d3   : >> { %10161 = vmatprep.mubr.f32.mxu0 %v5078_v39  ;;  %4280 = vmax.xlane.f32.xlu1 %v16415_v26  ;;  %12633 = vpow2.f32 %v4486_v48 }
 0x6d4   : >> { %10162 = vmatmul.mubr.f32.gmra.mrb[108].mxu0 %v5079_v63  ;;  %v19538_v63 = vld [vmem:[#allocation150_spill] sm:$0xff]  ;;  %v16568_v46 = vpop.eup %12631 }
 0x6d5   : >> { %v16546_v28 = vpop.xlane.xlu0 %4180 }
 0x6d6   : >> { %19533 = vst [vmem:[#allocation114_spill] sm:$0xff] %v16546_v28  ;;  %v16548_v42 = vpop.xlane.xlu1 %4182 }
 0x6d7   : >> { %19534 = vst [vmem:[#allocation120_spill] sm:$0xff] %v16548_v42  ;;  %4284 = vmax.xlane.f32.xlu1 %v16427_v32 }
 0x6d9   : >> { %v16554_v57 = vpop.xlane.xlu0 %4152 }
 0x6da   : >> { %v16556_v14 = vpop.xlane.xlu1 %4154 }
 0x6db   : >> { %4282 = vmax.xlane.f32.xlu1 %v16430_v59 }
 0x6dd   : >> { %v16559_v39 = vpop.xlane.xlu0 %4184  ;;  %v16577_v48 = vpop.eup %12633 }
 0x6de   : >> { %19536 = vst [vmem:[#allocation131_spill] sm:$0xff] %v16559_v39  ;;  %v16561_v0 = vpop.xlane.xlu1 %4186 }
 0x6df   : >> { %19537 = vst [vmem:[#allocation64_spill] sm:$0xff] %v16561_v0  ;;  %4254 = vmax.xlane.f32.xlu1 %v19538_v63 }
 0x6e1   : >> { %v16564_v13 = vpop.xlane.xlu0 %4156 }
 0x6e2   : >> { %v16566_v51 = vpop.xlane.xlu1 %4192 }
 0x6e3   : >> { %19539 = vst [vmem:[#allocation133_spill] sm:$0xff] %v16566_v51  ;;  %4712 = vadd.xlane.f32.xlu1 %v16568_v46 }
 0x6e4   : >> { %12319 = vrot.lane.b32.xlu0 %v19541_v53, %s13675_s26 }
 0x6e5   : >> { %v16571_v23 = vpop.xlane.xlu0 %4188 }
 0x6e6   : >> { %19540 = vst [vmem:[#allocation143_spill] sm:$0xff] %v16571_v23  ;;  %v16575_v11 = vpop.xlane.xlu1 %4158 }
 0x6e7   : >> { %4742 = vadd.xlane.f32.xlu1 %v16577_v48 }
 0x6e9   : >> { %v16580_v32 = vpop.xlane.xlu0 %4160 }
 0x6ea   : >> { %v16582_v63 = vpop.xlane.xlu1 %4190 }
 0x6eb   : >> { %19542 = vst [vmem:[#allocation62_spill] sm:$0xff] %v16582_v63  ;;  %v19548_v63 = vld [vmem:[#allocation92_spill] sm:$0xff] }
 0x6ec   : >> { %v4347_v42 = vsub.f32 %v19548_v63, %v16485_v6 }
 0x6ed   : >> { %v16584_v26 = vpop.xlane.xlu0 %4164 }
 0x6ee   : >> { %v16586_v59 = vpop.xlane.xlu1 %4162 }
 0x6f1   : >> { %v16588_v43 = vpop.xlane.xlu0 %4196 }
 0x6f2   : >> { %19543 = vst [vmem:[#allocation171_spill] sm:$0xff] %v16588_v43  ;;  %v16590_v51 = vpop.xlane.xlu1 %4200  ;;  %v4524_v43 = vmul.f32 1.442695, %v4347_v42  ;;  %v19557_v42 = vld [vmem:[#allocation91_spill] sm:$0xff] }
 0x6f3   : >> { %19544 = vst [vmem:[#allocation135_spill] sm:$0xff] %v16590_v51  ;;  %v19558_v63 = vsub.f32 %v15942_v33, %v19557_v42 }
 0x6f4   : >> { %12635 = vpow2.f32 %v4524_v43 }
 0x6f5   : >> { %v16592_v23 = vpop.xlane.xlu0 %4194 }
 0x6f6   : >> { %19545 = vst [vmem:[#allocation155_spill] sm:$0xff] %v16592_v23  ;;  %v16594_v39 = vpop.xlane.xlu1 %4166 }
 0x6f8   : >> { %12314 = vrot.lane.b32.xlu1 %v19541_v53, %s13674_s8 }
 0x6f9   : >> { %v16596_v0 = vpop.xlane.xlu0 %4168 }
 0x6fa   : >> { %19546 = vst [vmem:[#allocation101_spill] sm:$0xff] %v16596_v0  ;;  %v16600_v28 = vpop.xlane.xlu1 %4198 }
 0x6fb   : >> { %19547 = vst [vmem:[#allocation177_spill] sm:$0xff] %v16600_v28  ;;  %v19554_v28 = vld [vmem:[#allocation165_spill] sm:$0xff] }
 0x6fd   : >> { %v16604_v25 = vpop.xlane.xlu0 %4204 }
 0x6fe   : >> { %19549 = vst [vmem:[#allocation92_spill] sm:$0xff] %v16604_v25  ;;  %v16606_v44 = vpop.xlane.xlu1 %4202  ;;  %v16632_v25 = vpop.eup %12635 }
 0x6ff   : >> { %19562 = vst [vmem:[#allocation184_spill] sm:$0xff] %v16632_v25 }
 0x701   : >> { %v16608_v51 = vpop.xlane.xlu0 %4236 }
 0x702   : >> { %19550 = vst [vmem:[#allocation178_spill] sm:$0xff] %v16608_v51  ;;  %v16610_v23 = vpop.xlane.xlu1 %4240  ;;  %v4496_v51 = vmul.f32 1.442695, %v19558_v63  ;;  %v19570_v63 = vld [vmem:[#allocation61_spill] sm:$0xff] }
 0x703   : >> { %19551 = vst [vmem:[#allocation179_spill] sm:$0xff] %v16610_v23  ;;  %4288 = vmax.xlane.f32.xlu0 %v16439_v7  ;;  %v19559_v23 = vld [vmem:[#allocation83_spill] sm:$0xff] }
 0x704   : >> { %v4348_v7 = vsub.f32 %v19559_v23, %v16510_v18  ;;  %12637 = vpow2.f32 %v4496_v51 }
 0x705   : >> { %v16613_v0 = vpop.xlane.xlu0 %4234 }
 0x706   : >> { %19552 = vst [vmem:[#allocation180_spill] sm:$0xff] %v16613_v0  ;;  %v16615_v31 = vpop.xlane.xlu1 %4206 }
 0x707   : >> { %19553 = vst [vmem:[#allocation181_spill] sm:$0xff] %v16615_v31  ;;  %4260 = vmax.xlane.f32.xlu0 %v19554_v28  ;;  %v4526_v28 = vmul.f32 1.442695, %v4348_v7  ;;  %v19572_v7 = vld [vmem:[#allocation81_spill] sm:$0xff] }
 0x709   : >> { %v16618_v53 = vpop.xlane.xlu0 %4208  ;;  %12639 = vpow2.f32 %v4526_v28 }
 0x70a   : >> { %19555 = vst [vmem:[#allocation182_spill] sm:$0xff] %v16618_v53  ;;  %v16620_v6 = vpop.xlane.xlu1 %4238  ;;  %v19565_v53 = vld [vmem:[#allocation162_spill] sm:$0xff] }
 0x70b   : >> { %19556 = vst [vmem:[#allocation183_spill] sm:$0xff] %v16620_v6  ;;  %4290 = vmax.xlane.f32.xlu0 %v16457_v30  ;;  %v19564_v30 = vld [vmem:[#allocation128_spill] sm:$0xff] }
 0x70c   : >> { %v19566_v31 = vsub.f32 %v19564_v30, %v19565_v53  ;;  %v19575_v30 = vld [vmem:[#allocation86_spill] sm:$0xff] }
 0x70d   : >> { %v16628_v43 = vpop.xlane.xlu0 %4212 }
 0x70e   : >> { %19560 = vst [vmem:[#allocation91_spill] sm:$0xff] %v16628_v43  ;;  %v16630_v0 = vpop.xlane.xlu1 %4210  ;;  %v4490_v33 = vmul.f32 1.442695, %v19566_v31  ;;  %v4346_v31 = vsub.f32 %v19575_v30, %v16490_v1  ;;  %v19584_v30 = vld [vmem:[#allocation144_spill] sm:$0xff] }
 0x70f   : >> { %19561 = vst [vmem:[#allocation83_spill] sm:$0xff] %v16630_v0  ;;  %4780 = vadd.xlane.f32.xlu0 %v16632_v25 }
 0x710   : >> { %12641 = vpow2.f32 %v4490_v33  ;;  %v4522_v33 = vmul.f32 1.442695, %v4346_v31 }
 0x711   : >> { %v16635_v6 = vpop.xlane.xlu0 %4244 }
 0x712   : >> { %19563 = vst [vmem:[#allocation185_spill] sm:$0xff] %v16635_v6  ;;  %v16640_v42 = vpop.xlane.xlu1 %4248  ;;  %v19573_v6 = vld [vmem:[#allocation172_spill] sm:$0xff] }
 0x713   : >> { %19567 = vst [vmem:[#allocation128_spill] sm:$0xff] %v16640_v42  ;;  %4292 = vmax.xlane.f32.xlu0 %v16452_v3  ;;  %v19574_v43 = vsub.f32 %v19572_v7, %v19573_v6  ;;  %v16657_v3 = vpop.eup %12637 }
 0x714   : >> { %19577 = vst [vmem:[#allocation172_spill] sm:$0xff] %v16657_v3  ;;  %v16665_v42 = vpop.eup %12639 }
 0x715   : >> { %v16643_v18 = vpop.xlane.xlu0 %4242  ;;  %v4492_v0 = vmul.f32 1.442695, %v19574_v43  ;;  %19580 = vst [vmem:[#allocation189_spill] sm:$0xff] %v16665_v42 }
 0x716   : >> { %19568 = vst [vmem:[#allocation162_spill] sm:$0xff] %v16643_v18  ;;  %v16645_v23 = vpop.xlane.xlu1 %4214 }
 0x717   : >> { %19569 = vst [vmem:[#allocation186_spill] sm:$0xff] %v16645_v23  ;;  %4262 = vmax.xlane.f32.xlu0 %v19570_v63  ;;  %12643 = vpow2.f32 %v4492_v0 }
 0x718   : >> { %12645 = vpow2.f32 %v4522_v33 }
 0x719   : >> { %v16648_v51 = vpop.xlane.xlu0 %4216 }
 0x71a   : >> { %19571 = vst [vmem:[#allocation187_spill] sm:$0xff] %v16648_v51  ;;  %v16655_v53 = vpop.xlane.xlu1 %4246  ;;  %v16667_v6 = vpop.eup %12641 }
 0x71b   : >> { %19576 = vst [vmem:[#allocation81_spill] sm:$0xff] %v16655_v53  ;;  %4752 = vadd.xlane.f32.xlu0 %v16657_v3 }
 0x71c   : >> { %4286 = vmax.xlane.f32.xlu1 %v16444_v9 }
 0x71d   : >> { %v16660_v28 = vpop.xlane.xlu0 %4250 }
 0x71e   : >> { %19578 = vst [vmem:[#allocation86_spill] sm:$0xff] %v16660_v28  ;;  %v16663_v63 = vpop.xlane.xlu1 %4220 }
 0x71f   : >> { %19579 = vst [vmem:[#allocation188_spill] sm:$0xff] %v16663_v63  ;;  %4782 = vadd.xlane.f32.xlu0 %v16665_v42  ;;  %v19591_v63 = vld [vmem:[#allocation163_spill] sm:$0xff] }
 0x720   : >> { %4746 = vadd.xlane.f32.xlu1 %v16667_v6 }
 0x721   : >> { %v16670_v1 = vpop.xlane.xlu0 %4224  ;;  %v16680_v31 = vpop.eup %12643 }
 0x722   : >> { %19581 = vst [vmem:[#allocation190_spill] sm:$0xff] %v16670_v1  ;;  %v16673_v43 = vpop.xlane.xlu1 %4252  ;;  %19586 = vst [vmem:[#allocation194_spill] sm:$0xff] %v16680_v31  ;;  %v16687_v53 = vpop.eup %12645 }
 0x723   : >> { %19582 = vst [vmem:[#allocation191_spill] sm:$0xff] %v16673_v43 }
 0x724   : >> { %4258 = vmax.xlane.f32.xlu1 %v19584_v30 }
 0x725   : >> { %v16675_v7 = vpop.xlane.xlu0 %4226 }
 0x726   : >> { %19583 = vst [vmem:[#allocation192_spill] sm:$0xff] %v16675_v7  ;;  %v16678_v0 = vpop.xlane.xlu1 %4218 }
 0x727   : >> { %19585 = vst [vmem:[#allocation193_spill] sm:$0xff] %v16678_v0 }
 0x728   : >> { %4748 = vadd.xlane.f32.xlu1 %v16680_v31 }
 0x729   : >> { %v16682_v9 = vpop.xlane.xlu0 %4230 }
 0x72a   : >> { %19587 = vst [vmem:[#allocation195_spill] sm:$0xff] %v16682_v9  ;;  %v16685_v28 = vpop.xlane.xlu1 %4222 }
 0x72b   : >> { %19588 = vst [vmem:[#allocation196_spill] sm:$0xff] %v16685_v28 }
 0x72c   : >> { %4778 = vadd.xlane.f32.xlu1 %v16687_v53 }
 0x72d   : >> { %v4715_v18 = vpop.xlane.xlu0 %4714 }
 0x72e   : >> { %v16690_v33 = vpop.xlane.xlu1 %4228  ;;  %12647 = vrcp.f32 %v4715_v18  ;;  %v19592_v18 = vld [vmem:[#allocation153_spill] sm:$0xff] }
 0x72f   : >> { %19589 = vst [vmem:[#allocation197_spill] sm:$0xff] %v16690_v33 }
 0x731   : >> { %v4725_v43 = vpop.xlane.xlu0 %4724 }
 0x732   : >> { %v16692_v30 = vpop.xlane.xlu1 %4232 }
 0x733   : >> { %19590 = vst [vmem:[#allocation198_spill] sm:$0xff] %v16692_v30 }
 0x735   : >> { %v4723_v1 = vpop.xlane.xlu0 %4722  ;;  %12334 = vrot.lane.b32.xlu0 %v19591_v63, %s13674_s8 }
 0x736   : >> { %v4717_v7 = vpop.xlane.xlu1 %4716 }
 0x737   : >> { %12649 = vrcp.f32 %v4717_v7 }
 0x738   : >> { %v12648_v51 = vpop.eup %12647  ;;  %12651 = vrcp.f32 %v4723_v1 }
 0x739   : >> { %v4733_v9 = vpop.xlane.xlu0 %4732  ;;  %v5082_v0 = vmul.f32 %v12648_v51, %v16411_v19  ;;  %v19593_v51 = vld [vmem:[#allocation93_spill] sm:$0xff] }
 0x73a   : >> { %v4721_v28 = vpop.xlane.xlu1 %4720 }
 0x73b   : >> { %10199 = vmatprep.mubr.f32.mxu1 %v5082_v0  ;;  %12653 = vrcp.f32 %v4721_v28 }
 0x73d   : >> { %v4731_v23 = vpop.xlane.xlu0 %4730  ;;  %12324 = vrot.lane.b32.xlu1 %v19592_v18, %s13674_s8 }
 0x73e   : >> { %v4719_v33 = vpop.xlane.xlu1 %4718 }
 0x73f   : >> { %12655 = vrcp.f32 %v4719_v33 }
 0x740   : >> { %12657 = vrcp.f32 %v4725_v43  ;;  %v19594_v43 = vsub.f32 %v15958_v38, %v16300_v17  ;;  %v19596_v38 = vsub.f32 %v15952_v50, %v16310_v15 }
 0x741   : >> { %v4739_v30 = vpop.xlane.xlu0 %4738  ;;  %v12650_v42 = vpop.eup %12649  ;;  %12329 = vrot.lane.b32.xlu1 %v19592_v18, %s13675_s26  ;;  %12659 = vrcp.f32 %v4731_v23 }
 0x742   : >> { %v4729_v25 = vpop.xlane.xlu1 %4728  ;;  %v5083_v7 = vmul.f32 %v12650_v42, %v16434_v47  ;;  %v12652_v1 = vpop.eup %12651  ;;  %v4498_v33 = vmul.f32 1.442695, %v19594_v43  ;;  %v4500_v17 = vmul.f32 1.442695, %v19596_v38 }
 0x743   : >> { %12661 = vrcp.f32 %v4729_v25 }
 0x744   : >> { %10200 = vmatmul.mubr.f32.vlgmr.msra.gmra.mrb[80].mxu1 %v5083_v7  ;;  %v5086_v7 = vmul.f32 %v12652_v1, %v16432_v61 }
 0x745   : >> { %v16702_v19 = vpop.xlane.xlu0 %4266  ;;  %11351 = vmatpush3.bf16.msra.mxu1 %v19593_v51  ;;  %v12654_v0 = vpop.eup %12653 }
 0x746   : >> { %v4727_v28 = vpop.xlane.xlu1 %4726  ;;  %v5085_v23 = vmul.f32 %v12654_v0, %v16446_v8 }
 0x747   : >> { %12663 = vrcp.f32 %v4727_v28 }
 0x748   : >> { %12665 = vrcp.f32 %v4733_v9  ;;  %v19597_v9 = vld [vmem:[#allocation100_spill] sm:$0xff] }
 0x749   : >> { %v12656_v3 = vpop.eup %12655  ;;  %v16708_v31 = vpop.xlane.xlu0 %4270  ;;  %12667 = vpow2.f32 %v4498_v33  ;;  %v4350_v28 = vsub.f32 %v19597_v9, %v16525_v20 }
 0x74a   : >> { %v4737_v47 = vpop.xlane.xlu1 %4736  ;;  %v5084_v42 = vmul.f32 %v12656_v3, %v16455_v54  ;;  %v12658_v25 = vpop.eup %12657  ;;  %12669 = vrcp.f32 %v4739_v30 }
 0x74b   : >> { %12671 = vrcp.f32 %v4737_v47  ;;  %v12660_v8 = vpop.eup %12659  ;;  %v5087_v54 = vmul.f32 %v12658_v25, %v16422_v34  ;;  %v4530_v1 = vmul.f32 1.442695, %v4350_v28  ;;  %v19599_v25 = vld [vmem:[#allocation82_spill] sm:$0xff] }
 0x74c   : >> { %10202 = vmatprep.mubr.f32.mxu1 %v5084_v42  ;;  %v5090_v33 = vmul.f32 %v12660_v8, %v16459_v29  ;;  %v19604_v8 = vld [vmem:[#allocation68_spill] sm:$0xff] }
 0x74d   : >> { %10203 = vmatmul.mubr.f32.gmra.mrb[82].mxu1 %v5085_v23  ;;  %v16713_v51 = vpop.xlane.xlu0 %4274  ;;  %v12662_v0 = vpop.eup %12661 }
 0x74e   : >> { %19595 = vst [vmem:[#allocation163_spill] sm:$0xff] %v16713_v51  ;;  %v4735_v3 = vpop.xlane.xlu1 %4734  ;;  %10205 = vmatprep.mubr.f32.mxu1 %v5086_v7  ;;  %v5089_v15 = vmul.f32 %v12662_v0, %v16461_v37 }
 0x74f   : >> { %12673 = vrcp.f32 %v4735_v3 }
 0x750   : >> { %12675 = vpow2.f32 %v4500_v17 }
 0x751   : >> { %v12664_v61 = vpop.eup %12663  ;;  %10206 = vmatmul.mubr.f32.gmra.mrb[84].mxu1 %v5087_v54  ;;  %v16721_v30 = vpop.xlane.xlu0 %4278  ;;  %v4349_v54 = vsub.f32 %v19604_v8, %v16523_v58 }
 0x752   : >> { %19598 = vst [vmem:[#allocation153_spill] sm:$0xff] %v16721_v30  ;;  %v4741_v43 = vpop.xlane.xlu1 %4740  ;;  %v5088_v50 = vmul.f32 %v12664_v61, %v16480_v16  ;;  %v12666_v20 = vpop.eup %12665  ;;  %v19600_v16 = vld [vmem:[#allocation173_spill] sm:$0xff] }
 0x753   : >> { %12677 = vrcp.f32 %v4741_v43  ;;  %v16727_v34 = vpop.eup %12667  ;;  %v19601_v7 = vsub.f32 %v19599_v25, %v19600_v16  ;;  %v5091_v37 = vmul.f32 %v12666_v20, %v16442_v10 }
 0x754   : >> { %10208 = vmatprep.mubr.f32.mxu1 %v5088_v50  ;;  %4294 = vmax.xlane.f32.xlu0 %v16471_v24  ;;  %12679 = vpow2.f32 %v4530_v1  ;;  %v12670_v23 = vpop.eup %12669 }
 0x755   : >> { %10209 = vmatmul.mubr.f32.gmra.mrb[86].mxu1 %v5089_v15  ;;  %v4711_v47 = vpop.xlane.xlu0 %4710  ;;  %v4494_v38 = vmul.f32 1.442695, %v19601_v7  ;;  %v12672_v17 = vpop.eup %12671  ;;  %v5094_v10 = vmul.f32 %v12670_v23, %v16464_v41  ;;  %v4528_v15 = vmul.f32 1.442695, %v4349_v54 }
 0x756   : >> { %v16729_v42 = vpop.xlane.xlu1 %4268  ;;  %10211 = vmatprep.mubr.f32.mxu1 %v5090_v33  ;;  %12681 = vrcp.f32 %v4711_v47  ;;  %v5093_v0 = vmul.f32 %v12672_v17, %v16488_v2 }
 0x757   : >> { %12683 = vpow2.f32 %v4494_v38  ;;  %v19609_v38 = vld [vmem:[#allocation175_spill] sm:$0xff] }
 0x758   : >> { %4754 = vadd.xlane.f32.xlu0 %v16727_v34  ;;  %12685 = vpow2.f32 %v4528_v15 }
 0x759   : >> { %v12674_v29 = vpop.eup %12673  ;;  %10212 = vmatmul.mubr.f32.gmra.mrb[88].mxu1 %v5091_v37  ;;  %v16735_v9 = vpop.xlane.xlu0 %4256 }
 0x75a   : >> { %19602 = vst [vmem:[#allocation93_spill] sm:$0xff] %v16735_v9  ;;  %v16738_v28 = vpop.xlane.xlu1 %4272  ;;  %v5092_v3 = vmul.f32 %v12674_v29, %v16500_v60  ;;  %v16744_v61 = vpop.eup %12675 }
 0x75b   : >> { %19603 = vst [vmem:[#allocation100_spill] sm:$0xff] %v16738_v28 }
 0x75c   : >> { %10214 = vmatprep.mubr.f32.mxu1 %v5092_v3  ;;  %4756 = vadd.xlane.f32.xlu0 %v16744_v61  ;;  %v19611_v3 = vld [vmem:[#allocation160_spill] sm:$0xff] }
 0x75d   : >> { %v12678_v1 = vpop.eup %12677  ;;  %10215 = vmatmul.mubr.f32.gmra.mrb[90].mxu1 %v5093_v0  ;;  %v4745_v43 = vpop.xlane.xlu0 %4744 }
 0x75e   : >> { %v16748_v50 = vpop.xlane.xlu1 %4276  ;;  %10217 = vmatprep.mubr.f32.mxu1 %v5094_v10  ;;  %v5095_v60 = vmul.f32 %v12678_v1, %v16508_v5  ;;  %v16751_v20 = vpop.eup %12679 }
 0x75f   : >> { %19605 = vst [vmem:[#allocation82_spill] sm:$0xff] %v16748_v50 }
 0x760   : >> { %v12682_v58 = vpop.eup %12681  ;;  %4786 = vadd.xlane.f32.xlu0 %v16751_v20 }
 0x761   : >> { %10218 = vmatmul.mubr.f32.gmra.mrb[92].mxu1 %v5095_v60  ;;  %v12320_v2 = vpop.permute.xlu0 %12319  ;;  %v5080_v23 = vmul.f32 %v12682_v58, %v16516_v35  ;;  %v16757_v16 = vpop.eup %12683 }
 0x762   : >> { %v12322_v33 = vunpack.i.h.bf16 %v12320_v2  ;;  %v12321_v41 = vunpack.i.l.bf16 %v12320_v2  ;;  %v16754_v47 = vpop.xlane.xlu1 %4280  ;;  %v16765_v37 = vpop.eup %12685 }
 0x763   : >> { %19606 = vst [vmem:[#allocation173_spill] sm:$0xff] %v16754_v47  ;;  %10164 = vmatprep.mubr.f32.mxu0 %v5080_v23  ;;  %v19613_v23 = vld [vmem:[#allocation59_spill] sm:$0xff] }
 0x764   : >> { %v11352_v25 = vpack.c.bf16 %v12322_v33, %v12321_v41  ;;  %v19612_v33 = vsub.f32 %v15971_v55, %v16314_v40 }
 0x765   : >> { %4750 = vadd.xlane.f32.xlu1 %v16757_v16 }
 0x766   : >> { %v16759_v5 = vpop.xlane.xlu1 %4284  ;;  %11353 = vmatprep.subr.bf16.mxu1 %v11352_v25  ;;  %v4502_v41 = vmul.f32 1.442695, %v19612_v33 }
 0x767   : >> { %19607 = vst [vmem:[#allocation68_spill] sm:$0xff] %v16759_v5  ;;  %11355 = vmatpush3.bf16.msra.mxu1 %v11352_v25 }
 0x769   : >> { %4264 = vmax.xlane.f32.xlu1 %v19609_v38 }
 0x76a   : >> { %v16762_v7 = vpop.xlane.xlu1 %4282 }
 0x76b   : >> { %19608 = vst [vmem:[#allocation199_spill] sm:$0xff] %v16762_v7 }
 0x76d   : >> { %4784 = vadd.xlane.f32.xlu1 %v16765_v37 }
 0x76e   : >> { %v16767_v17 = vpop.xlane.xlu1 %4254 }
 0x76f   : >> { %19610 = vst [vmem:[#allocation200_spill] sm:$0xff] %v16767_v17 }
 0x772   : >> { %v4713_v35 = vpop.xlane.xlu1 %4712 }
 0x773   : >> { %12687 = vrcp.f32 %v4713_v35 }
 0x774   : >> { %12689 = vrcp.f32 %v4745_v43 }
 0x776   : >> { %v4743_v29 = vpop.xlane.xlu1 %4742  ;;  %12344 = vrot.lane.b32.xlu0 %v19611_v3, %s13674_s8 }
 0x777   : >> { %12691 = vrcp.f32 %v4743_v29 }
 0x778   : >> { %12693 = vpow2.f32 %v4502_v41 }
 0x77a   : >> { %v12315_v8 = vpop.permute.xlu1 %12314 }
 0x77b   : >> { %v12317_v54 = vunpack.i.h.bf16 %v12315_v8  ;;  %v12316_v0 = vunpack.i.l.bf16 %v12315_v8 }
 0x77d   : >> { %v11320_v10 = vpack.c.bf16 %v12317_v54, %v12316_v0  ;;  %v12688_v1 = vpop.eup %12687  ;;  %v19615_v54 = vld [vmem:[#allocation84_spill] sm:$0xff] }
 0x77e   : >> { %v5081_v60 = vmul.f32 %v12688_v1, %v16568_v46  ;;  %12339 = vrot.lane.b32.xlu1 %v19591_v63, %s13675_s26  ;;  %v12690_v15 = vpop.eup %12689  ;;  %v4352_v46 = vsub.f32 %v19613_v23, %v16542_v36  ;;  %v4351_v0 = vsub.f32 %v19615_v54, %v16539_v52 }
 0x77f   : >> { %11321 = vmatprep.subr.bf16.mxu0 %v11320_v10  ;;  %v5097_v2 = vmul.f32 %v12690_v15, %v16531_v56 }
 0x780   : >> { %11323 = vmatpush3.bf16.msra.mxu0 %v11320_v10  ;;  %v4534_v29 = vmul.f32 1.442695, %v4352_v46 }
 0x781   : >> { %v12692_v58 = vpop.eup %12691  ;;  %10165 = vmatmul.mubr.f32.gmra.mrb[110].mxu0 %v5081_v60 }
 0x782   : >> { %v5096_v43 = vmul.f32 %v12692_v58, %v16577_v48  ;;  %12695 = vpow2.f32 %v4534_v29  ;;  %v16793_v1 = vpop.eup %12693  ;;  %v4532_v58 = vmul.f32 1.442695, %v4351_v0 }
 0x784   : >> { %10220 = vmatprep.mubr.f32.mxu1 %v5096_v43  ;;  %12697 = vpow2.f32 %v4532_v58 }
 0x785   : >> { %10221 = vmatmul.mubr.f32.gmra.mrb[94].mxu1 %v5097_v2 }
 0x786   : >> { %v10145_v25 = vpop.f32.mrb[96].mxu0 }
 0x787   : >> { %6355 = vst.msk [vmem:[#allocation2 + $0x8] sm:$0xff] %vm2369_vm2, %v10145_v25  ;;  %v5260_v35 = vpop.f32.mrb[97].mxu0 }
 0x788   : >> { %6354 = vst.msk [vmem:[#allocation2] sm:$0xff] %vm2369_vm2, %v5260_v35 }
 0x78a   : >> { %v10148_v48 = vpop.f32.mrb[98].mxu0 }
 0x78b   : >> { %6357 = vst.msk [vmem:[#allocation2 + $0x18] sm:$0xff] %vm2369_vm2, %v10148_v48  ;;  %v5270_v56 = vpop.f32.mrb[99].mxu0 }
 0x78c   : >> { %6356 = vst.msk [vmem:[#allocation2 + $0x10] sm:$0xff] %vm2369_vm2, %v5270_v56  ;;  %v16800_v2 = vpop.eup %12695 }
 0x78e   : >> { %v10151_v55 = vpop.f32.mrb[100].mxu0  ;;  %v16813_v25 = vpop.eup %12697 }
 0x78f   : >> { %6359 = vst.msk [vmem:[#allocation2 + $0x28] sm:$0xff] %vm2369_vm2, %v10151_v55  ;;  %v5280_v40 = vpop.f32.mrb[101].mxu0 }
 0x790   : >> { %6358 = vst.msk [vmem:[#allocation2 + $0x20] sm:$0xff] %vm2369_vm2, %v5280_v40  ;;  %v16788_v36 = vpop.xlane.xlu0 %4288 }
 0x791   : >> { %19614 = vst [vmem:[#allocation160_spill] sm:$0xff] %v16788_v36  ;;  %v19624_v36 = vld [vmem:[#allocation148_spill] sm:$0xff] }
 0x792   : >> { %v10154_v8 = vpop.f32.mrb[102].mxu0  ;;  %v4354_v38 = vsub.f32 %v19624_v36, %v16556_v14  ;;  %v19627_v14 = vld [vmem:[#allocation138_spill] sm:$0xff] }
 0x793   : >> { %6361 = vst.msk [vmem:[#allocation2 + $0x38] sm:$0xff] %vm2369_vm2, %v10154_v8  ;;  %v5290_v10 = vpop.f32.mrb[103].mxu0  ;;  %v19621_v8 = vld [vmem:[#allocation167_spill] sm:$0xff]  ;;  %v4353_v36 = vsub.f32 %v19627_v14, %v16554_v57 }
 0x794   : >> { %6360 = vst.msk [vmem:[#allocation2 + $0x30] sm:$0xff] %vm2369_vm2, %v5290_v10  ;;  %v16796_v60 = vpop.xlane.xlu0 %4260 }
 0x795   : >> { %19616 = vst [vmem:[#allocation59_spill] sm:$0xff] %v16796_v60  ;;  %4758 = vadd.xlane.f32.xlu0 %v16793_v1 }
 0x797   : >> { %v10157_v15 = vpop.f32.mrb[104].mxu0 }
 0x798   : >> { %6363 = vst.msk [vmem:[#allocation2 + $0x48] sm:$0xff] %vm2369_vm2, %v10157_v15  ;;  %v5300_v43 = vpop.f32.mrb[105].mxu0  ;;  %v16803_v52 = vpop.xlane.xlu0 %4290 }
 0x799   : >> { %6362 = vst.msk [vmem:[#allocation2 + $0x40] sm:$0xff] %vm2369_vm2, %v5300_v43  ;;  %19617 = vst [vmem:[#allocation84_spill] sm:$0xff] %v16803_v52  ;;  %4790 = vadd.xlane.f32.xlu0 %v16800_v2 }
 0x79b   : >> { %v10160_v33 = vpop.f32.mrb[106].mxu0 }
 0x79c   : >> { %6365 = vst.msk [vmem:[#allocation2 + $0x58] sm:$0xff] %vm2369_vm2, %v10160_v33  ;;  %v5310_v41 = vpop.f32.mrb[107].mxu0  ;;  %v16808_v23 = vpop.xlane.xlu0 %4780 }
 0x79d   : >> { %6364 = vst.msk [vmem:[#allocation2 + $0x50] sm:$0xff] %vm2369_vm2, %v5310_v41 }
 0x7a0   : >> { %v16811_v46 = vpop.xlane.xlu0 %4292 }
 0x7a1   : >> { %19618 = vst [vmem:[#allocation201_spill] sm:$0xff] %v16811_v46 }
 0x7a2   : >> { %4296 = vmax.xlane.f32.xlu1 %v16468_v45  ;;  %v19623_v45 = vsub.f32 %v15985_v49, %v16330_v4  ;;  %v19625_v4 = vld [vmem:[#allocation103_spill] sm:$0xff] }
 0x7a3   : >> { %v19626_v49 = vsub.f32 %v15965_v21, %v19625_v4  ;;  %v19632_v4 = vld [vmem:[#allocation146_spill] sm:$0xff] }
 0x7a4   : >> { %v16818_v48 = vpop.xlane.xlu0 %4262  ;;  %v4506_v24 = vmul.f32 1.442695, %v19623_v45 }
 0x7a5   : >> { %19619 = vst [vmem:[#allocation202_spill] sm:$0xff] %v16818_v48  ;;  %v4504_v45 = vmul.f32 1.442695, %v19626_v49  ;;  %v4356_v49 = vsub.f32 %v19632_v4, %v16575_v11 }
 0x7a6   : >> { %4788 = vadd.xlane.f32.xlu1 %v16813_v25 }
 0x7a7   : >> { %v10163_v35 = vpop.f32.mrb[108].mxu0  ;;  %v4542_v14 = vmul.f32 1.442695, %v4356_v49 }
 0x7a8   : >> { %6367 = vst.msk [vmem:[#allocation2 + $0x68] sm:$0xff] %vm2369_vm2, %v10163_v35  ;;  %v5320_v29 = vpop.f32.mrb[109].mxu0  ;;  %v16822_v40 = vpop.xlane.xlu0 %4752 }
 0x7a9   : >> { %6366 = vst.msk [vmem:[#allocation2 + $0x60] sm:$0xff] %vm2369_vm2, %v5320_v29  ;;  %v16820_v56 = vpop.xlane.xlu1 %4286 }
 0x7aa   : >> { %19620 = vst [vmem:[#allocation203_spill] sm:$0xff] %v16820_v56  ;;  %v19665_v56 = vld [vmem:[#allocation71_spill] sm:$0xff] }
 0x7ab   : >> { %v4360_v17 = vsub.f32 %v19665_v56, %v16594_v39  ;;  %v19671_v56 = vld [vmem:[#allocation94_spill] sm:$0xff] }
 0x7ac   : >> { %v16828_v0 = vpop.xlane.xlu0 %4782 }
 0x7ad   : >> { %v4747_v55 = vpop.xlane.xlu1 %4746  ;;  %v4550_v7 = vmul.f32 1.442695, %v4360_v17 }
 0x7ae   : >> { %12699 = vrcp.f32 %v4747_v55 }
 0x7af   : >> { %12354 = vrot.lane.b32.xlu0 %v19621_v8, %s13674_s8 }
 0x7b0   : >> { %v12335_v33 = vpop.permute.xlu0 %12334 }
 0x7b1   : >> { %v16826_v54 = vpop.xlane.xlu1 %4258  ;;  %v12337_v35 = vunpack.i.h.bf16 %v12335_v33  ;;  %v12336_v29 = vunpack.i.l.bf16 %v12335_v33 }
 0x7b2   : >> { %19622 = vst [vmem:[#allocation204_spill] sm:$0xff] %v16826_v54  ;;  %v19652_v54 = vld [vmem:[#allocation60_spill] sm:$0xff] }
 0x7b5   : >> { %v16830_v10 = vpop.xlane.xlu1 %4748 }
 0x7b7   : >> { %12349 = vrot.lane.b32.xlu1 %v19611_v3, %s13675_s26 }
 0x7b8   : >> { %v12700_v15 = vpop.eup %12699 }
 0x7b9   : >> { %v4779_v58 = vpop.xlane.xlu1 %4778  ;;  %v5098_v43 = vmul.f32 %v12700_v15, %v16667_v6  ;;  %v11328_v6 = vpack.c.bf16 %v12337_v35, %v12336_v29  ;;  %v4538_v15 = vmul.f32 1.442695, %v4354_v38 }
 0x7ba   : >> { %12701 = vrcp.f32 %v4779_v58 }
 0x7bb   : >> { %10255 = vmatprep.mubr.f32.mxu0 %v5098_v43  ;;  %12703 = vpow2.f32 %v4506_v24 }
 0x7bc   : >> { %12705 = vpow2.f32 %v4538_v15 }
 0x7bd   : >> { %v12325_v41 = vpop.permute.xlu1 %12324  ;;  %12707 = vpow2.f32 %v4504_v45 }
 0x7be   : >> { %v12327_v55 = vunpack.i.h.bf16 %v12325_v41  ;;  %v12326_v60 = vunpack.i.l.bf16 %v12325_v41 }
 0x7c0   : >> { %v11324_v9 = vpack.c.bf16 %v12327_v55, %v12326_v60 }
 0x7c1   : >> { %v12330_v48 = vpop.permute.xlu1 %12329 }
 0x7c2   : >> { %v12332_v46 = vunpack.i.h.bf16 %v12330_v48  ;;  %v12331_v58 = vunpack.i.l.bf16 %v12330_v48  ;;  %11325 = vmatprep.subr.bf16.mxu0 %v11324_v9 }
 0x7c3   : >> { %11327 = vmatpush3.bf16.msra.mxu0 %v11324_v9  ;;  %v4536_v9 = vmul.f32 1.442695, %v4353_v36 }
 0x7c4   : >> { %v12702_v43 = vpop.eup %12701  ;;  %11329 = vmatprep.subr.bf16.mxu0 %v11328_v6  ;;  %v11356_v33 = vpack.c.bf16 %v12332_v46, %v12331_v58  ;;  %v19629_v46 = vld [vmem:[#allocation164_spill] sm:$0xff] }
 0x7c5   : >> { %v5114_v41 = vmul.f32 %v12702_v43, %v16687_v53  ;;  %v16846_v24 = vpop.eup %12703  ;;  %12709 = vpow2.f32 %v4536_v9 }
 0x7c6   : >> { %11357 = vmatprep.subr.bf16.mxu1 %v11356_v33  ;;  %v16849_v38 = vpop.eup %12705 }
 0x7c7   : >> { %11331 = vmatpush3.bf16.msra.mxu0 %v11328_v6  ;;  %11359 = vmatpush3.bf16.msra.mxu1 %v11356_v33  ;;  %v16852_v53 = vpop.eup %12707  ;;  %v19631_v33 = vsub.f32 %v15999_v22, %v16344_v27  ;;  %v19634_v22 = vld [vmem:[#allocation66_spill] sm:$0xff] }
 0x7c8   : >> { %10311 = vmatprep.mubr.f32.mxu1 %v5114_v41  ;;  %v4355_v27 = vsub.f32 %v19634_v22, %v16564_v13 }
 0x7c9   : >> { %v4510_v41 = vmul.f32 1.442695, %v19631_v33 }
 0x7ca   : >> { %v4540_v11 = vmul.f32 1.442695, %v4355_v27 }
 0x7cb   : >> { %12711 = vpow2.f32 %v4510_v41 }
 0x7cc   : >> { %12713 = vpow2.f32 %v4542_v14 }
 0x7ce   : >> { %4762 = vadd.xlane.f32.xlu0 %v16846_v24 }
 0x7cf   : >> { %v16855_v21 = vpop.eup %12709 }
 0x7d2   : >> { %4794 = vadd.xlane.f32.xlu0 %v16849_v38 }
 0x7d5   : >> { %v16886_v33 = vpop.eup %12711 }
 0x7d6   : >> { %v16889_v41 = vpop.eup %12713 }
 0x7db   : >> { %4760 = vadd.xlane.f32.xlu1 %v16852_v53 }
 0x7df   : >> { %4792 = vadd.xlane.f32.xlu1 %v16855_v21 }
 0x7e1   : >> { %v16858_v57 = vpop.xlane.xlu0 %4294 }
 0x7e2   : >> { %19628 = vst [vmem:[#allocation148_spill] sm:$0xff] %v16858_v57 }
 0x7e5   : >> { %v16860_v60 = vpop.xlane.xlu0 %4754 }
 0x7e8   : >> { %12364 = vrot.lane.b32.xlu0 %v19629_v46, %s13674_s8 }
 0x7e9   : >> { %v16864_v48 = vpop.xlane.xlu0 %4756 }
 0x7ed   : >> { %v16866_v35 = vpop.xlane.xlu0 %4786 }
 0x7f0   : >> { %12359 = vrot.lane.b32.xlu1 %v19621_v8, %s13675_s26 }
 0x7f1   : >> { %v12345_v29 = vpop.permute.xlu0 %12344 }
 0x7f2   : >> { %v12347_v55 = vunpack.i.h.bf16 %v12345_v29  ;;  %v12346_v58 = vunpack.i.l.bf16 %v12345_v29  ;;  %v16870_v6 = vpop.xlane.xlu1 %4750 }
 0x7f4   : >> { %v11332_v15 = vpack.c.bf16 %v12347_v55, %v12346_v58  ;;  %v19633_v58 = vsub.f32 %v15979_v12, %v16340_v62 }
 0x7f6   : >> { %v16872_v43 = vpop.xlane.xlu1 %4264  ;;  %11333 = vmatprep.subr.bf16.mxu0 %v11332_v15 }
 0x7f7   : >> { %19630 = vst [vmem:[#allocation103_spill] sm:$0xff] %v16872_v43  ;;  %11335 = vmatpush3.bf16.msra.mxu0 %v11332_v15  ;;  %v4508_v15 = vmul.f32 1.442695, %v19633_v58 }
 0x7f9   : >> { %12715 = vpow2.f32 %v4508_v15 }
 0x7fa   : >> { %v16879_v45 = vpop.xlane.xlu1 %4784  ;;  %12717 = vpow2.f32 %v4540_v11 }
 0x7fe   : >> { %v12340_v36 = vpop.permute.xlu1 %12339 }
 0x7ff   : >> { %v12342_v9 = vunpack.i.h.bf16 %v12340_v36  ;;  %v12341_v29 = vunpack.i.l.bf16 %v12340_v36  ;;  %v19639_v36 = vld [vmem:[#allocation168_spill] sm:$0xff] }
 0x801   : >> { %v11360_v55 = vpack.c.bf16 %v12342_v9, %v12341_v29 }
 0x803   : >> { %11361 = vmatprep.subr.bf16.mxu1 %v11360_v55  ;;  %v16892_v4 = vpop.eup %12715 }
 0x804   : >> { %11363 = vmatpush3.bf16.msra.mxu1 %v11360_v55  ;;  %v16895_v12 = vpop.eup %12717 }
 0x807   : >> { %4766 = vadd.xlane.f32.xlu0 %v16886_v33 }
 0x80b   : >> { %4798 = vadd.xlane.f32.xlu0 %v16889_v41 }
 0x814   : >> { %4764 = vadd.xlane.f32.xlu1 %v16892_v4 }
 0x817   : >> { %v16897_v62 = vpop.f32.mrb[80].mxu1 }
 0x818   : >> { %19635 = vst [vmem:[#allocation138_spill] sm:$0xff] %v16897_v62  ;;  %v16899_v13 = vpop.f32.mrb[81].mxu1  ;;  %4796 = vadd.xlane.f32.xlu1 %v16895_v12 }
 0x819   : >> { %19636 = vst [vmem:[#allocation146_spill] sm:$0xff] %v16899_v13 }
 0x820   : >> { %v16902_v49 = vpop.f32.mrb[82].mxu1 }
 0x821   : >> { %19637 = vst [vmem:[#allocation66_spill] sm:$0xff] %v16902_v49  ;;  %v16904_v14 = vpop.f32.mrb[83].mxu1  ;;  %12374 = vrot.lane.b32.xlu0 %v19639_v36, %s13674_s8 }
 0x822   : >> { %19638 = vst [vmem:[#allocation205_spill] sm:$0xff] %v16904_v14  ;;  %v16908_v9 = vpop.xlane.xlu0 %4758 }
 0x824   : >> { %v16910_v29 = vpop.f32.mrb[84].mxu1 }
 0x825   : >> { %19640 = vst [vmem:[#allocation206_spill] sm:$0xff] %v16910_v29  ;;  %v16912_v55 = vpop.f32.mrb[85].mxu1 }
 0x826   : >> { %19641 = vst [vmem:[#allocation207_spill] sm:$0xff] %v16912_v55  ;;  %v16914_v58 = vpop.xlane.xlu0 %4790 }
 0x828   : >> { %v16916_v15 = vpop.f32.mrb[86].mxu1 }
 0x829   : >> { %19642 = vst [vmem:[#allocation208_spill] sm:$0xff] %v16916_v15  ;;  %v16918_v22 = vpop.f32.mrb[87].mxu1  ;;  %12369 = vrot.lane.b32.xlu1 %v19629_v46, %s13675_s26  ;;  %v19650_v15 = vld [vmem:[#allocation126_spill] sm:$0xff] }
 0x82a   : >> { %19643 = vst [vmem:[#allocation209_spill] sm:$0xff] %v16918_v22  ;;  %v12355_v27 = vpop.permute.xlu0 %12354  ;;  %v19649_v22 = vld [vmem:[#allocation109_spill] sm:$0xff] }
 0x82b   : >> { %v12357_v14 = vunpack.i.h.bf16 %v12355_v27  ;;  %v12356_v13 = vunpack.i.l.bf16 %v12355_v27  ;;  %v19651_v43 = vsub.f32 %v19649_v22, %v19650_v15  ;;  %v19655_v15 = vld [vmem:[#allocation110_spill] sm:$0xff] }
 0x82c   : >> { %v16922_v11 = vpop.f32.mrb[88].mxu1 }
 0x82d   : >> { %19644 = vst [vmem:[#allocation210_spill] sm:$0xff] %v16922_v11  ;;  %v16924_v49 = vpop.f32.mrb[89].mxu1  ;;  %v11336_v62 = vpack.c.bf16 %v12357_v14, %v12356_v13  ;;  %v4514_v52 = vmul.f32 1.442695, %v19651_v43  ;;  %v4358_v11 = vsub.f32 %v19652_v54, %v16586_v59  ;;  %v19656_v43 = vld [vmem:[#allocation107_spill] sm:$0xff]  ;;  %v19658_v59 = vld [vmem:[#allocation78_spill] sm:$0xff] }
 0x82e   : >> { %19645 = vst [vmem:[#allocation211_spill] sm:$0xff] %v16924_v49  ;;  %v19657_v22 = vsub.f32 %v19655_v15, %v19656_v43  ;;  %v4357_v54 = vsub.f32 %v19658_v59, %v16580_v32 }
 0x82f   : >> { %v16928_v55 = vpop.xlane.xlu1 %4296  ;;  %11337 = vmatprep.subr.bf16.mxu0 %v11336_v62  ;;  %12719 = vpow2.f32 %v4514_v52  ;;  %v4546_v14 = vmul.f32 1.442695, %v4358_v11 }
 0x830   : >> { %v16926_v29 = vpop.f32.mrb[90].mxu1  ;;  %19647 = vst [vmem:[#allocation213_spill] sm:$0xff] %v16928_v55  ;;  %11339 = vmatpush3.bf16.msra.mxu0 %v11336_v62  ;;  %v4544_v52 = vmul.f32 1.442695, %v4357_v54 }
 0x831   : >> { %19646 = vst [vmem:[#allocation212_spill] sm:$0xff] %v16926_v29  ;;  %v16930_v57 = vpop.f32.mrb[91].mxu1  ;;  %12721 = vpow2.f32 %v4546_v14 }
 0x832   : >> { %19648 = vst [vmem:[#allocation214_spill] sm:$0xff] %v16930_v57  ;;  %v4512_v57 = vmul.f32 1.442695, %v19657_v22 }
 0x833   : >> { %v16939_v27 = vpop.xlane.xlu1 %4788 }
 0x834   : >> { %v16937_v5 = vpop.f32.mrb[92].mxu1  ;;  %12723 = vpow2.f32 %v4512_v57 }
 0x835   : >> { %19653 = vst [vmem:[#allocation109_spill] sm:$0xff] %v16937_v5  ;;  %v16941_v13 = vpop.f32.mrb[93].mxu1  ;;  %12725 = vpow2.f32 %v4544_v52 }
 0x836   : >> { %19654 = vst [vmem:[#allocation126_spill] sm:$0xff] %v16941_v13 }
 0x837   : >> { %v12350_v29 = vpop.permute.xlu1 %12349 }
 0x838   : >> { %v12352_v49 = vunpack.i.h.bf16 %v12350_v29  ;;  %v12351_v55 = vunpack.i.l.bf16 %v12350_v29 }
 0x839   : >> { %v16948_v5 = vpop.eup %12719 }
 0x83a   : >> { %v11364_v62 = vpack.c.bf16 %v12352_v49, %v12351_v55 }
 0x83b   : >> { %v16951_v11 = vpop.eup %12721 }
 0x83c   : >> { %11365 = vmatprep.subr.bf16.mxu1 %v11364_v62 }
 0x83d   : >> { %11367 = vmatpush3.bf16.msra.mxu1 %v11364_v62  ;;  %v19661_v62 = vld [vmem:[#allocation147_spill] sm:$0xff] }
 0x83e   : >> { %v16954_v49 = vpop.eup %12723 }
 0x83f   : >> { %v16957_v29 = vpop.eup %12725 }
 0x840   : >> { %4770 = vadd.xlane.f32.xlu0 %v16948_v5 }
 0x844   : >> { %4802 = vadd.xlane.f32.xlu0 %v16951_v11 }
 0x84d   : >> { %4768 = vadd.xlane.f32.xlu1 %v16954_v49 }
 0x851   : >> { %4800 = vadd.xlane.f32.xlu1 %v16957_v29 }
 0x854   : >> { %v10166_v32 = vpop.f32.mrb[110].mxu0 }
 0x855   : >> { %6369 = vst.msk [vmem:[#allocation2 + $0x78] sm:$0xff] %vm2369_vm2, %v10166_v32  ;;  %v5330_v55 = vpop.f32.mrb[111].mxu0 }
 0x856   : >> { %6368 = vst.msk [vmem:[#allocation2 + $0x70] sm:$0xff] %vm2369_vm2, %v5330_v55  ;;  %v19662_v55 = vld [vmem:[#allocation55_spill] sm:$0xff] }
 0x858   : >> { %v16962_v57 = vpop.f32.mrb[94].mxu1 }
 0x859   : >> { %19659 = vst [vmem:[#allocation60_spill] sm:$0xff] %v16962_v57  ;;  %v16964_v14 = vpop.f32.mrb[95].mxu1  ;;  %v19663_v57 = vld [vmem:[#allocation119_spill] sm:$0xff] }
 0x85a   : >> { %19660 = vst [vmem:[#allocation110_spill] sm:$0xff] %v16964_v14  ;;  %12384 = vrot.lane.b32.xlu0 %v19661_v62, %s13676_s17  ;;  %v19664_v13 = vsub.f32 %v19662_v55, %v19663_v57 }
 0x85b   : >> { %v4763_v15 = vpop.xlane.xlu0 %4762 }
 0x85c   : >> { %v4518_v14 = vmul.f32 1.442695, %v19664_v13  ;;  %v19669_v13 = vld [vmem:[#allocation87_spill] sm:$0xff] }
 0x85d   : >> { %v4359_v57 = vsub.f32 %v19669_v13, %v16584_v26  ;;  %v19670_v26 = vld [vmem:[#allocation156_spill] sm:$0xff] }
 0x85e   : >> { %12727 = vpow2.f32 %v4518_v14  ;;  %v19672_v14 = vld [vmem:[#allocation58_spill] sm:$0xff] }
 0x85f   : >> { %v16968_v43 = vpop.xlane.xlu0 %4794  ;;  %12729 = vpow2.f32 %v4550_v7  ;;  %v4548_v39 = vmul.f32 1.442695, %v4359_v57 }
 0x862   : >> { %12379 = vrot.lane.b32.xlu1 %v19639_v36, %s13675_s26 }
 0x863   : >> { %v12365_v22 = vpop.permute.xlu0 %12364 }
 0x864   : >> { %v12367_v59 = vunpack.i.h.bf16 %v12365_v22  ;;  %v12366_v54 = vunpack.i.l.bf16 %v12365_v22 }
 0x866   : >> { %v11340_v52 = vpack.c.bf16 %v12367_v59, %v12366_v54  ;;  %v19666_v59 = vld [vmem:[#allocation97_spill] sm:$0xff] }
 0x867   : >> { %v19667_v54 = vld [vmem:[#allocation117_spill] sm:$0xff] }
 0x868   : >> { %v4761_v32 = vpop.xlane.xlu1 %4760  ;;  %11341 = vmatprep.subr.bf16.mxu0 %v11340_v52  ;;  %v16984_v55 = vpop.eup %12727 }
 0x869   : >> { %11343 = vmatpush3.bf16.msra.mxu0 %v11340_v52  ;;  %v19668_v52 = vsub.f32 %v19666_v59, %v19667_v54  ;;  %v16987_v17 = vpop.eup %12729 }
 0x86b   : >> { %v4516_v51 = vmul.f32 1.442695, %v19668_v52 }
 0x86c   : >> { %v16977_v47 = vpop.xlane.xlu1 %4792 }
 0x86d   : >> { %12731 = vpow2.f32 %v4516_v51 }
 0x86e   : >> { %12733 = vpow2.f32 %v4548_v39  ;;  %v19674_v39 = vld [vmem:[#allocation194_spill] sm:$0xff] }
 0x86f   : >> { %12735 = vrcp.f32 %v16830_v10 }
 0x870   : >> { %v12360_v50 = vpop.permute.xlu1 %12359  ;;  %12737 = vrcp.f32 %v16870_v6 }
 0x871   : >> { %v12362_v30 = vunpack.i.h.bf16 %v12360_v50  ;;  %v12361_v28 = vunpack.i.l.bf16 %v12360_v50  ;;  %12739 = vrcp.f32 %v16822_v40 }
 0x872   : >> { %12741 = vrcp.f32 %v16860_v60  ;;  %v19673_v60 = vld [vmem:[#allocation152_spill] sm:$0xff] }
 0x873   : >> { %v11368_v22 = vpack.c.bf16 %v12362_v30, %v12361_v28  ;;  %12743 = vrcp.f32 %v16864_v48  ;;  %v4378_v57 = vsub.f32 %v19673_v60, %v16606_v44 }
 0x874   : >> { %12745 = vrcp.f32 %v16908_v9 }
 0x875   : >> { %11369 = vmatprep.subr.bf16.mxu1 %v11368_v22  ;;  %12747 = vrcp.f32 %v4761_v32  ;;  %v19675_v32 = vld [vmem:[#allocation172_spill] sm:$0xff] }
 0x876   : >> { %11371 = vmatpush3.bf16.msra.mxu1 %v11368_v22  ;;  %v4362_v22 = vsub.f32 %v19672_v14, %v19671_v56  ;;  %12749 = vrcp.f32 %v4763_v15 }
 0x877   : >> { %v16990_v30 = vpop.eup %12731 }
 0x878   : >> { %v16993_v28 = vpop.eup %12733  ;;  %v4554_v13 = vmul.f32 1.442695, %v4362_v22  ;;  %v4586_v22 = vmul.f32 1.442695, %v4378_v57 }
 0x879   : >> { %4774 = vadd.xlane.f32.xlu0 %v16984_v55  ;;  %v12736_v6 = vpop.eup %12735 }
 0x87a   : >> { %v12738_v52 = vpop.eup %12737  ;;  %v5099_v56 = vmul.f32 %v12736_v6, %v19674_v39  ;;  %12751 = vpow2.f32 %v4554_v13  ;;  %v19676_v13 = vld [vmem:[#allocation130_spill] sm:$0xff] }
 0x87b   : >> { %v12740_v14 = vpop.eup %12739 }
 0x87c   : >> { %v12742_v48 = vpop.eup %12741 }
 0x87d   : >> { %4806 = vadd.xlane.f32.xlu0 %v16987_v17  ;;  %v5102_v44 = vmul.f32 %v12742_v48, %v16727_v34 }
 0x886   : >> { %4772 = vadd.xlane.f32.xlu1 %v16990_v30 }
 0x88a   : >> { %4804 = vadd.xlane.f32.xlu1 %v16993_v28 }
 0x893   : >> { %12394 = vrot.lane.b32.xlu0 %v19670_v26, %s13676_s17 }
 0x894   : >> { %v4767_v50 = vpop.xlane.xlu0 %4766 }
 0x898   : >> { %v17000_v51 = vpop.xlane.xlu0 %4798 }
 0x89b   : >> { %12389 = vrot.lane.b32.xlu1 %v19661_v62, %s13677_s29 }
 0x89c   : >> { %v12375_v7 = vpop.permute.xlu0 %12374 }
 0x89d   : >> { %v12377_v59 = vunpack.i.h.bf16 %v12375_v7  ;;  %v12376_v54 = vunpack.i.l.bf16 %v12375_v7  ;;  %v5100_v7 = vmul.f32 %v12738_v52, %v16757_v16 }
 0x89f   : >> { %v11344_v10 = vpack.c.bf16 %v12377_v59, %v12376_v54  ;;  %v5101_v59 = vmul.f32 %v12740_v14, %v19675_v32  ;;  %v12744_v54 = vpop.eup %12743 }
 0x8a0   : >> { %v12746_v15 = vpop.eup %12745  ;;  %v5103_v16 = vmul.f32 %v12744_v54, %v16744_v61  ;;  %v19679_v61 = vld [vmem:[#allocation90_spill] sm:$0xff] }
 0x8a1   : >> { %v4765_v40 = vpop.xlane.xlu1 %4764  ;;  %11345 = vmatprep.subr.bf16.mxu0 %v11344_v10  ;;  %v12748_v52 = vpop.eup %12747 }
 0x8a2   : >> { %11347 = vmatpush3.bf16.msra.mxu0 %v11344_v10  ;;  %12753 = vrcp.f32 %v4765_v40  ;;  %v19677_v40 = vld [vmem:[#allocation124_spill] sm:$0xff]  ;;  %v5105_v14 = vmul.f32 %v12748_v52, %v16852_v53  ;;  %v19680_v52 = vld [vmem:[#allocation137_spill] sm:$0xff] }
 0x8a3   : >> { %12755 = vrcp.f32 %v4767_v50  ;;  %v4345_v39 = vsub.f32 %v19677_v40, %v19676_v13  ;;  %v5104_v50 = vmul.f32 %v12746_v15, %v16793_v1  ;;  %v19681_v13 = vld [vmem:[#allocation70_spill] sm:$0xff] }
 0x8a4   : >> { %12757 = vpow2.f32 %v4586_v22  ;;  %v19678_v22 = vld [vmem:[#allocation101_spill] sm:$0xff]  ;;  %v4364_v40 = vsub.f32 %v19681_v13, %v19680_v52 }
 0x8a5   : >> { %v17014_v9 = vpop.xlane.xlu1 %4796  ;;  %10256 = vmatmul.mubr.f32.vlgmr.msra.gmra.mrb[112].mxu0 %v5099_v56  ;;  %v12750_v56 = vpop.eup %12749  ;;  %v4520_v48 = vmul.f32 1.442695, %v4345_v39  ;;  %v4361_v32 = vsub.f32 %v19679_v61, %v19678_v22 }
 0x8a6   : >> { %10258 = vmatprep.mubr.f32.mxu0 %v5100_v7  ;;  %v17022_v34 = vpop.eup %12751 }
 0x8a7   : >> { %12759 = vpow2.f32 %v4520_v48 }
 0x8a9   : >> { %v12370_v10 = vpop.permute.xlu1 %12369  ;;  %10259 = vmatmul.mubr.f32.gmra.mrb[114].mxu0 %v5101_v59  ;;  %v5106_v59 = vmul.f32 %v12750_v56, %v16846_v24  ;;  %v19682_v56 = vld [vmem:[#allocation181_spill] sm:$0xff] }
 0x8aa   : >> { %v12372_v6 = vunpack.i.h.bf16 %v12370_v10  ;;  %v12371_v60 = vunpack.i.l.bf16 %v12370_v10  ;;  %10261 = vmatprep.mubr.f32.mxu0 %v5102_v44  ;;  %v4552_v44 = vmul.f32 1.442695, %v4361_v32  ;;  %v19684_v32 = vld [vmem:[#allocation98_spill] sm:$0xff] }
 0x8ac   : >> { %v11372_v57 = vpack.c.bf16 %v12372_v6, %v12371_v60  ;;  %v12754_v7 = vpop.eup %12753  ;;  %12761 = vpow2.f32 %v4552_v44 }
 0x8ad   : >> { %10262 = vmatmul.mubr.f32.gmra.mrb[116].mxu0 %v5103_v16  ;;  %v12756_v54 = vpop.eup %12755  ;;  %v5107_v1 = vmul.f32 %v12754_v7, %v16892_v4 }
 0x8ae   : >> { %10264 = vmatprep.mubr.f32.mxu0 %v5104_v50  ;;  %11373 = vmatprep.subr.bf16.mxu1 %v11372_v57  ;;  %v5108_v15 = vmul.f32 %v12756_v54, %v16886_v33  ;;  %v17031_v10 = vpop.eup %12757 }
 0x8af   : >> { %11375 = vmatpush3.bf16.msra.mxu1 %v11372_v57  ;;  %v4558_v57 = vmul.f32 1.442695, %v4364_v40 }
 0x8b1   : >> { %10265 = vmatmul.mubr.f32.gmra.mrb[118].mxu0 %v5105_v14  ;;  %v17034_v53 = vpop.eup %12759  ;;  %v19683_v14 = vld [vmem:[#allocation99_spill] sm:$0xff] }
 0x8b2   : >> { %4810 = vadd.xlane.f32.xlu0 %v17022_v34  ;;  %10267 = vmatprep.mubr.f32.mxu0 %v5106_v59  ;;  %v4380_v7 = vsub.f32 %v19683_v14, %v19682_v56  ;;  %v19685_v59 = vld [vmem:[#allocation79_spill] sm:$0xff] }
 0x8b3   : >> { %v4363_v54 = vsub.f32 %v19685_v59, %v19684_v32 }
 0x8b4   : >> { %v4590_v22 = vmul.f32 1.442695, %v4380_v7 }
 0x8b5   : >> { %10268 = vmatmul.mubr.f32.gmra.mrb[120].mxu0 %v5107_v1 }
 0x8b6   : >> { %4842 = vadd.xlane.f32.xlu0 %v17031_v10  ;;  %10270 = vmatprep.mubr.f32.mxu0 %v5108_v15  ;;  %v17037_v24 = vpop.eup %12761 }
 0x8bf   : >> { %4776 = vadd.xlane.f32.xlu1 %v17034_v53 }
 0x8c3   : >> { %4808 = vadd.xlane.f32.xlu1 %v17037_v24 }
 0x8cc   : >> { %12404 = vrot.lane.b32.xlu0 %v19592_v18, %s13676_s17 }
 0x8cd   : >> { %v4771_v4 = vpop.xlane.xlu0 %4770 }
 0x8ce   : >> { %12763 = vrcp.f32 %v4771_v4 }
 0x8d1   : >> { %v17042_v33 = vpop.xlane.xlu0 %4802 }
 0x8d4   : >> { %12399 = vrot.lane.b32.xlu1 %v19670_v26, %s13677_s29 }
 0x8d5   : >> { %v12385_v6 = vpop.permute.xlu0 %12384 }
 0x8d6   : >> { %v12387_v60 = vunpack.i.h.bf16 %v12385_v6  ;;  %v12386_v16 = vunpack.i.l.bf16 %v12385_v6 }
 0x8d8   : >> { %v11380_v39 = vpack.c.bf16 %v12387_v60, %v12386_v16  ;;  %v12764_v15 = vpop.eup %12763  ;;  %v4556_v60 = vmul.f32 1.442695, %v4363_v54  ;;  %v19687_v16 = vld [vmem:[#allocation85_spill] sm:$0xff] }
 0x8d9   : >> { %v5110_v13 = vmul.f32 %v12764_v15, %v16948_v5 }
 0x8da   : >> { %v4769_v50 = vpop.xlane.xlu1 %4768  ;;  %11381 = vmatprep.subr.bf16.mxu0 %v11380_v39 }
 0x8db   : >> { %12765 = vrcp.f32 %v4769_v50  ;;  %11383 = vmatpush3.bf16.msra.mxu0 %v11380_v39  ;;  %v19689_v39 = vld [vmem:[#allocation189_spill] sm:$0xff] }
 0x8dc   : >> { %12767 = vrcp.f32 %v16808_v23 }
 0x8dd   : >> { %12769 = vrcp.f32 %v16828_v0 }
 0x8de   : >> { %v4801_v48 = vpop.xlane.xlu1 %4800  ;;  %12771 = vpow2.f32 %v4558_v57 }
 0x8df   : >> { %12773 = vrcp.f32 %v16879_v45 }
 0x8e0   : >> { %12775 = vrcp.f32 %v16866_v35  ;;  %v19686_v35 = vld [vmem:[#allocation92_spill] sm:$0xff] }
 0x8e1   : >> { %12777 = vpow2.f32 %v4590_v22  ;;  %v4379_v52 = vsub.f32 %v19687_v16, %v19686_v35  ;;  %v19693_v35 = vld [vmem:[#allocation116_spill] sm:$0xff] }
 0x8e2   : >> { %v12380_v61 = vpop.permute.xlu1 %12379  ;;  %12779 = vrcp.f32 %v16939_v27 }
 0x8e3   : >> { %v12382_v1 = vunpack.i.h.bf16 %v12380_v61  ;;  %v12381_v44 = vunpack.i.l.bf16 %v12380_v61  ;;  %12781 = vrcp.f32 %v16914_v58  ;;  %v19688_v58 = vld [vmem:[#allocation184_spill] sm:$0xff]  ;;  %v4588_v56 = vmul.f32 1.442695, %v4379_v52 }
 0x8e4   : >> { %12783 = vrcp.f32 %v16977_v47 }
 0x8e5   : >> { %v12766_v23 = vpop.eup %12765  ;;  %v11376_v0 = vpack.c.bf16 %v12382_v1, %v12381_v44  ;;  %12785 = vrcp.f32 %v16968_v43 }
 0x8e6   : >> { %v12768_v4 = vpop.eup %12767  ;;  %v5109_v6 = vmul.f32 %v12766_v23, %v16954_v49  ;;  %12787 = vpow2.f32 %v4556_v60  ;;  %v19692_v60 = vld [vmem:[#allocation83_spill] sm:$0xff] }
 0x8e7   : >> { %v12770_v45 = vpop.eup %12769  ;;  %11377 = vmatprep.subr.bf16.mxu1 %v11376_v0  ;;  %v5115_v40 = vmul.f32 %v12768_v4, %v19688_v58  ;;  %12789 = vrcp.f32 %v17014_v9  ;;  %v19691_v4 = vld [vmem:[#allocation67_spill] sm:$0xff]  ;;  %v4382_v16 = vsub.f32 %v19693_v35, %v19692_v60 }
 0x8e8   : >> { %10271 = vmatmul.mubr.f32.gmra.mrb[122].mxu0 %v5109_v6  ;;  %11379 = vmatpush3.bf16.msra.mxu1 %v11376_v0  ;;  %v17063_v27 = vpop.eup %12771  ;;  %v5116_v50 = vmul.f32 %v12770_v45, %v19689_v39  ;;  %12791 = vrcp.f32 %v17000_v51  ;;  %v19690_v0 = vld [vmem:[#allocation80_spill] sm:$0xff] }
 0x8e9   : >> { %10273 = vmatprep.mubr.f32.mxu0 %v5110_v13  ;;  %v12774_v49 = vpop.eup %12773  ;;  %12793 = vpow2.f32 %v4588_v56  ;;  %v4366_v6 = vsub.f32 %v19691_v4, %v19690_v0  ;;  %v4594_v13 = vmul.f32 1.442695, %v4382_v16  ;;  %v19695_v56 = vld [vmem:[#allocation77_spill] sm:$0xff]  ;;  %v19700_v4 = vld [vmem:[#allocation186_spill] sm:$0xff] }
 0x8ea   : >> { %v12776_v57 = vpop.eup %12775  ;;  %v5117_v5 = vmul.f32 %v12774_v49, %v16765_v37  ;;  %12795 = vrcp.f32 %v4801_v48 }
 0x8eb   : >> { %10312 = vmatmul.mubr.f32.vlgmr.msra.gmra.mrb[96].mxu1 %v5115_v40  ;;  %4814 = vadd.xlane.f32.xlu0 %v17063_v27  ;;  %v17070_v47 = vpop.eup %12777  ;;  %v5118_v14 = vmul.f32 %v12776_v57, %v16751_v20  ;;  %12797 = vrcp.f32 %v17042_v33  ;;  %v19694_v57 = vld [vmem:[#allocation106_spill] sm:$0xff] }
 0x8ec   : >> { %10314 = vmatprep.mubr.f32.mxu1 %v5116_v50  ;;  %v12780_v43 = vpop.eup %12779 }
 0x8ed   : >> { %v12782_v7 = vpop.eup %12781  ;;  %v5119_v9 = vmul.f32 %v12780_v43, %v16813_v25 }
 0x8ee   : >> { %v12784_v22 = vpop.eup %12783  ;;  %v5120_v61 = vmul.f32 %v12782_v7, %v16800_v2 }
 0x8ef   : >> { %4846 = vadd.xlane.f32.xlu0 %v17070_v47  ;;  %10315 = vmatmul.mubr.f32.gmra.mrb[98].mxu1 %v5117_v5  ;;  %v12786_v51 = vpop.eup %12785  ;;  %v5121_v20 = vmul.f32 %v12784_v22, %v16855_v21  ;;  %v4365_v5 = vsub.f32 %v19695_v56, %v19694_v57 }
 0x8f0   : >> { %10317 = vmatprep.mubr.f32.mxu1 %v5118_v14  ;;  %v17079_v37 = vpop.eup %12787  ;;  %v5122_v59 = vmul.f32 %v12786_v51, %v16849_v38  ;;  %v19696_v51 = vld [vmem:[#allocation182_spill] sm:$0xff] }
 0x8f1   : >> { %v12790_v32 = vpop.eup %12789 }
 0x8f2   : >> { %v12792_v54 = vpop.eup %12791  ;;  %v5123_v25 = vmul.f32 %v12790_v32, %v16895_v12 }
 0x8f3   : >> { %10318 = vmatmul.mubr.f32.gmra.mrb[100].mxu1 %v5119_v9  ;;  %v17084_v33 = vpop.eup %12793  ;;  %v5124_v48 = vmul.f32 %v12792_v54, %v16889_v41 }
 0x8f4   : >> { %10320 = vmatprep.mubr.f32.mxu1 %v5120_v61  ;;  %v12796_v2 = vpop.eup %12795  ;;  %v4560_v61 = vmul.f32 1.442695, %v4365_v5 }
 0x8f5   : >> { %v12798_v1 = vpop.eup %12797  ;;  %v5125_v21 = vmul.f32 %v12796_v2, %v16957_v29 }
 0x8f6   : >> { %v5126_v38 = vmul.f32 %v12798_v1, %v16951_v11  ;;  %v4562_v11 = vmul.f32 1.442695, %v4366_v6  ;;  %v19701_v6 = vld [vmem:[#allocation136_spill] sm:$0xff] }
 0x8f7   : >> { %10321 = vmatmul.mubr.f32.gmra.mrb[102].mxu1 %v5121_v20  ;;  %v19697_v20 = vld [vmem:[#allocation88_spill] sm:$0xff] }
 0x8f8   : >> { %4812 = vadd.xlane.f32.xlu1 %v17079_v37  ;;  %10323 = vmatprep.mubr.f32.mxu1 %v5122_v59  ;;  %v4381_v32 = vsub.f32 %v19697_v20, %v19696_v51 }
 0x8fb   : >> { %10324 = vmatmul.mubr.f32.gmra.mrb[104].mxu1 %v5123_v25 }
 0x8fc   : >> { %4844 = vadd.xlane.f32.xlu1 %v17084_v33  ;;  %10326 = vmatprep.mubr.f32.mxu1 %v5124_v48 }
 0x8ff   : >> { %10327 = vmatmul.mubr.f32.gmra.mrb[106].mxu1 %v5125_v21 }
 0x900   : >> { %10329 = vmatprep.mubr.f32.mxu1 %v5126_v38 }
 0x905   : >> { %12414 = vrot.lane.b32.xlu0 %v19591_v63, %s13676_s17 }
 0x906   : >> { %v4775_v44 = vpop.xlane.xlu0 %4774 }
 0x907   : >> { %12799 = vrcp.f32 %v4775_v44  ;;  %v19698_v44 = vld [vmem:[#allocation120_spill] sm:$0xff] }
 0x90a   : >> { %v4807_v15 = vpop.xlane.xlu0 %4806 }
 0x90d   : >> { %12409 = vrot.lane.b32.xlu1 %v19592_v18, %s13677_s29 }
 0x90e   : >> { %v12395_v41 = vpop.permute.xlu0 %12394 }
 0x90f   : >> { %v12397_v12 = vunpack.i.h.bf16 %v12395_v41  ;;  %v12396_v23 = vunpack.i.l.bf16 %v12395_v41 }
 0x911   : >> { %v11384_v45 = vpack.c.bf16 %v12397_v12, %v12396_v23  ;;  %v12800_v39 = vpop.eup %12799 }
 0x912   : >> { %v5112_v7 = vmul.f32 %v12800_v39, %v16984_v55  ;;  %v4592_v55 = vmul.f32 1.442695, %v4381_v32 }
 0x913   : >> { %v4773_v29 = vpop.xlane.xlu1 %4772  ;;  %11385 = vmatprep.subr.bf16.mxu0 %v11384_v45 }
 0x914   : >> { %12801 = vrcp.f32 %v4773_v29  ;;  %11387 = vmatpush3.bf16.msra.mxu0 %v11384_v45  ;;  %v4384_v45 = vsub.f32 %v19701_v6, %v19700_v4 }
 0x915   : >> { %12803 = vrcp.f32 %v4807_v15  ;;  %v19699_v15 = vld [vmem:[#allocation108_spill] sm:$0xff] }
 0x916   : >> { %v4368_v41 = vsub.f32 %v19699_v15, %v19698_v44  ;;  %v19712_v15 = vld [vmem:[#allocation64_spill] sm:$0xff] }
 0x917   : >> { %v4805_v52 = vpop.xlane.xlu1 %4804 }
 0x918   : >> { %12805 = vrcp.f32 %v4805_v52  ;;  %v4566_v0 = vmul.f32 1.442695, %v4368_v41  ;;  %v19713_v41 = vld [vmem:[#allocation112_spill] sm:$0xff] }
 0x919   : >> { %12807 = vpow2.f32 %v4562_v11  ;;  %v4598_v11 = vmul.f32 1.442695, %v4384_v45 }
 0x91a   : >> { %12809 = vpow2.f32 %v4594_v13 }
 0x91b   : >> { %v12390_v58 = vpop.permute.xlu1 %12389  ;;  %12811 = vpow2.f32 %v4560_v61 }
 0x91c   : >> { %v12392_v40 = vunpack.i.h.bf16 %v12390_v58  ;;  %v12391_v49 = vunpack.i.l.bf16 %v12390_v58  ;;  %12813 = vpow2.f32 %v4592_v55  ;;  %v19702_v58 = vld [vmem:[#allocation114_spill] sm:$0xff] }
 0x91e   : >> { %v12802_v50 = vpop.eup %12801  ;;  %v11412_v43 = vpack.c.bf16 %v12392_v40, %v12391_v49  ;;  %v19703_v40 = vld [vmem:[#allocation56_spill] sm:$0xff] }
 0x91f   : >> { %v5111_v14 = vmul.f32 %v12802_v50, %v16990_v30  ;;  %v12804_v9 = vpop.eup %12803  ;;  %v4367_v49 = vsub.f32 %v19703_v40, %v19702_v58 }
 0x920   : >> { %11413 = vmatprep.subr.bf16.mxu1 %v11412_v43  ;;  %v5128_v30 = vmul.f32 %v12804_v9, %v16987_v17 }
 0x921   : >> { %10274 = vmatmul.mubr.f32.gmra.mrb[124].mxu0 %v5111_v14  ;;  %11415 = vmatpush3.bf16.msra.mxu1 %v11412_v43  ;;  %v4564_v43 = vmul.f32 1.442695, %v4367_v49  ;;  %v19704_v14 = vld [vmem:[#allocation91_spill] sm:$0xff] }
 0x922   : >> { %v12806_v22 = vpop.eup %12805  ;;  %10276 = vmatprep.mubr.f32.mxu0 %v5112_v7  ;;  %v19705_v7 = vld [vmem:[#allocation161_spill] sm:$0xff] }
 0x923   : >> { %v17105_v59 = vpop.eup %12807  ;;  %v5127_v54 = vmul.f32 %v12806_v22, %v16993_v28  ;;  %v4383_v9 = vsub.f32 %v19705_v7, %v19704_v14  ;;  %v19723_v14 = vld [vmem:[#allocation159_spill] sm:$0xff] }
 0x924   : >> { %4818 = vadd.xlane.f32.xlu0 %v17105_v59  ;;  %v17110_v25 = vpop.eup %12809 }
 0x925   : >> { %10330 = vmatmul.mubr.f32.gmra.mrb[108].mxu1 %v5127_v54  ;;  %v17113_v2 = vpop.eup %12811 }
 0x926   : >> { %10332 = vmatprep.mubr.f32.mxu1 %v5128_v30  ;;  %v17116_v48 = vpop.eup %12813 }
 0x928   : >> { %4850 = vadd.xlane.f32.xlu0 %v17110_v25 }
 0x931   : >> { %4816 = vadd.xlane.f32.xlu1 %v17113_v2 }
 0x935   : >> { %4848 = vadd.xlane.f32.xlu1 %v17116_v48 }
 0x93e   : >> { %12424 = vrot.lane.b32.xlu0 %v19611_v3, %s13676_s17 }
 0x93f   : >> { %v4811_v17 = vpop.xlane.xlu0 %4810 }
 0x940   : >> { %12815 = vrcp.f32 %v4811_v17 }
 0x943   : >> { %v4843_v28 = vpop.xlane.xlu0 %4842 }
 0x946   : >> { %12419 = vrot.lane.b32.xlu1 %v19591_v63, %s13677_s29 }
 0x947   : >> { %v12405_v1 = vpop.permute.xlu0 %12404 }
 0x948   : >> { %v12407_v21 = vunpack.i.h.bf16 %v12405_v1  ;;  %v12406_v38 = vunpack.i.l.bf16 %v12405_v1 }
 0x94a   : >> { %v11388_v12 = vpack.c.bf16 %v12407_v21, %v12406_v38  ;;  %v12816_v52 = vpop.eup %12815 }
 0x94b   : >> { %v5130_v57 = vmul.f32 %v12816_v52, %v17022_v34  ;;  %v4596_v34 = vmul.f32 1.442695, %v4383_v9 }
 0x94c   : >> { %v4777_v23 = vpop.xlane.xlu1 %4776  ;;  %11389 = vmatprep.subr.bf16.mxu0 %v11388_v12 }
 0x94d   : >> { %12817 = vrcp.f32 %v4777_v23  ;;  %11391 = vmatpush3.bf16.msra.mxu0 %v11388_v12  ;;  %v4370_v12 = vsub.f32 %v19713_v41, %v19712_v15 }
 0x94e   : >> { %12819 = vrcp.f32 %v4843_v28 }
 0x94f   : >> { %v4570_v45 = vmul.f32 1.442695, %v4370_v12 }
 0x950   : >> { %v4809_v29 = vpop.xlane.xlu1 %4808 }
 0x951   : >> { %12821 = vrcp.f32 %v4809_v29  ;;  %v19716_v29 = vld [vmem:[#allocation193_spill] sm:$0xff] }
 0x952   : >> { %12823 = vpow2.f32 %v4566_v0 }
 0x953   : >> { %12825 = vpow2.f32 %v4598_v11  ;;  %v19717_v11 = vld [vmem:[#allocation169_spill] sm:$0xff] }
 0x954   : >> { %v12400_v60 = vpop.permute.xlu1 %12399  ;;  %12827 = vpow2.f32 %v4564_v43  ;;  %v19722_v43 = vld [vmem:[#allocation187_spill] sm:$0xff] }
 0x955   : >> { %v12402_v35 = vunpack.i.h.bf16 %v12400_v60  ;;  %v12401_v16 = vunpack.i.l.bf16 %v12400_v60  ;;  %12829 = vpow2.f32 %v4596_v34  ;;  %v4386_v60 = vsub.f32 %v19717_v11, %v19716_v29  ;;  %v19726_v29 = vld [vmem:[#allocation57_spill] sm:$0xff] }
 0x956   : >> { %12831 = vpow2.f32 %v4570_v45  ;;  %v4385_v7 = vsub.f32 %v19723_v14, %v19722_v43  ;;  %v19725_v45 = vld [vmem:[#allocation62_spill] sm:$0xff] }
 0x957   : >> { %v12818_v13 = vpop.eup %12817  ;;  %v11416_v39 = vpack.c.bf16 %v12402_v35, %v12401_v16  ;;  %v4372_v11 = vsub.f32 %v19726_v29, %v19725_v45  ;;  %v19736_v29 = vld [vmem:[#allocation143_spill] sm:$0xff] }
 0x958   : >> { %v5113_v50 = vmul.f32 %v12818_v13, %v17034_v53  ;;  %v12820_v56 = vpop.eup %12819  ;;  %v4602_v13 = vmul.f32 1.442695, %v4386_v60 }
 0x959   : >> { %11417 = vmatprep.subr.bf16.mxu1 %v11416_v39  ;;  %v5146_v53 = vmul.f32 %v12820_v56, %v17031_v10 }
 0x95a   : >> { %10277 = vmatmul.mubr.f32.gmra.mrb[126].mxu0 %v5113_v50  ;;  %11419 = vmatpush3.bf16.msra.mxu1 %v11416_v39  ;;  %12833 = vpow2.f32 %v4602_v13  ;;  %v19720_v39 = vld [vmem:[#allocation131_spill] sm:$0xff]  ;;  %v19721_v50 = vld [vmem:[#allocation102_spill] sm:$0xff] }
 0x95b   : >> { %v12822_v5 = vpop.eup %12821  ;;  %10367 = vmatprep.mubr.f32.mxu0 %v5130_v57  ;;  %v4369_v57 = vsub.f32 %v19721_v50, %v19720_v39  ;;  %v4574_v39 = vmul.f32 1.442695, %v4372_v11  ;;  %v19730_v50 = vld [vmem:[#allocation196_spill] sm:$0xff] }
 0x95c   : >> { %v17133_v22 = vpop.eup %12823  ;;  %v5129_v61 = vmul.f32 %v12822_v5, %v17037_v24  ;;  %v19737_v11 = vld [vmem:[#allocation96_spill] sm:$0xff] }
 0x95d   : >> { %4822 = vadd.xlane.f32.xlu0 %v17133_v22  ;;  %v17138_v51 = vpop.eup %12825  ;;  %v4568_v5 = vmul.f32 1.442695, %v4369_v57  ;;  %v19731_v57 = vld [vmem:[#allocation170_spill] sm:$0xff] }
 0x95e   : >> { %10333 = vmatmul.mubr.f32.gmra.mrb[110].mxu1 %v5129_v61  ;;  %v17141_v20 = vpop.eup %12827  ;;  %v4600_v61 = vmul.f32 1.442695, %v4385_v7 }
 0x95f   : >> { %10423 = vmatprep.mubr.f32.mxu1 %v5146_v53  ;;  %v17144_v32 = vpop.eup %12829  ;;  %12835 = vpow2.f32 %v4568_v5 }
 0x960   : >> { %v17187_v9 = vpop.eup %12831  ;;  %12837 = vpow2.f32 %v4600_v61 }
 0x961   : >> { %4854 = vadd.xlane.f32.xlu0 %v17138_v51  ;;  %12839 = vpow2.f32 %v4574_v39 }
 0x964   : >> { %v17190_v53 = vpop.eup %12833 }
 0x969   : >> { %v17193_v34 = vpop.eup %12835 }
 0x96a   : >> { %4820 = vadd.xlane.f32.xlu1 %v17141_v20 }
 0x96e   : >> { %4852 = vadd.xlane.f32.xlu1 %v17144_v32 }
 0x977   : >> { %12434 = vrot.lane.b32.xlu0 %v19621_v8, %s13676_s17 }
 0x978   : >> { %v17149_v10 = vpop.xlane.xlu0 %4814  ;;  %v17151_v24 = vpop.f32.mrb[112].mxu0 }
 0x979   : >> { %19706 = vst [vmem:[#allocation107_spill] sm:$0xff] %v17151_v24  ;;  %v17153_v54 = vpop.f32.mrb[113].mxu0 }
 0x97a   : >> { %19707 = vst [vmem:[#allocation78_spill] sm:$0xff] %v17153_v54  ;;  %v19763_v54 = vld [vmem:[#allocation195_spill] sm:$0xff] }
 0x97c   : >> { %v17155_v30 = vpop.xlane.xlu0 %4846  ;;  %v17157_v55 = vpop.f32.mrb[114].mxu0 }
 0x97d   : >> { %19708 = vst [vmem:[#allocation147_spill] sm:$0xff] %v17157_v55  ;;  %v17159_v17 = vpop.f32.mrb[115].mxu0  ;;  %v19764_v55 = vld [vmem:[#allocation89_spill] sm:$0xff] }
 0x97e   : >> { %19709 = vst [vmem:[#allocation55_spill] sm:$0xff] %v17159_v17 }
 0x97f   : >> { %12429 = vrot.lane.b32.xlu1 %v19611_v3, %s13677_s29 }
 0x980   : >> { %v12415_v28 = vpop.permute.xlu0 %12414  ;;  %v17163_v1 = vpop.f32.mrb[116].mxu0 }
 0x981   : >> { %19710 = vst [vmem:[#allocation119_spill] sm:$0xff] %v17163_v1  ;;  %v12417_v21 = vunpack.i.h.bf16 %v12415_v28  ;;  %v12416_v38 = vunpack.i.l.bf16 %v12415_v28  ;;  %v17165_v44 = vpop.f32.mrb[117].mxu0  ;;  %v17196_v28 = vpop.eup %12837 }
 0x982   : >> { %19711 = vst [vmem:[#allocation71_spill] sm:$0xff] %v17165_v44  ;;  %v19752_v44 = vld [vmem:[#allocation75_spill] sm:$0xff] }
 0x983   : >> { %v11392_v23 = vpack.c.bf16 %v12417_v21, %v12416_v38 }
 0x984   : >> { %v17169_v0 = vpop.f32.mrb[118].mxu0 }
 0x985   : >> { %19714 = vst [vmem:[#allocation97_spill] sm:$0xff] %v17169_v0  ;;  %v17171_v4 = vpop.xlane.xlu1 %4812  ;;  %v17173_v6 = vpop.f32.mrb[119].mxu0  ;;  %11393 = vmatprep.subr.bf16.mxu0 %v11392_v23 }
 0x986   : >> { %19715 = vst [vmem:[#allocation117_spill] sm:$0xff] %v17173_v6  ;;  %11395 = vmatpush3.bf16.msra.mxu0 %v11392_v23 }
 0x988   : >> { %v17177_v35 = vpop.f32.mrb[120].mxu0 }
 0x989   : >> { %19718 = vst [vmem:[#allocation87_spill] sm:$0xff] %v17177_v35  ;;  %v17179_v16 = vpop.xlane.xlu1 %4844  ;;  %v17181_v52 = vpop.f32.mrb[121].mxu0 }
 0x98a   : >> { %19719 = vst [vmem:[#allocation156_spill] sm:$0xff] %v17181_v52  ;;  %v17239_v35 = vpop.eup %12839 }
 0x98d   : >> { %v12410_v58 = vpop.permute.xlu1 %12409 }
 0x98e   : >> { %v12412_v40 = vunpack.i.h.bf16 %v12410_v58  ;;  %v12411_v49 = vunpack.i.l.bf16 %v12410_v58 }
 0x990   : >> { %v11420_v56 = vpack.c.bf16 %v12412_v40, %v12411_v49 }
 0x992   : >> { %11421 = vmatprep.subr.bf16.mxu1 %v11420_v56 }
 0x993   : >> { %11423 = vmatpush3.bf16.msra.mxu1 %v11420_v56  ;;  %v4388_v56 = vsub.f32 %v19731_v57, %v19730_v50 }
 0x995   : >> { %v4606_v7 = vmul.f32 1.442695, %v4388_v56  ;;  %v19740_v56 = vld [vmem:[#allocation188_spill] sm:$0xff] }
 0x996   : >> { %4826 = vadd.xlane.f32.xlu0 %v17187_v9 }
 0x997   : >> { %12841 = vpow2.f32 %v4606_v7 }
 0x99a   : >> { %4858 = vadd.xlane.f32.xlu0 %v17190_v53 }
 0x9a3   : >> { %4824 = vadd.xlane.f32.xlu1 %v17193_v34 }
 0x9a7   : >> { %4856 = vadd.xlane.f32.xlu1 %v17196_v28 }
 0x9b0   : >> { %12444 = vrot.lane.b32.xlu0 %v19629_v46, %s13676_s17 }
 0x9b1   : >> { %v17201_v21 = vpop.xlane.xlu0 %4818 }
 0x9b5   : >> { %v17203_v38 = vpop.xlane.xlu0 %4850 }
 0x9b8   : >> { %12439 = vrot.lane.b32.xlu1 %v19621_v8, %s13677_s29 }
 0x9b9   : >> { %v12425_v15 = vpop.permute.xlu0 %12424 }
 0x9ba   : >> { %v12427_v41 = vunpack.i.h.bf16 %v12425_v15  ;;  %v12426_v12 = vunpack.i.l.bf16 %v12425_v15 }
 0x9bb   : >> { %v17207_v23 = vpop.f32.mrb[122].mxu0 }
 0x9bc   : >> { %19724 = vst [vmem:[#allocation94_spill] sm:$0xff] %v17207_v23  ;;  %v17211_v60 = vpop.f32.mrb[123].mxu0  ;;  %v11396_v13 = vpack.c.bf16 %v12427_v41, %v12426_v12  ;;  %v19741_v23 = vld [vmem:[#allocation166_spill] sm:$0xff] }
 0x9bd   : >> { %19727 = vst [vmem:[#allocation58_spill] sm:$0xff] %v17211_v60  ;;  %v4387_v52 = vsub.f32 %v19741_v23, %v19740_v56 }
 0x9be   : >> { %v17213_v58 = vpop.xlane.xlu1 %4816  ;;  %v17215_v40 = vpop.f32.mrb[96].mxu1  ;;  %11397 = vmatprep.subr.bf16.mxu0 %v11396_v13 }
 0x9bf   : >> { %19728 = vst [vmem:[#allocation152_spill] sm:$0xff] %v17215_v40  ;;  %v17217_v49 = vpop.f32.mrb[97].mxu1  ;;  %11399 = vmatpush3.bf16.msra.mxu0 %v11396_v13  ;;  %v4371_v13 = vsub.f32 %v19737_v11, %v19736_v29 }
 0x9c0   : >> { %19729 = vst [vmem:[#allocation194_spill] sm:$0xff] %v17217_v49  ;;  %v4392_v49 = vsub.f32 %v19764_v55, %v19763_v54 }
 0x9c1   : >> { %v4572_v39 = vmul.f32 1.442695, %v4371_v13 }
 0x9c2   : >> { %v17221_v5 = vpop.xlane.xlu1 %4848  ;;  %v17223_v43 = vpop.f32.mrb[98].mxu1 }
 0x9c3   : >> { %19732 = vst [vmem:[#allocation172_spill] sm:$0xff] %v17223_v43  ;;  %v17225_v14 = vpop.f32.mrb[99].mxu1  ;;  %12843 = vpow2.f32 %v4572_v39 }
 0x9c4   : >> { %19733 = vst [vmem:[#allocation130_spill] sm:$0xff] %v17225_v14 }
 0x9c6   : >> { %v12420_v61 = vpop.permute.xlu1 %12419  ;;  %v17227_v15 = vpop.f32.mrb[100].mxu1 }
 0x9c7   : >> { %19734 = vst [vmem:[#allocation124_spill] sm:$0xff] %v17227_v15  ;;  %v12422_v41 = vunpack.i.h.bf16 %v12420_v61  ;;  %v12421_v12 = vunpack.i.l.bf16 %v12420_v61  ;;  %v17229_v45 = vpop.f32.mrb[101].mxu1  ;;  %v19751_v15 = vld [vmem:[#allocation192_spill] sm:$0xff] }
 0x9c8   : >> { %19735 = vst [vmem:[#allocation101_spill] sm:$0xff] %v17229_v45  ;;  %v4390_v1 = vsub.f32 %v19752_v44, %v19751_v15 }
 0x9c9   : >> { %v11424_v50 = vpack.c.bf16 %v12422_v41, %v12421_v12  ;;  %v4604_v41 = vmul.f32 1.442695, %v4387_v52  ;;  %v17246_v12 = vpop.eup %12841 }
 0x9ca   : >> { %v17233_v57 = vpop.f32.mrb[102].mxu1 }
 0x9cb   : >> { %19738 = vst [vmem:[#allocation90_spill] sm:$0xff] %v17233_v57  ;;  %v17235_v60 = vpop.f32.mrb[103].mxu1  ;;  %11425 = vmatprep.subr.bf16.mxu1 %v11424_v50  ;;  %12845 = vpow2.f32 %v4604_v41 }
 0x9cc   : >> { %19739 = vst [vmem:[#allocation137_spill] sm:$0xff] %v17235_v60  ;;  %11427 = vmatpush3.bf16.msra.mxu1 %v11424_v50 }
 0x9cd   : >> { %v17253_v23 = vpop.eup %12843 }
 0x9ce   : >> { %v17241_v61 = vpop.f32.mrb[104].mxu1 }
 0x9cf   : >> { %19742 = vst [vmem:[#allocation70_spill] sm:$0xff] %v17241_v61  ;;  %4830 = vadd.xlane.f32.xlu0 %v17239_v35  ;;  %v17244_v7 = vpop.f32.mrb[105].mxu1 }
 0x9d0   : >> { %19743 = vst [vmem:[#allocation181_spill] sm:$0xff] %v17244_v7  ;;  %v19748_v7 = vld [vmem:[#allocation73_spill] sm:$0xff] }
 0x9d2   : >> { %v17248_v29 = vpop.f32.mrb[106].mxu1 }
 0x9d3   : >> { %19744 = vst [vmem:[#allocation99_spill] sm:$0xff] %v17248_v29  ;;  %4862 = vadd.xlane.f32.xlu0 %v17246_v12  ;;  %v17251_v11 = vpop.f32.mrb[107].mxu1  ;;  %v19747_v29 = vld [vmem:[#allocation155_spill] sm:$0xff] }
 0x9d4   : >> { %19745 = vst [vmem:[#allocation98_spill] sm:$0xff] %v17251_v11  ;;  %v4374_v61 = vsub.f32 %v19748_v7, %v19747_v29 }
 0x9d5   : >> { %v17256_v13 = vpop.eup %12845 }
 0x9d6   : >> { %v4578_v45 = vmul.f32 1.442695, %v4374_v61  ;;  %v19756_v61 = vld [vmem:[#allocation190_spill] sm:$0xff] }
 0x9d8   : >> { %12847 = vpow2.f32 %v4578_v45 }
 0x9dc   : >> { %4828 = vadd.xlane.f32.xlu1 %v17253_v23 }
 0x9e0   : >> { %4860 = vadd.xlane.f32.xlu1 %v17256_v13 }
 0x9e2   : >> { %v17287_v15 = vpop.eup %12847 }
 0x9e9   : >> { %12454 = vrot.lane.b32.xlu0 %v19639_v36, %s13676_s17 }
 0x9ea   : >> { %v17261_v52 = vpop.xlane.xlu0 %4822 }
 0x9ee   : >> { %v17263_v50 = vpop.xlane.xlu0 %4854 }
 0x9f1   : >> { %12449 = vrot.lane.b32.xlu1 %v19629_v46, %s13677_s29 }
 0x9f2   : >> { %v12435_v39 = vpop.permute.xlu0 %12434 }
 0x9f3   : >> { %v12437_v56 = vunpack.i.h.bf16 %v12435_v39  ;;  %v12436_v41 = vunpack.i.l.bf16 %v12435_v39 }
 0x9f4   : >> { %v17267_v11 = vpop.f32.mrb[124].mxu0 }
 0x9f5   : >> { %19746 = vst [vmem:[#allocation79_spill] sm:$0xff] %v17267_v11  ;;  %v17271_v60 = vpop.f32.mrb[125].mxu0  ;;  %v11400_v57 = vpack.c.bf16 %v12437_v56, %v12436_v41  ;;  %v4610_v11 = vmul.f32 1.442695, %v4390_v1  ;;  %v19754_v56 = vld [vmem:[#allocation133_spill] sm:$0xff]  ;;  %v19755_v41 = vld [vmem:[#allocation142_spill] sm:$0xff] }
 0x9f6   : >> { %19749 = vst [vmem:[#allocation92_spill] sm:$0xff] %v17271_v60  ;;  %v4373_v43 = vsub.f32 %v19755_v41, %v19754_v56  ;;  %v19759_v41 = vld [vmem:[#allocation177_spill] sm:$0xff] }
 0x9f7   : >> { %v17273_v6 = vpop.xlane.xlu1 %4820  ;;  %11401 = vmatprep.subr.bf16.mxu0 %v11400_v57  ;;  %12849 = vpow2.f32 %v4610_v11 }
 0x9f8   : >> { %v17275_v0 = vpop.f32.mrb[108].mxu1  ;;  %11403 = vmatpush3.bf16.msra.mxu0 %v11400_v57  ;;  %v4576_v57 = vmul.f32 1.442695, %v4373_v43 }
 0x9f9   : >> { %19750 = vst [vmem:[#allocation85_spill] sm:$0xff] %v17275_v0  ;;  %v17279_v14 = vpop.f32.mrb[109].mxu1  ;;  %v19757_v0 = vld [vmem:[#allocation174_spill] sm:$0xff] }
 0x9fa   : >> { %19753 = vst [vmem:[#allocation184_spill] sm:$0xff] %v17279_v14  ;;  %v4389_v44 = vsub.f32 %v19757_v0, %v19756_v61  ;;  %12851 = vpow2.f32 %v4576_v57  ;;  %v19760_v57 = vld [vmem:[#allocation145_spill] sm:$0xff] }
 0x9fb   : >> { %v17281_v39 = vpop.xlane.xlu1 %4852  ;;  %v4376_v61 = vsub.f32 %v19760_v57, %v19759_v41 }
 0x9fc   : >> { %v4608_v1 = vmul.f32 1.442695, %v4389_v44 }
 0x9fd   : >> { %v4582_v24 = vmul.f32 1.442695, %v4376_v61 }
 0x9fe   : >> { %12853 = vpow2.f32 %v4608_v1 }
 0x9ff   : >> { %v12430_v7 = vpop.permute.xlu1 %12429  ;;  %12855 = vpow2.f32 %v4582_v24 }
 0xa00   : >> { %v12432_v29 = vunpack.i.h.bf16 %v12430_v7  ;;  %v12431_v60 = vunpack.i.l.bf16 %v12430_v7 }
 0xa01   : >> { %v17290_v45 = vpop.eup %12849 }
 0xa02   : >> { %v11428_v17 = vpack.c.bf16 %v12432_v29, %v12431_v60 }
 0xa04   : >> { %11429 = vmatprep.subr.bf16.mxu1 %v11428_v17  ;;  %v17293_v11 = vpop.eup %12851 }
 0xa05   : >> { %11431 = vmatpush3.bf16.msra.mxu1 %v11428_v17 }
 0xa08   : >> { %4834 = vadd.xlane.f32.xlu0 %v17287_v15  ;;  %v17296_v17 = vpop.eup %12853 }
 0xa09   : >> { %v17325_v55 = vpop.eup %12855 }
 0xa0c   : >> { %4866 = vadd.xlane.f32.xlu0 %v17290_v45 }
 0xa15   : >> { %4832 = vadd.xlane.f32.xlu1 %v17293_v11 }
 0xa19   : >> { %4864 = vadd.xlane.f32.xlu1 %v17296_v17 }
 0xa22   : >> { %12464 = vrot.lane.b32.xlu0 %v19661_v62, %s13678_s19 }
 0xa23   : >> { %v17301_v0 = vpop.xlane.xlu0 %4826 }
 0xa27   : >> { %v17303_v60 = vpop.xlane.xlu0 %4858 }
 0xa2a   : >> { %12459 = vrot.lane.b32.xlu1 %v19639_v36, %s13677_s29 }
 0xa2b   : >> { %v12445_v43 = vpop.permute.xlu0 %12444 }
 0xa2c   : >> { %v12447_v7 = vunpack.i.h.bf16 %v12445_v43  ;;  %v12446_v29 = vunpack.i.l.bf16 %v12445_v43 }
 0xa2d   : >> { %v17307_v56 = vpop.f32.mrb[126].mxu0 }
 0xa2e   : >> { %19758 = vst [vmem:[#allocation189_spill] sm:$0xff] %v17307_v56  ;;  %v17311_v44 = vpop.f32.mrb[127].mxu0  ;;  %v11404_v1 = vpack.c.bf16 %v12447_v7, %v12446_v29  ;;  %v4614_v56 = vmul.f32 1.442695, %v4392_v49  ;;  %v19766_v7 = vld [vmem:[#allocation171_spill] sm:$0xff]  ;;  %v19767_v29 = vld [vmem:[#allocation149_spill] sm:$0xff] }
 0xa2f   : >> { %19761 = vst [vmem:[#allocation80_spill] sm:$0xff] %v17311_v44  ;;  %v4375_v44 = vsub.f32 %v19767_v29, %v19766_v7 }
 0xa30   : >> { %v4825_v14 = vpop.xlane.xlu1 %4824  ;;  %11405 = vmatprep.subr.bf16.mxu0 %v11404_v1  ;;  %12857 = vpow2.f32 %v4614_v56 }
 0xa31   : >> { %v17313_v40 = vpop.f32.mrb[110].mxu1  ;;  %11407 = vmatpush3.bf16.msra.mxu0 %v11404_v1  ;;  %v4580_v61 = vmul.f32 1.442695, %v4375_v44  ;;  %v19768_v1 = vld [vmem:[#allocation197_spill] sm:$0xff] }
 0xa32   : >> { %19762 = vst [vmem:[#allocation67_spill] sm:$0xff] %v17313_v40  ;;  %v17317_v36 = vpop.f32.mrb[111].mxu1  ;;  %v19769_v40 = vld [vmem:[#allocation63_spill] sm:$0xff] }
 0xa33   : >> { %19765 = vst [vmem:[#allocation83_spill] sm:$0xff] %v17317_v36  ;;  %v4391_v54 = vsub.f32 %v19769_v40, %v19768_v1  ;;  %12859 = vpow2.f32 %v4580_v61 }
 0xa34   : >> { %v17319_v43 = vpop.xlane.xlu1 %4856 }
 0xa35   : >> { %v4612_v24 = vmul.f32 1.442695, %v4391_v54 }
 0xa37   : >> { %12861 = vpow2.f32 %v4612_v24 }
 0xa38   : >> { %v12440_v46 = vpop.permute.xlu1 %12439  ;;  %12863 = vrcp.f32 %v17171_v4 }
 0xa39   : >> { %v12442_v41 = vunpack.i.h.bf16 %v12440_v46  ;;  %v12441_v57 = vunpack.i.l.bf16 %v12440_v46  ;;  %12865 = vrcp.f32 %v17149_v10 }
 0xa3a   : >> { %v17328_v49 = vpop.eup %12857  ;;  %12867 = vrcp.f32 %v17213_v58 }
 0xa3b   : >> { %v11432_v8 = vpack.c.bf16 %v12442_v41, %v12441_v57  ;;  %12869 = vrcp.f32 %v17201_v21  ;;  %v19770_v41 = vld [vmem:[#allocation180_spill] sm:$0xff] }
 0xa3c   : >> { %v19771_v57 = vld [vmem:[#allocation72_spill] sm:$0xff]  ;;  %12871 = vrcp.f32 %v17273_v6 }
 0xa3d   : >> { %11433 = vmatprep.subr.bf16.mxu1 %v11432_v8  ;;  %v17331_v46 = vpop.eup %12859  ;;  %v4394_v7 = vsub.f32 %v19771_v57, %v19770_v41  ;;  %12873 = vrcp.f32 %v17261_v52 }
 0xa3e   : >> { %11435 = vmatpush3.bf16.msra.mxu1 %v11432_v8  ;;  %12875 = vrcp.f32 %v4825_v14 }
 0xa3f   : >> { %v4618_v54 = vmul.f32 1.442695, %v4394_v7  ;;  %12877 = vrcp.f32 %v17301_v0 }
 0xa41   : >> { %4838 = vadd.xlane.f32.xlu0 %v17325_v55  ;;  %v17334_v8 = vpop.eup %12861  ;;  %12879 = vpow2.f32 %v4618_v54 }
 0xa42   : >> { %v12864_v4 = vpop.eup %12863 }
 0xa43   : >> { %v12866_v1 = vpop.eup %12865  ;;  %v5131_v24 = vmul.f32 %v12864_v4, %v17079_v37  ;;  %v19773_v4 = vld [vmem:[#allocation135_spill] sm:$0xff] }
 0xa44   : >> { %v5132_v6 = vmul.f32 %v12866_v1, %v17063_v27  ;;  %v19774_v1 = vld [vmem:[#allocation74_spill] sm:$0xff] }
 0xa45   : >> { %4870 = vadd.xlane.f32.xlu0 %v17328_v49  ;;  %v4377_v54 = vsub.f32 %v19774_v1, %v19773_v4 }
 0xa4e   : >> { %4836 = vadd.xlane.f32.xlu1 %v17331_v46 }
 0xa52   : >> { %4868 = vadd.xlane.f32.xlu1 %v17334_v8 }
 0xa5b   : >> { %12474 = vrot.lane.b32.xlu0 %v19670_v26, %s13678_s19 }
 0xa5c   : >> { %v4831_v40 = vpop.xlane.xlu0 %4830 }
 0xa60   : >> { %v17341_v56 = vpop.xlane.xlu0 %4862 }
 0xa63   : >> { %12469 = vrot.lane.b32.xlu1 %v19661_v62, %s13679_s5  ;;  %v19772_v62 = vld [vmem:[#allocation113_spill] sm:$0xff] }
 0xa64   : >> { %v12455_v44 = vpop.permute.xlu0 %12454  ;;  %v4410_v21 = vsub.f32 %v19772_v62, %v16702_v19 }
 0xa65   : >> { %v12457_v29 = vunpack.i.h.bf16 %v12455_v44  ;;  %v12456_v61 = vunpack.i.l.bf16 %v12455_v44  ;;  %v12868_v44 = vpop.eup %12867 }
 0xa66   : >> { %v12870_v41 = vpop.eup %12869  ;;  %v4650_v57 = vmul.f32 1.442695, %v4410_v21  ;;  %v5133_v14 = vmul.f32 %v12868_v44, %v17113_v2  ;;  %v19775_v44 = vld [vmem:[#allocation198_spill] sm:$0xff] }
 0xa67   : >> { %v11408_v10 = vpack.c.bf16 %v12457_v29, %v12456_v61  ;;  %v12872_v7 = vpop.eup %12871  ;;  %v5134_v19 = vmul.f32 %v12870_v41, %v17105_v59 }
 0xa68   : >> { %v12874_v0 = vpop.eup %12873  ;;  %v5135_v27 = vmul.f32 %v12872_v7, %v17141_v20  ;;  %v19776_v20 = vld [vmem:[#allocation76_spill] sm:$0xff] }
 0xa69   : >> { %v4829_v58 = vpop.xlane.xlu1 %4828  ;;  %11409 = vmatprep.subr.bf16.mxu0 %v11408_v10 }
 0xa6a   : >> { %11411 = vmatpush3.bf16.msra.mxu0 %v11408_v10  ;;  %12881 = vrcp.f32 %v4829_v58  ;;  %v12876_v10 = vpop.eup %12875 }
 0xa6b   : >> { %12883 = vrcp.f32 %v4831_v40  ;;  %v5136_v40 = vmul.f32 %v12874_v0, %v17133_v22  ;;  %v12878_v2 = vpop.eup %12877  ;;  %v5137_v62 = vmul.f32 %v12876_v10, %v17193_v34 }
 0xa6c   : >> { %12885 = vpow2.f32 %v4650_v57  ;;  %v17364_v59 = vpop.eup %12879  ;;  %v5138_v41 = vmul.f32 %v12878_v2, %v17187_v9 }
 0xa6d   : >> { %v17356_v52 = vpop.xlane.xlu1 %4860  ;;  %10368 = vmatmul.mubr.f32.vlgmr.msra.gmra.mrb[128].mxu0 %v5131_v24  ;;  %v4584_v24 = vmul.f32 1.442695, %v4377_v54 }
 0xa6e   : >> { %10370 = vmatprep.mubr.f32.mxu0 %v5132_v6  ;;  %v4393_v6 = vsub.f32 %v19776_v20, %v19775_v44 }
 0xa6f   : >> { %12887 = vpow2.f32 %v4584_v24  ;;  %v19781_v24 = vld [vmem:[#allocation154_spill] sm:$0xff] }
 0xa71   : >> { %v12450_v29 = vpop.permute.xlu1 %12449  ;;  %10371 = vmatmul.mubr.f32.gmra.mrb[130].mxu0 %v5133_v14  ;;  %v4616_v14 = vmul.f32 1.442695, %v4393_v6 }
 0xa72   : >> { %v12452_v37 = vunpack.i.h.bf16 %v12450_v29  ;;  %v12451_v61 = vunpack.i.l.bf16 %v12450_v29  ;;  %10373 = vmatprep.mubr.f32.mxu0 %v5134_v19 }
 0xa73   : >> { %12889 = vpow2.f32 %v4616_v14 }
 0xa74   : >> { %v11436_v58 = vpack.c.bf16 %v12452_v37, %v12451_v61  ;;  %v12882_v21 = vpop.eup %12881  ;;  %v19777_v61 = vld [vmem:[#allocation183_spill] sm:$0xff] }
 0xa75   : >> { %10374 = vmatmul.mubr.f32.gmra.mrb[132].mxu0 %v5135_v27  ;;  %v12884_v57 = vpop.eup %12883  ;;  %v5139_v22 = vmul.f32 %v12882_v21, %v17253_v23  ;;  %v19778_v27 = vld [vmem:[#allocation105_spill] sm:$0xff]  ;;  %v19780_v21 = vld [vmem:[#allocation178_spill] sm:$0xff] }
 0xa76   : >> { %10376 = vmatprep.mubr.f32.mxu0 %v5136_v40  ;;  %11437 = vmatprep.subr.bf16.mxu1 %v11436_v58  ;;  %v5140_v7 = vmul.f32 %v12884_v57, %v17239_v35  ;;  %v17373_v19 = vpop.eup %12885  ;;  %v4396_v10 = vsub.f32 %v19778_v27, %v19777_v61  ;;  %v19779_v40 = vld [vmem:[#allocation111_spill] sm:$0xff]  ;;  %v4395_v44 = vsub.f32 %v19781_v24, %v19780_v21 }
 0xa77   : >> { %11439 = vmatpush3.bf16.msra.mxu1 %v11436_v58  ;;  %v4412_v58 = vsub.f32 %v19779_v40, %v16708_v31  ;;  %v19785_v24 = vld [vmem:[#allocation163_spill] sm:$0xff] }
 0xa78   : >> { %v4622_v54 = vmul.f32 1.442695, %v4396_v10 }
 0xa79   : >> { %10377 = vmatmul.mubr.f32.gmra.mrb[134].mxu0 %v5137_v62  ;;  %v17376_v34 = vpop.eup %12887  ;;  %v4654_v2 = vmul.f32 1.442695, %v4412_v58 }
 0xa7a   : >> { %4874 = vadd.xlane.f32.xlu0 %v17364_v59  ;;  %10379 = vmatprep.mubr.f32.mxu0 %v5138_v41 }
 0xa7d   : >> { %10380 = vmatmul.mubr.f32.gmra.mrb[136].mxu0 %v5139_v22  ;;  %v17379_v9 = vpop.eup %12889  ;;  %v4620_v22 = vmul.f32 1.442695, %v4395_v44  ;;  %v19786_v44 = vld [vmem:[#allocation121_spill] sm:$0xff] }
 0xa7e   : >> { %4906 = vadd.xlane.f32.xlu0 %v17373_v19  ;;  %10382 = vmatprep.mubr.f32.mxu0 %v5140_v7 }
 0xa87   : >> { %4840 = vadd.xlane.f32.xlu1 %v17376_v34 }
 0xa8b   : >> { %4872 = vadd.xlane.f32.xlu1 %v17379_v9 }
 0xa94   : >> { %12484 = vrot.lane.b32.xlu0 %v19592_v18, %s13678_s19 }
 0xa95   : >> { %v4835_v23 = vpop.xlane.xlu0 %4834 }
 0xa96   : >> { %12891 = vrcp.f32 %v4835_v23 }
 0xa99   : >> { %v17384_v35 = vpop.xlane.xlu0 %4866 }
 0xa9c   : >> { %12479 = vrot.lane.b32.xlu1 %v19670_v26, %s13679_s5 }
 0xa9d   : >> { %v12465_v0 = vpop.permute.xlu0 %12464 }
 0xa9e   : >> { %v12467_v29 = vunpack.i.h.bf16 %v12465_v0  ;;  %v12466_v37 = vunpack.i.l.bf16 %v12465_v0 }
 0xaa0   : >> { %v11444_v4 = vpack.c.bf16 %v12467_v29, %v12466_v37  ;;  %v12892_v6 = vpop.eup %12891 }
 0xaa1   : >> { %v5142_v7 = vmul.f32 %v12892_v6, %v17287_v15 }
 0xaa2   : >> { %v4833_v1 = vpop.xlane.xlu1 %4832  ;;  %11445 = vmatprep.subr.bf16.mxu0 %v11444_v4 }
 0xaa3   : >> { %12893 = vrcp.f32 %v4833_v1  ;;  %11447 = vmatpush3.bf16.msra.mxu0 %v11444_v4 }
 0xaa4   : >> { %12895 = vrcp.f32 %v17179_v16 }
 0xaa5   : >> { %12897 = vrcp.f32 %v17155_v30 }
 0xaa6   : >> { %v4865_v26 = vpop.xlane.xlu1 %4864  ;;  %12899 = vpow2.f32 %v4622_v54 }
 0xaa7   : >> { %12901 = vrcp.f32 %v17221_v5 }
 0xaa8   : >> { %12903 = vrcp.f32 %v17203_v38  ;;  %v19782_v38 = vld [vmem:[#allocation141_spill] sm:$0xff] }
 0xaa9   : >> { %12905 = vpow2.f32 %v4654_v2  ;;  %v4411_v14 = vsub.f32 %v19782_v38, %v16729_v42  ;;  %v19784_v2 = vld [vmem:[#allocation151_spill] sm:$0xff] }
 0xaaa   : >> { %v12460_v62 = vpop.permute.xlu1 %12459  ;;  %12907 = vrcp.f32 %v17281_v39 }
 0xaab   : >> { %v12462_v20 = vunpack.i.h.bf16 %v12460_v62  ;;  %v12461_v31 = vunpack.i.l.bf16 %v12460_v62  ;;  %12909 = vrcp.f32 %v17263_v50  ;;  %v4652_v42 = vmul.f32 1.442695, %v4411_v14 }
 0xaac   : >> { %12911 = vrcp.f32 %v17319_v43 }
 0xaad   : >> { %v12894_v16 = vpop.eup %12893  ;;  %v11440_v30 = vpack.c.bf16 %v12462_v20, %v12461_v31  ;;  %12913 = vrcp.f32 %v17303_v60  ;;  %v4414_v20 = vsub.f32 %v19786_v44, %v19785_v24 }
 0xaae   : >> { %v12896_v41 = vpop.eup %12895  ;;  %v5141_v57 = vmul.f32 %v12894_v16, %v17293_v11  ;;  %12915 = vpow2.f32 %v4620_v22  ;;  %v19788_v22 = vld [vmem:[#allocation95_spill] sm:$0xff] }
 0xaaf   : >> { %v12898_v5 = vpop.eup %12897  ;;  %11441 = vmatprep.subr.bf16.mxu1 %v11440_v30  ;;  %v5147_v50 = vmul.f32 %v12896_v41, %v17084_v33  ;;  %12917 = vrcp.f32 %v17356_v52 }
 0xab0   : >> { %10383 = vmatmul.mubr.f32.gmra.mrb[138].mxu0 %v5141_v57  ;;  %11443 = vmatpush3.bf16.msra.mxu1 %v11440_v30  ;;  %v17405_v39 = vpop.eup %12899  ;;  %v5148_v23 = vmul.f32 %v12898_v5, %v17070_v47  ;;  %12919 = vrcp.f32 %v17341_v56  ;;  %v19787_v5 = vld [vmem:[#allocation179_spill] sm:$0xff] }
 0xab1   : >> { %10385 = vmatprep.mubr.f32.mxu0 %v5142_v7  ;;  %v12902_v11 = vpop.eup %12901  ;;  %12921 = vpow2.f32 %v4652_v42  ;;  %v4397_v38 = vsub.f32 %v19788_v22, %v19787_v5  ;;  %v19789_v42 = vld [vmem:[#allocation100_spill] sm:$0xff] }
 0xab2   : >> { %v12904_v0 = vpop.eup %12903  ;;  %v5149_v60 = vmul.f32 %v12902_v11, %v17116_v48  ;;  %12923 = vrcp.f32 %v4865_v26  ;;  %v19783_v26 = vld [vmem:[#allocation162_spill] sm:$0xff] }
 0xab3   : >> { %4878 = vadd.xlane.f32.xlu0 %v17405_v39  ;;  %10424 = vmatmul.mubr.f32.vlgmr.msra.gmra.mrb[112].mxu1 %v5147_v50  ;;  %v17412_v15 = vpop.eup %12905  ;;  %v5150_v33 = vmul.f32 %v12904_v0, %v17110_v25  ;;  %12925 = vrcp.f32 %v17384_v35  ;;  %v4398_v62 = vsub.f32 %v19784_v2, %v19783_v26  ;;  %v4624_v0 = vmul.f32 1.442695, %v4397_v38 }
 0xab4   : >> { %10426 = vmatprep.mubr.f32.mxu1 %v5148_v23  ;;  %v12908_v43 = vpop.eup %12907 }
 0xab5   : >> { %v12910_v29 = vpop.eup %12909  ;;  %v5151_v47 = vmul.f32 %v12908_v43, %v17144_v32 }
 0xab6   : >> { %v12912_v52 = vpop.eup %12911  ;;  %v5152_v37 = vmul.f32 %v12910_v29, %v17138_v51 }
 0xab7   : >> { %4910 = vadd.xlane.f32.xlu0 %v17412_v15  ;;  %10427 = vmatmul.mubr.f32.gmra.mrb[114].mxu1 %v5149_v60  ;;  %v12914_v56 = vpop.eup %12913  ;;  %v5153_v25 = vmul.f32 %v12912_v52, %v17196_v28  ;;  %v19790_v60 = vld [vmem:[#allocation115_spill] sm:$0xff] }
 0xab8   : >> { %10429 = vmatprep.mubr.f32.mxu1 %v5150_v33  ;;  %v17421_v48 = vpop.eup %12915  ;;  %v5154_v27 = vmul.f32 %v12914_v56, %v17190_v53  ;;  %v4413_v43 = vsub.f32 %v19790_v60, %v19789_v42 }
 0xab9   : >> { %v12918_v61 = vpop.eup %12917 }
 0xaba   : >> { %v12920_v10 = vpop.eup %12919  ;;  %v5155_v32 = vmul.f32 %v12918_v61, %v17256_v13 }
 0xabb   : >> { %10430 = vmatmul.mubr.f32.gmra.mrb[116].mxu1 %v5151_v47  ;;  %v17426_v35 = vpop.eup %12921  ;;  %v5156_v4 = vmul.f32 %v12920_v10, %v17246_v12  ;;  %v19792_v10 = vld [vmem:[#allocation157_spill] sm:$0xff] }
 0xabc   : >> { %10432 = vmatprep.mubr.f32.mxu1 %v5152_v37  ;;  %v12924_v51 = vpop.eup %12923 }
 0xabd   : >> { %v12926_v1 = vpop.eup %12925  ;;  %v5157_v28 = vmul.f32 %v12924_v51, %v17296_v17 }
 0xabe   : >> { %v5158_v53 = vmul.f32 %v12926_v1, %v17290_v45  ;;  %v4626_v45 = vmul.f32 1.442695, %v4398_v62  ;;  %v19795_v62 = vld [vmem:[#allocation185_spill] sm:$0xff] }
 0xabf   : >> { %10433 = vmatmul.mubr.f32.gmra.mrb[118].mxu1 %v5153_v25 }
 0xac0   : >> { %4876 = vadd.xlane.f32.xlu1 %v17421_v48  ;;  %10435 = vmatprep.mubr.f32.mxu1 %v5154_v27  ;;  %v19791_v27 = vld [vmem:[#allocation81_spill] sm:$0xff] }
 0xac3   : >> { %10436 = vmatmul.mubr.f32.gmra.mrb[120].mxu1 %v5155_v32  ;;  %v4400_v32 = vsub.f32 %v19792_v10, %v19791_v27  ;;  %v19806_v27 = vld [vmem:[#allocation199_spill] sm:$0xff]  ;;  %v19807_v10 = vld [vmem:[#allocation132_spill] sm:$0xff] }
 0xac4   : >> { %4908 = vadd.xlane.f32.xlu1 %v17426_v35  ;;  %10438 = vmatprep.mubr.f32.mxu1 %v5156_v4 }
 0xac5   : >> { %v4630_v1 = vmul.f32 1.442695, %v4400_v32  ;;  %v4418_v32 = vsub.f32 %v19807_v10, %v19806_v27  ;;  %v19820_v27 = vld [vmem:[#allocation140_spill] sm:$0xff] }
 0xac7   : >> { %10439 = vmatmul.mubr.f32.gmra.mrb[122].mxu1 %v5157_v28  ;;  %v19793_v28 = vld [vmem:[#allocation153_spill] sm:$0xff] }
 0xac8   : >> { %10441 = vmatprep.mubr.f32.mxu1 %v5158_v53  ;;  %v19794_v53 = vld [vmem:[#allocation127_spill] sm:$0xff] }
 0xacd   : >> { %12494 = vrot.lane.b32.xlu0 %v19591_v63, %s13678_s19 }
 0xace   : >> { %v4839_v54 = vpop.xlane.xlu0 %4838 }
 0xacf   : >> { %12927 = vrcp.f32 %v4839_v54  ;;  %v4416_v54 = vsub.f32 %v19794_v53, %v19793_v28  ;;  %v4666_v28 = vmul.f32 1.442695, %v4418_v32 }
 0xad2   : >> { %v4871_v40 = vpop.xlane.xlu0 %4870 }
 0xad5   : >> { %12489 = vrot.lane.b32.xlu1 %v19592_v18, %s13679_s5  ;;  %v4658_v18 = vmul.f32 1.442695, %v4414_v20 }
 0xad6   : >> { %v12475_v12 = vpop.permute.xlu0 %12474 }
 0xad7   : >> { %v12477_v13 = vunpack.i.h.bf16 %v12475_v12  ;;  %v12476_v58 = vunpack.i.l.bf16 %v12475_v12 }
 0xad9   : >> { %v11448_v21 = vpack.c.bf16 %v12477_v13, %v12476_v58  ;;  %v12928_v41 = vpop.eup %12927 }
 0xada   : >> { %v5144_v50 = vmul.f32 %v12928_v41, %v17325_v55  ;;  %v4656_v55 = vmul.f32 1.442695, %v4413_v43 }
 0xadb   : >> { %v4837_v17 = vpop.xlane.xlu1 %4836  ;;  %11449 = vmatprep.subr.bf16.mxu0 %v11448_v21 }
 0xadc   : >> { %12929 = vrcp.f32 %v4837_v17  ;;  %11451 = vmatpush3.bf16.msra.mxu0 %v11448_v21  ;;  %v19796_v21 = vld [vmem:[#allocation122_spill] sm:$0xff] }
 0xadd   : >> { %12931 = vrcp.f32 %v4871_v40  ;;  %v4399_v17 = vsub.f32 %v19796_v21, %v19795_v62  ;;  %v19813_v62 = vld [vmem:[#allocation125_spill] sm:$0xff] }
 0xadf   : >> { %v4869_v31 = vpop.xlane.xlu1 %4868 }
 0xae0   : >> { %12933 = vrcp.f32 %v4869_v31 }
 0xae1   : >> { %12935 = vpow2.f32 %v4626_v45 }
 0xae2   : >> { %12937 = vpow2.f32 %v4658_v18  ;;  %v4628_v18 = vmul.f32 1.442695, %v4399_v17 }
 0xae3   : >> { %v12470_v6 = vpop.permute.xlu1 %12469  ;;  %12939 = vpow2.f32 %v4624_v0 }
 0xae4   : >> { %v12472_v16 = vunpack.i.h.bf16 %v12470_v6  ;;  %v12471_v30 = vunpack.i.l.bf16 %v12470_v6  ;;  %12941 = vpow2.f32 %v4656_v55  ;;  %v19797_v6 = vld [vmem:[#allocation82_spill] sm:$0xff] }
 0xae5   : >> { %v19803_v55 = vld [vmem:[#allocation118_spill] sm:$0xff] }
 0xae6   : >> { %v12930_v57 = vpop.eup %12929  ;;  %v11476_v14 = vpack.c.bf16 %v12472_v16, %v12471_v30  ;;  %v19798_v16 = vld [vmem:[#allocation123_spill] sm:$0xff] }
 0xae7   : >> { %v5143_v7 = vmul.f32 %v12930_v57, %v17331_v46  ;;  %v12932_v11 = vpop.eup %12931  ;;  %v4415_v30 = vsub.f32 %v19798_v16, %v19797_v6 }
 0xae8   : >> { %11477 = vmatprep.subr.bf16.mxu1 %v11476_v14  ;;  %v5160_v46 = vmul.f32 %v12932_v11, %v17328_v49 }
 0xae9   : >> { %10386 = vmatmul.mubr.f32.gmra.mrb[140].mxu0 %v5143_v7  ;;  %11479 = vmatpush3.bf16.msra.mxu1 %v11476_v14 }
 0xaea   : >> { %v12934_v23 = vpop.eup %12933  ;;  %10388 = vmatprep.mubr.f32.mxu0 %v5144_v50 }
 0xaeb   : >> { %v17447_v33 = vpop.eup %12935  ;;  %v5159_v29 = vmul.f32 %v12934_v23, %v17334_v8 }
 0xaec   : >> { %4882 = vadd.xlane.f32.xlu0 %v17447_v33  ;;  %v17452_v47 = vpop.eup %12937 }
 0xaed   : >> { %10442 = vmatmul.mubr.f32.gmra.mrb[124].mxu1 %v5159_v29  ;;  %v17455_v52 = vpop.eup %12939 }
 0xaee   : >> { %10444 = vmatprep.mubr.f32.mxu1 %v5160_v46  ;;  %v17458_v37 = vpop.eup %12941  ;;  %v19802_v46 = vld [vmem:[#allocation86_spill] sm:$0xff] }
 0xaf0   : >> { %4914 = vadd.xlane.f32.xlu0 %v17452_v47 }
 0xaf9   : >> { %4880 = vadd.xlane.f32.xlu1 %v17455_v52 }
 0xafd   : >> { %4912 = vadd.xlane.f32.xlu1 %v17458_v37 }
 0xb06   : >> { %12504 = vrot.lane.b32.xlu0 %v19611_v3, %s13678_s19 }
 0xb07   : >> { %v4875_v49 = vpop.xlane.xlu0 %4874 }
 0xb08   : >> { %12943 = vrcp.f32 %v4875_v49  ;;  %v4402_v49 = vsub.f32 %v19803_v55, %v19802_v46 }
 0xb0b   : >> { %v4907_v8 = vpop.xlane.xlu0 %4906 }
 0xb0e   : >> { %12499 = vrot.lane.b32.xlu1 %v19591_v63, %s13679_s5  ;;  %v4662_v63 = vmul.f32 1.442695, %v4416_v54 }
 0xb0f   : >> { %v12485_v56 = vpop.permute.xlu0 %12484 }
 0xb10   : >> { %v12487_v25 = vunpack.i.h.bf16 %v12485_v56  ;;  %v12486_v61 = vunpack.i.l.bf16 %v12485_v56 }
 0xb12   : >> { %v11452_v51 = vpack.c.bf16 %v12487_v25, %v12486_v61  ;;  %v12944_v26 = vpop.eup %12943 }
 0xb13   : >> { %v5162_v44 = vmul.f32 %v12944_v26, %v17364_v59  ;;  %v4660_v59 = vmul.f32 1.442695, %v4415_v30 }
 0xb14   : >> { %v4841_v4 = vpop.xlane.xlu1 %4840  ;;  %11453 = vmatprep.subr.bf16.mxu0 %v11452_v51 }
 0xb15   : >> { %12945 = vrcp.f32 %v4841_v4  ;;  %11455 = vmatpush3.bf16.msra.mxu0 %v11452_v51 }
 0xb16   : >> { %12947 = vrcp.f32 %v4907_v8 }
 0xb18   : >> { %v4873_v40 = vpop.xlane.xlu1 %4872 }
 0xb19   : >> { %12949 = vrcp.f32 %v4873_v40 }
 0xb1a   : >> { %12951 = vpow2.f32 %v4630_v1 }
 0xb1b   : >> { %12953 = vpow2.f32 %v4662_v63  ;;  %v19810_v63 = vld [vmem:[#allocation128_spill] sm:$0xff] }
 0xb1c   : >> { %v12480_v12 = vpop.permute.xlu1 %12479  ;;  %12955 = vpow2.f32 %v4628_v18 }
 0xb1d   : >> { %v12482_v13 = vunpack.i.h.bf16 %v12480_v12  ;;  %v12481_v58 = vunpack.i.l.bf16 %v12480_v12  ;;  %12957 = vpow2.f32 %v4660_v59  ;;  %v19811_v12 = vld [vmem:[#allocation139_spill] sm:$0xff]  ;;  %v19816_v59 = vld [vmem:[#allocation200_spill] sm:$0xff] }
 0xb1f   : >> { %v12946_v2 = vpop.eup %12945  ;;  %v11480_v45 = vpack.c.bf16 %v12482_v13, %v12481_v58  ;;  %v4401_v13 = vsub.f32 %v19811_v12, %v19810_v63 }
 0xb20   : >> { %v5145_v24 = vmul.f32 %v12946_v2, %v17376_v34  ;;  %v12948_v20 = vpop.eup %12947  ;;  %v19812_v2 = vld [vmem:[#allocation173_spill] sm:$0xff] }
 0xb21   : >> { %11481 = vmatprep.subr.bf16.mxu1 %v11480_v45  ;;  %v5178_v34 = vmul.f32 %v12948_v20, %v17373_v19  ;;  %v4632_v26 = vmul.f32 1.442695, %v4401_v13  ;;  %v4417_v21 = vsub.f32 %v19813_v62, %v19812_v2  ;;  %v19825_v2 = vld [vmem:[#allocation104_spill] sm:$0xff] }
 0xb22   : >> { %10389 = vmatmul.mubr.f32.gmra.mrb[142].mxu0 %v5145_v24  ;;  %11483 = vmatpush3.bf16.msra.mxu1 %v11480_v45 }
 0xb23   : >> { %v12950_v31 = vpop.eup %12949  ;;  %10479 = vmatprep.mubr.f32.mxu0 %v5162_v44  ;;  %v4664_v45 = vmul.f32 1.442695, %v4417_v21 }
 0xb24   : >> { %v17475_v41 = vpop.eup %12951  ;;  %v5161_v57 = vmul.f32 %v12950_v31, %v17379_v9  ;;  %v19799_v9 = vld [vmem:[#allocation167_spill] sm:$0xff]  ;;  %v19814_v31 = vld [vmem:[#allocation164_spill] sm:$0xff] }
 0xb25   : >> { %4886 = vadd.xlane.f32.xlu0 %v17475_v41  ;;  %v17480_v5 = vpop.eup %12953 }
 0xb26   : >> { %10445 = vmatmul.mubr.f32.gmra.mrb[126].mxu1 %v5161_v57  ;;  %v17483_v22 = vpop.eup %12955 }
 0xb27   : >> { %10535 = vmatprep.mubr.f32.mxu1 %v5178_v34  ;;  %v17486_v38 = vpop.eup %12957 }
 0xb29   : >> { %4918 = vadd.xlane.f32.xlu0 %v17480_v5 }
 0xb32   : >> { %4884 = vadd.xlane.f32.xlu1 %v17483_v22 }
 0xb36   : >> { %4916 = vadd.xlane.f32.xlu1 %v17486_v38 }
 0xb3f   : >> { %12514 = vrot.lane.b32.xlu0 %v19799_v9, %s13678_s19 }
 0xb40   : >> { %v17491_v19 = vpop.xlane.xlu0 %4878  ;;  %v17493_v14 = vpop.f32.mrb[128].mxu0 }
 0xb41   : >> { %v17495_v7 = vpop.f32.mrb[129].mxu0 }
 0xb44   : >> { %v17497_v50 = vpop.xlane.xlu0 %4910  ;;  %v17499_v11 = vpop.f32.mrb[130].mxu0 }
 0xb45   : >> { %v17501_v23 = vpop.f32.mrb[131].mxu0 }
 0xb47   : >> { %12509 = vrot.lane.b32.xlu1 %v19611_v3, %s13679_s5  ;;  %v4634_v3 = vmul.f32 1.442695, %v4402_v49 }
 0xb48   : >> { %v12495_v0 = vpop.permute.xlu0 %12494  ;;  %v17505_v42 = vpop.f32.mrb[132].mxu0 }
 0xb49   : >> { %19800 = vst [vmem:[#allocation116_spill] sm:$0xff] %v17505_v42  ;;  %v12497_v60 = vunpack.i.h.bf16 %v12495_v0  ;;  %v12496_v43 = vunpack.i.l.bf16 %v12495_v0  ;;  %v17507_v29 = vpop.f32.mrb[133].mxu0  ;;  %12959 = vpow2.f32 %v4634_v3  ;;  %v19817_v0 = vld [vmem:[#allocation150_spill] sm:$0xff]  ;;  %v19819_v3 = vld [vmem:[#allocation203_spill] sm:$0xff] }
 0xb4a   : >> { %19801 = vst [vmem:[#allocation106_spill] sm:$0xff] %v17507_v29  ;;  %12961 = vpow2.f32 %v4666_v28  ;;  %v4420_v10 = vsub.f32 %v19820_v27, %v19819_v3  ;;  %v19859_v29 = vld [vmem:[#allocation138_spill] sm:$0xff] }
 0xb4b   : >> { %v11456_v8 = vpack.c.bf16 %v12497_v60, %v12496_v43  ;;  %12963 = vpow2.f32 %v4632_v26  ;;  %v4404_v60 = vsub.f32 %v19817_v0, %v19816_v59  ;;  %v19824_v26 = vld [vmem:[#allocation191_spill] sm:$0xff]  ;;  %v19829_v59 = vld [vmem:[#allocation129_spill] sm:$0xff] }
 0xb4c   : >> { %v17511_v56 = vpop.f32.mrb[134].mxu0  ;;  %12965 = vpow2.f32 %v4664_v45  ;;  %v4403_v62 = vsub.f32 %v19825_v2, %v19824_v26 }
 0xb4d   : >> { %19804 = vst [vmem:[#allocation77_spill] sm:$0xff] %v17511_v56  ;;  %v17513_v25 = vpop.xlane.xlu1 %4876  ;;  %v17515_v61 = vpop.f32.mrb[135].mxu0  ;;  %11457 = vmatprep.subr.bf16.mxu0 %v11456_v8  ;;  %v19850_v56 = vld [vmem:[#allocation175_spill] sm:$0xff] }
 0xb4e   : >> { %19805 = vst [vmem:[#allocation182_spill] sm:$0xff] %v17515_v61  ;;  %11459 = vmatpush3.bf16.msra.mxu0 %v11456_v8  ;;  %v19847_v61 = vld [vmem:[#allocation93_spill] sm:$0xff] }
 0xb50   : >> { %v17519_v51 = vpop.f32.mrb[136].mxu0 }
 0xb51   : >> { %19808 = vst [vmem:[#allocation88_spill] sm:$0xff] %v17519_v51  ;;  %v17521_v4 = vpop.xlane.xlu1 %4908  ;;  %v17523_v1 = vpop.f32.mrb[137].mxu0  ;;  %v19843_v51 = vld [vmem:[#allocation201_spill] sm:$0xff] }
 0xb52   : >> { %19809 = vst [vmem:[#allocation120_spill] sm:$0xff] %v17523_v1 }
 0xb53   : >> { %v17529_v17 = vpop.eup %12959 }
 0xb54   : >> { %v17532_v24 = vpop.eup %12961 }
 0xb55   : >> { %v12490_v53 = vpop.permute.xlu1 %12489  ;;  %v17535_v44 = vpop.eup %12963 }
 0xb56   : >> { %v12492_v54 = vunpack.i.h.bf16 %v12490_v53  ;;  %v12491_v40 = vunpack.i.l.bf16 %v12490_v53  ;;  %v17538_v20 = vpop.eup %12965 }
 0xb58   : >> { %v11484_v58 = vpack.c.bf16 %v12492_v54, %v12491_v40  ;;  %v4670_v54 = vmul.f32 1.442695, %v4420_v10 }
 0xb5a   : >> { %11485 = vmatprep.subr.bf16.mxu1 %v11484_v58 }
 0xb5b   : >> { %11487 = vmatpush3.bf16.msra.mxu1 %v11484_v58 }
 0xb5e   : >> { %4890 = vadd.xlane.f32.xlu0 %v17529_v17 }
 0xb62   : >> { %4922 = vadd.xlane.f32.xlu0 %v17532_v24 }
 0xb6b   : >> { %4888 = vadd.xlane.f32.xlu1 %v17535_v44 }
 0xb6f   : >> { %4920 = vadd.xlane.f32.xlu1 %v17538_v20 }
 0xb78   : >> { %12524 = vrot.lane.b32.xlu0 %v19814_v31, %s13678_s19 }
 0xb79   : >> { %v17543_v18 = vpop.xlane.xlu0 %4882 }
 0xb7d   : >> { %v17545_v6 = vpop.xlane.xlu0 %4914 }
 0xb80   : >> { %12519 = vrot.lane.b32.xlu1 %v19799_v9, %s13679_s5  ;;  %v4638_v9 = vmul.f32 1.442695, %v4404_v60 }
 0xb81   : >> { %v12505_v16 = vpop.permute.xlu0 %12504 }
 0xb82   : >> { %v12507_v30 = vunpack.i.h.bf16 %v12505_v16  ;;  %v12506_v57 = vunpack.i.l.bf16 %v12505_v16  ;;  %12967 = vpow2.f32 %v4638_v9 }
 0xb83   : >> { %v17549_v34 = vpop.f32.mrb[138].mxu0  ;;  %12969 = vpow2.f32 %v4670_v54 }
 0xb84   : >> { %19815 = vst [vmem:[#allocation108_spill] sm:$0xff] %v17549_v34  ;;  %v17553_v43 = vpop.f32.mrb[139].mxu0  ;;  %v11460_v46 = vpack.c.bf16 %v12507_v30, %v12506_v57  ;;  %v4636_v30 = vmul.f32 1.442695, %v4403_v62  ;;  %v19828_v57 = vld [vmem:[#allocation68_spill] sm:$0xff] }
 0xb85   : >> { %19818 = vst [vmem:[#allocation186_spill] sm:$0xff] %v17553_v43  ;;  %v4419_v0 = vsub.f32 %v19829_v59, %v19828_v57  ;;  %v19836_v59 = vld [vmem:[#allocation204_spill] sm:$0xff] }
 0xb86   : >> { %v17555_v55 = vpop.xlane.xlu1 %4880  ;;  %v17557_v49 = vpop.f32.mrb[112].mxu1  ;;  %11461 = vmatprep.subr.bf16.mxu0 %v11460_v46  ;;  %12971 = vpow2.f32 %v4636_v30  ;;  %v19840_v34 = vld [vmem:[#allocation84_spill] sm:$0xff] }
 0xb87   : >> { %v17559_v8 = vpop.f32.mrb[113].mxu1  ;;  %11463 = vmatpush3.bf16.msra.mxu0 %v11460_v46  ;;  %v4668_v3 = vmul.f32 1.442695, %v4419_v0  ;;  %v19837_v0 = vld [vmem:[#allocation144_spill] sm:$0xff] }
 0xb89   : >> { %12973 = vpow2.f32 %v4668_v3  ;;  %v4406_v3 = vsub.f32 %v19837_v0, %v19836_v59  ;;  %v19844_v59 = vld [vmem:[#allocation69_spill] sm:$0xff] }
 0xb8a   : >> { %v17563_v32 = vpop.xlane.xlu1 %4912  ;;  %v17565_v28 = vpop.f32.mrb[114].mxu1  ;;  %v4423_v0 = vsub.f32 %v19844_v59, %v19843_v51  ;;  %v19852_v59 = vld [vmem:[#allocation134_spill] sm:$0xff] }
 0xb8b   : >> { %v17567_v53 = vpop.f32.mrb[115].mxu1 }
 0xb8c   : >> { %19821 = vst [vmem:[#allocation136_spill] sm:$0xff] %v17567_v53  ;;  %v17581_v60 = vpop.eup %12967 }
 0xb8d   : >> { %v17588_v27 = vpop.eup %12969 }
 0xb8e   : >> { %v12500_v40 = vpop.permute.xlu1 %12499  ;;  %v17569_v63 = vpop.f32.mrb[116].mxu1 }
 0xb8f   : >> { %19822 = vst [vmem:[#allocation114_spill] sm:$0xff] %v17569_v63  ;;  %v12502_v12 = vunpack.i.h.bf16 %v12500_v40  ;;  %v12501_v13 = vunpack.i.l.bf16 %v12500_v40  ;;  %v17571_v58 = vpop.f32.mrb[117].mxu1 }
 0xb90   : >> { %19823 = vst [vmem:[#allocation56_spill] sm:$0xff] %v17571_v58  ;;  %v17595_v40 = vpop.eup %12971 }
 0xb91   : >> { %v11488_v21 = vpack.c.bf16 %v12502_v12, %v12501_v13  ;;  %v19834_v13 = vld [vmem:[#allocation168_spill] sm:$0xff] }
 0xb92   : >> { %v17575_v45 = vpop.f32.mrb[118].mxu1 }
 0xb93   : >> { %19826 = vst [vmem:[#allocation91_spill] sm:$0xff] %v17575_v45  ;;  %v17577_v16 = vpop.f32.mrb[119].mxu1  ;;  %11489 = vmatprep.subr.bf16.mxu1 %v11488_v21  ;;  %v17598_v12 = vpop.eup %12973 }
 0xb94   : >> { %19827 = vst [vmem:[#allocation161_spill] sm:$0xff] %v17577_v16  ;;  %11491 = vmatpush3.bf16.msra.mxu1 %v11488_v21  ;;  %v4676_v16 = vmul.f32 1.442695, %v4423_v0  ;;  %v19854_v0 = vld [vmem:[#allocation176_spill] sm:$0xff] }
 0xb96   : >> { %v17583_v46 = vpop.f32.mrb[120].mxu1 }
 0xb97   : >> { %19830 = vst [vmem:[#allocation64_spill] sm:$0xff] %v17583_v46  ;;  %4894 = vadd.xlane.f32.xlu0 %v17581_v60  ;;  %v17586_v9 = vpop.f32.mrb[121].mxu1  ;;  %v4642_v46 = vmul.f32 1.442695, %v4406_v3 }
 0xb98   : >> { %19831 = vst [vmem:[#allocation112_spill] sm:$0xff] %v17586_v9  ;;  %v19841_v9 = vld [vmem:[#allocation54_spill] sm:$0xff] }
 0xb99   : >> { %12975 = vpow2.f32 %v4642_v46  ;;  %v19851_v46 = vld [vmem:[#allocation160_spill] sm:$0xff] }
 0xb9a   : >> { %v17590_v10 = vpop.f32.mrb[122].mxu1 }
 0xb9b   : >> { %19832 = vst [vmem:[#allocation193_spill] sm:$0xff] %v17590_v10  ;;  %4926 = vadd.xlane.f32.xlu0 %v17588_v27  ;;  %v17593_v54 = vpop.f32.mrb[123].mxu1 }
 0xb9c   : >> { %19833 = vst [vmem:[#allocation169_spill] sm:$0xff] %v17593_v54 }
 0xba4   : >> { %4892 = vadd.xlane.f32.xlu1 %v17595_v40 }
 0xba8   : >> { %4924 = vadd.xlane.f32.xlu1 %v17598_v12 }
 0xbb1   : >> { %12534 = vrot.lane.b32.xlu0 %v19834_v13, %s13678_s19 }
 0xbb2   : >> { %v17603_v26 = vpop.xlane.xlu0 %4886 }
 0xbb6   : >> { %v17605_v2 = vpop.xlane.xlu0 %4918 }
 0xbb9   : >> { %12529 = vrot.lane.b32.xlu1 %v19814_v31, %s13679_s5  ;;  %v4422_v31 = vsub.f32 %v19841_v9, %v19840_v34  ;;  %v19848_v34 = vld [vmem:[#allocation158_spill] sm:$0xff] }
 0xbba   : >> { %v12515_v62 = vpop.permute.xlu0 %12514  ;;  %v4405_v9 = vsub.f32 %v19848_v34, %v19847_v61 }
 0xbbb   : >> { %v12517_v21 = vunpack.i.h.bf16 %v12515_v62  ;;  %v12516_v30 = vunpack.i.l.bf16 %v12515_v62 }
 0xbbc   : >> { %v17609_v57 = vpop.f32.mrb[140].mxu0  ;;  %v4640_v51 = vmul.f32 1.442695, %v4405_v9 }
 0xbbd   : >> { %19835 = vst [vmem:[#allocation131_spill] sm:$0xff] %v17609_v57  ;;  %v17613_v36 = vpop.f32.mrb[141].mxu0  ;;  %v11464_v54 = vpack.c.bf16 %v12517_v21, %v12516_v30  ;;  %v4674_v57 = vmul.f32 1.442695, %v4422_v31  ;;  %v19849_v31 = vld [vmem:[#allocation103_spill] sm:$0xff] }
 0xbbe   : >> { %19838 = vst [vmem:[#allocation102_spill] sm:$0xff] %v17613_v36  ;;  %v4409_v58 = vsub.f32 %v19850_v56, %v19849_v31 }
 0xbbf   : >> { %v17615_v10 = vpop.xlane.xlu1 %4884  ;;  %11465 = vmatprep.subr.bf16.mxu0 %v11464_v54  ;;  %12977 = vpow2.f32 %v4674_v57  ;;  %v17635_v57 = vpop.eup %12975 }
 0xbc0   : >> { %v17617_v43 = vpop.f32.mrb[124].mxu1  ;;  %11467 = vmatpush3.bf16.msra.mxu0 %v11464_v54  ;;  %v19846_v54 = vld [vmem:[#allocation61_spill] sm:$0xff]  ;;  %12979 = vpow2.f32 %v4676_v16 }
 0xbc1   : >> { %19839 = vst [vmem:[#allocation187_spill] sm:$0xff] %v17617_v43  ;;  %v17621_v1 = vpop.f32.mrb[125].mxu1  ;;  %v19845_v43 = vld [vmem:[#allocation202_spill] sm:$0xff] }
 0xbc2   : >> { %19842 = vst [vmem:[#allocation159_spill] sm:$0xff] %v17621_v1  ;;  %v4408_v45 = vsub.f32 %v19846_v54, %v19845_v43  ;;  %v19853_v43 = vld [vmem:[#allocation148_spill] sm:$0xff]  ;;  %v19856_v54 = vld [vmem:[#allocation65_spill] sm:$0xff] }
 0xbc3   : >> { %v17623_v62 = vpop.xlane.xlu1 %4916  ;;  %v4424_v61 = vsub.f32 %v19854_v0, %v19853_v43 }
 0xbc4   : >> { %v4646_v1 = vmul.f32 1.442695, %v4408_v45 }
 0xbc5   : >> { %v4678_v56 = vmul.f32 1.442695, %v4424_v61 }
 0xbc6   : >> { %12981 = vpow2.f32 %v4646_v1 }
 0xbc7   : >> { %v12510_v21 = vpop.permute.xlu1 %12509  ;;  %12983 = vpow2.f32 %v4640_v51 }
 0xbc8   : >> { %v12512_v30 = vunpack.i.h.bf16 %v12510_v21  ;;  %v12511_v36 = vunpack.i.l.bf16 %v12510_v21  ;;  %v4421_v21 = vsub.f32 %v19852_v59, %v19851_v46 }
 0xbc9   : >> { %v17640_v45 = vpop.eup %12977 }
 0xbca   : >> { %v11492_v3 = vpack.c.bf16 %v12512_v30, %v12511_v36  ;;  %v4648_v36 = vmul.f32 1.442695, %v4409_v58  ;;  %v4672_v16 = vmul.f32 1.442695, %v4421_v21  ;;  %v19855_v30 = vld [vmem:[#allocation213_spill] sm:$0xff]  ;;  %v17645_v9 = vpop.eup %12979 }
 0xbcb   : >> { %v4425_v34 = vsub.f32 %v19856_v54, %v19855_v30 }
 0xbcc   : >> { %11493 = vmatprep.subr.bf16.mxu1 %v11492_v3  ;;  %12985 = vpow2.f32 %v4648_v36 }
 0xbcd   : >> { %11495 = vmatpush3.bf16.msra.mxu1 %v11492_v3  ;;  %12987 = vpow2.f32 %v4672_v16  ;;  %v4680_v1 = vmul.f32 1.442695, %v4425_v34 }
 0xbce   : >> { %12989 = vpow2.f32 %v4678_v56 }
 0xbcf   : >> { %12991 = vpow2.f32 %v4680_v1 }
 0xbd0   : >> { %4898 = vadd.xlane.f32.xlu0 %v17635_v57  ;;  %v17648_v3 = vpop.eup %12981 }
 0xbd1   : >> { %v17650_v58 = vpop.eup %12983 }
 0xbd4   : >> { %4930 = vadd.xlane.f32.xlu0 %v17640_v45 }
 0xbd6   : >> { %v17654_v31 = vpop.eup %12985 }
 0xbd7   : >> { %v17656_v51 = vpop.eup %12987 }
 0xbd8   : >> { %4932 = vadd.xlane.f32.xlu0 %v17645_v9  ;;  %v17660_v46 = vpop.eup %12989 }
 0xbd9   : >> { %v17663_v59 = vpop.eup %12991 }
 0xbdc   : >> { %4902 = vadd.xlane.f32.xlu0 %v17648_v3 }
 0xbdd   : >> { %4896 = vadd.xlane.f32.xlu1 %v17650_v58 }
 0xbe0   : >> { %4904 = vadd.xlane.f32.xlu0 %v17654_v31 }
 0xbe1   : >> { %4928 = vadd.xlane.f32.xlu1 %v17656_v51 }
 0xbe4   : >> { %4934 = vadd.xlane.f32.xlu0 %v17660_v46 }
 0xbe8   : >> { %4936 = vadd.xlane.f32.xlu0 %v17663_v59 }
 0xbeb   : >> { %v4891_v21 = vpop.xlane.xlu0 %4890 }
 0xbef   : >> { %v17666_v43 = vpop.xlane.xlu0 %4922 }
 0xbf2   : >> { %12539 = vrot.lane.b32.xlu1 %v19834_v13, %s13679_s5 }
 0xbf3   : >> { %v12525_v0 = vpop.permute.xlu0 %12524 }
 0xbf4   : >> { %v12527_v61 = vunpack.i.h.bf16 %v12525_v0  ;;  %v12526_v36 = vunpack.i.l.bf16 %v12525_v0 }
 0xbf5   : >> { %v17670_v16 = vpop.f32.mrb[142].mxu0 }
 0xbf6   : >> { %19857 = vst [vmem:[#allocation62_spill] sm:$0xff] %v17670_v16  ;;  %v17672_v56 = vpop.f32.mrb[143].mxu0  ;;  %v11468_v30 = vpack.c.bf16 %v12527_v61, %v12526_v36  ;;  %v19860_v16 = vld [vmem:[#allocation194_spill] sm:$0xff]  ;;  %v19862_v61 = vld [vmem:[#allocation165_spill] sm:$0xff] }
 0xbf7   : >> { %19858 = vst [vmem:[#allocation57_spill] sm:$0xff] %v17672_v56  ;;  %v19861_v56 = vld [vmem:[#allocation59_spill] sm:$0xff] }
 0xbf8   : >> { %v4889_v54 = vpop.xlane.xlu1 %4888  ;;  %11469 = vmatprep.subr.bf16.mxu0 %v11468_v30  ;;  %v4407_v36 = vsub.f32 %v19862_v61, %v19861_v56 }
 0xbf9   : >> { %v17674_v34 = vpop.f32.mrb[126].mxu1  ;;  %11471 = vmatpush3.bf16.msra.mxu0 %v11468_v30 }
 0xbfa   : >> { %v17676_v1 = vpop.f32.mrb[127].mxu1  ;;  %v4644_v30 = vmul.f32 1.442695, %v4407_v36 }
 0xbfc   : >> { %v17678_v63 = vpop.xlane.xlu1 %4920  ;;  %12993 = vpow2.f32 %v4644_v30 }
 0xbfd   : >> { %12995 = vrcp.f32 %v17513_v25 }
 0xbfe   : >> { %6388 = vrot.lane.b32.xlu0 %v19859_v29, %s13679_s5  ;;  %v19863_v29 = vld [vmem:[#allocation66_spill] sm:$0xff]  ;;  %12997 = vrcp.f32 %v17491_v19  ;;  %v19867_v19 = vld [vmem:[#allocation107_spill] sm:$0xff] }
 0xbff   : >> { %12999 = vrcp.f32 %v17555_v55 }
 0xc00   : >> { %v12520_v13 = vpop.permute.xlu1 %12519  ;;  %13001 = vrcp.f32 %v17543_v18  ;;  %v19868_v18 = vld [vmem:[#allocation152_spill] sm:$0xff] }
 0xc01   : >> { %v12522_v42 = vunpack.i.h.bf16 %v12520_v13  ;;  %v12521_v0 = vunpack.i.l.bf16 %v12520_v13  ;;  %13003 = vrcp.f32 %v17615_v10 }
 0xc02   : >> { %6548 = vrot.lane.b32.xlu0 %v19860_v16, %s13677_s29  ;;  %13005 = vrcp.f32 %v17603_v26 }
 0xc03   : >> { %v11496_v53 = vpack.c.bf16 %v12522_v42, %v12521_v0  ;;  %v19864_v42 = vld [vmem:[#allocation147_spill] sm:$0xff]  ;;  %13007 = vrcp.f32 %v4889_v54 }
 0xc04   : >> { %13009 = vrcp.f32 %v4891_v21 }
 0xc05   : >> { %11497 = vmatprep.subr.bf16.mxu1 %v11496_v53 }
 0xc06   : >> { %11499 = vmatpush3.bf16.msra.mxu1 %v11496_v53  ;;  %6629 = vrot.lane.b32.xlu0 %v17495_v7, %s13676_s17  ;;  %v17694_v16 = vpop.eup %12993 }
 0xc07   : >> { %v12996_v61 = vpop.eup %12995 }
 0xc08   : >> { %v12998_v36 = vpop.eup %12997  ;;  %v5163_v55 = vmul.f32 %v12996_v61, %v17421_v48 }
 0xc09   : >> { %v5164_v10 = vmul.f32 %v12998_v36, %v17405_v39 }
 0xc0a   : >> { %6631 = vrot.lane.b32.xlu0 %v17493_v14, %s13676_s17  ;;  %v19865_v14 = vld [vmem:[#allocation146_spill] sm:$0xff] }
 0xc0e   : >> { %6392 = vrot.lane.b32.xlu0 %v19863_v29, %s13679_s5  ;;  %v13000_v29 = vpop.eup %12999 }
 0xc0f   : >> { %v13002_v26 = vpop.eup %13001  ;;  %v5165_v21 = vmul.f32 %v13000_v29, %v17455_v52 }
 0xc10   : >> { %v13004_v54 = vpop.eup %13003 }
 0xc12   : >> { %6712 = vrot.lane.b32.xlu0 %v17557_v49, %s13675_s26  ;;  %v19866_v49 = vld [vmem:[#allocation78_spill] sm:$0xff] }
 0xc16   : >> { %4900 = vadd.xlane.f32.xlu1 %v17694_v16  ;;  %6473 = vrot.lane.b32.xlu0 %v19864_v42, %s13678_s19 }
 0xc24   : >> { %v4895_v53 = vpop.xlane.xlu0 %4894 }
 0xc27   : >> { %6386 = vrot.lane.b32.xlu1 %v19865_v14, %s13679_s5  ;;  %v19869_v14 = vld [vmem:[#allocation205_spill] sm:$0xff] }
 0xc28   : >> { %v17703_v7 = vpop.xlane.xlu0 %4926 }
 0xc2b   : >> { %6467 = vrot.lane.b32.xlu1 %v19866_v49, %s13678_s19  ;;  %v5166_v49 = vmul.f32 %v13002_v26, %v17447_v33  ;;  %v19870_v33 = vld [vmem:[#allocation55_spill] sm:$0xff] }
 0xc2c   : >> { %v12535_v56 = vpop.permute.xlu0 %12534 }
 0xc2d   : >> { %v12537_v13 = vunpack.i.h.bf16 %v12535_v56  ;;  %v12536_v0 = vunpack.i.l.bf16 %v12535_v56  ;;  %v13006_v56 = vpop.eup %13005 }
 0xc2f   : >> { %6469 = vrot.lane.b32.xlu1 %v19867_v19, %s13678_s19  ;;  %v11472_v25 = vpack.c.bf16 %v12537_v13, %v12536_v0  ;;  %v5167_v0 = vmul.f32 %v13004_v54, %v17483_v22  ;;  %v5168_v19 = vmul.f32 %v13006_v56, %v17475_v41 }
 0xc31   : >> { %v4893_v30 = vpop.xlane.xlu1 %4892  ;;  %11473 = vmatprep.subr.bf16.mxu0 %v11472_v25 }
 0xc32   : >> { %11475 = vmatpush3.bf16.msra.mxu0 %v11472_v25  ;;  %13011 = vrcp.f32 %v4893_v30 }
 0xc33   : >> { %6550 = vrot.lane.b32.xlu1 %v19868_v18, %s13677_s29  ;;  %13013 = vrcp.f32 %v4895_v53  ;;  %v13008_v53 = vpop.eup %13007 }
 0xc34   : >> { %v13010_v61 = vpop.eup %13009  ;;  %v5169_v52 = vmul.f32 %v13008_v53, %v17535_v44 }
 0xc35   : >> { %v17717_v42 = vpop.xlane.xlu1 %4924  ;;  %10480 = vmatmul.mubr.f32.vlgmr.msra.gmra.mrb[144].mxu0 %v5163_v55  ;;  %v5170_v30 = vmul.f32 %v13010_v61, %v17529_v17 }
 0xc36   : >> { %10482 = vmatprep.mubr.f32.mxu0 %v5164_v10 }
 0xc37   : >> { %6390 = vrot.lane.b32.xlu1 %v19869_v14, %s13679_s5 }
 0xc39   : >> { %v12530_v48 = vpop.permute.xlu1 %12529  ;;  %10483 = vmatmul.mubr.f32.gmra.mrb[146].mxu0 %v5165_v21 }
 0xc3a   : >> { %v12532_v13 = vunpack.i.h.bf16 %v12530_v48  ;;  %v12531_v39 = vunpack.i.l.bf16 %v12530_v48  ;;  %10485 = vmatprep.mubr.f32.mxu0 %v5166_v49 }
 0xc3b   : >> { %6710 = vrot.lane.b32.xlu1 %v17559_v8, %s13675_s26 }
 0xc3c   : >> { %v11500_v25 = vpack.c.bf16 %v12532_v13, %v12531_v39  ;;  %v13012_v36 = vpop.eup %13011 }
 0xc3d   : >> { %10486 = vmatmul.mubr.f32.gmra.mrb[148].mxu0 %v5167_v0  ;;  %v13014_v8 = vpop.eup %13013  ;;  %v5171_v22 = vmul.f32 %v13012_v36, %v17595_v40 }
 0xc3e   : >> { %10488 = vmatprep.mubr.f32.mxu0 %v5168_v19  ;;  %11501 = vmatprep.subr.bf16.mxu1 %v11500_v25  ;;  %v5172_v41 = vmul.f32 %v13014_v8, %v17581_v60 }
 0xc3f   : >> { %11503 = vmatpush3.bf16.msra.mxu1 %v11500_v25  ;;  %6471 = vrot.lane.b32.xlu1 %v19870_v33, %s13678_s19 }
 0xc41   : >> { %10489 = vmatmul.mubr.f32.gmra.mrb[150].mxu0 %v5169_v52 }
 0xc42   : >> { %10491 = vmatprep.mubr.f32.mxu0 %v5170_v30 }
 0xc45   : >> { %10492 = vmatmul.mubr.f32.gmra.mrb[152].mxu0 %v5171_v22 }
 0xc46   : >> { %10494 = vmatprep.mubr.f32.mxu0 %v5172_v41 }
 0xc5d   : >> { %v4899_v18 = vpop.xlane.xlu0 %4898 }
 0xc5e   : >> { %13015 = vrcp.f32 %v4899_v18 }
 0xc61   : >> { %v4931_v55 = vpop.xlane.xlu0 %4930 }
 0xc65   : >> { %v4933_v29 = vpop.xlane.xlu0 %4932 }
 0xc68   : >> { %v13016_v54 = vpop.eup %13015 }
 0xc69   : >> { %v17733_v10 = vpop.xlane.xlu0 %4902 }
 0xc6a   : >> { %v4897_v26 = vpop.xlane.xlu1 %4896 }
 0xc6b   : >> { %13017 = vrcp.f32 %v4897_v26 }
 0xc6c   : >> { %13019 = vrcp.f32 %v17521_v4 }
 0xc6d   : >> { %13021 = vrcp.f32 %v17497_v50  ;;  %v17737_v17 = vpop.xlane.xlu0 %4904 }
 0xc6e   : >> { %v4929_v44 = vpop.xlane.xlu1 %4928  ;;  %13023 = vrcp.f32 %v17563_v32 }
 0xc6f   : >> { %13025 = vrcp.f32 %v17545_v6  ;;  %v5174_v6 = vmul.f32 %v13016_v54, %v17635_v57 }
 0xc70   : >> { %13027 = vrcp.f32 %v17623_v62 }
 0xc71   : >> { %v4935_v60 = vpop.xlane.xlu0 %4934  ;;  %13029 = vrcp.f32 %v17605_v2 }
 0xc72   : >> { %v12540_v40 = vpop.permute.xlu1 %12539  ;;  %13031 = vrcp.f32 %v17678_v63 }
 0xc73   : >> { %v12542_v14 = vunpack.i.h.bf16 %v12540_v40  ;;  %v12541_v21 = vunpack.i.l.bf16 %v12540_v40  ;;  %13033 = vrcp.f32 %v17666_v43 }
 0xc74   : >> { %13035 = vrcp.f32 %v17717_v42 }
 0xc75   : >> { %v13018_v49 = vpop.eup %13017  ;;  %v4937_v4 = vpop.xlane.xlu0 %4936  ;;  %v11504_v56 = vpack.c.bf16 %v12542_v14, %v12541_v21  ;;  %13037 = vrcp.f32 %v17703_v7 }
 0xc76   : >> { %v13020_v50 = vpop.eup %13019  ;;  %v5173_v48 = vmul.f32 %v13018_v49, %v17650_v58  ;;  %13039 = vrcp.f32 %v4929_v44  ;;  %v19871_v49 = vld [vmem:[#allocation172_spill] sm:$0xff] }
 0xc77   : >> { %v13022_v13 = vpop.eup %13021  ;;  %11505 = vmatprep.subr.bf16.mxu1 %v11504_v56  ;;  %v5179_v2 = vmul.f32 %v13020_v50, %v17426_v35  ;;  %13041 = vrcp.f32 %v4931_v55 }
 0xc78   : >> { %10495 = vmatmul.mubr.f32.gmra.mrb[154].mxu0 %v5173_v48  ;;  %11507 = vmatpush3.bf16.msra.mxu1 %v11504_v56  ;;  %v13024_v62 = vpop.eup %13023  ;;  %v5180_v58 = vmul.f32 %v13022_v13, %v17412_v15  ;;  %13043 = vrcp.f32 %v4933_v29  ;;  %v19872_v56 = vld [vmem:[#allocation130_spill] sm:$0xff] }
 0xc79   : >> { %v6389_v32 = vpop.permute.xlu0 %6388  ;;  %10497 = vmatprep.mubr.f32.mxu0 %v5174_v6  ;;  %v13026_v39 = vpop.eup %13025  ;;  %v5181_v57 = vmul.f32 %v13024_v62, %v17458_v37  ;;  %13045 = vrcp.f32 %v4935_v60  ;;  %v6955_v62 = vld [vmem:[%s17812_s18] sm:$0xff] }
 0xc7a   : >> { %6436 = vst.msk [vmem:[#allocation2 + $0x8] sm:$0xff] %vm6434_vm4, %v6389_v32  ;;  %v13028_v43 = vpop.eup %13027  ;;  %v5182_v0 = vmul.f32 %v13026_v39, %v17452_v47  ;;  %13047 = vrcp.f32 %v4937_v4 }
 0xc7b   : >> { %10536 = vmatmul.mubr.f32.vlgmr.msra.gmra.mrb[128].mxu1 %v5179_v2  ;;  %v13030_v53 = vpop.eup %13029  ;;  %v5183_v15 = vmul.f32 %v13028_v43, %v17486_v38  ;;  %13049 = vrcp.f32 %v17733_v10 }
 0xc7c   : >> { %10538 = vmatprep.mubr.f32.mxu1 %v5180_v58  ;;  %v13032_v19 = vpop.eup %13031  ;;  %v5184_v42 = vmul.f32 %v13030_v53, %v17480_v5  ;;  %v6956_v58 = vld [vmem:[%s17812_s18 + $0x8] sm:$0xff] }
 0xc7d   : >> { %v6549_v63 = vpop.permute.xlu0 %6548  ;;  %v13034_v25 = vpop.eup %13033  ;;  %v5185_v7 = vmul.f32 %v13032_v19, %v17538_v20  ;;  %v11508_v39 = vpack.c.bf16 %v6956_v58, %v6955_v62  ;;  %v6960_v53 = vld [vmem:[%s17812_s18 + $0x28] sm:$0xff]  ;;  %v6962_v19 = vld [vmem:[%s17812_s18 + $0x38] sm:$0xff]  ;;  %v19886_v62 = vld [vmem:[#allocation97_spill] sm:$0xff] }
 0xc7e   : >> { %v13036_v47 = vpop.eup %13035  ;;  %v5186_v61 = vmul.f32 %v13034_v25, %v17532_v24  ;;  %v6963_v25 = vld [vmem:[%s17812_s18 + $0x40] sm:$0xff] }
 0xc7f   : >> { %10539 = vmatmul.mubr.f32.gmra.mrb[130].mxu1 %v5181_v57  ;;  %v13038_v33 = vpop.eup %13037  ;;  %v5187_v38 = vmul.f32 %v13036_v47, %v17598_v12  ;;  %11509 = vmatprep.subr.bf16.mxu0 %v11508_v39  ;;  %v6958_v57 = vld [vmem:[%s17812_s18 + $0x18] sm:$0xff]  ;;  %v6965_v47 = vld [vmem:[%s17812_s18 + $0x50] sm:$0xff] }
 0xc80   : >> { %10541 = vmatprep.mubr.f32.mxu1 %v5182_v0  ;;  %v13040_v36 = vpop.eup %13039  ;;  %v5188_v5 = vmul.f32 %v13038_v33, %v17588_v27  ;;  %11511 = vmatpush3.bf16.msra.mxu0 %v11508_v39  ;;  %v6959_v0 = vld [vmem:[%s17812_s18 + $0x20] sm:$0xff]  ;;  %v19887_v39 = vld [vmem:[#allocation117_spill] sm:$0xff] }
 0xc81   : >> { %v6630_v35 = vpop.permute.xlu0 %6629  ;;  %v13042_v30 = vpop.eup %13041  ;;  %v5189_v20 = vmul.f32 %v13040_v36, %v17656_v51 }
 0xc82   : >> { %v13044_v22 = vpop.eup %13043  ;;  %v5190_v24 = vmul.f32 %v13042_v30, %v17640_v45  ;;  %v6970_v30 = vld [vmem:[%s17812_s18 + $0x78] sm:$0xff] }
 0xc83   : >> { %10542 = vmatmul.mubr.f32.gmra.mrb[132].mxu1 %v5183_v15  ;;  %v13046_v41 = vpop.eup %13045  ;;  %v5191_v12 = vmul.f32 %v13044_v22, %v17645_v9  ;;  %v6961_v15 = vld [vmem:[%s17812_s18 + $0x30] sm:$0xff] }
 0xc84   : >> { %10544 = vmatprep.mubr.f32.mxu1 %v5184_v42  ;;  %v13048_v55 = vpop.eup %13047  ;;  %v5192_v27 = vmul.f32 %v13046_v41, %v17660_v46  ;;  %v11520_v42 = vpack.c.bf16 %v6962_v19, %v6961_v15  ;;  %v19891_v19 = vld [vmem:[#allocation182_spill] sm:$0xff] }
 0xc85   : >> { %v6632_v37 = vpop.permute.xlu0 %6631  ;;  %v5193_v29 = vmul.f32 %v13048_v55, %v17663_v59  ;;  %v13050_v46 = vpop.eup %13049 }
 0xc87   : >> { %10545 = vmatmul.mubr.f32.gmra.mrb[134].mxu1 %v5185_v7 }
 0xc88   : >> { %10547 = vmatprep.mubr.f32.mxu1 %v5186_v61  ;;  %v6966_v61 = vld [vmem:[%s17812_s18 + $0x58] sm:$0xff] }
 0xc89   : >> { %v6393_v52 = vpop.permute.xlu0 %6392  ;;  %v11528_v33 = vpack.c.bf16 %v6966_v61, %v6965_v47  ;;  %v19896_v47 = vld [vmem:[#allocation87_spill] sm:$0xff]  ;;  %v19897_v61 = vld [vmem:[#allocation156_spill] sm:$0xff] }
 0xc8a   : >> { %6438 = vst.msk [vmem:[#allocation2 + $0x18] sm:$0xff] %vm6434_vm4, %v6393_v52  ;;  %v6967_v52 = vld [vmem:[%s17812_s18 + $0x60] sm:$0xff] }
 0xc8b   : >> { %10548 = vmatmul.mubr.f32.gmra.mrb[136].mxu1 %v5187_v38  ;;  %v6968_v38 = vld [vmem:[%s17812_s18 + $0x68] sm:$0xff] }
 0xc8c   : >> { %10550 = vmatprep.mubr.f32.mxu1 %v5188_v5  ;;  %v11532_v36 = vpack.c.bf16 %v6968_v38, %v6967_v52  ;;  %v6969_v5 = vld [vmem:[%s17812_s18 + $0x70] sm:$0xff]  ;;  %v19900_v38 = vld [vmem:[#allocation88_spill] sm:$0xff] }
 0xc8d   : >> { %v6713_v8 = vpop.permute.xlu0 %6712  ;;  %v19899_v52 = vld [vmem:[#allocation181_spill] sm:$0xff] }
 0xc8f   : >> { %10551 = vmatmul.mubr.f32.gmra.mrb[138].mxu1 %v5189_v20 }
 0xc90   : >> { %10553 = vmatprep.mubr.f32.mxu1 %v5190_v24 }
 0xc91   : >> { %v6474_v18 = vpop.permute.xlu0 %6473 }
 0xc92   : >> { %6519 = vst.msk [vmem:[#allocation2 + $0x18] sm:$0xff] %vm6515_vm5, %v6474_v18 }
 0xc93   : >> { %10554 = vmatmul.mubr.f32.gmra.mrb[140].mxu1 %v5191_v12 }
 0xc94   : >> { %10556 = vmatprep.mubr.f32.mxu1 %v5192_v27 }
 0xc97   : >> { %10557 = vmatmul.mubr.f32.gmra.mrb[142].mxu1 %v5193_v29  ;;  %v19873_v29 = vld [vmem:[#allocation206_spill] sm:$0xff] }
 0xca3   : >> { %v4901_v45 = vpop.xlane.xlu1 %4900 }
 0xca4   : >> { %13051 = vrcp.f32 %v4901_v45  ;;  %v19874_v45 = vld [vmem:[#allocation207_spill] sm:$0xff] }
 0xca5   : >> { %13053 = vrcp.f32 %v17737_v17  ;;  %v5176_v17 = vmul.f32 %v13050_v46, %v17648_v3  ;;  %v19875_v46 = vld [vmem:[#allocation136_spill] sm:$0xff] }
 0xca7   : >> { %v6387_v51 = vpop.permute.xlu1 %6386 }
 0xca8   : >> { %6435 = vst.msk [vmem:[#allocation2] sm:$0xff] %vm6434_vm4, %v6387_v51 }
 0xcab   : >> { %v6468_v9 = vpop.permute.xlu1 %6467 }
 0xcac   : >> { %6516 = vst.msk [vmem:[#allocation2] sm:$0xff] %vm6515_vm5, %v6468_v9 }
 0xcad   : >> { %6597 = vst.msk [vmem:[#allocation2] sm:$0xff] %vm6596_vm6, %v6549_v63  ;;  %v6957_v63 = vld [vmem:[%s17812_s18 + $0x10] sm:$0xff] }
 0xcae   : >> { %v13052_v26 = vpop.eup %13051  ;;  %6678 = vst.msk [vmem:[#allocation2] sm:$0xff] %vm6677_vm7, %v6630_v35  ;;  %v11512_v43 = vpack.c.bf16 %v6958_v57, %v6957_v63  ;;  %v11516_v35 = vpack.c.bf16 %v6960_v53, %v6959_v0  ;;  %v19889_v0 = vld [vmem:[#allocation137_spill] sm:$0xff] }
 0xcaf   : >> { %v6470_v59 = vpop.permute.xlu1 %6469  ;;  %v5175_v10 = vmul.f32 %v13052_v26, %v17694_v16  ;;  %v13054_v44 = vpop.eup %13053 }
 0xcb0   : >> { %6517 = vst.msk [vmem:[#allocation2 + $0x8] sm:$0xff] %vm6515_vm5, %v6470_v59  ;;  %v5177_v40 = vmul.f32 %v13054_v44, %v17654_v31  ;;  %11513 = vmatprep.subr.bf16.mxu0 %v11512_v43  ;;  %v19877_v59 = vld [vmem:[#allocation71_spill] sm:$0xff] }
 0xcb1   : >> { %10498 = vmatmul.mubr.f32.gmra.mrb[156].mxu0 %v5175_v10 }
 0xcb2   : >> { %10500 = vmatprep.mubr.f32.mxu0 %v5176_v17  ;;  %11515 = vmatpush3.bf16.msra.mxu0 %v11512_v43  ;;  %v19888_v43 = vld [vmem:[#allocation90_spill] sm:$0xff] }
 0xcb3   : >> { %v6551_v60 = vpop.permute.xlu1 %6550  ;;  %11517 = vmatprep.subr.bf16.mxu0 %v11516_v35 }
 0xcb4   : >> { %6598 = vst.msk [vmem:[#allocation2 + $0x8] sm:$0xff] %vm6596_vm6, %v6551_v60  ;;  %v19878_v60 = vld [vmem:[#allocation124_spill] sm:$0xff] }
 0xcb5   : >> { %6679 = vst.msk [vmem:[#allocation2 + $0x8] sm:$0xff] %vm6677_vm7, %v6632_v37  ;;  %10501 = vmatmul.mubr.f32.gmra.mrb[158].mxu0 %v5177_v40  ;;  %v6964_v37 = vld [vmem:[%s17812_s18 + $0x48] sm:$0xff]  ;;  %v19879_v40 = vld [vmem:[#allocation101_spill] sm:$0xff] }
 0xcb6   : >> { %6760 = vst.msk [vmem:[#allocation2 + $0x8] sm:$0xff] %vm6758_vm8, %v6713_v8  ;;  %11519 = vmatpush3.bf16.msra.mxu0 %v11516_v35  ;;  %v11524_v7 = vpack.c.bf16 %v6964_v37, %v6963_v25  ;;  %v11536_v8 = vpack.c.bf16 %v6970_v30, %v6969_v5  ;;  %v19893_v25 = vld [vmem:[#allocation211_spill] sm:$0xff]  ;;  %v19904_v5 = vld [vmem:[#allocation64_spill] sm:$0xff] }
 0xcb7   : >> { %v6391_v14 = vpop.permute.xlu1 %6390  ;;  %11521 = vmatprep.subr.bf16.mxu0 %v11520_v42  ;;  %v19894_v37 = vld [vmem:[#allocation91_spill] sm:$0xff]  ;;  %v19905_v30 = vld [vmem:[#allocation112_spill] sm:$0xff] }
 0xcb8   : >> { %6437 = vst.msk [vmem:[#allocation2 + $0x10] sm:$0xff] %vm6434_vm4, %v6391_v14 }
 0xcba   : >> { %11523 = vmatpush3.bf16.msra.mxu0 %v11520_v42  ;;  %v19892_v42 = vld [vmem:[#allocation210_spill] sm:$0xff] }
 0xcbb   : >> { %v6711_v16 = vpop.permute.xlu1 %6710  ;;  %11525 = vmatprep.subr.bf16.mxu0 %v11524_v7 }
 0xcbc   : >> { %6759 = vst.msk [vmem:[#allocation2] sm:$0xff] %vm6758_vm8, %v6711_v16 }
 0xcbe   : >> { %11527 = vmatpush3.bf16.msra.mxu0 %v11524_v7  ;;  %v19895_v7 = vld [vmem:[#allocation161_spill] sm:$0xff] }
 0xcbf   : >> { %v6472_v3 = vpop.permute.xlu1 %6471  ;;  %11529 = vmatprep.subr.bf16.mxu0 %v11528_v33 }
 0xcc0   : >> { %6518 = vst.msk [vmem:[#allocation2 + $0x10] sm:$0xff] %vm6515_vm5, %v6472_v3  ;;  %v19880_v3 = vld [vmem:[#allocation116_spill] sm:$0xff] }
 0xcc2   : >> { %11531 = vmatpush3.bf16.msra.mxu0 %v11528_v33  ;;  %v19898_v33 = vld [vmem:[#allocation70_spill] sm:$0xff] }
 0xcc3   : >> { %11533 = vmatprep.subr.bf16.mxu0 %v11532_v36 }
 0xcc6   : >> { %11535 = vmatpush3.bf16.msra.mxu0 %v11532_v36  ;;  %v19901_v36 = vld [vmem:[#allocation120_spill] sm:$0xff] }
 0xcc7   : >> { %11537 = vmatprep.subr.bf16.mxu0 %v11536_v8 }
 0xcca   : >> { %11539 = vmatpush3.bf16.msra.mxu0 %v11536_v8  ;;  %v19906_v8 = vld [vmem:[#allocation94_spill] sm:$0xff] }
 0xd08   : >> { %v10481_v21 = vpop.f32.mrb[144].mxu0 }
 0xd09   : >> { %6793 = vrot.lane.b32.xlu0 %v10481_v21, %s13674_s8  ;;  %v6130_v31 = vpop.f32.mrb[145].mxu0  ;;  %v19881_v21 = vld [vmem:[#allocation106_spill] sm:$0xff] }
 0xd0a   : >> { %6791 = vrot.lane.b32.xlu1 %v6130_v31, %s13674_s8  ;;  %v19882_v31 = vld [vmem:[#allocation208_spill] sm:$0xff] }
 0xd0c   : >> { %v17785_v54 = vpop.f32.mrb[146].mxu0 }
 0xd0d   : >> { %6554 = vrot.lane.b32.xlu0 %v19871_v49, %s13677_s29  ;;  %v17789_v4 = vpop.f32.mrb[147].mxu0  ;;  %v19884_v49 = vld [vmem:[#allocation114_spill] sm:$0xff] }
 0xd0e   : >> { %6552 = vrot.lane.b32.xlu1 %v19872_v56, %s13677_s29 }
 0xd10   : >> { %v17793_v50 = vpop.f32.mrb[148].mxu0 }
 0xd11   : >> { %v17795_v48 = vpop.f32.mrb[149].mxu0 }
 0xd14   : >> { %v17797_v13 = vpop.f32.mrb[150].mxu0 }
 0xd15   : >> { %v17799_v6 = vpop.f32.mrb[151].mxu0 }
 0xd18   : >> { %v17801_v32 = vpop.f32.mrb[152].mxu0 }
 0xd19   : >> { %v17803_v2 = vpop.f32.mrb[153].mxu0 }
 0xd4b   : >> { %v17830_v20 = vpop.f32.mrb[154].mxu0 }
 0xd4c   : >> { %v17832_v22 = vpop.f32.mrb[155].mxu0 }
 0xd4e   : >> { %v10537_v24 = vpop.f32.mrb[128].mxu1 }
 0xd4f   : >> { %v6275_v41 = vpop.f32.mrb[129].mxu1  ;;  %6874 = vrot.lane.b32.xlu0 %v10537_v24, %s13673_s4  ;;  %v19907_v24 = vld [vmem:[#allocation58_spill] sm:$0xff] }
 0xd50   : >> { %6872 = vrot.lane.b32.xlu1 %v6275_v41, %s13673_s4  ;;  %v19908_v41 = vld [vmem:[#allocation99_spill] sm:$0xff] }
 0xd52   : >> { %v10540_v18 = vpop.f32.mrb[130].mxu1 }
 0xd53   : >> { %v6285_v12 = vpop.f32.mrb[131].mxu1  ;;  %6635 = vrot.lane.b32.xlu0 %v17499_v11, %s13676_s17 }
 0xd54   : >> { %6633 = vrot.lane.b32.xlu1 %v17501_v23, %s13676_s17  ;;  %v19876_v23 = vld [vmem:[#allocation119_spill] sm:$0xff] }
 0xd56   : >> { %v10543_v55 = vpop.f32.mrb[132].mxu1 }
 0xd57   : >> { %v6295_v27 = vpop.f32.mrb[133].mxu1  ;;  %6396 = vrot.lane.b32.xlu0 %v19873_v29, %s13679_s5 }
 0xd58   : >> { %6394 = vrot.lane.b32.xlu1 %v19874_v45, %s13679_s5  ;;  %v19912_v45 = vld [vmem:[#allocation109_spill] sm:$0xff] }
 0xd5a   : >> { %v10546_v51 = vpop.f32.mrb[134].mxu1 }
 0xd5b   : >> { %v6305_v9 = vpop.f32.mrb[135].mxu1  ;;  %6716 = vrot.lane.b32.xlu0 %v17565_v28, %s13675_s26 }
 0xd5c   : >> { %6714 = vrot.lane.b32.xlu1 %v19875_v46, %s13675_s26 }
 0xd5e   : >> { %v17848_v11 = vpop.f32.mrb[136].mxu1 }
 0xd5f   : >> { %v17850_v26 = vpop.f32.mrb[137].mxu1  ;;  %6477 = vrot.lane.b32.xlu0 %v19876_v23, %s13678_s19 }
 0xd60   : >> { %6475 = vrot.lane.b32.xlu1 %v19877_v59, %s13678_s19  ;;  %v19915_v59 = vld [vmem:[#allocation169_spill] sm:$0xff] }
 0xd62   : >> { %v17856_v10 = vpop.f32.mrb[138].mxu1 }
 0xd63   : >> { %v17858_v44 = vpop.f32.mrb[139].mxu1  ;;  %6797 = vrot.lane.b32.xlu0 %v17785_v54, %s13674_s8  ;;  %v19883_v54 = vld [vmem:[#allocation209_spill] sm:$0xff] }
 0xd64   : >> { %6795 = vrot.lane.b32.xlu1 %v17789_v4, %s13674_s8  ;;  %v19885_v4 = vld [vmem:[#allocation56_spill] sm:$0xff] }
 0xd66   : >> { %v17864_v28 = vpop.f32.mrb[140].mxu1 }
 0xd67   : >> { %v17866_v17 = vpop.f32.mrb[141].mxu1  ;;  %6558 = vrot.lane.b32.xlu0 %v19878_v60, %s13677_s29 }
 0xd68   : >> { %6556 = vrot.lane.b32.xlu1 %v19879_v40, %s13677_s29 }
 0xd6a   : >> { %v17872_v14 = vpop.f32.mrb[142].mxu1 }
 0xd6b   : >> { %v17874_v16 = vpop.f32.mrb[143].mxu1  ;;  %6878 = vrot.lane.b32.xlu0 %v10540_v18, %s13673_s4  ;;  %v19909_v18 = vld [vmem:[#allocation98_spill] sm:$0xff] }
 0xd6c   : >> { %6876 = vrot.lane.b32.xlu1 %v6285_v12, %s13673_s4 }
 0xd6f   : >> { %6639 = vrot.lane.b32.xlu0 %v19880_v3, %s13676_s17  ;;  %v19916_v3 = vld [vmem:[#allocation79_spill] sm:$0xff] }
 0xd70   : >> { %6637 = vrot.lane.b32.xlu1 %v19881_v21, %s13676_s17  ;;  %v19917_v21 = vld [vmem:[#allocation92_spill] sm:$0xff] }
 0xd73   : >> { %6400 = vrot.lane.b32.xlu0 %v19882_v31, %s13679_s5 }
 0xd74   : >> { %6398 = vrot.lane.b32.xlu1 %v19883_v54, %s13679_s5 }
 0xd77   : >> { %6720 = vrot.lane.b32.xlu0 %v19884_v49, %s13675_s26 }
 0xd78   : >> { %6718 = vrot.lane.b32.xlu1 %v19885_v4, %s13675_s26 }
 0xd7b   : >> { %v6794_v56 = vpop.permute.xlu0 %6793  ;;  %6481 = vrot.lane.b32.xlu0 %v19886_v62, %s13678_s19  ;;  %v19919_v62 = vld [vmem:[#allocation184_spill] sm:$0xff] }
 0xd7c   : >> { %6841 = vst.msk [vmem:[#allocation2 + $0x8] sm:$0xff] %vm6839_vm9, %v6794_v56  ;;  %v6792_v58 = vpop.permute.xlu1 %6791  ;;  %6479 = vrot.lane.b32.xlu1 %v19887_v39, %s13678_s19  ;;  %v19918_v56 = vld [vmem:[#allocation85_spill] sm:$0xff] }
 0xd7d   : >> { %6840 = vst.msk [vmem:[#allocation2] sm:$0xff] %vm6839_vm9, %v6792_v58 }
 0xd7f   : >> { %v6555_v63 = vpop.permute.xlu0 %6554  ;;  %6801 = vrot.lane.b32.xlu0 %v17793_v50, %s13674_s8 }
 0xd80   : >> { %6600 = vst.msk [vmem:[#allocation2 + $0x18] sm:$0xff] %vm6596_vm6, %v6555_v63  ;;  %v6553_v57 = vpop.permute.xlu1 %6552  ;;  %6799 = vrot.lane.b32.xlu1 %v17795_v48, %s13674_s8  ;;  %v19890_v48 = vld [vmem:[#allocation77_spill] sm:$0xff]  ;;  %v19920_v63 = vld [vmem:[#allocation131_spill] sm:$0xff] }
 0xd81   : >> { %6599 = vst.msk [vmem:[#allocation2 + $0x10] sm:$0xff] %vm6596_vm6, %v6553_v57  ;;  %v19921_v57 = vld [vmem:[#allocation102_spill] sm:$0xff] }
 0xd83   : >> { %6562 = vrot.lane.b32.xlu0 %v19888_v43, %s13677_s29 }
 0xd84   : >> { %6560 = vrot.lane.b32.xlu1 %v19889_v0, %s13677_s29  ;;  %v17906_v53 = vpop.f32.mrb[156].mxu0 }
 0xd85   : >> { %v17908_v35 = vpop.f32.mrb[157].mxu0 }
 0xd87   : >> { %6882 = vrot.lane.b32.xlu0 %v10543_v55, %s13673_s4  ;;  %v19911_v55 = vld [vmem:[#allocation186_spill] sm:$0xff] }
 0xd88   : >> { %6880 = vrot.lane.b32.xlu1 %v6295_v27, %s13673_s4  ;;  %v17912_v50 = vpop.f32.mrb[158].mxu0 }
 0xd89   : >> { %v17914_v15 = vpop.f32.mrb[159].mxu0 }
 0xd8b   : >> { %6643 = vrot.lane.b32.xlu0 %v19890_v48, %s13676_s17 }
 0xd8c   : >> { %6641 = vrot.lane.b32.xlu1 %v19891_v19, %s13676_s17 }
 0xd8f   : >> { %6404 = vrot.lane.b32.xlu0 %v19892_v42, %s13679_s5 }
 0xd90   : >> { %6402 = vrot.lane.b32.xlu1 %v19893_v25, %s13679_s5  ;;  %v19924_v25 = vld [vmem:[#allocation187_spill] sm:$0xff] }
 0xd93   : >> { %6724 = vrot.lane.b32.xlu0 %v19894_v37, %s13675_s26 }
 0xd94   : >> { %6722 = vrot.lane.b32.xlu1 %v19895_v7, %s13675_s26  ;;  %v19925_v7 = vld [vmem:[#allocation159_spill] sm:$0xff] }
 0xd97   : >> { %6485 = vrot.lane.b32.xlu0 %v19896_v47, %s13678_s19 }
 0xd98   : >> { %6483 = vrot.lane.b32.xlu1 %v19897_v61, %s13678_s19 }
 0xd9b   : >> { %6805 = vrot.lane.b32.xlu0 %v17797_v13, %s13674_s8  ;;  %v19902_v13 = vld [vmem:[#allocation212_spill] sm:$0xff] }
 0xd9c   : >> { %6803 = vrot.lane.b32.xlu1 %v17799_v6, %s13674_s8  ;;  %v19903_v6 = vld [vmem:[#allocation214_spill] sm:$0xff] }
 0xd9f   : >> { %6566 = vrot.lane.b32.xlu0 %v19898_v33, %s13677_s29  ;;  %v19926_v33 = vld [vmem:[#allocation189_spill] sm:$0xff] }
 0xda0   : >> { %6564 = vrot.lane.b32.xlu1 %v19899_v52, %s13677_s29  ;;  %v19927_v52 = vld [vmem:[#allocation80_spill] sm:$0xff] }
 0xda3   : >> { %6886 = vrot.lane.b32.xlu0 %v10546_v51, %s13673_s4  ;;  %v19913_v51 = vld [vmem:[#allocation126_spill] sm:$0xff] }
 0xda4   : >> { %6884 = vrot.lane.b32.xlu1 %v6305_v9, %s13673_s4 }
 0xda7   : >> { %6647 = vrot.lane.b32.xlu0 %v19900_v38, %s13676_s17 }
 0xda8   : >> { %6645 = vrot.lane.b32.xlu1 %v19901_v36, %s13676_s17 }
 0xdab   : >> { %6408 = vrot.lane.b32.xlu0 %v19902_v13, %s13679_s5 }
 0xdac   : >> { %6406 = vrot.lane.b32.xlu1 %v19903_v6, %s13679_s5 }
 0xdaf   : >> { %6728 = vrot.lane.b32.xlu0 %v19904_v5, %s13675_s26  ;;  %v19928_v5 = vld [vmem:[#allocation67_spill] sm:$0xff] }
 0xdb0   : >> { %6726 = vrot.lane.b32.xlu1 %v19905_v30, %s13675_s26  ;;  %v19929_v30 = vld [vmem:[#allocation83_spill] sm:$0xff] }
 0xdb3   : >> { %6489 = vrot.lane.b32.xlu0 %v19906_v8, %s13678_s19 }
 0xdb4   : >> { %6487 = vrot.lane.b32.xlu1 %v19907_v24, %s13678_s19 }
 0xdb7   : >> { %6809 = vrot.lane.b32.xlu0 %v17801_v32, %s13674_s8 }
 0xdb8   : >> { %6807 = vrot.lane.b32.xlu1 %v17803_v2, %s13674_s8  ;;  %v19910_v2 = vld [vmem:[#allocation108_spill] sm:$0xff] }
 0xdbb   : >> { %6570 = vrot.lane.b32.xlu0 %v19908_v41, %s13677_s29  ;;  %v19930_v41 = vld [vmem:[#allocation57_spill] sm:$0xff] }
 0xdbc   : >> { %6568 = vrot.lane.b32.xlu1 %v19909_v18, %s13677_s29 }
 0xdbf   : >> { %6890 = vrot.lane.b32.xlu0 %v17848_v11, %s13673_s4 }
 0xdc0   : >> { %6888 = vrot.lane.b32.xlu1 %v17850_v26, %s13673_s4  ;;  %v19914_v26 = vld [vmem:[#allocation193_spill] sm:$0xff] }
 0xdc1   : >> { %v6875_v12 = vpop.permute.xlu0 %6874 }
 0xdc2   : >> { %6922 = vst.msk [vmem:[#allocation2 + $0x8] sm:$0xff] %vm6920_vm10, %v6875_v12  ;;  %v6873_v32 = vpop.permute.xlu1 %6872 }
 0xdc3   : >> { %6921 = vst.msk [vmem:[#allocation2] sm:$0xff] %vm6920_vm10, %v6873_v32  ;;  %6651 = vrot.lane.b32.xlu0 %v19910_v2, %s13676_s17 }
 0xdc4   : >> { %6649 = vrot.lane.b32.xlu1 %v19911_v55, %s13676_s17 }
 0xdc5   : >> { %v6636_v27 = vpop.permute.xlu0 %6635 }
 0xdc6   : >> { %6681 = vst.msk [vmem:[#allocation2 + $0x18] sm:$0xff] %vm6677_vm7, %v6636_v27  ;;  %v6634_v29 = vpop.permute.xlu1 %6633 }
 0xdc7   : >> { %6680 = vst.msk [vmem:[#allocation2 + $0x10] sm:$0xff] %vm6677_vm7, %v6634_v29  ;;  %6412 = vrot.lane.b32.xlu0 %v19912_v45, %s13679_s5 }
 0xdc8   : >> { %6410 = vrot.lane.b32.xlu1 %v19913_v51, %s13679_s5 }
 0xdc9   : >> { %v6397_v9 = vpop.permute.xlu0 %6396  ;;  %v6938_v23 = vld [vmem:[#allocation2 + $0x8] sm:$0xff] }
 0xdca   : >> { %6440 = vst.msk [vmem:[#allocation2 + $0x28] sm:$0xff] %vm6434_vm4, %v6397_v9  ;;  %v6395_v46 = vpop.permute.xlu1 %6394  ;;  %v6937_v11 = vld [vmem:[#allocation2] sm:$0xff] }
 0xdcb   : >> { %6439 = vst.msk [vmem:[#allocation2 + $0x20] sm:$0xff] %vm6434_vm4, %v6395_v46  ;;  %10591 = vmatprep.mubr.f32.mxu0 %v6937_v11  ;;  %6732 = vrot.lane.b32.xlu0 %v19914_v26, %s13675_s26 }
 0xdcc   : >> { %10592 = vmatmul.mubr.f32.vlgmr.msra.gmra.mrb[160].mxu0 %v6938_v23  ;;  %6730 = vrot.lane.b32.xlu1 %v19915_v59, %s13675_s26 }
 0xdcd   : >> { %v6717_v60 = vpop.permute.xlu0 %6716 }
 0xdce   : >> { %6762 = vst.msk [vmem:[#allocation2 + $0x18] sm:$0xff] %vm6758_vm8, %v6717_v60  ;;  %v6715_v40 = vpop.permute.xlu1 %6714 }
 0xdcf   : >> { %6761 = vst.msk [vmem:[#allocation2 + $0x10] sm:$0xff] %vm6758_vm8, %v6715_v40  ;;  %6493 = vrot.lane.b32.xlu0 %v19916_v3, %s13678_s19 }
 0xdd0   : >> { %6491 = vrot.lane.b32.xlu1 %v19917_v21, %s13678_s19 }
 0xdd1   : >> { %v6478_v31 = vpop.permute.xlu0 %6477 }
 0xdd2   : >> { %6521 = vst.msk [vmem:[#allocation2 + $0x28] sm:$0xff] %vm6515_vm5, %v6478_v31  ;;  %v6476_v54 = vpop.permute.xlu1 %6475 }
 0xdd3   : >> { %6520 = vst.msk [vmem:[#allocation2 + $0x20] sm:$0xff] %vm6515_vm5, %v6476_v54  ;;  %6813 = vrot.lane.b32.xlu0 %v17830_v20, %s13674_s8 }
 0xdd4   : >> { %6811 = vrot.lane.b32.xlu1 %v17832_v22, %s13674_s8 }
 0xdd5   : >> { %v6798_v49 = vpop.permute.xlu0 %6797 }
 0xdd6   : >> { %6843 = vst.msk [vmem:[#allocation2 + $0x18] sm:$0xff] %vm6839_vm9, %v6798_v49  ;;  %v6796_v4 = vpop.permute.xlu1 %6795 }
 0xdd7   : >> { %6842 = vst.msk [vmem:[#allocation2 + $0x10] sm:$0xff] %vm6839_vm9, %v6796_v4  ;;  %6574 = vrot.lane.b32.xlu0 %v19918_v56, %s13677_s29 }
 0xdd8   : >> { %6572 = vrot.lane.b32.xlu1 %v19919_v62, %s13677_s29 }
 0xdd9   : >> { %v6559_v58 = vpop.permute.xlu0 %6558 }
 0xdda   : >> { %6602 = vst.msk [vmem:[#allocation2 + $0x28] sm:$0xff] %vm6596_vm6, %v6559_v58  ;;  %v6557_v39 = vpop.permute.xlu1 %6556 }
 0xddb   : >> { %6601 = vst.msk [vmem:[#allocation2 + $0x20] sm:$0xff] %vm6596_vm6, %v6557_v39  ;;  %6894 = vrot.lane.b32.xlu0 %v17856_v10, %s13673_s4  ;;  %v19922_v10 = vld [vmem:[#allocation60_spill] sm:$0xff] }
 0xddc   : >> { %6892 = vrot.lane.b32.xlu1 %v17858_v44, %s13673_s4  ;;  %v19923_v44 = vld [vmem:[#allocation110_spill] sm:$0xff] }
 0xddd   : >> { %v6879_v20 = vpop.permute.xlu0 %6878 }
 0xdde   : >> { %6924 = vst.msk [vmem:[#allocation2 + $0x18] sm:$0xff] %vm6920_vm10, %v6879_v20  ;;  %v6877_v22 = vpop.permute.xlu1 %6876 }
 0xddf   : >> { %6923 = vst.msk [vmem:[#allocation2 + $0x10] sm:$0xff] %vm6920_vm10, %v6877_v22  ;;  %6655 = vrot.lane.b32.xlu0 %v19920_v63, %s13676_s17 }
 0xde0   : >> { %6653 = vrot.lane.b32.xlu1 %v19921_v57, %s13676_s17 }
 0xde1   : >> { %v6640_v43 = vpop.permute.xlu0 %6639 }
 0xde2   : >> { %6683 = vst.msk [vmem:[#allocation2 + $0x28] sm:$0xff] %vm6677_vm7, %v6640_v43  ;;  %v6638_v0 = vpop.permute.xlu1 %6637 }
 0xde3   : >> { %6682 = vst.msk [vmem:[#allocation2 + $0x20] sm:$0xff] %vm6677_vm7, %v6638_v0  ;;  %6416 = vrot.lane.b32.xlu0 %v19922_v10, %s13679_s5 }
 0xde4   : >> { %6414 = vrot.lane.b32.xlu1 %v19923_v44, %s13679_s5  ;;  %s7739_s5 = scalar_lea.vmem [#allocation11], %s13652_s2 }
 0xde5   : >> { %v6401_v48 = vpop.permute.xlu0 %6400  ;;  %v6940_v37 = vld [vmem:[#allocation2 + $0x18] sm:$0xff] }
 0xde6   : >> { %6442 = vst.msk [vmem:[#allocation2 + $0x38] sm:$0xff] %vm6434_vm4, %v6401_v48  ;;  %v6399_v19 = vpop.permute.xlu1 %6398  ;;  %v6939_v42 = vld [vmem:[#allocation2 + $0x10] sm:$0xff] }
 0xde7   : >> { %6441 = vst.msk [vmem:[#allocation2 + $0x30] sm:$0xff] %vm6434_vm4, %v6399_v19  ;;  %10594 = vmatprep.mubr.f32.mxu0 %v6939_v42  ;;  %6736 = vrot.lane.b32.xlu0 %v19924_v25, %s13675_s26 }
 0xde8   : >> { %10595 = vmatmul.mubr.f32.gmra.mrb[162].mxu0 %v6940_v37  ;;  %6734 = vrot.lane.b32.xlu1 %v19925_v7, %s13675_s26 }
 0xde9   : >> { %v6721_v47 = vpop.permute.xlu0 %6720 }
 0xdea   : >> { %6764 = vst.msk [vmem:[#allocation2 + $0x28] sm:$0xff] %vm6758_vm8, %v6721_v47  ;;  %v6719_v61 = vpop.permute.xlu1 %6718 }
 0xdeb   : >> { %6763 = vst.msk [vmem:[#allocation2 + $0x20] sm:$0xff] %vm6758_vm8, %v6719_v61  ;;  %6497 = vrot.lane.b32.xlu0 %v19926_v33, %s13678_s19 }
 0xdec   : >> { %6495 = vrot.lane.b32.xlu1 %v19927_v52, %s13678_s19  ;;  %s7737_s19 = scalar_lea.vmem [#allocation9], %s13652_s2 }
 0xded   : >> { %v6482_v38 = vpop.permute.xlu0 %6481 }
 0xdee   : >> { %6523 = vst.msk [vmem:[#allocation2 + $0x38] sm:$0xff] %vm6515_vm5, %v6482_v38  ;;  %v6480_v36 = vpop.permute.xlu1 %6479 }
 0xdef   : >> { %6522 = vst.msk [vmem:[#allocation2 + $0x30] sm:$0xff] %vm6515_vm5, %v6480_v36  ;;  %6817 = vrot.lane.b32.xlu0 %v17906_v53, %s13674_s8 }
 0xdf0   : >> { %6815 = vrot.lane.b32.xlu1 %v17908_v35, %s13674_s8 }
 0xdf1   : >> { %v6802_v13 = vpop.permute.xlu0 %6801 }
 0xdf2   : >> { %6845 = vst.msk [vmem:[#allocation2 + $0x28] sm:$0xff] %vm6839_vm9, %v6802_v13  ;;  %v6800_v6 = vpop.permute.xlu1 %6799 }
 0xdf3   : >> { %6844 = vst.msk [vmem:[#allocation2 + $0x20] sm:$0xff] %vm6839_vm9, %v6800_v6  ;;  %6578 = vrot.lane.b32.xlu0 %v19928_v5, %s13677_s29 }
 0xdf4   : >> { %6576 = vrot.lane.b32.xlu1 %v19929_v30, %s13677_s29  ;;  %s7568_s29 = scalar_lea.vmem [#allocation17], %s13652_s2 }
 0xdf5   : >> { %v6563_v8 = vpop.permute.xlu0 %6562 }
 0xdf6   : >> { %6604 = vst.msk [vmem:[#allocation2 + $0x38] sm:$0xff] %vm6596_vm6, %v6563_v8  ;;  %v6561_v24 = vpop.permute.xlu1 %6560 }
 0xdf7   : >> { %6603 = vst.msk [vmem:[#allocation2 + $0x30] sm:$0xff] %vm6596_vm6, %v6561_v24  ;;  %6898 = vrot.lane.b32.xlu0 %v17864_v28, %s13673_s4  ;;  %v19931_v28 = vld [vmem:[#allocation62_spill] sm:$0xff] }
 0xdf8   : >> { %6896 = vrot.lane.b32.xlu1 %v17866_v17, %s13673_s4 }
 0xdf9   : >> { %v6883_v53 = vpop.permute.xlu0 %6882 }
 0xdfa   : >> { %6926 = vst.msk [vmem:[#allocation2 + $0x28] sm:$0xff] %vm6920_vm10, %v6883_v53  ;;  %v6881_v35 = vpop.permute.xlu1 %6880 }
 0xdfb   : >> { %6925 = vst.msk [vmem:[#allocation2 + $0x20] sm:$0xff] %vm6920_vm10, %v6881_v35  ;;  %6738 = vrot.lane.b32.xlu0 %v17676_v1, %s13675_s26 }
 0xdfc   : >> { %6657 = vrot.lane.b32.xlu1 %v19930_v41, %s13676_s17 }
 0xdfd   : >> { %v6644_v18 = vpop.permute.xlu0 %6643 }
 0xdfe   : >> { %6685 = vst.msk [vmem:[#allocation2 + $0x38] sm:$0xff] %vm6677_vm7, %v6644_v18  ;;  %v6642_v12 = vpop.permute.xlu1 %6641 }
 0xdff   : >> { %6684 = vst.msk [vmem:[#allocation2 + $0x30] sm:$0xff] %vm6677_vm7, %v6642_v12  ;;  %6819 = vrot.lane.b32.xlu0 %v17914_v15, %s13674_s8 }
 0xe00   : >> { %6659 = vrot.lane.b32.xlu1 %v19931_v28, %s13676_s17  ;;  %s7382_s17 = scalar_lea.vmem [#allocation14], %s13652_s2 }
 0xe01   : >> { %v6405_v17 = vpop.permute.xlu0 %6404  ;;  %v6942_v2 = vld [vmem:[#allocation2 + $0x28] sm:$0xff] }
 0xe02   : >> { %6444 = vst.msk [vmem:[#allocation2 + $0x48] sm:$0xff] %vm6434_vm4, %v6405_v17  ;;  %v6403_v32 = vpop.permute.xlu1 %6402  ;;  %v6941_v1 = vld [vmem:[#allocation2 + $0x20] sm:$0xff] }
 0xe03   : >> { %6443 = vst.msk [vmem:[#allocation2 + $0x40] sm:$0xff] %vm6434_vm4, %v6403_v32  ;;  %10597 = vmatprep.mubr.f32.mxu0 %v6941_v1  ;;  %6900 = vrot.lane.b32.xlu0 %v17874_v16, %s13673_s4 }
 0xe04   : >> { %10598 = vmatmul.mubr.f32.gmra.mrb[164].mxu0 %v6942_v2  ;;  %6740 = vrot.lane.b32.xlu1 %v17674_v34, %s13675_s26  ;;  %s18356_s26 = scalar_lea.vmem [#allocation15], %s17806_s0 }
 0xe05   : >> { %v6725_v15 = vpop.permute.xlu0 %6724 }
 0xe06   : >> { %6766 = vst.msk [vmem:[#allocation2 + $0x38] sm:$0xff] %vm6758_vm8, %v6725_v15  ;;  %v6723_v55 = vpop.permute.xlu1 %6722 }
 0xe07   : >> { %6765 = vst.msk [vmem:[#allocation2 + $0x30] sm:$0xff] %vm6758_vm8, %v6723_v55 }
 0xe08   : >> { %6821 = vrot.lane.b32.xlu1 %v17912_v50, %s13674_s8  ;;  %s7142_s8 = scalar_lea.vmem [#allocation8], %s13652_s2 }
 0xe09   : >> { %v6486_v27 = vpop.permute.xlu0 %6485 }
 0xe0a   : >> { %6525 = vst.msk [vmem:[#allocation2 + $0x48] sm:$0xff] %vm6515_vm5, %v6486_v27  ;;  %v6484_v29 = vpop.permute.xlu1 %6483 }
 0xe0b   : >> { %6524 = vst.msk [vmem:[#allocation2 + $0x40] sm:$0xff] %vm6515_vm5, %v6484_v29 }
 0xe0c   : >> { %6902 = vrot.lane.b32.xlu1 %v17872_v14, %s13673_s4  ;;  %s7140_s4 = scalar_lea.vmem [#allocation6], %s13652_s2  ;;  %s1144_s2 = sadd.s32 1, %s13652_s2  }
 0xe0d   : >> { %v6806_v16 = vpop.permute.xlu0 %6805  ;;  %p18663_p5 = scmp.ge.s32.totalorder %s1144_s2, 5  }
 0xe0e   : >> { %6847 = vst.msk [vmem:[#allocation2 + $0x38] sm:$0xff] %vm6839_vm9, %v6806_v16  ;;  %v6804_v34 = vpop.permute.xlu1 %6803  ;;  %s19981_s18 = sld [smem:[#allocation223_spill]] (%p18663_p5)  ;;  %s19982_s2 = sld [smem:[#allocation225_spill]] (%p18663_p5)  ;;  %vm8174_vm11 = vcmask (%p18663_p5), 523264  }
 0xe0f   : >> { %6846 = vst.msk [vmem:[#allocation2 + $0x30] sm:$0xff] %vm6839_vm9, %v6804_v34  ;;  %s8361_s0 = scalar_lea.sflag (%p18663_p5), [#allocation5], %s805_s21 }
 0xe11   : >> { %v6567_v45 = vpop.permute.xlu0 %6566 }
 0xe12   : >> { %6606 = vst.msk [vmem:[#allocation2 + $0x48] sm:$0xff] %vm6596_vm6, %v6567_v45  ;;  %v6565_v51 = vpop.permute.xlu1 %6564  ;;  %v18140_v45 = vld [vmem:[%s6971_s30] ss:$0 sm:$0xff] }
 0xe13   : >> { %6605 = vst.msk [vmem:[#allocation2 + $0x40] sm:$0xff] %vm6596_vm6, %v6565_v51 }
 0xe14   : > { %s19983_s24 = smov (%p18663_p5), %s19982_s2 }
 0xe15   : >> { %v6887_v50 = vpop.permute.xlu0 %6886 }
 0xe16   : >> { %6928 = vst.msk [vmem:[#allocation2 + $0x38] sm:$0xff] %vm6920_vm10, %v6887_v50  ;;  %v6885_v9 = vpop.permute.xlu1 %6884 }
 0xe17   : >> { %6927 = vst.msk [vmem:[#allocation2 + $0x30] sm:$0xff] %vm6920_vm10, %v6885_v9 }
 0xe19   : >> { %v6648_v46 = vpop.permute.xlu0 %6647 }
 0xe1a   : >> { %6687 = vst.msk [vmem:[#allocation2 + $0x48] sm:$0xff] %vm6677_vm7, %v6648_v46  ;;  %v6646_v14 = vpop.permute.xlu1 %6645 }
 0xe1b   : >> { %6686 = vst.msk [vmem:[#allocation2 + $0x40] sm:$0xff] %vm6677_vm7, %v6646_v14  ;;  %v19932_v14 = vld [vmem:[#allocation52_spill] sm:$0xff] }
 0xe1d   : >> { %v6409_v11 = vpop.permute.xlu0 %6408  ;;  %v6944_v59 = vld [vmem:[#allocation2 + $0x38] sm:$0xff] }
 0xe1e   : >> { %6446 = vst.msk [vmem:[#allocation2 + $0x58] sm:$0xff] %vm6434_vm4, %v6409_v11  ;;  %v6407_v26 = vpop.permute.xlu1 %6406  ;;  %v6943_v23 = vld [vmem:[#allocation2 + $0x30] sm:$0xff] }
 0xe1f   : >> { %6445 = vst.msk [vmem:[#allocation2 + $0x50] sm:$0xff] %vm6434_vm4, %v6407_v26  ;;  %10600 = vmatprep.mubr.f32.mxu0 %v6943_v23  ;;  %v19933_v26 = vld [vmem:[#allocation53_spill] sm:$0xff] }
 0xe20   : >> { %10601 = vmatmul.mubr.f32.gmra.mrb[166].mxu0 %v6944_v59 }
 0xe21   : >> { %v6729_v60 = vpop.permute.xlu0 %6728 }
 0xe22   : >> { %6768 = vst.msk [vmem:[#allocation2 + $0x48] sm:$0xff] %vm6758_vm8, %v6729_v60  ;;  %v6727_v40 = vpop.permute.xlu1 %6726 }
 0xe23   : >> { %6767 = vst.msk [vmem:[#allocation2 + $0x40] sm:$0xff] %vm6758_vm8, %v6727_v40 }
 0xe25   : >> { %v6490_v3 = vpop.permute.xlu0 %6489 }
 0xe26   : >> { %6527 = vst.msk [vmem:[#allocation2 + $0x58] sm:$0xff] %vm6515_vm5, %v6490_v3  ;;  %v6488_v21 = vpop.permute.xlu1 %6487 }
 0xe27   : >> { %6526 = vst.msk [vmem:[#allocation2 + $0x50] sm:$0xff] %vm6515_vm5, %v6488_v21  ;;  %v19934_v21 = vld [vmem:[#allocation51_spill] sm:$0xff] }
 0xe29   : >> { %v6810_v31 = vpop.permute.xlu0 %6809 }
 0xe2a   : >> { %6849 = vst.msk [vmem:[#allocation2 + $0x48] sm:$0xff] %vm6839_vm9, %v6810_v31  ;;  %v6808_v54 = vpop.permute.xlu1 %6807 }
 0xe2b   : >> { %6848 = vst.msk [vmem:[#allocation2 + $0x40] sm:$0xff] %vm6839_vm9, %v6808_v54  ;;  %v19935_v54 = vld [vmem:[#allocation50_spill] sm:$0xff] }
 0xe2d   : >> { %v6571_v49 = vpop.permute.xlu0 %6570 }
 0xe2e   : >> { %6608 = vst.msk [vmem:[#allocation2 + $0x58] sm:$0xff] %vm6596_vm6, %v6571_v49  ;;  %v6569_v4 = vpop.permute.xlu1 %6568 }
 0xe2f   : >> { %6607 = vst.msk [vmem:[#allocation2 + $0x50] sm:$0xff] %vm6596_vm6, %v6569_v4 }
 0xe31   : >> { %v6891_v56 = vpop.permute.xlu0 %6890 }
 0xe32   : >> { %6930 = vst.msk [vmem:[#allocation2 + $0x48] sm:$0xff] %vm6920_vm10, %v6891_v56  ;;  %v6889_v62 = vpop.permute.xlu1 %6888 }
 0xe33   : >> { %6929 = vst.msk [vmem:[#allocation2 + $0x40] sm:$0xff] %vm6920_vm10, %v6889_v62 }
 0xe35   : >> { %v6652_v58 = vpop.permute.xlu0 %6651 }
 0xe36   : >> { %6689 = vst.msk [vmem:[#allocation2 + $0x58] sm:$0xff] %vm6677_vm7, %v6652_v58  ;;  %v6650_v39 = vpop.permute.xlu1 %6649 }
 0xe37   : >> { %6688 = vst.msk [vmem:[#allocation2 + $0x50] sm:$0xff] %vm6677_vm7, %v6650_v39  ;;  %v19936_v39 = vld [vmem:[#allocation48_spill] sm:$0xff] }
 0xe39   : >> { %v6413_v20 = vpop.permute.xlu0 %6412  ;;  %v6946_v57 = vld [vmem:[#allocation2 + $0x48] sm:$0xff] }
 0xe3a   : >> { %6448 = vst.msk [vmem:[#allocation2 + $0x68] sm:$0xff] %vm6434_vm4, %v6413_v20  ;;  %v6411_v22 = vpop.permute.xlu1 %6410  ;;  %v6945_v63 = vld [vmem:[#allocation2 + $0x40] sm:$0xff] }
 0xe3b   : >> { %6447 = vst.msk [vmem:[#allocation2 + $0x60] sm:$0xff] %vm6434_vm4, %v6411_v22  ;;  %10603 = vmatprep.mubr.f32.mxu0 %v6945_v63  ;;  %v19937_v22 = vld [vmem:[#allocation49_spill] sm:$0xff] }
 0xe3c   : >> { %10604 = vmatmul.mubr.f32.gmra.mrb[168].mxu0 %v6946_v57 }
 0xe3d   : >> { %v6733_v43 = vpop.permute.xlu0 %6732 }
 0xe3e   : >> { %6770 = vst.msk [vmem:[#allocation2 + $0x58] sm:$0xff] %vm6758_vm8, %v6733_v43  ;;  %v6731_v0 = vpop.permute.xlu1 %6730 }
 0xe3f   : >> { %6769 = vst.msk [vmem:[#allocation2 + $0x50] sm:$0xff] %vm6758_vm8, %v6731_v0 }
 0xe41   : >> { %v6494_v10 = vpop.permute.xlu0 %6493 }
 0xe42   : >> { %6529 = vst.msk [vmem:[#allocation2 + $0x68] sm:$0xff] %vm6515_vm5, %v6494_v10  ;;  %v6492_v44 = vpop.permute.xlu1 %6491 }
 0xe43   : >> { %6528 = vst.msk [vmem:[#allocation2 + $0x60] sm:$0xff] %vm6515_vm5, %v6492_v44  ;;  %v19938_v44 = vld [vmem:[#allocation46_spill] sm:$0xff] }
 0xe45   : >> { %v6814_v48 = vpop.permute.xlu0 %6813 }
 0xe46   : >> { %6851 = vst.msk [vmem:[#allocation2 + $0x58] sm:$0xff] %vm6839_vm9, %v6814_v48  ;;  %v6812_v19 = vpop.permute.xlu1 %6811 }
 0xe47   : >> { %6850 = vst.msk [vmem:[#allocation2 + $0x50] sm:$0xff] %vm6839_vm9, %v6812_v19  ;;  %v19939_v19 = vld [vmem:[#allocation47_spill] sm:$0xff] }
 0xe49   : >> { %v6575_v42 = vpop.permute.xlu0 %6574 }
 0xe4a   : >> { %6610 = vst.msk [vmem:[#allocation2 + $0x68] sm:$0xff] %vm6596_vm6, %v6575_v42  ;;  %v6573_v25 = vpop.permute.xlu1 %6572 }
 0xe4b   : >> { %6609 = vst.msk [vmem:[#allocation2 + $0x60] sm:$0xff] %vm6596_vm6, %v6573_v25 }
 0xe4d   : >> { %v6895_v37 = vpop.permute.xlu0 %6894 }
 0xe4e   : >> { %6932 = vst.msk [vmem:[#allocation2 + $0x58] sm:$0xff] %vm6920_vm10, %v6895_v37  ;;  %v6893_v7 = vpop.permute.xlu1 %6892 }
 0xe4f   : >> { %6931 = vst.msk [vmem:[#allocation2 + $0x50] sm:$0xff] %vm6920_vm10, %v6893_v7 }
 0xe51   : >> { %v6656_v47 = vpop.permute.xlu0 %6655 }
 0xe52   : >> { %6691 = vst.msk [vmem:[#allocation2 + $0x68] sm:$0xff] %vm6677_vm7, %v6656_v47  ;;  %v6654_v61 = vpop.permute.xlu1 %6653 }
 0xe53   : >> { %6690 = vst.msk [vmem:[#allocation2 + $0x60] sm:$0xff] %vm6677_vm7, %v6654_v61  ;;  %v19940_v61 = vld [vmem:[#allocation44_spill] sm:$0xff] }
 0xe55   : >> { %v6417_v33 = vpop.permute.xlu0 %6416  ;;  %v6948_v36 = vld [vmem:[#allocation2 + $0x58] sm:$0xff] }
 0xe56   : >> { %6450 = vst.msk [vmem:[#allocation2 + $0x78] sm:$0xff] %vm6434_vm4, %v6417_v33  ;;  %v6415_v52 = vpop.permute.xlu1 %6414  ;;  %v6947_v38 = vld [vmem:[#allocation2 + $0x50] sm:$0xff] }
 0xe57   : >> { %6449 = vst.msk [vmem:[#allocation2 + $0x70] sm:$0xff] %vm6434_vm4, %v6415_v52  ;;  %10606 = vmatprep.mubr.f32.mxu0 %v6947_v38  ;;  %v19941_v52 = vld [vmem:[#allocation45_spill] sm:$0xff]  ;;  %vm13682_vm4 = vmmov (%p18663_p5), 0  }
 0xe58   : >> { %10607 = vmatmul.mubr.f32.gmra.mrb[170].mxu0 %v6948_v36 }
 0xe59   : >> { %v6737_v13 = vpop.permute.xlu0 %6736 }
 0xe5a   : >> { %6772 = vst.msk [vmem:[#allocation2 + $0x68] sm:$0xff] %vm6758_vm8, %v6737_v13  ;;  %v6735_v6 = vpop.permute.xlu1 %6734 }
 0xe5b   : >> { %6771 = vst.msk [vmem:[#allocation2 + $0x60] sm:$0xff] %vm6758_vm8, %v6735_v6 }
 0xe5d   : >> { %v6498_v5 = vpop.permute.xlu0 %6497 }
 0xe5e   : >> { %6531 = vst.msk [vmem:[#allocation2 + $0x78] sm:$0xff] %vm6515_vm5, %v6498_v5  ;;  %v6496_v30 = vpop.permute.xlu1 %6495 }
 0xe5f   : >> { %6530 = vst.msk [vmem:[#allocation2 + $0x70] sm:$0xff] %vm6515_vm5, %v6496_v30  ;;  %v19942_v30 = vld [vmem:[#allocation42_spill] sm:$0xff] }
 0xe61   : >> { %v6818_v8 = vpop.permute.xlu0 %6817 }
 0xe62   : >> { %6853 = vst.msk [vmem:[#allocation2 + $0x68] sm:$0xff] %vm6839_vm9, %v6818_v8  ;;  %v6816_v24 = vpop.permute.xlu1 %6815 }
 0xe63   : >> { %6852 = vst.msk [vmem:[#allocation2 + $0x60] sm:$0xff] %vm6839_vm9, %v6816_v24  ;;  %v19943_v24 = vld [vmem:[#allocation43_spill] sm:$0xff] }
 0xe65   : >> { %v6579_v53 = vpop.permute.xlu0 %6578 }
 0xe66   : >> { %6612 = vst.msk [vmem:[#allocation2 + $0x78] sm:$0xff] %vm6596_vm6, %v6579_v53  ;;  %v6577_v35 = vpop.permute.xlu1 %6576 }
 0xe67   : >> { %6611 = vst.msk [vmem:[#allocation2 + $0x70] sm:$0xff] %vm6596_vm6, %v6577_v35 }
 0xe69   : >> { %v6899_v41 = vpop.permute.xlu0 %6898 }
 0xe6a   : >> { %6934 = vst.msk [vmem:[#allocation2 + $0x68] sm:$0xff] %vm6920_vm10, %v6899_v41  ;;  %v6897_v18 = vpop.permute.xlu1 %6896 }
 0xe6b   : >> { %6933 = vst.msk [vmem:[#allocation2 + $0x60] sm:$0xff] %vm6920_vm10, %v6897_v18 }
 0xe6d   : >> { %v6739_v12 = vpop.permute.xlu0 %6738 }
 0xe6e   : >> { %v6658_v28 = vpop.permute.xlu1 %6657 }
 0xe6f   : >> { %6692 = vst.msk [vmem:[#allocation2 + $0x70] sm:$0xff] %vm6677_vm7, %v6658_v28  ;;  %v19944_v28 = vld [vmem:[#allocation40_spill] sm:$0xff] }
 0xe70   : >> { %6773 = vst.msk [vmem:[#allocation2 + $0x70] sm:$0xff] %vm6758_vm8, %v6739_v12 }
 0xe71   : >> { %v6820_v17 = vpop.permute.xlu0 %6819  ;;  %v6950_v2 = vld [vmem:[#allocation2 + $0x68] sm:$0xff] }
 0xe72   : >> { %6854 = vst.msk [vmem:[#allocation2 + $0x70] sm:$0xff] %vm6839_vm9, %v6820_v17  ;;  %v6660_v32 = vpop.permute.xlu1 %6659  ;;  %v6949_v1 = vld [vmem:[#allocation2 + $0x60] sm:$0xff] }
 0xe73   : >> { %6693 = vst.msk [vmem:[#allocation2 + $0x78] sm:$0xff] %vm6677_vm7, %v6660_v32  ;;  %10609 = vmatprep.mubr.f32.mxu0 %v6949_v1  ;;  %v19945_v32 = vld [vmem:[#allocation41_spill] sm:$0xff] }
 0xe74   : >> { %10610 = vmatmul.mubr.f32.gmra.mrb[172].mxu0 %v6950_v2 }
 0xe75   : >> { %v6901_v15 = vpop.permute.xlu0 %6900 }
 0xe76   : >> { %6935 = vst.msk [vmem:[#allocation2 + $0x70] sm:$0xff] %vm6920_vm10, %v6901_v15  ;;  %v6741_v55 = vpop.permute.xlu1 %6740 }
 0xe77   : >> { %6774 = vst.msk [vmem:[#allocation2 + $0x78] sm:$0xff] %vm6758_vm8, %v6741_v55 }
 0xe7a   : >> { %v6822_v27 = vpop.permute.xlu1 %6821 }
 0xe7b   : >> { %6855 = vst.msk [vmem:[#allocation2 + $0x78] sm:$0xff] %vm6839_vm9, %v6822_v27  ;;  %vm8285_vm9 = vcmask (%p18663_p5), 261120  }
 0xe7d   : >> { %v6951_v29 = vld [vmem:[#allocation2 + $0x70] sm:$0xff] }
 0xe7e   : >> { %v6903_v16 = vpop.permute.xlu1 %6902  ;;  %10612 = vmatprep.mubr.f32.mxu0 %v6951_v29 }
 0xe7f   : >> { %6936 = vst.msk [vmem:[#allocation2 + $0x78] sm:$0xff] %vm6920_vm10, %v6903_v16 }
 0xe86   : >> { %v6952_v34 = vld [vmem:[#allocation2 + $0x78] sm:$0xff] }
 0xe87   : >> { %10613 = vmatmul.mubr.f32.gmra.mrb[174].mxu0 %v6952_v34 }
 0xe9f   : >> { %v10593_v51 = vpop.f32.mrb[160].mxu0 }
 0xea0   : >> { %v7051_v50 = vadd.f32 %v10593_v51, %v18140_v45  ;;  %v7045_v9 = vpop.f32.mrb[161].mxu0 }
 0xea1   : >> { %v7046_v46 = vadd.f32 %v18140_v45, %v7045_v9 }
 0xea2   : >> { %v7125_v11 = vadd.f32 %v19932_v14, %v7051_v50 }
 0xea3   : >> { %v18146_v23 = vadd.f32 %v19933_v26, %v7046_v46  ;;  %v19946_v26 = vld [vmem:[#allocation38_spill] sm:$0xff] }
 0xea4   : >> { %7146 = vadd.xlane.f32.xlu1 %v7125_v11 }
 0xea5   : >> { %7144 = vadd.xlane.f32.xlu0 %v18146_v23 }
 0xebb   : >> { %v10596_v59 = vpop.f32.mrb[162].mxu0 }
 0xebc   : >> { %v7055_v60 = vpop.f32.mrb[163].mxu0  ;;  %v7061_v3 = vadd.f32 %v10596_v59, %v18140_v45 }
 0xebd   : >> { %v7056_v40 = vadd.f32 %v18140_v45, %v7055_v60 }
 0xebe   : >> { %v7127_v49 = vadd.f32 %v19935_v54, %v7061_v3  ;;  %v19947_v3 = vld [vmem:[#allocation39_spill] sm:$0xff] }
 0xebf   : >> { %v18152_v31 = vadd.f32 %v19934_v21, %v7056_v40 }
 0xec1   : >> { %7148 = vadd.xlane.f32.xlu0 %v18152_v31 }
 0xec5   : >> { %7150 = vadd.xlane.f32.xlu0 %v7127_v49 }
 0xed7   : >> { %v10599_v4 = vpop.f32.mrb[164].mxu0 }
 0xed8   : >> { %v7071_v56 = vadd.f32 %v10599_v4, %v18140_v45  ;;  %v7065_v62 = vpop.f32.mrb[165].mxu0  ;;  %v7366_v4 = vld [vmem:[%s18231_s27] sm:$0xff] }
 0xed9   : >> { %v7066_v58 = vadd.f32 %v18140_v45, %v7065_v62  ;;  %v7368_v62 = vld [vmem:[%s18231_s27 + $0x10] sm:$0xff] }
 0xeda   : >> { %v18159_v20 = vadd.f32 %v19936_v39, %v7071_v56  ;;  %v7367_v56 = vld [vmem:[%s18231_s27 + $0x8] sm:$0xff] }
 0xedb   : >> { %v18162_v63 = vadd.f32 %v19937_v22, %v7066_v58  ;;  %v7369_v58 = vld [vmem:[%s18231_s27 + $0x18] sm:$0xff] }
 0xedc   : >> { %7154 = vadd.xlane.f32.xlu0 %v18159_v20  ;;  %v11544_v39 = vpack.c.bf16 %v7369_v58, %v7368_v62 }
 0xedd   : >> { %7152 = vadd.xlane.f32.xlu1 %v18162_v63 }
 0xef3   : >> { %v10602_v57 = vpop.f32.mrb[166].mxu0 }
 0xef4   : >> { %v7081_v43 = vadd.f32 %v10602_v57, %v18140_v45  ;;  %v7075_v0 = vpop.f32.mrb[167].mxu0 }
 0xef5   : >> { %v7076_v10 = vadd.f32 %v18140_v45, %v7075_v0 }
 0xef6   : >> { %v18169_v48 = vadd.f32 %v19938_v44, %v7081_v43 }
 0xef7   : >> { %v18172_v42 = vadd.f32 %v19939_v19, %v7076_v10 }
 0xef8   : >> { %7158 = vadd.xlane.f32.xlu0 %v18169_v48 }
 0xef9   : >> { %7156 = vadd.xlane.f32.xlu1 %v18172_v42 }
 0xf0f   : >> { %v10605_v25 = vpop.f32.mrb[168].mxu0 }
 0xf10   : >> { %v7091_v37 = vadd.f32 %v10605_v25, %v18140_v45  ;;  %v7085_v7 = vpop.f32.mrb[169].mxu0 }
 0xf11   : >> { %v7086_v47 = vadd.f32 %v18140_v45, %v7085_v7  ;;  %v7370_v7 = vld [vmem:[%s18231_s27 + $0x20] sm:$0xff] }
 0xf12   : >> { %v18179_v33 = vadd.f32 %v19940_v61, %v7091_v37 }
 0xf13   : >> { %v18182_v38 = vadd.f32 %v19941_v52, %v7086_v47  ;;  %v7371_v47 = vld [vmem:[%s18231_s27 + $0x28] sm:$0xff] }
 0xf14   : >> { %7162 = vadd.xlane.f32.xlu0 %v18179_v33  ;;  %v11548_v61 = vpack.c.bf16 %v7371_v47, %v7370_v7 }
 0xf15   : >> { %7160 = vadd.xlane.f32.xlu1 %v18182_v38 }
 0xf2b   : >> { %v10608_v36 = vpop.f32.mrb[170].mxu0 }
 0xf2c   : >> { %v7101_v13 = vadd.f32 %v10608_v36, %v18140_v45  ;;  %v7095_v6 = vpop.f32.mrb[171].mxu0  ;;  %v7374_v36 = vld [vmem:[%s18231_s27 + $0x40] sm:$0xff] }
 0xf2d   : >> { %v7096_v5 = vadd.f32 %v18140_v45, %v7095_v6 }
 0xf2e   : >> { %v18189_v8 = vadd.f32 %v19942_v30, %v7101_v13  ;;  %v7375_v13 = vld [vmem:[%s18231_s27 + $0x48] sm:$0xff]  ;;  %v7377_v30 = vld [vmem:[%s18231_s27 + $0x58] sm:$0xff] }
 0xf2f   : >> { %v18192_v53 = vadd.f32 %v19943_v24, %v7096_v5  ;;  %v11556_v6 = vpack.c.bf16 %v7375_v13, %v7374_v36  ;;  %v7376_v5 = vld [vmem:[%s18231_s27 + $0x50] sm:$0xff] }
 0xf30   : >> { %7166 = vadd.xlane.f32.xlu0 %v18189_v8  ;;  %v11560_v24 = vpack.c.bf16 %v7377_v30, %v7376_v5 }
 0xf31   : >> { %7164 = vadd.xlane.f32.xlu1 %v18192_v53  ;;  %v7147_v55 = vpop.xlane.xlu1 %7146 }
 0xf32   : >> { %v7145_v2 = vpop.xlane.xlu0 %7144  ;;  %v7178_v27 = vmul.f32 0.0078125, %v7147_v55 }
 0xf33   : >> { %v7177_v29 = vmul.f32 0.0078125, %v7145_v2 }
 0xf34   : >> { %v18208_v46 = vsub.f32 %v7125_v11, %v7178_v27 }
 0xf35   : >> { %v18214_v60 = vsub.f32 %v18146_v23, %v7177_v29 }
 0xf37   : >> { %v7209_v23 = vmul.f32 %v18214_v60, %v18214_v60 }
 0xf47   : >> { %v10611_v35 = vpop.f32.mrb[172].mxu0 }
 0xf48   : >> { %v7111_v41 = vadd.f32 %v10611_v35, %v18140_v45  ;;  %v7105_v18 = vpop.f32.mrb[173].mxu0  ;;  %v7378_v35 = vld [vmem:[%s18231_s27 + $0x60] sm:$0xff] }
 0xf49   : >> { %v7106_v12 = vadd.f32 %v18140_v45, %v7105_v18 }
 0xf4a   : >> { %v18199_v17 = vadd.f32 %v19944_v28, %v7111_v41  ;;  %v7379_v41 = vld [vmem:[%s18231_s27 + $0x68] sm:$0xff]  ;;  %v7381_v28 = vld [vmem:[%s18231_s27 + $0x78] sm:$0xff] }
 0xf4b   : >> { %v18202_v1 = vadd.f32 %v19945_v32, %v7106_v12  ;;  %v11564_v18 = vpack.c.bf16 %v7379_v41, %v7378_v35  ;;  %v7380_v12 = vld [vmem:[%s18231_s27 + $0x70] sm:$0xff] }
 0xf4c   : >> { %7170 = vadd.xlane.f32.xlu0 %v18199_v17  ;;  %v11568_v32 = vpack.c.bf16 %v7381_v28, %v7380_v12 }
 0xf4d   : >> { %7168 = vadd.xlane.f32.xlu1 %v18202_v1 }
 0xf4e   : >> { %v7149_v15 = vpop.xlane.xlu0 %7148 }
 0xf4f   : >> { %v7179_v40 = vmul.f32 0.0078125, %v7149_v15 }
 0xf51   : >> { %v18226_v11 = vsub.f32 %v18152_v31, %v7179_v40 }
 0xf52   : >> { %v7151_v16 = vpop.xlane.xlu0 %7150 }
 0xf53   : >> { %v7180_v14 = vmul.f32 0.0078125, %v7151_v16  ;;  %v7211_v22 = vmul.f32 %v18226_v11, %v18226_v11 }
 0xf55   : >> { %v18221_v54 = vsub.f32 %v7127_v49, %v7180_v14  ;;  %v11540_v49 = vpack.c.bf16 %v7367_v56, %v7366_v4 }
 0xf57   : >> { %v7212_v31 = vmul.f32 %v18221_v54, %v18221_v54  ;;  %11541 = vmatprep.subr.bf16.mxu1 %v11540_v49 }
 0xf58   : >> { %11543 = vmatpush3.bf16.msra.mxu1 %v11540_v49 }
 0xf59   : >> { %11545 = vmatprep.subr.bf16.mxu1 %v11544_v39 }
 0xf5a   : >> { %v10614_v34 = vpop.f32.mrb[174].mxu0 }
 0xf5b   : >> { %v7121_v51 = vadd.f32 %v10614_v34, %v18140_v45  ;;  %v7115_v50 = vpop.f32.mrb[175].mxu0 }
 0xf5c   : >> { %v7116_v9 = vadd.f32 %v18140_v45, %v7115_v50  ;;  %v7210_v45 = vmul.f32 %v18208_v46, %v18208_v46  ;;  %11547 = vmatpush3.bf16.msra.mxu1 %v11544_v39 }
 0xf5d   : >> { %v18211_v59 = vadd.f32 %v19946_v26, %v7121_v51  ;;  %11549 = vmatprep.subr.bf16.mxu1 %v11548_v61 }
 0xf5e   : >> { %v18217_v21 = vadd.f32 %v19947_v3, %v7116_v9 }
 0xf5f   : >> { %7174 = vadd.xlane.f32.xlu0 %v18211_v59 }
 0xf60   : >> { %7172 = vadd.xlane.f32.xlu1 %v18217_v21  ;;  %11551 = vmatpush3.bf16.msra.mxu1 %v11548_v61 }
 0xf63   : >> { %7227 = vadd.xlane.f32.xlu0 %v7210_v45 }
 0xf64   : >> { %7225 = vadd.xlane.f32.xlu1 %v7209_v23 }
 0xf67   : >> { %7231 = vadd.xlane.f32.xlu0 %v7212_v31 }
 0xf68   : >> { %7229 = vadd.xlane.f32.xlu1 %v7211_v22 }
 0xf69   : >> { %v7155_v57 = vpop.xlane.xlu0 %7154 }
 0xf6a   : >> { %v7182_v43 = vmul.f32 0.0078125, %v7155_v57  ;;  %v7153_v0 = vpop.xlane.xlu1 %7152 }
 0xf6b   : >> { %v7181_v10 = vmul.f32 0.0078125, %v7153_v0 }
 0xf6c   : >> { %v18242_v44 = vsub.f32 %v18159_v20, %v7182_v43  ;;  %v7372_v20 = vld [vmem:[%s18231_s27 + $0x30] sm:$0xff] }
 0xf6d   : >> { %v18245_v19 = vsub.f32 %v18162_v63, %v7181_v10  ;;  %v7373_v63 = vld [vmem:[%s18231_s27 + $0x38] sm:$0xff]  ;;  %s19986_s27 = sld [smem:[#allocation34_spill]] (%p18663_p5) }
 0xf6e   : >> { %v7214_v25 = vmul.f32 %v18242_v44, %v18242_v44  ;;  %v11552_v52 = vpack.c.bf16 %v7373_v63, %v7372_v20 }
 0xf6f   : >> { %v7213_v37 = vmul.f32 %v18245_v19, %v18245_v19 }
 0xf70   : >> { %7235 = vadd.xlane.f32.xlu0 %v7214_v25  ;;  %11553 = vmatprep.subr.bf16.mxu1 %v11552_v52 }
 0xf71   : >> { %7233 = vadd.xlane.f32.xlu1 %v7213_v37  ;;  %11555 = vmatpush3.bf16.msra.mxu1 %v11552_v52 }
 0xf72   : >> { %11557 = vmatprep.subr.bf16.mxu1 %v11556_v6 }
 0xf73   : > { %p19988_p0 = scmp.ne.s32.totalorder (%p18663_p5), %s19986_s27, 0 }
 0xf75   : >> { %11559 = vmatpush3.bf16.msra.mxu1 %v11556_v6 }
 0xf76   : >> { %11561 = vmatprep.subr.bf16.mxu1 %v11560_v24 }
 0xf79   : >> { %11563 = vmatpush3.bf16.msra.mxu1 %v11560_v24 }
 0xf7a   : >> { %11565 = vmatprep.subr.bf16.mxu1 %v11564_v18 }
 0xf7d   : >> { %11567 = vmatpush3.bf16.msra.mxu1 %v11564_v18 }
 0xf7e   : >> { %11569 = vmatprep.subr.bf16.mxu1 %v11568_v32 }
 0xf81   : >> { %11571 = vmatpush3.bf16.msra.mxu1 %v11568_v32  ;;  %v18314_v32 = vld [vmem:[%s7140_s4] ss:$0 sm:$0xff]  ;;  %s8921_s4 = sshll.u32 (%p18663_p5), %s13815_s3, 4  ;;  %s13683_s3 = smov (%p18663_p5), [#allocation21]  }
 0xf82   : > { %s13434_s28 = sshll.u32 (%p18663_p5), %s13683_s3, 4  ;;  %s13435_s28 = int_to_ptr.vmem [resolvable:$false] %s13434_s28 }
 0xf83   : > { %s13436_s10 = scalar_lea.vmem (%p18663_p5), %s13435_s28, 32 }
 0xf85   : >> { %v7159_v2 = vpop.xlane.xlu0 %7158 }
 0xf86   : >> { %v7184_v15 = vmul.f32 0.0078125, %v7159_v2  ;;  %v7157_v55 = vpop.xlane.xlu1 %7156 }
 0xf87   : >> { %v7183_v27 = vmul.f32 0.0078125, %v7157_v55 }
 0xf88   : >> { %v18264_v29 = vsub.f32 %v18169_v48, %v7184_v15 }
 0xf89   : >> { %v18267_v16 = vsub.f32 %v18172_v42, %v7183_v27 }
 0xf8a   : >> { %v7216_v34 = vmul.f32 %v18264_v29, %v18264_v29 }
 0xf8b   : >> { %v7215_v51 = vmul.f32 %v18267_v16, %v18267_v16 }
 0xf8c   : >> { %7239 = vadd.xlane.f32.xlu0 %v7216_v34 }
 0xf8d   : >> { %7237 = vadd.xlane.f32.xlu1 %v7215_v51  ;;  %v18319_v51 = vld [vmem:[%s7142_s8] ss:$0 sm:$0xff]  ;;  %s8373_s8 = sshll.u32 (%p18663_p5), %s14269_s1, 4  ;;  %s18795_s8 = int_to_ptr.vmem [resolvable:$true] %s8373_s8 }
 0xf8e   : > { %s13430_s23 = scalar_lea.vmem (%p18663_p5), %s18795_s8, 16  ;;  %p13437_p4 = scmp.lt.s32.totalorder (%p18663_p5), %s18795_s8, %s13435_s28 }
 0xf8f   : > { %p13431_p10 = scmp.ne.s32.totalorder (%p18663_p5), %s18795_s8, %s13430_s23  ;;  %p13438_p12 = scmp.lt.s32.totalorder (%p18663_p5), %s13436_s10, %s13430_s23 }
 0xf91   : > { %p13432_p2 = pnand (%p18663_p5), %p13431_p10, %p19988_p0  ;;  %p13439_p7 = por (%p18663_p5), %p13438_p12, %p13437_p4 }
 0xf93   : > { %p13433_p3 = pneg (%p18663_p5), %p13432_p2 }
 0xf95   : > { %p13440_p8 = pnand (%p18663_p5), %p13439_p7, %p13433_p3 }
 0xfa1   : >> { %v7163_v50 = vpop.xlane.xlu0 %7162 }
 0xfa2   : >> { %v7186_v9 = vmul.f32 0.0078125, %v7163_v50  ;;  %v7161_v14 = vpop.xlane.xlu1 %7160 }
 0xfa3   : >> { %v7185_v26 = vmul.f32 0.0078125, %v7161_v14 }
 0xfa4   : >> { %v18274_v40 = vsub.f32 %v18179_v33, %v7186_v9 }
 0xfa5   : >> { %v18277_v48 = vsub.f32 %v18182_v38, %v7185_v26 }
 0xfa6   : >> { %v7218_v42 = vmul.f32 %v18274_v40, %v18274_v40 }
 0xfa7   : >> { %v7217_v3 = vmul.f32 %v18277_v48, %v18277_v48 }
 0xfa8   : >> { %7243 = vadd.xlane.f32.xlu0 %v7218_v42 }
 0xfa9   : >> { %7241 = vadd.xlane.f32.xlu1 %v7217_v3 }
 0xfbd   : >> { %v7167_v45 = vpop.xlane.xlu0 %7166 }
 0xfbe   : >> { %v7188_v23 = vmul.f32 0.0078125, %v7167_v45  ;;  %v7165_v4 = vpop.xlane.xlu1 %7164 }
 0xfbf   : >> { %v7187_v56 = vmul.f32 0.0078125, %v7165_v4 }
 0xfc0   : >> { %v18284_v62 = vsub.f32 %v18189_v8, %v7188_v23 }
 0xfc1   : >> { %v18287_v33 = vsub.f32 %v18192_v53, %v7187_v56 }
 0xfc2   : >> { %v7220_v38 = vmul.f32 %v18284_v62, %v18284_v62 }
 0xfc3   : >> { %v7219_v49 = vmul.f32 %v18287_v33, %v18287_v33 }
 0xfc4   : >> { %7247 = vadd.xlane.f32.xlu0 %v7220_v38 }
 0xfc5   : >> { %7245 = vadd.xlane.f32.xlu1 %v7219_v49 }
 0xfd9   : >> { %v7171_v58 = vpop.xlane.xlu0 %7170 }
 0xfda   : >> { %v7190_v39 = vmul.f32 0.0078125, %v7171_v58  ;;  %v7169_v31 = vpop.xlane.xlu1 %7168 }
 0xfdb   : >> { %v7189_v22 = vmul.f32 0.0078125, %v7169_v31 }
 0xfdc   : >> { %v18294_v57 = vsub.f32 %v18199_v17, %v7190_v39 }
 0xfdd   : >> { %v18297_v8 = vsub.f32 %v18202_v1, %v7189_v22 }
 0xfde   : >> { %v7222_v53 = vmul.f32 %v18294_v57, %v18294_v57 }
 0xfdf   : >> { %v7221_v43 = vmul.f32 %v18297_v8, %v18297_v8 }
 0xfe0   : >> { %7251 = vadd.xlane.f32.xlu0 %v7222_v53 }
 0xfe1   : >> { %7249 = vadd.xlane.f32.xlu1 %v7221_v43  ;;  %v7554_v43 = vld [vmem:[%s18356_s26 + $0x10] sm:$0xff] }
 0xfec   : >> { %v7175_v0 = vpop.xlane.xlu0 %7174 }
 0xfed   : >> { %v7192_v10 = vmul.f32 0.0078125, %v7175_v0  ;;  %v7173_v25 = vpop.xlane.xlu1 %7172 }
 0xfee   : >> { %v7191_v37 = vmul.f32 0.0078125, %v7173_v25 }
 0xfef   : >> { %v18304_v7 = vsub.f32 %v18211_v59, %v7192_v10 }
 0xff0   : >> { %v18307_v17 = vsub.f32 %v18217_v21, %v7191_v37  ;;  %v7228_v1 = vpop.xlane.xlu0 %7227  ;;  %v7555_v37 = vld [vmem:[%s18356_s26 + $0x18] sm:$0xff] }
 0xff1   : >> { %v7258_v47 = vmul.f32 0.0078125, %v7228_v1  ;;  %v7226_v61 = vpop.xlane.xlu1 %7225  ;;  %v7224_v20 = vmul.f32 %v18304_v7, %v18304_v7 }
 0xff2   : >> { %v7257_v63 = vmul.f32 0.0078125, %v7226_v61  ;;  %v7223_v52 = vmul.f32 %v18307_v17, %v18307_v17  ;;  %v7556_v61 = vld [vmem:[%s18356_s26 + $0x20] sm:$0xff] }
 0xff3   : >> { %v7274_v36 = vadd.f32 1e-05, %v7258_v47  ;;  %7255 = vadd.xlane.f32.xlu0 %v7224_v20  ;;  %v11576_v47 = vpack.c.bf16 %v7555_v37, %v7554_v43  ;;  %v7557_v20 = vld [vmem:[%s18356_s26 + $0x28] sm:$0xff] }
 0xff4   : >> { %v7273_v13 = vadd.f32 1e-05, %v7257_v63  ;;  %7253 = vadd.xlane.f32.xlu1 %v7223_v52  ;;  %v7232_v59 = vpop.xlane.xlu0 %7231 }
 0xff5   : >> { %13055 = vrsqrt.f32 %v7274_v36  ;;  %v7260_v6 = vmul.f32 0.0078125, %v7232_v59  ;;  %v7230_v21 = vpop.xlane.xlu1 %7229  ;;  %v11580_v36 = vpack.c.bf16 %v7557_v20, %v7556_v61  ;;  %v7559_v59 = vld [vmem:[%s18356_s26 + $0x38] sm:$0xff] }
 0xff6   : >> { %13057 = vrsqrt.f32 %v7273_v13  ;;  %v7259_v5 = vmul.f32 0.0078125, %v7230_v21  ;;  %v7558_v13 = vld [vmem:[%s18356_s26 + $0x30] sm:$0xff]  ;;  %v7560_v21 = vld [vmem:[%s18356_s26 + $0x40] sm:$0xff] }
 0xff7   : >> { %v7276_v30 = vadd.f32 1e-05, %v7260_v6  ;;  %v11584_v6 = vpack.c.bf16 %v7559_v59, %v7558_v13 }
 0xff8   : >> { %v7275_v24 = vadd.f32 1e-05, %v7259_v5  ;;  %v7561_v5 = vld [vmem:[%s18356_s26 + $0x48] sm:$0xff] }
 0xff9   : >> { %13059 = vrsqrt.f32 %v7276_v30  ;;  %v11588_v30 = vpack.c.bf16 %v7561_v5, %v7560_v21 }
 0xffa   : >> { %13061 = vrsqrt.f32 %v7275_v24  ;;  %v7562_v24 = vld [vmem:[%s18356_s26 + $0x50] sm:$0xff] }
 0xffd   : >> { %v7236_v35 = vpop.xlane.xlu0 %7235 }
 0xffe   : >> { %v7262_v41 = vmul.f32 0.0078125, %v7236_v35  ;;  %v7234_v18 = vpop.xlane.xlu1 %7233  ;;  %v7563_v35 = vld [vmem:[%s18356_s26 + $0x58] sm:$0xff] }
 0xfff   : >> { %v13056_v12 = vpop.eup %13055  ;;  %v7261_v28 = vmul.f32 0.0078125, %v7234_v18 }
0x1000   : >> { %v13058_v2 = vpop.eup %13057  ;;  %v7306_v15 = vmul.f32 %v13056_v12, %v18208_v46  ;;  %v7278_v55 = vadd.f32 1e-05, %v7262_v41 }
0x1001   : >> { %v7277_v27 = vadd.f32 1e-05, %v7261_v28  ;;  %v7305_v34 = vmul.f32 %v13058_v2, %v18214_v60  ;;  %v11592_v2 = vpack.c.bf16 %v7563_v35, %v7562_v24 }
0x1002   : >> { %13063 = vrsqrt.f32 %v7278_v55  ;;  %v7328_v50 = vmul.f32 %v18314_v32, %v7306_v15  ;;  %v7564_v55 = vld [vmem:[%s18356_s26 + $0x60] sm:$0xff] }
0x1003   : >> { %v13060_v9 = vpop.eup %13059  ;;  %13065 = vrsqrt.f32 %v7277_v27  ;;  %v7327_v14 = vmul.f32 %v18314_v32, %v7305_v34  ;;  %v7565_v27 = vld [vmem:[%s18356_s26 + $0x68] sm:$0xff] }
0x1004   : >> { %v13062_v26 = vpop.eup %13061  ;;  %v7308_v42 = vmul.f32 %v13060_v9, %v18221_v54  ;;  %v18329_v60 = vadd.f32 %v18319_v51, %v7328_v50 }
0x1005   : >> { %v18325_v3 = vadd.f32 %v18319_v51, %v7327_v14  ;;  %v7307_v46 = vmul.f32 %v13062_v26, %v18226_v11 }
0x1006   : >> { %v7330_v45 = vmul.f32 %v18314_v32, %v7308_v42 }
0x1007   : >> { %10647 = vmatprep.mubr.f32.mxu1 %v18325_v3  ;;  %v7329_v23 = vmul.f32 %v18314_v32, %v7307_v46 }
0x1008   : >> { %10648 = vmatmul.mubr.f32.vlgmr.msra.gmra.mrb[144].mxu1 %v18329_v60  ;;  %v18339_v54 = vadd.f32 %v18319_v51, %v7330_v45 }
0x1009   : >> { %v18336_v4 = vadd.f32 %v18319_v51, %v7329_v23 }
0x100b   : >> { %10650 = vmatprep.mubr.f32.mxu1 %v18336_v4 }
0x100c   : >> { %v13064_v11 = vpop.eup %13063  ;;  %10651 = vmatmul.mubr.f32.gmra.mrb[146].mxu1 %v18339_v54 }
0x100d   : >> { %v13066_v56 = vpop.eup %13065  ;;  %v7310_v38 = vmul.f32 %v13064_v11, %v18242_v44  ;;  %v7552_v44 = vld [vmem:[%s18356_s26] sm:$0xff] }
0x100e   : >> { %v7309_v49 = vmul.f32 %v13066_v56, %v18245_v19  ;;  %v7553_v19 = vld [vmem:[%s18356_s26 + $0x8] sm:$0xff] }
0x100f   : >> { %v7332_v58 = vmul.f32 %v18314_v32, %v7310_v38  ;;  %v11572_v25 = vpack.c.bf16 %v7553_v19, %v7552_v44 }
0x1010   : >> { %v7331_v39 = vmul.f32 %v18314_v32, %v7309_v49 }
0x1011   : >> { %v18351_v22 = vadd.f32 %v18319_v51, %v7332_v58  ;;  %11573 = vmatprep.subr.bf16.mxu0 %v11572_v25  ;;  %11660 = vmatprep.subr.bf16.mxu1 %v11572_v25 }
0x1012   : >> { %v18348_v31 = vadd.f32 %v18319_v51, %v7331_v39  ;;  %11575 = vmatpush3.bf16.msra.mxu0 %v11572_v25  ;;  %11668 = vmatpush3.bf16.msra.mxu1 %v11572_v25  ;;  %v7567_v25 = vld [vmem:[%s18356_s26 + $0x78] sm:$0xff] }
0x1013   : >> { %11577 = vmatprep.subr.bf16.mxu0 %v11576_v47  ;;  %11661 = vmatprep.subr.bf16.mxu1 %v11576_v47 }
0x1014   : >> { %10653 = vmatprep.mubr.f32.mxu1 %v18348_v31 }
0x1015   : >> { %10654 = vmatmul.mubr.f32.gmra.mrb[148].mxu1 %v18351_v22 }
0x1016   : >> { %11579 = vmatpush3.bf16.msra.mxu0 %v11576_v47  ;;  %11669 = vmatpush3.bf16.msra.mxu1 %v11576_v47 }
0x1017   : >> { %11581 = vmatprep.subr.bf16.mxu0 %v11580_v36  ;;  %11662 = vmatprep.subr.bf16.mxu1 %v11580_v36 }
0x1019   : >> { %v7240_v53 = vpop.xlane.xlu0 %7239 }
0x101a   : >> { %v7264_v0 = vmul.f32 0.0078125, %v7240_v53  ;;  %v7238_v10 = vpop.xlane.xlu1 %7237  ;;  %11583 = vmatpush3.bf16.msra.mxu0 %v11580_v36  ;;  %11670 = vmatpush3.bf16.msra.mxu1 %v11580_v36 }
0x101b   : >> { %v7263_v1 = vmul.f32 0.0078125, %v7238_v10  ;;  %11585 = vmatprep.subr.bf16.mxu0 %v11584_v6  ;;  %11663 = vmatprep.subr.bf16.mxu1 %v11584_v6  ;;  %v7566_v10 = vld [vmem:[%s18356_s26 + $0x70] sm:$0xff] }
0x101c   : >> { %v7280_v63 = vadd.f32 1e-05, %v7264_v0  ;;  %v11600_v37 = vpack.c.bf16 %v7567_v25, %v7566_v10 }
0x101d   : >> { %v7279_v52 = vadd.f32 1e-05, %v7263_v1 }
0x101e   : >> { %13067 = vrsqrt.f32 %v7280_v63  ;;  %11587 = vmatpush3.bf16.msra.mxu0 %v11584_v6  ;;  %11671 = vmatpush3.bf16.msra.mxu1 %v11584_v6 }
0x101f   : >> { %13069 = vrsqrt.f32 %v7279_v52  ;;  %11589 = vmatprep.subr.bf16.mxu0 %v11588_v30  ;;  %11664 = vmatprep.subr.bf16.mxu1 %v11588_v30 }
0x1022   : >> { %11591 = vmatpush3.bf16.msra.mxu0 %v11588_v30  ;;  %11672 = vmatpush3.bf16.msra.mxu1 %v11588_v30 }
0x1023   : >> { %11593 = vmatprep.subr.bf16.mxu0 %v11592_v2  ;;  %11665 = vmatprep.subr.bf16.mxu1 %v11592_v2 }
0x1026   : >> { %11595 = vmatpush3.bf16.msra.mxu0 %v11592_v2  ;;  %11673 = vmatpush3.bf16.msra.mxu1 %v11592_v2 }
0x1028   : >> { %v13068_v41 = vpop.eup %13067 }
0x1029   : >> { %v13070_v18 = vpop.eup %13069  ;;  %v7312_v12 = vmul.f32 %v13068_v41, %v18264_v29  ;;  %v11596_v29 = vpack.c.bf16 %v7565_v27, %v7564_v55 }
0x102a   : >> { %v7311_v28 = vmul.f32 %v13070_v18, %v18267_v16 }
0x102b   : >> { %v7334_v15 = vmul.f32 %v18314_v32, %v7312_v12  ;;  %11597 = vmatprep.subr.bf16.mxu0 %v11596_v29  ;;  %11666 = vmatprep.subr.bf16.mxu1 %v11596_v29 }
0x102c   : >> { %v7333_v34 = vmul.f32 %v18314_v32, %v7311_v28  ;;  %11599 = vmatpush3.bf16.msra.mxu0 %v11596_v29  ;;  %11674 = vmatpush3.bf16.msra.mxu1 %v11596_v29 }
0x102d   : >> { %v18380_v9 = vadd.f32 %v18319_v51, %v7334_v15  ;;  %11601 = vmatprep.subr.bf16.mxu0 %v11600_v37  ;;  %11667 = vmatprep.subr.bf16.mxu1 %v11600_v37 }
0x102e   : >> { %v18377_v50 = vadd.f32 %v18319_v51, %v7333_v34 }
0x1030   : >> { %10656 = vmatprep.mubr.f32.mxu1 %v18377_v50  ;;  %11603 = vmatpush3.bf16.msra.mxu0 %v11600_v37 }
0x1031   : >> { %10657 = vmatmul.mubr.f32.gmra.mrb[150].mxu1 %v18380_v9 }
0x1032   : >> { %11675 = vmatpush3.bf16.msra.mxu1 %v11600_v37 }
0x1035   : >> { %v7244_v16 = vpop.xlane.xlu0 %7243 }
0x1036   : >> { %v7266_v14 = vmul.f32 0.0078125, %v7244_v16  ;;  %v7242_v26 = vpop.xlane.xlu1 %7241 }
0x1037   : >> { %v7265_v42 = vmul.f32 0.0078125, %v7242_v26 }
0x1038   : >> { %v7282_v46 = vadd.f32 1e-05, %v7266_v14 }
0x1039   : >> { %v7281_v45 = vadd.f32 1e-05, %v7265_v42 }
0x103a   : >> { %13071 = vrsqrt.f32 %v7282_v46 }
0x103b   : >> { %13073 = vrsqrt.f32 %v7281_v45 }
0x1044   : >> { %v13072_v23 = vpop.eup %13071 }
0x1045   : >> { %v13074_v11 = vpop.eup %13073  ;;  %v7314_v56 = vmul.f32 %v13072_v23, %v18274_v40 }
0x1046   : >> { %v7313_v38 = vmul.f32 %v13074_v11, %v18277_v48  ;;  %v8912_v11 = vld [vmem:[%s7382_s17] ss:$0 sm:$0xff] }
0x1047   : >> { %v7336_v49 = vmul.f32 %v18314_v32, %v7314_v56 }
0x1048   : >> { %v7335_v58 = vmul.f32 %v18314_v32, %v7313_v38 }
0x1049   : >> { %v18392_v53 = vadd.f32 %v18319_v51, %v7336_v49 }
0x104a   : >> { %v18389_v39 = vadd.f32 %v18319_v51, %v7335_v58 }
0x104c   : >> { %10659 = vmatprep.mubr.f32.mxu1 %v18389_v39 }
0x104d   : >> { %10660 = vmatmul.mubr.f32.gmra.mrb[152].mxu1 %v18392_v53 }
0x1051   : >> { %v7248_v44 = vpop.xlane.xlu0 %7247 }
0x1052   : >> { %v7268_v40 = vmul.f32 0.0078125, %v7248_v44  ;;  %v7246_v19 = vpop.xlane.xlu1 %7245 }
0x1053   : >> { %v7267_v43 = vmul.f32 0.0078125, %v7246_v19 }
0x1054   : >> { %v7284_v48 = vadd.f32 1e-05, %v7268_v40 }
0x1055   : >> { %v7283_v0 = vadd.f32 1e-05, %v7267_v43 }
0x1056   : >> { %13075 = vrsqrt.f32 %v7284_v48 }
0x1057   : >> { %13077 = vrsqrt.f32 %v7283_v0 }
0x1060   : >> { %v13076_v1 = vpop.eup %13075 }
0x1061   : >> { %v13078_v47 = vpop.eup %13077  ;;  %v7316_v61 = vmul.f32 %v13076_v1, %v18284_v62 }
0x1062   : >> { %v7315_v20 = vmul.f32 %v13078_v47, %v18287_v33 }
0x1063   : >> { %v7338_v63 = vmul.f32 %v18314_v32, %v7316_v61 }
0x1064   : >> { %v7337_v52 = vmul.f32 %v18314_v32, %v7315_v20 }
0x1065   : >> { %v18406_v13 = vadd.f32 %v18319_v51, %v7338_v63 }
0x1066   : >> { %v18403_v36 = vadd.f32 %v18319_v51, %v7337_v52 }
0x1068   : >> { %10662 = vmatprep.mubr.f32.mxu1 %v18403_v36 }
0x1069   : >> { %10663 = vmatmul.mubr.f32.gmra.mrb[154].mxu1 %v18406_v13 }
0x106d   : >> { %v7252_v62 = vpop.xlane.xlu0 %7251 }
0x106e   : >> { %v7270_v59 = vmul.f32 0.0078125, %v7252_v62  ;;  %v7250_v6 = vpop.xlane.xlu1 %7249 }
0x106f   : >> { %v7269_v33 = vmul.f32 0.0078125, %v7250_v6 }
0x1070   : >> { %v7286_v21 = vadd.f32 1e-05, %v7270_v59 }
0x1071   : >> { %v7285_v5 = vadd.f32 1e-05, %v7269_v33 }
0x1072   : >> { %13079 = vrsqrt.f32 %v7286_v21 }
0x1073   : >> { %13081 = vrsqrt.f32 %v7285_v5 }
0x107c   : >> { %v13080_v30 = vpop.eup %13079 }
0x107d   : >> { %v13082_v24 = vpop.eup %13081  ;;  %v7318_v35 = vmul.f32 %v13080_v30, %v18294_v57 }
0x107e   : >> { %v7317_v41 = vmul.f32 %v13082_v24, %v18297_v8 }
0x107f   : >> { %v7340_v18 = vmul.f32 %v18314_v32, %v7318_v35 }
0x1080   : >> { %v7256_v12 = vpop.xlane.xlu0 %7255  ;;  %v7339_v28 = vmul.f32 %v18314_v32, %v7317_v41 }
0x1081   : >> { %v7272_v2 = vmul.f32 0.0078125, %v7256_v12  ;;  %v7254_v15 = vpop.xlane.xlu1 %7253  ;;  %v18418_v29 = vadd.f32 %v18319_v51, %v7340_v18 }
0x1082   : >> { %v7271_v55 = vmul.f32 0.0078125, %v7254_v15  ;;  %v18415_v27 = vadd.f32 %v18319_v51, %v7339_v28 }
0x1083   : >> { %v7288_v34 = vadd.f32 1e-05, %v7272_v2 }
0x1084   : >> { %v7287_v16 = vadd.f32 1e-05, %v7271_v55  ;;  %10665 = vmatprep.mubr.f32.mxu1 %v18415_v27 }
0x1085   : >> { %13083 = vrsqrt.f32 %v7288_v34  ;;  %10666 = vmatmul.mubr.f32.gmra.mrb[156].mxu1 %v18418_v29 }
0x1086   : >> { %13085 = vrsqrt.f32 %v7287_v16 }
0x108f   : >> { %v13084_v57 = vpop.eup %13083 }
0x1090   : >> { %v13086_v8 = vpop.eup %13085  ;;  %v7320_v14 = vmul.f32 %v13084_v57, %v18304_v7 }
0x1091   : >> { %v7319_v26 = vmul.f32 %v13086_v8, %v18307_v17 }
0x1092   : >> { %v7342_v42 = vmul.f32 %v18314_v32, %v7320_v14 }
0x1093   : >> { %v7341_v46 = vmul.f32 %v18314_v32, %v7319_v26 }
0x1094   : >> { %v18430_v23 = vadd.f32 %v18319_v51, %v7342_v42 }
0x1095   : >> { %v18427_v45 = vadd.f32 %v18319_v51, %v7341_v46 }
0x1097   : >> { %10668 = vmatprep.mubr.f32.mxu1 %v18427_v45 }
0x1098   : >> { %10669 = vmatmul.mubr.f32.gmra.mrb[158].mxu1 %v18430_v23 }
0x10db   : >> { %v10649_v56 = vpop.f32.mrb[144].mxu1 }
0x10dc   : >> { %v7462_v7 = vadd.f32 %v10649_v56, %v8912_v11  ;;  %v7456_v38 = vpop.f32.mrb[145].mxu1 }
0x10dd   : >> { %v7457_v17 = vadd.f32 %v8912_v11, %v7456_v38 }
0x10de   : >> { %v7536_v44 = vmax.f32 %v7462_v7, 0.0  ;;  %v8913_v7 = vld [vmem:[%s7568_s29] ss:$0 sm:$0xff]  ;;  %s19987_s29 = sld [smem:[#allocation226_spill]] (%p18663_p5) }
0x10df   : >> { %v7535_v49 = vmax.f32 %v7457_v17, 0.0  ;;  %v10652_v58 = vpop.f32.mrb[146].mxu1 }
0x10e0   : >> { %v7472_v32 = vadd.f32 %v10652_v58, %v8912_v11  ;;  %v7466_v40 = vpop.f32.mrb[147].mxu1 }
0x10e1   : >> { %v7467_v19 = vadd.f32 %v8912_v11, %v7466_v40  ;;  %10703 = vmatprep.mubr.f32.mxu0 %v7535_v49 }
0x10e2   : >> { %10704 = vmatmul.mubr.f32.vlgmr.msra.gmra.mrb[176].mxu0 %v7536_v44  ;;  %v7538_v43 = vmax.f32 %v7472_v32, 0.0 }
0x10e3   : >> { %v7537_v51 = vmax.f32 %v7467_v19, 0.0 }
0x10e5   : >> { %10706 = vmatprep.mubr.f32.mxu0 %v7537_v51 }
0x10e6   : >> { %10707 = vmatmul.mubr.f32.gmra.mrb[178].mxu0 %v7538_v43 }
0x10e8   : >> { %v10655_v48 = vpop.f32.mrb[148].mxu1 }
0x10e9   : >> { %v7482_v0 = vadd.f32 %v10655_v48, %v8912_v11  ;;  %v7476_v10 = vpop.f32.mrb[149].mxu1 }
0x10ea   : >> { %v7477_v25 = vadd.f32 %v8912_v11, %v7476_v10 }
0x10eb   : >> { %v7540_v1 = vmax.f32 %v7482_v0, 0.0 }
0x10ec   : >> { %v7539_v37 = vmax.f32 %v7477_v25, 0.0 }
0x10ee   : >> { %10709 = vmatprep.mubr.f32.mxu0 %v7539_v37 }
0x10ef   : >> { %10710 = vmatmul.mubr.f32.gmra.mrb[180].mxu0 %v7540_v1 }
0x1104   : >> { %v10658_v47 = vpop.f32.mrb[150].mxu1 }
0x1105   : >> { %v7492_v61 = vadd.f32 %v10658_v47, %v8912_v11  ;;  %v7486_v20 = vpop.f32.mrb[151].mxu1 }
0x1106   : >> { %v7487_v63 = vadd.f32 %v8912_v11, %v7486_v20 }
0x1107   : >> { %v7542_v62 = vmax.f32 %v7492_v61, 0.0 }
0x1108   : >> { %v7541_v52 = vmax.f32 %v7487_v63, 0.0 }
0x110a   : >> { %10712 = vmatprep.mubr.f32.mxu0 %v7541_v52 }
0x110b   : >> { %10713 = vmatmul.mubr.f32.gmra.mrb[182].mxu0 %v7542_v62 }
0x1120   : >> { %v10661_v59 = vpop.f32.mrb[152].mxu1 }
0x1121   : >> { %v7502_v6 = vadd.f32 %v10661_v59, %v8912_v11  ;;  %v7496_v33 = vpop.f32.mrb[153].mxu1 }
0x1122   : >> { %v7497_v21 = vadd.f32 %v8912_v11, %v7496_v33 }
0x1123   : >> { %v7544_v30 = vmax.f32 %v7502_v6, 0.0 }
0x1124   : >> { %v7543_v5 = vmax.f32 %v7497_v21, 0.0 }
0x1126   : >> { %10715 = vmatprep.mubr.f32.mxu1 %v7543_v5 }
0x1127   : >> { %10716 = vmatmul.mubr.f32.vlgmr.msra.gmra.mrb[160].mxu1 %v7544_v30 }
0x113c   : >> { %v10664_v24 = vpop.f32.mrb[154].mxu1 }
0x113d   : >> { %v7512_v35 = vadd.f32 %v10664_v24, %v8912_v11  ;;  %v7506_v41 = vpop.f32.mrb[155].mxu1 }
0x113e   : >> { %v7507_v18 = vadd.f32 %v8912_v11, %v7506_v41 }
0x113f   : >> { %v7546_v28 = vmax.f32 %v7512_v35, 0.0 }
0x1140   : >> { %v7545_v12 = vmax.f32 %v7507_v18, 0.0 }
0x1142   : >> { %10718 = vmatprep.mubr.f32.mxu1 %v7545_v12 }
0x1143   : >> { %10719 = vmatmul.mubr.f32.gmra.mrb[162].mxu1 %v7546_v28 }
0x1158   : >> { %v10667_v2 = vpop.f32.mrb[156].mxu1 }
0x1159   : >> { %v7522_v15 = vadd.f32 %v10667_v2, %v8912_v11  ;;  %v7516_v55 = vpop.f32.mrb[157].mxu1 }
0x115a   : >> { %v7517_v34 = vadd.f32 %v8912_v11, %v7516_v55 }
0x115b   : >> { %v7548_v57 = vmax.f32 %v7522_v15, 0.0 }
0x115c   : >> { %v7547_v16 = vmax.f32 %v7517_v34, 0.0 }
0x115e   : >> { %10721 = vmatprep.mubr.f32.mxu1 %v7547_v16 }
0x115f   : >> { %10722 = vmatmul.mubr.f32.gmra.mrb[164].mxu1 %v7548_v57 }
0x116b   : >> { %v10670_v8 = vpop.f32.mrb[158].mxu1 }
0x116c   : >> { %v7532_v14 = vadd.f32 %v10670_v8, %v8912_v11  ;;  %v7526_v26 = vpop.f32.mrb[159].mxu1 }
0x116d   : >> { %v7527_v42 = vadd.f32 %v8912_v11, %v7526_v26 }
0x116e   : >> { %v7550_v56 = vmax.f32 %v7532_v14, 0.0 }
0x116f   : >> { %v7549_v46 = vmax.f32 %v7527_v42, 0.0 }
0x1171   : >> { %10724 = vmatprep.mubr.f32.mxu1 %v7549_v46 }
0x1172   : >> { %10725 = vmatmul.mubr.f32.gmra.mrb[166].mxu1 %v7550_v56 }
0x11b5   : >> { %v10705_v38 = vpop.f32.mrb[176].mxu0 }
0x11b6   : >> { %v7648_v17 = vadd.f32 %v10705_v38, %v8913_v7  ;;  %v7642_v49 = vpop.f32.mrb[177].mxu0 }
0x11b7   : >> { %v7643_v58 = vadd.f32 %v8913_v7, %v7642_v49 }
0x11b8   : >> { %v7722_v44 = vadd.f32 %v7648_v17, %v18329_v60 }
0x11b9   : >> { %v18438_v32 = vadd.f32 %v7643_v58, %v18325_v3  ;;  %v10708_v40 = vpop.f32.mrb[178].mxu0 }
0x11ba   : >> { %v7658_v19 = vadd.f32 %v10708_v40, %v8913_v7  ;;  %7743 = vadd.xlane.f32.xlu0 %v7722_v44  ;;  %v7652_v51 = vpop.f32.mrb[179].mxu0 }
0x11bb   : >> { %v7653_v11 = vadd.f32 %v8913_v7, %v7652_v51  ;;  %7741 = vadd.xlane.f32.xlu1 %v18438_v32 }
0x11bc   : >> { %v18442_v43 = vadd.f32 %v7658_v19, %v18339_v54 }
0x11bd   : >> { %v18445_v48 = vadd.f32 %v7653_v11, %v18336_v4 }
0x11be   : >> { %7747 = vadd.xlane.f32.xlu0 %v18442_v43 }
0x11bf   : >> { %7745 = vadd.xlane.f32.xlu1 %v18445_v48 }
0x11c2   : >> { %v10711_v60 = vpop.f32.mrb[180].mxu0 }
0x11c3   : >> { %v7668_v3 = vadd.f32 %v10711_v60, %v8913_v7  ;;  %v7662_v0 = vpop.f32.mrb[181].mxu0 }
0x11c4   : >> { %v7663_v10 = vadd.f32 %v8913_v7, %v7662_v0 }
0x11c5   : >> { %v18450_v25 = vadd.f32 %v7668_v3, %v18351_v22 }
0x11c6   : >> { %v18453_v37 = vadd.f32 %v7663_v10, %v18348_v31 }
0x11c7   : >> { %7751 = vadd.xlane.f32.xlu0 %v18450_v25 }
0x11c8   : >> { %7749 = vadd.xlane.f32.xlu1 %v18453_v37 }
0x11de   : >> { %v10714_v4 = vpop.f32.mrb[182].mxu0 }
0x11df   : >> { %v7678_v54 = vadd.f32 %v10714_v4, %v8913_v7  ;;  %v7672_v1 = vpop.f32.mrb[183].mxu0 }
0x11e0   : >> { %v7673_v47 = vadd.f32 %v8913_v7, %v7672_v1 }
0x11e1   : >> { %v18458_v61 = vadd.f32 %v7678_v54, %v18380_v9 }
0x11e2   : >> { %v18461_v20 = vadd.f32 %v7673_v47, %v18377_v50 }
0x11e3   : >> { %7755 = vadd.xlane.f32.xlu0 %v18458_v61 }
0x11e4   : >> { %7753 = vadd.xlane.f32.xlu1 %v18461_v20 }
0x11fa   : >> { %v10717_v31 = vpop.f32.mrb[160].mxu1 }
0x11fb   : >> { %v7688_v22 = vadd.f32 %v10717_v31, %v8913_v7  ;;  %v7682_v63 = vpop.f32.mrb[161].mxu1 }
0x11fc   : >> { %v7683_v52 = vadd.f32 %v8913_v7, %v7682_v63 }
0x11fd   : >> { %v18466_v62 = vadd.f32 %v7688_v22, %v18392_v53 }
0x11fe   : >> { %v18469_v59 = vadd.f32 %v7683_v52, %v18389_v39 }
0x11ff   : >> { %7759 = vadd.xlane.f32.xlu0 %v18466_v62 }
0x1200   : >> { %7757 = vadd.xlane.f32.xlu1 %v18469_v59 }
0x1216   : >> { %v10720_v50 = vpop.f32.mrb[162].mxu1 }
0x1217   : >> { %v7698_v9 = vadd.f32 %v10720_v50, %v8913_v7  ;;  %v7692_v6 = vpop.f32.mrb[163].mxu1 }
0x1218   : >> { %v7693_v33 = vadd.f32 %v8913_v7, %v7692_v6 }
0x1219   : >> { %v18474_v21 = vadd.f32 %v7698_v9, %v18406_v13 }
0x121a   : >> { %v18477_v5 = vadd.f32 %v7693_v33, %v18403_v36 }
0x121b   : >> { %7763 = vadd.xlane.f32.xlu0 %v18474_v21 }
0x121c   : >> { %7761 = vadd.xlane.f32.xlu1 %v18477_v5 }
0x1232   : >> { %v10723_v39 = vpop.f32.mrb[164].mxu1 }
0x1233   : >> { %v7708_v53 = vadd.f32 %v10723_v39, %v8913_v7  ;;  %v7702_v30 = vpop.f32.mrb[165].mxu1 }
0x1234   : >> { %v7703_v24 = vadd.f32 %v8913_v7, %v7702_v30 }
0x1235   : >> { %v18482_v35 = vadd.f32 %v7708_v53, %v18418_v29 }
0x1236   : >> { %v18485_v41 = vadd.f32 %v7703_v24, %v18415_v27 }
0x1237   : >> { %7767 = vadd.xlane.f32.xlu0 %v18482_v35 }
0x1238   : >> { %7765 = vadd.xlane.f32.xlu1 %v18485_v41 }
0x1245   : >> { %v10726_v36 = vpop.f32.mrb[166].mxu1 }
0x1246   : >> { %v7718_v13 = vadd.f32 %v10726_v36, %v8913_v7  ;;  %v7712_v18 = vpop.f32.mrb[167].mxu1 }
0x1247   : >> { %v7713_v12 = vadd.f32 %v8913_v7, %v7712_v18  ;;  %v7744_v28 = vpop.xlane.xlu0 %7743 }
0x1248   : >> { %v18490_v2 = vadd.f32 %v7718_v13, %v18430_v23  ;;  %v7774_v15 = vmul.f32 0.0078125, %v7744_v28  ;;  %v7742_v55 = vpop.xlane.xlu1 %7741 }
0x1249   : >> { %v18493_v29 = vadd.f32 %v7713_v12, %v18427_v45  ;;  %v7773_v34 = vmul.f32 0.0078125, %v7742_v55 }
0x124a   : >> { %v18495_v27 = vsub.f32 %v7722_v44, %v7774_v15  ;;  %7771 = vadd.xlane.f32.xlu0 %v18490_v2 }
0x124b   : >> { %v18499_v16 = vsub.f32 %v18438_v32, %v7773_v34  ;;  %7769 = vadd.xlane.f32.xlu1 %v18493_v29  ;;  %v7748_v57 = vpop.xlane.xlu0 %7747 }
0x124c   : >> { %v7776_v8 = vmul.f32 0.0078125, %v7748_v57  ;;  %v7746_v14 = vpop.xlane.xlu1 %7745  ;;  %v7806_v23 = vmul.f32 %v18495_v27, %v18495_v27 }
0x124d   : >> { %v7775_v26 = vmul.f32 0.0078125, %v7746_v14  ;;  %v7805_v45 = vmul.f32 %v18499_v16, %v18499_v16 }
0x124e   : >> { %v18507_v42 = vsub.f32 %v18442_v43, %v7776_v8  ;;  %7823 = vadd.xlane.f32.xlu0 %v7806_v23 }
0x124f   : >> { %v18510_v46 = vsub.f32 %v18445_v48, %v7775_v26  ;;  %7821 = vadd.xlane.f32.xlu1 %v7805_v45 }
0x1250   : >> { %v7808_v56 = vmul.f32 %v18507_v42, %v18507_v42 }
0x1251   : >> { %v7807_v7 = vmul.f32 %v18510_v46, %v18510_v46 }
0x1252   : >> { %7827 = vadd.xlane.f32.xlu0 %v7808_v56 }
0x1253   : >> { %7825 = vadd.xlane.f32.xlu1 %v7807_v7 }
0x1254   : >> { %v7752_v38 = vpop.xlane.xlu0 %7751 }
0x1255   : >> { %v7778_v17 = vmul.f32 0.0078125, %v7752_v38  ;;  %v7750_v49 = vpop.xlane.xlu1 %7749 }
0x1256   : >> { %v7777_v58 = vmul.f32 0.0078125, %v7750_v49 }
0x1257   : >> { %v18517_v44 = vsub.f32 %v18450_v25, %v7778_v17 }
0x1258   : >> { %v18520_v32 = vsub.f32 %v18453_v37, %v7777_v58 }
0x1259   : >> { %v7810_v40 = vmul.f32 %v18517_v44, %v18517_v44 }
0x125a   : >> { %v7809_v19 = vmul.f32 %v18520_v32, %v18520_v32 }
0x125b   : >> { %7831 = vadd.xlane.f32.xlu0 %v7810_v40  ;;  %v18577_v40 = vld [vmem:[%s7737_s19] ss:$0 sm:$0xff]  ;;  %s18793_s19 = scalar_lea.hbm (%p18663_p5), %s19987_s29, %s8921_s4 }
0x125c   : >> { %7829 = vadd.xlane.f32.xlu1 %v7809_v19 }
0x1270   : >> { %v7756_v51 = vpop.xlane.xlu0 %7755 }
0x1271   : >> { %v7780_v11 = vmul.f32 0.0078125, %v7756_v51  ;;  %v7754_v43 = vpop.xlane.xlu1 %7753 }
0x1272   : >> { %v7779_v48 = vmul.f32 0.0078125, %v7754_v43 }
0x1273   : >> { %v18527_v60 = vsub.f32 %v18458_v61, %v7780_v11 }
0x1274   : >> { %v18530_v3 = vsub.f32 %v18461_v20, %v7779_v48  ;;  %v18581_v48 = vld [vmem:[%s7739_s5] ss:$0 sm:$0xff]  ;;  %s19984_s5 = sld [smem:[#allocation224_spill]] (%p18663_p5) }
0x1275   : >> { %v7812_v0 = vmul.f32 %v18527_v60, %v18527_v60 }
0x1276   : >> { %v7811_v10 = vmul.f32 %v18530_v3, %v18530_v3 }
0x1277   : >> { %7835 = vadd.xlane.f32.xlu0 %v7812_v0 }
0x1278   : >> { %7833 = vadd.xlane.f32.xlu1 %v7811_v10 }
0x128c   : >> { %v7760_v25 = vpop.xlane.xlu0 %7759 }
0x128d   : >> { %v7782_v37 = vmul.f32 0.0078125, %v7760_v25  ;;  %v7758_v4 = vpop.xlane.xlu1 %7757 }
0x128e   : >> { %v7781_v54 = vmul.f32 0.0078125, %v7758_v4 }
0x128f   : >> { %v18537_v1 = vsub.f32 %v18466_v62, %v7782_v37 }
0x1290   : >> { %v18540_v47 = vsub.f32 %v18469_v59, %v7781_v54 }
0x1291   : >> { %v7814_v61 = vmul.f32 %v18537_v1, %v18537_v1 }
0x1292   : >> { %v7813_v20 = vmul.f32 %v18540_v47, %v18540_v47 }
0x1293   : >> { %7839 = vadd.xlane.f32.xlu0 %v7814_v61 }
0x1294   : >> { %7837 = vadd.xlane.f32.xlu1 %v7813_v20 }
0x12a8   : >> { %v7764_v31 = vpop.xlane.xlu0 %7763 }
0x12a9   : >> { %v7784_v22 = vmul.f32 0.0078125, %v7764_v31  ;;  %v7762_v63 = vpop.xlane.xlu1 %7761 }
0x12aa   : >> { %v7783_v52 = vmul.f32 0.0078125, %v7762_v63 }
0x12ab   : >> { %v18547_v50 = vsub.f32 %v18474_v21, %v7784_v22 }
0x12ac   : >> { %v18550_v62 = vsub.f32 %v18477_v5, %v7783_v52 }
0x12ad   : >> { %v7816_v59 = vmul.f32 %v18547_v50, %v18547_v50 }
0x12ae   : >> { %v7815_v9 = vmul.f32 %v18550_v62, %v18550_v62 }
0x12af   : >> { %7843 = vadd.xlane.f32.xlu0 %v7816_v59 }
0x12b0   : >> { %7841 = vadd.xlane.f32.xlu1 %v7815_v9 }
0x12c4   : >> { %v7768_v6 = vpop.xlane.xlu0 %7767 }
0x12c5   : >> { %v7786_v33 = vmul.f32 0.0078125, %v7768_v6  ;;  %v7766_v39 = vpop.xlane.xlu1 %7765 }
0x12c6   : >> { %v7785_v53 = vmul.f32 0.0078125, %v7766_v39 }
0x12c7   : >> { %v18557_v30 = vsub.f32 %v18482_v35, %v7786_v33 }
0x12c8   : >> { %v18560_v21 = vsub.f32 %v18485_v41, %v7785_v53 }
0x12c9   : >> { %v7818_v5 = vmul.f32 %v18557_v30, %v18557_v30 }
0x12ca   : >> { %v7817_v24 = vmul.f32 %v18560_v21, %v18560_v21 }
0x12cb   : >> { %7847 = vadd.xlane.f32.xlu0 %v7818_v5 }
0x12cc   : >> { %7845 = vadd.xlane.f32.xlu1 %v7817_v24 }
0x12d7   : >> { %v7772_v36 = vpop.xlane.xlu0 %7771 }
0x12d8   : >> { %v7788_v13 = vmul.f32 0.0078125, %v7772_v36  ;;  %v7770_v18 = vpop.xlane.xlu1 %7769 }
0x12d9   : >> { %v7787_v12 = vmul.f32 0.0078125, %v7770_v18 }
0x12da   : >> { %v18567_v28 = vsub.f32 %v18490_v2, %v7788_v13 }
0x12db   : >> { %v18570_v35 = vsub.f32 %v18493_v29, %v7787_v12  ;;  %v7824_v41 = vpop.xlane.xlu0 %7823 }
0x12dc   : >> { %v7854_v15 = vmul.f32 0.0078125, %v7824_v41  ;;  %v7822_v55 = vpop.xlane.xlu1 %7821  ;;  %v7820_v34 = vmul.f32 %v18567_v28, %v18567_v28 }
0x12dd   : >> { %v7853_v57 = vmul.f32 0.0078125, %v7822_v55  ;;  %v7819_v8 = vmul.f32 %v18570_v35, %v18570_v35 }
0x12de   : >> { %v7870_v14 = vadd.f32 1e-05, %v7854_v15  ;;  %7851 = vadd.xlane.f32.xlu0 %v7820_v34 }
0x12df   : >> { %v7869_v23 = vadd.f32 1e-05, %v7853_v57  ;;  %7849 = vadd.xlane.f32.xlu1 %v7819_v8  ;;  %v7828_v2 = vpop.xlane.xlu0 %7827 }
0x12e0   : >> { %13087 = vrsqrt.f32 %v7870_v14  ;;  %v7856_v26 = vmul.f32 0.0078125, %v7828_v2  ;;  %v7826_v29 = vpop.xlane.xlu1 %7825 }
0x12e1   : >> { %13089 = vrsqrt.f32 %v7869_v23  ;;  %v7855_v45 = vmul.f32 0.0078125, %v7826_v29 }
0x12e2   : >> { %v7872_v56 = vadd.f32 1e-05, %v7856_v26 }
0x12e3   : >> { %v7871_v7 = vadd.f32 1e-05, %v7855_v45 }
0x12e4   : >> { %13091 = vrsqrt.f32 %v7872_v56 }
0x12e5   : >> { %13093 = vrsqrt.f32 %v7871_v7 }
0x12e8   : >> { %v7832_v38 = vpop.xlane.xlu0 %7831 }
0x12e9   : >> { %v7858_v17 = vmul.f32 0.0078125, %v7832_v38  ;;  %v7830_v49 = vpop.xlane.xlu1 %7829 }
0x12ea   : >> { %v13088_v58 = vpop.eup %13087  ;;  %v7857_v19 = vmul.f32 0.0078125, %v7830_v49 }
0x12eb   : >> { %v13090_v51 = vpop.eup %13089  ;;  %v7902_v11 = vmul.f32 %v13088_v58, %v18495_v27  ;;  %v7874_v43 = vadd.f32 1e-05, %v7858_v17 }
0x12ec   : >> { %v7901_v0 = vmul.f32 %v13090_v51, %v18499_v16  ;;  %v7873_v10 = vadd.f32 1e-05, %v7857_v19 }
0x12ed   : >> { %v7924_v25 = vmul.f32 %v18577_v40, %v7902_v11  ;;  %13095 = vrsqrt.f32 %v7874_v43 }
0x12ee   : >> { %v13092_v37 = vpop.eup %13091  ;;  %v7923_v4 = vmul.f32 %v18577_v40, %v7901_v0  ;;  %13097 = vrsqrt.f32 %v7873_v10 }
0x12ef   : >> { %v13094_v54 = vpop.eup %13093  ;;  %v18587_v10 = vadd.f32 %v18581_v48, %v7924_v25   ;;  %v7904_v27 = vmul.f32 %v13092_v37, %v18507_v42 }
0x12f0   : >> { %v18591_v57 = vadd.f32 %v18581_v48, %v7923_v4   ;;  %v7903_v31 = vmul.f32 %v13094_v54, %v18510_v46 }
0x12f1   : >> { %v19948_v61 = vmov %v18587_v10  ;;  %v7926_v16 = vmul.f32 %v18577_v40, %v7904_v27 }
0x12f2   : >> { %v19949_v20 = vmov %v18591_v57  ;;  %v7925_v22 = vmul.f32 %v18577_v40, %v7903_v31 }
0x12f3   : >> { %v18597_v46 = vadd.f32 %v18581_v48, %v7926_v16  }
0x12f4   : >> { %v18600_v33 = vadd.f32 %v18581_v48, %v7925_v22  }
0x12f5   : >> { %v19950_v63 = vmov %v18597_v46 }
0x12f6   : >> { %v19951_v52 = vmov %v18600_v33 }
0x12f7   : >> { %v13096_v59 = vpop.eup %13095 }
0x12f8   : >> { %v13098_v9 = vpop.eup %13097  ;;  %v7906_v6 = vmul.f32 %v13096_v59, %v18517_v44 }
0x12f9   : >> { %v7905_v42 = vmul.f32 %v13098_v9, %v18520_v32 }
0x12fa   : >> { %v7928_v39 = vmul.f32 %v18577_v40, %v7906_v6 }
0x12fb   : >> { %v7927_v53 = vmul.f32 %v18577_v40, %v7905_v42 }
0x12fc   : >> { %v18607_v26 = vadd.f32 %v18581_v48, %v7928_v39  }
0x12fd   : >> { %v18610_v24 = vadd.f32 %v18581_v48, %v7927_v53  }
0x12fe   : >> { %v19952_v5 = vmov %v18607_v26 }
0x12ff   : >> { %v19953_v36 = vmov %v18610_v24 }
0x1304   : >> { %v7836_v46 = vpop.xlane.xlu0 %7835 }
0x1305   : >> { %v7860_v13 = vmul.f32 0.0078125, %v7836_v46  ;;  %v7834_v18 = vpop.xlane.xlu1 %7833 }
0x1306   : >> { %v7859_v33 = vmul.f32 0.0078125, %v7834_v18 }
0x1307   : >> { %v7876_v12 = vadd.f32 1e-05, %v7860_v13 }
0x1308   : >> { %v7875_v41 = vadd.f32 1e-05, %v7859_v33 }
0x1309   : >> { %13099 = vrsqrt.f32 %v7876_v12 }
0x130a   : >> { %13101 = vrsqrt.f32 %v7875_v41 }
0x1313   : >> { %v13100_v44 = vpop.eup %13099 }
0x1314   : >> { %v13102_v32 = vpop.eup %13101  ;;  %v7908_v15 = vmul.f32 %v13100_v44, %v18527_v60 }
0x1315   : >> { %v7907_v55 = vmul.f32 %v13102_v32, %v18530_v3 }
0x1316   : >> { %v7930_v34 = vmul.f32 %v18577_v40, %v7908_v15 }
0x1317   : >> { %v7929_v57 = vmul.f32 %v18577_v40, %v7907_v55 }
0x1318   : >> { %v18617_v39 = vadd.f32 %v18581_v48, %v7930_v34  }
0x1319   : >> { %v18620_v32 = vadd.f32 %v18581_v48, %v7929_v57  }
0x131a   : >> { %v19954_v8 = vmov %v18617_v39 }
0x131b   : >> { %v19955_v14 = vmov %v18620_v32 }
0x1320   : >> { %v7840_v23 = vpop.xlane.xlu0 %7839 }
0x1321   : >> { %v7862_v2 = vmul.f32 0.0078125, %v7840_v23  ;;  %v7838_v26 = vpop.xlane.xlu1 %7837 }
0x1322   : >> { %v7861_v29 = vmul.f32 0.0078125, %v7838_v26 }
0x1323   : >> { %v7878_v45 = vadd.f32 1e-05, %v7862_v2 }
0x1324   : >> { %v7877_v56 = vadd.f32 1e-05, %v7861_v29 }
0x1325   : >> { %13103 = vrsqrt.f32 %v7878_v45 }
0x1326   : >> { %13105 = vrsqrt.f32 %v7877_v56  ;;  %v7969_v56 = vld [vmem:[%s19981_s18] sm:$0xff] (%p18663_p5) }
0x132f   : >> { %v13104_v60 = vpop.eup %13103 }
0x1330   : >> { %v13106_v3 = vpop.eup %13105  ;;  %v7910_v7 = vmul.f32 %v13104_v60, %v18537_v1  ;;  %v13680_v60 = vmov (%p18663_p5), 0  }
0x1331   : >> { %v7909_v38 = vmul.f32 %v13106_v3, %v18540_v47  ;;  %13120 = vset.pattern.permute.xlu0 (%p18663_p5), %v13680_v60  ;;  %v7971_v3 = vld [vmem:[%s19981_s18 + $0x10] sm:$0xff] (%p18663_p5)  ;;  %13121 = vset.pattern.permute.xlu1 (%p18663_p5), %v13680_v60 }
0x1332   : >> { %v7932_v17 = vmul.f32 %v18577_v40, %v7910_v7  ;;  %7979 = vperm.xlu0 (%p18663_p5), %13120, %v7969_v56   ;;  %7989 = vperm.xlu1 (%p18663_p5), %13121, %v7971_v3   ;;  %v8150_v7 = vld [vmem:[%s19982_s2] sm:$0xff] (%p18663_p5) }
0x1333   : >> { %v7931_v49 = vmul.f32 %v18577_v40, %v7909_v38  ;;  %v8151_v38 = vld [vmem:[%s19983_s24 + $0x8] sm:$0xff] (%p18663_p5) }
0x1334   : >> { %v18627_v11 = vadd.f32 %v18581_v48, %v7932_v17   ;;  %v8152_v17 = vld [vmem:[%s19983_s24 + $0x10] sm:$0xff] (%p18663_p5) }
0x1335   : >> { %v18630_v58 = vadd.f32 %v18581_v48, %v7931_v49  }
0x1336   : >> { %v19956_v19 = vmov %v18627_v11 }
0x1337   : >> { %v19957_v51 = vmov %v18630_v58 }
0x133c   : >> { %v7844_v43 = vpop.xlane.xlu0 %7843 }
0x133d   : >> { %v7864_v0 = vmul.f32 0.0078125, %v7844_v43  ;;  %v7842_v10 = vpop.xlane.xlu1 %7841 }
0x133e   : >> { %v7863_v25 = vmul.f32 0.0078125, %v7842_v10  ;;  %v19979_v10 = vmov %v19948_v61 }
0x133f   : >> { %v7880_v37 = vadd.f32 1e-05, %v7864_v0  ;;  %v7964_v10 = vld [vmem:[#allocation18 + $0x18] sm:$0xff] (%p18663_p5) }
0x1340   : >> { %v7879_v4 = vadd.f32 1e-05, %v7863_v25  ;;  %v7965_v25 = vld [vmem:[#allocation18 + $0x20] sm:$0xff] (%p18663_p5) }
0x1341   : >> { %13107 = vrsqrt.f32 %v7880_v37  ;;  %v7966_v37 = vld [vmem:[#allocation18 + $0x28] sm:$0xff] (%p18663_p5) }
0x1342   : >> { %13109 = vrsqrt.f32 %v7879_v4  ;;  %v7967_v4 = vld [vmem:[#allocation18 + $0x30] sm:$0xff] (%p18663_p5) }
0x134b   : >> { %v13108_v1 = vpop.eup %13107 }
0x134c   : >> { %v13110_v47 = vpop.eup %13109  ;;  %v7912_v54 = vmul.f32 %v13108_v1, %v18547_v50  ;;  %v19976_v1 = vmov %v19953_v36 }
0x134d   : >> { %v7911_v27 = vmul.f32 %v13110_v47, %v18550_v62  ;;  %v7968_v1 = vld [vmem:[#allocation18 + $0x38] sm:$0xff] (%p18663_p5) }
0x134e   : >> { %v7934_v31 = vmul.f32 %v18577_v40, %v7912_v54 }
0x134f   : >> { %v7933_v11 = vmul.f32 %v18577_v40, %v7911_v27 }
0x1350   : >> { %v18637_v47 = vadd.f32 %v18581_v48, %v7934_v31  }
0x1351   : >> { %v18640_v34 = vadd.f32 %v18581_v48, %v7933_v11   ;;  %v19971_v11 = vmov %v19956_v19 }
0x1352   : >> { %v19958_v16 = vmov %v18637_v47 }
0x1353   : >> { %v19959_v22 = vmov %v18640_v34  ;;  %v19969_v47 = vmov %v19958_v16 }
0x1354   : > { %v11624_v49 = vpack.c.bf16 (%p18663_p5), %v19958_v16, %v19959_v22  ;;  %v8146_v47 = vld [vmem:[%s19984_s5] sm:$0xff] (%p18663_p5) }
0x1355   : > { %10787 = vmatprep.mubr.msk.f32.mxu1 (%p18663_p5), %vm8174_vm11, %v8146_v47 }
0x1358   : >> { %v7848_v58 = vpop.xlane.xlu0 %7847 }
0x1359   : >> { %v7866_v59 = vmul.f32 0.0078125, %v7848_v58  ;;  %v7846_v9 = vpop.xlane.xlu1 %7845  ;;  %v19972_v58 = vmov %v19957_v51 }
0x135a   : >> { %v7865_v6 = vmul.f32 0.0078125, %v7846_v9 }
0x135b   : >> { %v7882_v42 = vadd.f32 1e-05, %v7866_v59 }
0x135c   : >> { %v7881_v39 = vadd.f32 1e-05, %v7865_v6 }
0x135d   : >> { %13111 = vrsqrt.f32 %v7882_v42 }
0x135e   : >> { %13113 = vrsqrt.f32 %v7881_v39  ;;  %v19973_v39 = vmov %v19954_v8 }
0x1367   : >> { %v13112_v50 = vpop.eup %13111 }
0x1368   : >> { %v13114_v62 = vpop.eup %13113  ;;  %v7914_v53 = vmul.f32 %v13112_v50, %v18557_v30 }
0x1369   : >> { %v7913_v24 = vmul.f32 %v13114_v62, %v18560_v21 }
0x136a   : >> { %v7936_v46 = vmul.f32 %v18577_v40, %v7914_v53 }
0x136b   : >> { %v7935_v13 = vmul.f32 %v18577_v40, %v7913_v24  ;;  %v7852_v18 = vpop.xlane.xlu0 %7851 }
0x136c   : >> { %v18647_v27 = vadd.f32 %v18581_v48, %v7936_v46   ;;  %v7868_v33 = vmul.f32 0.0078125, %v7852_v18  ;;  %v7850_v41 = vpop.xlane.xlu1 %7849  ;;  %v19977_v46 = vmov %v19950_v63 }
0x136d   : >> { %v18650_v2 = vadd.f32 %v18581_v48, %v7935_v13   ;;  %v7867_v32 = vmul.f32 0.0078125, %v7850_v41 }
0x136e   : >> { %v19960_v12 = vmov %v18647_v27  ;;  %v7884_v15 = vadd.f32 1e-05, %v7868_v33  ;;  %v19978_v33 = vmov %v19951_v52 }
0x136f   : >> { %v19961_v44 = vmov %v18650_v2  ;;  %v7883_v55 = vadd.f32 1e-05, %v7867_v32  ;;  %v19967_v27 = vmov %v19960_v12  ;;  %v19974_v32 = vmov %v19955_v14 }
0x1370   : >> { %13115 = vrsqrt.f32 %v7884_v15  ;;  %v19968_v2 = vmov %v19961_v44  ;;  %v11628_v43 = vpack.c.bf16 (%p18663_p5), %v19960_v12, %v19961_v44 }
0x1371   : >> { %13117 = vrsqrt.f32 %v7883_v55  ;;  %v7975_v2 = vld [vmem:[%s19981_s18 + $0x30] sm:$0xff] (%p18663_p5) }
0x137a   : >> { %v13116_v30 = vpop.eup %13115 }
0x137b   : >> { %v13118_v21 = vpop.eup %13117  ;;  %v7916_v34 = vmul.f32 %v13116_v30, %v18567_v28  ;;  %v11604_v28 = vpack.c.bf16 (%p18663_p5), %v19948_v61, %v19949_v20  ;;  %v7972_v61 = vld [vmem:[%s19981_s18 + $0x18] sm:$0xff] (%p18663_p5) }
0x137c   : >> { %v7915_v57 = vmul.f32 %v13118_v21, %v18570_v35  ;;  %v11608_v35 = vpack.c.bf16 (%p18663_p5), %v19950_v63, %v19951_v52  ;;  %v7973_v63 = vld [vmem:[%s19981_s18 + $0x20] sm:$0xff] (%p18663_p5)  ;;  %7994 = vperm.xlu1 (%p18663_p5), %13121, %v7972_v61   ;;  %v7974_v52 = vld [vmem:[%s19981_s18 + $0x28] sm:$0xff] (%p18663_p5) }
0x137d   : >> { %v7938_v23 = vmul.f32 %v18577_v40, %v7916_v34  ;;  %v19970_v34 = vmov %v19959_v22  ;;  %1143 = sbr.rel (!%p18663_p5) target bundleno = 590 (0x24e), region = 203  ;;  %11605 = vmatprep.subr.bf16.mxu0 (%p18663_p5), %v11604_v28 }
0x137e   : >> { %v7937_v26 = vmul.f32 %v18577_v40, %v7915_v57  ;;  %v19980_v57 = vmov %v19949_v20  ;;  %11607 = vmatpush3.bf16.xpose.msra.mxu0 (%p18663_p5), %v11604_v28  ;;  %v11612_v20 = vpack.c.bf16 (%p18663_p5), %v19952_v5, %v19953_v36  ;;  %v11616_v36 = vpack.c.bf16 (%p18663_p5), %v19954_v8, %v19955_v14  ;;  %v8153_v8 = vld [vmem:[%s19983_s24 + $0x18] sm:$0xff] (%p18663_p5) }
0x137f   : >> { %v18657_v40 = vadd.f32 %v18581_v48, %v7938_v23   ;;  %11609 = vmatprep.subr.bf16.mxu0 (%p18663_p5), %v11608_v35  ;;  %v11620_v14 = vpack.c.bf16 (%p18663_p5), %v19956_v19, %v19957_v51  ;;  %v7962_v19 = vld [vmem:[#allocation18 + $0x8] sm:$0xff] (%p18663_p5)  ;;  %v7963_v51 = vld [vmem:[#allocation18 + $0x10] sm:$0xff] (%p18663_p5) }
0x1380   : >> { %v18660_v24 = vadd.f32 %v18581_v48, %v7937_v26   ;;  %v19975_v26 = vmov %v19952_v5  ;;  %v7961_v48 = vld [vmem:[#allocation18] sm:$0xff] (%p18663_p5)  ;;  %8004 = vperm.xlu1 (%p18663_p5), %13121, %v7974_v52   ;;  %v7976_v5 = vld [vmem:[%s19981_s18 + $0x38] sm:$0xff] (%p18663_p5) }
0x1381   : >> { %v19962_v29 = vmov %v18657_v40  ;;  %10759 = vmatprep.mubr.f32.mxu0 (%p18663_p5), %v7961_v48  ;;  %v8147_v52 = vld [vmem:[%s19984_s5 + $0x8] sm:$0xff] (%p18663_p5) }
0x1382   : >> { %v19963_v45 = vmov %v18660_v24  ;;  %v19965_v40 = vmov %v19962_v29 }
0x1383   : >> { %v19966_v24 = vmov %v19963_v45  ;;  %v7970_v40 = vld [vmem:[%s19981_s18 + $0x8] sm:$0xff] (%p18663_p5)  ;;  %v11632_v0 = vpack.c.bf16 (%p18663_p5), %v19962_v29, %v19963_v45 }
0x1384   : > { %7984 = vperm.xlu0 %13120, %v7970_v40   ;;  %8014 = vperm.xlu1 %13121, %v7976_v5   ;;  %v8149_v5 = vld [vmem:[%s19984_s5 + $0x18] sm:$0xff] }
0x1386   : > { %11611 = vmatpush3.bf16.xpose.msra.mxu0 %v11608_v35 }
0x1387   : > { %11613 = vmatprep.subr.bf16.mxu0 %v11612_v20 }
0x1388   : > { %7999 = vperm.xlu0 %13120, %v7973_v63   ;;  %8161 = vperm.xlu1 %13121, %v8151_v38  }
0x138c   : > { %8009 = vperm.xlu0 %13120, %v7975_v2   ;;  %8171 = vperm.xlu1 %13121, %v8153_v8   ;;  %v8148_v2 = vld [vmem:[%s19984_s5 + $0x10] sm:$0xff] }
0x138e   : > { %11615 = vmatpush3.bf16.xpose.msra.mxu0 %v11612_v20 }
0x138f   : > { %11617 = vmatprep.subr.bf16.mxu0 %v11616_v36 }
0x1390   : > { %8156 = vperm.xlu0 %13120, %v8150_v7   ;;  %v19985_v7 = vmov 0.0  }
0x1394   : > { %8166 = vperm.xlu0 %13120, %v8152_v17  }
0x1396   : > { %11619 = vmatpush3.bf16.xpose.msra.mxu0 %v11616_v36  ;;  %v13681_v36 = vmov 0.0|0.0  }
0x1397   : > { %11621 = vmatprep.subr.bf16.mxu0 %v11620_v14 }
0x139e   : > { %11623 = vmatpush3.bf16.xpose.msra.mxu0 %v11620_v14 }
0x139f   : > { %11625 = vmatprep.subr.bf16.mxu0 %v11624_v49 }
0x13a6   : > { %11627 = vmatpush3.bf16.xpose.msra.mxu0 %v11624_v49 }
0x13a7   : > { %11629 = vmatprep.subr.bf16.mxu0 %v11628_v43 }
0x13ae   : > { %11631 = vmatpush3.bf16.xpose.msra.mxu0 %v11628_v43 }
0x13af   : > { %11633 = vmatprep.subr.bf16.mxu0 %v11632_v0 }
0x13b1   : > { %v7980_v54 = vpop.permute.xlu0 %7979  ;;  %v7990_v27 = vpop.permute.xlu1 %7989 }
0x13b6   : > { %11635 = vmatpush3.bf16.xpose.msra.mxu0 %v11632_v0 }
0x13bd   : > { %10760 = vmatmul.mubr.f32.vlgmr.msra.gmra.mrb[0].mxu0 %v7962_v19 }
0x13be   : > { %10762 = vmatprep.mubr.f32.mxu0 %v7963_v51 }
0x13c1   : > { %10763 = vmatmul.mubr.f32.gmra.mrb[2].mxu0 %v7964_v10 }
0x13c2   : > { %10765 = vmatprep.mubr.f32.mxu0 %v7965_v25 }
0x13c5   : > { %10766 = vmatmul.mubr.f32.gmra.mrb[4].mxu0 %v7966_v37 }
0x13c6   : > { %10768 = vmatprep.mubr.f32.mxu0 %v7967_v4 }
0x13c9   : > { %10769 = vmatmul.mubr.f32.gmra.mrb[6].mxu0 %v7968_v1 }
0x13fb   : > { %v7995_v11 = vpop.permute.xlu1 %7994 }
0x13ff   : > { %v8005_v53 = vpop.permute.xlu1 %8004 }
0x1403   : > { %v7985_v31 = vpop.permute.xlu0 %7984  ;;  %v8015_v57 = vpop.permute.xlu1 %8014 }
0x1407   : > { %v8000_v13 = vpop.permute.xlu0 %7999  ;;  %v8162_v38 = vpop.permute.xlu1 %8161 }
0x140b   : > { %v8010_v29 = vpop.permute.xlu0 %8009  ;;  %v8172_v19 = vpop.permute.xlu1 %8171 }
0x140f   : > { %v8157_v17 = vpop.permute.xlu0 %8156 }
0x1413   : > { %v8167_v25 = vpop.permute.xlu0 %8166 }
0x1490   : > { %v10761_v16 = vpop.f32.mrb[0].mxu0 }
0x1491   : > { %v8089_v22 = vadd.f32 %v10761_v16, %v7985_v31  ;;  %v8083_v58 = vpop.f32.mrb[1].mxu0 }
0x1492   : > { %v8084_v59 = vadd.f32 %v8083_v58, %v7980_v54 }
0x1493   : > { %v8131_v9 = vmul.f32 0.01, %v8089_v22  ;;  %vm8123_vm12 = vcmp.gt.f32.partialorder %v8089_v22, 0.0 }
0x1494   : > { %v8130_v6 = vmul.f32 0.01, %v8084_v59  ;;  %v10764_v42 = vpop.f32.mrb[2].mxu0  ;;  %vm8122_vm13 = vcmp.gt.f32.partialorder %v8084_v59, 0.0 }
0x1495   : > { %v8099_v39 = vadd.f32 %v10764_v42, %v7995_v11  ;;  %v8093_v50 = vpop.f32.mrb[3].mxu0  ;;  %v8139_v62 = vsel %vm8123_vm12, %v8089_v22, %v8131_v9 }
0x1496   : > { %v8094_v24 = vadd.f32 %v8093_v50, %v7990_v27  ;;  %v8138_v46 = vsel %vm8122_vm13, %v8084_v59, %v8130_v6  ;;  %v8284_v59 = vld [vmem:[#allocation20] sm:$0x1] }
0x1497   : > { %vm8125_vm14 = vcmp.gt.f32.partialorder %v8099_v39, 0.0  ;;  %v8133_v18 = vmul.f32 0.01, %v8099_v39  ;;  %v11636_v12 = vpack.c.bf16 %v8139_v62, %v8138_v46 }
0x1498   : > { %vm8124_vm15 = vcmp.gt.f32.partialorder %v8094_v24, 0.0  ;;  %v8132_v33 = vmul.f32 0.01, %v8094_v24  ;;  %v10767_v41 = vpop.f32.mrb[4].mxu0 }
0x1499   : > { %v8109_v44 = vadd.f32 %v10767_v41, %v8005_v53  ;;  %v8103_v32 = vpop.f32.mrb[5].mxu0  ;;  %11637 = vmatprep.subr.bf16.mxu1 %v11636_v12  ;;  %v8141_v15 = vsel %vm8125_vm14, %v8099_v39, %v8133_v18 }
0x149a   : > { %v8104_v55 = vadd.f32 %v8103_v32, %v8000_v13  ;;  %11639 = vmatpush3.bf16.msra.mxu1 %v11636_v12  ;;  %v8140_v30 = vsel %vm8124_vm15, %v8094_v24, %v8132_v33 }
0x149b   : > { %vm8127_vm0 = vcmp.gt.f32.partialorder %v8109_v44, 0.0  ;;  %v8135_v21 = vmul.f32 0.01, %v8109_v44  ;;  %v11640_v34 = vpack.c.bf16 %v8141_v15, %v8140_v30 }
0x149c   : > { %vm8126_vm1 = vcmp.gt.f32.partialorder %v8104_v55, 0.0  ;;  %v8134_v23 = vmul.f32 0.01, %v8104_v55  ;;  %v10770_v26 = vpop.f32.mrb[6].mxu0 }
0x149d   : > { %v8119_v45 = vadd.f32 %v10770_v26, %v8015_v57  ;;  %v8113_v28 = vpop.f32.mrb[7].mxu0  ;;  %11641 = vmatprep.subr.bf16.mxu1 %v11640_v34  ;;  %v8143_v35 = vsel %vm8127_vm0, %v8109_v44, %v8135_v21 }
0x149e   : > { %v8114_v48 = vadd.f32 %v8113_v28, %v8010_v29  ;;  %11643 = vmatpush3.bf16.msra.mxu1 %v11640_v34  ;;  %v8142_v56 = vsel %vm8126_vm1, %v8104_v55, %v8134_v23 }
0x149f   : > { %vm8129_vm2 = vcmp.gt.f32.partialorder %v8119_v45, 0.0  ;;  %v8137_v60 = vmul.f32 0.01, %v8119_v45  ;;  %v11644_v3 = vpack.c.bf16 %v8143_v35, %v8142_v56 }
0x14a0   : > { %vm8128_vm3 = vcmp.gt.f32.partialorder %v8114_v48, 0.0  ;;  %v8136_v40 = vmul.f32 0.01, %v8114_v48 }
0x14a1   : > { %11645 = vmatprep.subr.bf16.mxu1 %v11644_v3  ;;  %v8145_v61 = vsel %vm8129_vm2, %v8119_v45, %v8137_v60 }
0x14a2   : > { %11647 = vmatpush3.bf16.msra.mxu1 %v11644_v3  ;;  %v8144_v20 = vsel %vm8128_vm3, %v8114_v48, %v8136_v40 }
0x14a3   : > { %v11648_v63 = vpack.c.bf16 %v8145_v61, %v8144_v20 }
0x14a5   : > { %11649 = vmatprep.subr.bf16.mxu1 %v11648_v63 }
0x14a6   : > { %11651 = vmatpush3.bf16.msra.mxu1 %v11648_v63 }
0x14a7   : > { %11652 = vmatprep.subr.bf16.mxu1 %v13681_v36 }
0x14a9   : > { %10788 = vmatmul.mubr.msk.f32.vlgmr.msra.gmra.mrb[0].mxu1 %vm8174_vm11, %v8147_v52 }
0x14aa   : > { %10790 = vmatprep.mubr.msk.f32.mxu1 %vm8174_vm11, %v8148_v2 }
0x14ad   : > { %10791 = vmatmul.mubr.msk.f32.gmra.mrb[2].mxu1 %vm8174_vm11, %v8149_v5 }
0x14ae   : > { %10801 = vmatprep.mubr.msk.f32.mxu1 %vm13682_vm4, %v19985_v7 }
0x157c   : > { %v10789_v8 = vpop.f32.mrb[0].mxu1 }
0x157d   : > { %v8259_v14 = vadd.f32 %v10789_v8, %v8162_v38  ;;  %v8253_v49 = vpop.f32.mrb[1].mxu1 }
0x157e   : > { %v8254_v43 = vadd.f32 %v8253_v49, %v8157_v17 }
0x157f   : > { %vm8273_vm5 = vcmp.gt.f32.partialorder %v8259_v14, 0.0  ;;  %v8277_v0 = vmul.f32 0.01, %v8259_v14 }
0x1580   : > { %vm8272_vm6 = vcmp.gt.f32.partialorder %v8254_v43, 0.0  ;;  %v8276_v51 = vmul.f32 0.01, %v8254_v43  ;;  %v10792_v10 = vpop.f32.mrb[2].mxu1 }
0x1581   : > { %v8281_v37 = vsel %vm8273_vm5, %v8259_v14, %v8277_v0  ;;  %v8269_v4 = vadd.f32 %v10792_v10, %v8172_v19  ;;  %v8263_v1 = vpop.f32.mrb[3].mxu1 }
0x1582   : > { %v8280_v47 = vsel %vm8272_vm6, %v8254_v43, %v8276_v51  ;;  %v8264_v54 = vadd.f32 %v8263_v1, %v8167_v25 }
0x1583   : > { %v11653_v27 = vpack.c.bf16 %v8281_v37, %v8280_v47  ;;  %vm8275_vm7 = vcmp.gt.f32.partialorder %v8269_v4, 0.0  ;;  %v8279_v31 = vmul.f32 0.01, %v8269_v4 }
0x1584   : > { %vm8274_vm8 = vcmp.gt.f32.partialorder %v8264_v54, 0.0  ;;  %v8278_v11 = vmul.f32 0.01, %v8264_v54 }
0x1585   : > { %v8283_v16 = vsel %vm8275_vm7, %v8269_v4, %v8279_v31  ;;  %11654 = vmatpush3.bf16.msra.mxu1 %v11653_v27 }
0x1586   : > { %v8282_v22 = vsel %vm8274_vm8, %v8264_v54, %v8278_v11  ;;  %11655 = vmatprep.subr.bf16.mxu1 %v13681_v36 }
0x1587   : > { %v11656_v58 = vpack.c.bf16 %v8283_v16, %v8282_v22 }
0x1589   : > { %11657 = vmatpush3.bf16.msra.mxu1 %v11656_v58 }
0x158c   : > { %10802 = vmatmul.mubr.msk.f32.vlgmr.msra.gmra.mrb[4].mxu1 %vm8285_vm9, %v8284_v59 }
0x165f   : > { %v8355_v9 = vpop.f32.mrb[4].mxu1 }
0x1660   : > { %8359 = vst [vmem:[%s14269_s1] sm:$0x1] %v8355_v9  ;;  %v10803_v6 = vpop.f32.mrb[5].mxu1 }
0x1661   : > { %13443 = shalt.err (!%p13440_p8)
}
0x1662   : > { %s13444_s21 = scalar_lea.hbm %s18793_s19, 16  ;;  %s13448_s30 = scalar_lea.hbm %s19987_s29, 32 }
0x1663   : > { %p13445_p11 = scmp.ne.s32.totalorder %s18793_s19, %s13444_s21  ;;  %p13449_p6 = scmp.lt.u32.totalorder %s18793_s19, %s19987_s29 }
0x1664   : > { %p13450_p9 = scmp.lt.u32.totalorder %s13448_s30, %s13444_s21  ;;  %p13452_p10 = scmp.lt.u32.totalorder %s13444_s21, %s18793_s19 }
0x1665   : > { %p13446_p13 = pnand %p13445_p11, %p19988_p0 }
0x1666   : > { %p13451_p5 = por %p13450_p9, %p13449_p6 }
0x1667   : > { %p13447_p1 = pneg %p13446_p13 }
0x1668   : > { %p13453_p2 = por %p13452_p10, %p13451_p5 }
0x166a   : > { %p13454_p3 = pnand %p13453_p2, %p13447_p1 }
0x166c   : > { %13457 = shalt.err (!%p13454_p3)
}
0x166d   : > { %11720 = dma.vmem_to_hbm [thread:$0]  (%p19988_p0), %s18795_s8, 16, %s18793_s19, %s8361_s0  }
0x166e PF: > { %s19989_s17 = sld [smem:[#allocation31_spill]]  ;;  %s19990_s23 = sld [smem:[#allocation29_spill]] }
0x166f   : > { %s19991_s3 = sld [smem:[#allocation35_spill]] }
0x1674   : > { %p11782_p4 = scmp.ge.s32.totalorder %s19989_s17, 2  ;;  %s8385_s28 = sand.u32 1, %s19990_s23  }
0x1675   : > { %p19992_p12 = scmp.ne.s32.totalorder %s19991_s3, 0  ;;  %s8386_s10 = scalar_lea.sflag [#allocation5], %s8385_s28 }
0x1677   : > { %p11757_p7 = pnand %p11782_p4, %p19992_p12 }
0x1679   : > { %13567 = dma.done.wait (!%p11757_p7), %s8386_s10, 16  }
0x167a   : > { %13569 = vsyncadd (!%p11757_p7), %s8386_s10, 4294967280  ;;  %s19993_s27 = sld [smem:[#allocation32_spill]]  ;;  %s19994_s21 = sld [smem:[#allocation30_spill]] }
0x167b   : > { %s19995_s26 = sld [smem:[#allocation33_spill]]  ;;  %s19996_s2 = smov %s13576_s25 }
0x1680   : > { %p37_p8 = scmp.ge.s32.totalorder %s19993_s27, 4   ;;  %s19997_s25 = smov %s19994_s21 }
0x1682   :  { %39 = sbr.rel (!%p37_p8) target bundleno = 22 (0x16), region = 214 }
0x1689   :  { %8390 = vsyncpa [#allocation4], 1 }
0x168a   :  { %8392 = vsyncpa [#allocation4 + $0x1], 1 }
0x168b   :  { %8393 = vsyncpa [#allocation7], 1 }
0x168c   :  { %8394 = vsyncpa [#allocation10], 1 }
0x168d   :  { %8395 = vsyncpa [#allocation13], 1 }
0x168e   :  { %8396 = vsyncpa [#allocation16], 1 }
0x168f   :  { %8397 = vsyncpa [#allocation19], 1 }
0x1690   :  { %8398 = vsyncpa [#allocation5], 1 }
0x1691   :  { %8400 = vsyncpa [#allocation5 + $0x1], 1 }

</bundles_post_ra>
